<compile_context>
chip_gen: v7x
topology: tpu7x:2x2x1
jax: 0.10.0
libtpu: 0.0.40
codegen_flags: <defaults>
</compile_context>

<pallas_src>
import functools

import jax
import jax.numpy as jnp
from jax.experimental import pallas as pl
from jax.experimental.pallas import tpu as pltpu


def _ppo_gridnet_kernel(patches_ref, w1_ref, b1_ref, w2_ref, b2_ref,
                        w3_ref, b3_ref, wfc_ref, bfc_ref, wh_ref, bh_ref,
                        out_ref,
                        acc_ref, pad1_ref, pad2_ref, flat_ref, *, G, T):
    GG = G * G
    bf16 = jnp.bfloat16
    c1 = pad1_ref.shape[-1]          # 64
    c2 = pad2_ref.shape[-1]          # 128

    # ---- zero only the 1-px halo of the padded scratch (interior is fully
    #      rewritten below).  Done every step so the kernel stays correct if
    #      the "parallel" grid axis is split across TensorCores. ----
    for ref, cc in ((pad1_ref, c1), (pad2_ref, c2)):
        zrow = jnp.zeros((1, G + 2, T, cc), bf16)
        zcol = jnp.zeros((G, 1, T, cc), bf16)
        ref[pl.ds(0, 1), :, :, :] = zrow
        ref[pl.ds(G + 1, 1), :, :, :] = zrow
        ref[pl.ds(1, G), pl.ds(0, 1), :, :] = zcol
        ref[pl.ds(1, G), pl.ds(G + 1, 1), :, :] = zcol

    # ---- conv1: im2col (done in the wrapper), a single MXU dot ----
    # patches rows are ordered p*T + t (position-major, batch-minor).
    h1 = jnp.dot(patches_ref[...], w1_ref[...],
                 preferred_element_type=jnp.float32)              # (GG*T, 64)
    h1 = jnp.maximum(h1 + b1_ref[...], 0.0)
    pad1_ref[pl.ds(1, G), pl.ds(1, G), :, :] = (
        h1.astype(bf16).reshape(G, G, T, c1))

    # ---- conv2: 9 shifted taps, f32 VMEM accumulation (bias in the init) ----
    acc_ref[...] = jnp.broadcast_to(b2_ref[...], acc_ref.shape)
    for k in range(9):
        dy, dx = k // 3, k % 3
        patch = pad1_ref[pl.ds(dy, G), pl.ds(dx, G), :, :].reshape(GG * T, c1)
        acc_ref[...] += jnp.dot(patch, w2_ref[pl.ds(k * c1, c1), :],
                                preferred_element_type=jnp.float32)
    pad2_ref[pl.ds(1, G), pl.ds(1, G), :, :] = (
        jnp.maximum(acc_ref[...], 0.0).astype(bf16).reshape(G, G, T, c2))

    # ---- conv3: same, then ReLU + repack (p*T + t, c) -> (t, p*128 + c) ----
    acc_ref[...] = jnp.broadcast_to(b3_ref[...], acc_ref.shape)
    for k in range(9):
        dy, dx = k // 3, k % 3
        patch = pad2_ref[pl.ds(dy, G), pl.ds(dx, G), :, :].reshape(GG * T, c2)
        acc_ref[...] += jnp.dot(patch, w3_ref[pl.ds(k * c2, c2), :],
                                preferred_element_type=jnp.float32)
    # Position-major rows make each per-p block a contiguous, aligned
    # (T, 128) tile read; the store is a single lane-chunk of the FC operand.
    for p in range(GG):
        rows = acc_ref[pl.ds(p * T, T), :]
        flat_ref[:, pl.ds(p * c2, c2)] = jnp.maximum(rows, 0.0).astype(bf16)

    # ---- flatten + FC + ReLU: ONE K = GG*128 contraction ----
    hidden = jnp.dot(flat_ref[...], wfc_ref[...],
                     preferred_element_type=jnp.float32)           # (T, FC)
    hidden = jnp.maximum(hidden + bfc_ref[...], 0.0)

    # ---- fused policy + value heads (lane-dense (T, HP) output slab) ----
    out_ref[...] = jnp.dot(hidden.astype(bf16), wh_ref[...],
                           preferred_element_type=jnp.float32) + bh_ref[...]


def _const_spec(arr):
    n = arr.ndim
    return pl.BlockSpec(arr.shape, lambda g, n=n: (0,) * n)


def ppo_gridnet_forward(x, params, *, grid_size, fc_hidden, batch_tile=8):
    """x: (B, C, G, G) or (C, G, G) float32 (PyTorch NCHW convention)."""
    G = grid_size
    GG = G * G
    squeeze = (x.ndim == 3)
    if squeeze:
        x = x[None]
    B, C = x.shape[0], x.shape[1]

    T = batch_tile
    NB = -(-B // T)                       # number of batch tiles
    Bp = NB * T

    w1, b1, w2, b2, w3, b3, wfc, bfc, wp, bp, wv, bv = params
    bf16 = jnp.bfloat16

    # ---- conv1 im2col in the wrapper (Cin is tiny, padding handled here) ----
    x_nhwc = jnp.transpose(x, (0, 2, 3, 1)).astype(jnp.float32)
    x_nhwc = jnp.pad(x_nhwc, ((0, Bp - B), (1, 1), (1, 1), (0, 0)))
    taps = [x_nhwc[:, dy:dy + G, dx:dx + G, :]
            for dy in range(3) for dx in range(3)]
    patches = jnp.concatenate(taps, axis=-1)                    # (Bp, G, G, 9C)
    K1 = 9 * C
    K1p = ((K1 + 127) // 128) * 128                              # lane-pad K
    patches = jnp.pad(patches, ((0, 0), (0, 0), (0, 0), (0, K1p - K1)))
    # Position-major / batch-minor row order inside each T-block: row = p*T+t.
    patches = patches.reshape(NB, T, GG, K1p).transpose(0, 2, 1, 3)
    patches = patches.reshape(NB * GG * T, K1p).astype(bf16)

    # ---- weight prep (matches torch's NCHW flatten: index c*G*G + p) ----
    w1k = jnp.pad(w1.reshape(K1, 64), ((0, K1p - K1), (0, 0))).astype(bf16)
    w2k = w2.reshape(9 * 64, 128).astype(bf16)
    w3k = w3.reshape(9 * 128, 128).astype(bf16)
    wfck = (wfc.reshape(128, GG, fc_hidden).transpose(1, 0, 2)
            .reshape(GG * 128, fc_hidden).astype(bf16))          # rows p*128 + c
    HP = ((GG + 1 + 127) // 128) * 128
    whk = jnp.concatenate(
        [wp, wv, jnp.zeros((fc_hidden, HP - GG - 1), jnp.float32)],
        axis=1).astype(bf16)
    bhk = jnp.concatenate(
        [bp, bv, jnp.zeros((1, HP - GG - 1), jnp.float32)], axis=1)

    weights = (w1k, b1, w2k, b2, w3k, b3, wfck, bfc, whk, bhk)

    in_specs = [pl.BlockSpec((GG * T, K1p), lambda g: (g, 0))]
    in_specs += [_const_spec(a) for a in weights]
    out_specs = pl.BlockSpec((T, HP), lambda g: (g, 0))

    flops_per_sample = (2 * GG * K1 * 64 + 2 * GG * 9 * 64 * 128 +
                        2 * GG * 9 * 128 * 128 + 2 * GG * 128 * fc_hidden +
                        2 * fc_hidden * (GG + 1))
    flops = int(flops_per_sample) * int(Bp)
    bytes_accessed = int(patches.size * 2 +
                         sum(int(a.size) * a.dtype.itemsize for a in weights) +
                         Bp * HP * 4)

    out = pl.pallas_call(
        functools.partial(_ppo_gridnet_kernel, G=G, T=T),
        out_shape=jax.ShapeDtypeStruct((Bp, HP), jnp.float32),
        grid_spec=pltpu.PrefetchScalarGridSpec(
            num_scalar_prefetch=0,
            grid=(NB,),
            in_specs=in_specs,
            out_specs=out_specs,
            scratch_shapes=[
                pltpu.VMEM((GG * T, 128), jnp.float32),       # shared conv acc
                pltpu.VMEM((G + 2, G + 2, T, 64), bf16),      # padded conv1 out
                pltpu.VMEM((G + 2, G + 2, T, 128), bf16),     # padded conv2 out
                pltpu.VMEM((T, GG * 128), bf16),              # flattened FC LHS
            ]),
        compiler_params=pltpu.CompilerParams(
            dimension_semantics=("parallel",),
            vmem_limit_bytes=48 << 20),
        cost_estimate=pl.CostEstimate(flops=flops, transcendentals=0,
                                      bytes_accessed=bytes_accessed),
    )(patches, *weights)

    logits = out[:B, :GG]                  # (B, G*G)
    value = out[:B, GG:GG + 1]             # (B, 1)
    if squeeze:
        logits, value = logits[0], value[0]
    return logits, value


def init_params(key, grid_size, num_channels, fc_hidden):
    """Deterministic synthetic parameters (shapes match PPOGridNet.__init__)."""
    G = grid_size
    ks = jax.random.split(key, 12)

    def w(k, shape, fan_in):
        return jax.random.normal(k, shape, jnp.float32) / jnp.sqrt(fan_in)

    def b(k, shape):
        return 0.01 * jax.random.normal(k, shape, jnp.float32)

    w1 = w(ks[0], (3, 3, num_channels, 64), 9 * num_channels)   # HWIO
    b1 = b(ks[1], (1, 64))
    w2 = w(ks[2], (3, 3, 64, 128), 9 * 64)
    b2 = b(ks[3], (1, 128))
    w3 = w(ks[4], (3, 3, 128, 128), 9 * 128)
    b3 = b(ks[5], (1, 128))
    wfc = w(ks[6], (128 * G * G, fc_hidden), 128 * G * G)       # (in, out)
    bfc = b(ks[7], (1, fc_hidden))
    wp = w(ks[8], (fc_hidden, G * G), fc_hidden)
    bp = b(ks[9], (1, G * G))
    wv = w(ks[10], (fc_hidden, 1), fc_hidden)
    bv = b(ks[11], (1, 1))
    return (w1, b1, w2, b2, w3, b3, wfc, bfc, wp, bp, wv, bv)


def reference_forward(x, params):
    """Pure-JAX f32 reference matching the PyTorch forward semantics."""
    w1, b1, w2, b2, w3, b3, wfc, bfc, wp, bp, wv, bv = params
    squeeze = (x.ndim == 3)
    if squeeze:
        x = x[None]
    h = jnp.transpose(x, (0, 2, 3, 1)).astype(jnp.float32)      # NHWC
    dn = ('NHWC', 'HWIO', 'NHWC')
    for w_, b_ in ((w1, b1), (w2, b2), (w3, b3)):
        h = jax.lax.conv_general_dilated(h, w_, (1, 1), 'SAME',
                                         dimension_numbers=dn)
        h = jax.nn.relu(h + b_)
    flat = jnp.transpose(h, (0, 3, 1, 2)).reshape(h.shape[0], -1)  # NCHW flatten
    hidden = jax.nn.relu(flat @ wfc + bfc)
    logits = hidden @ wp + bp
    value = hidden @ wv + bv
    if squeeze:
        logits, value = logits[0], value[0]
    return logits, value


if __name__ == "__main__":
    # grid_size=8, num_channels=2, batch=12 (exercises batch padding to T=8
    # and a 2-step "parallel" grid), fc_hidden_size=128 (small test config).
    G, C, B, FC = 8, 2, 12, 128

    key = jax.random.PRNGKey(0)
    pkey, xkey = jax.random.split(key)
    params = init_params(pkey, G, C, FC)
    x = jax.random.normal(xkey, (B, C, G, G), jnp.float32)

    logits, value = ppo_gridnet_forward(x, params, grid_size=G, fc_hidden=FC)
    logits, value = jax.block_until_ready((logits, value))

    assert logits.shape == (B, G * G) and value.shape == (B, 1)
    assert bool(jnp.all(jnp.isfinite(logits))) and bool(jnp.all(jnp.isfinite(value)))

    # bf16 MXU operands with f32 accumulation -> loose tolerance is intentional.
    ref_logits, ref_value = reference_forward(x, params)
    err_l = float(jnp.max(jnp.abs(logits - ref_logits)))
    err_v = float(jnp.max(jnp.abs(value - ref_value)))
    assert jnp.allclose(logits, ref_logits, rtol=3e-2, atol=3e-2), err_l
    assert jnp.allclose(value, ref_value, rtol=3e-2, atol=3e-2), err_v

    print("KERNEL_OK")
</pallas_src>

<mosaic_0001>
module attributes {stable_mosaic.version = 11 : i64} {
  func.func @_ppo_gridnet_kernel(%arg0: i32, %arg1: memref<512x128xbf16, #tpu.memory_space<vmem>>, %arg2: memref<128x64xbf16, #tpu.memory_space<vmem>>, %arg3: memref<1x64xf32, #tpu.memory_space<vmem>>, %arg4: memref<576x128xbf16, #tpu.memory_space<vmem>>, %arg5: memref<1x128xf32, #tpu.memory_space<vmem>>, %arg6: memref<1152x128xbf16, #tpu.memory_space<vmem>>, %arg7: memref<1x128xf32, #tpu.memory_space<vmem>>, %arg8: memref<8192x128xbf16, #tpu.memory_space<vmem>>, %arg9: memref<1x128xf32, #tpu.memory_space<vmem>>, %arg10: memref<128x128xbf16, #tpu.memory_space<vmem>>, %arg11: memref<1x128xf32, #tpu.memory_space<vmem>>, %arg12: memref<8x128xf32, #tpu.memory_space<vmem>>, %arg13: memref<512x128xf32, #tpu.memory_space<vmem>>, %arg14: memref<10x10x8x64xbf16, #tpu.memory_space<vmem>>, %arg15: memref<10x10x8x128xbf16, #tpu.memory_space<vmem>>, %arg16: memref<8x8192xbf16, #tpu.memory_space<vmem>>) attributes {dimension_semantics = [#tpu.dimension_semantics<parallel>], iteration_bounds = array<i64: 2>, scalar_prefetch = 0 : i64, scratch_operands = 4 : i64, tpu.core_type = #tpu.core_type<tc>, window_params = [{transform_indices = @transform_0, window_bounds = array<i64: 512, 128>}, {pipeline_mode = #tpu.pipeline_mode<synchronous>, transform_indices = @transform_1, window_bounds = array<i64: 128, 64>}, {pipeline_mode = #tpu.pipeline_mode<synchronous>, transform_indices = @transform_2, window_bounds = array<i64: 1, 64>}, {pipeline_mode = #tpu.pipeline_mode<synchronous>, transform_indices = @transform_3, window_bounds = array<i64: 576, 128>}, {pipeline_mode = #tpu.pipeline_mode<synchronous>, transform_indices = @transform_4, window_bounds = array<i64: 1, 128>}, {pipeline_mode = #tpu.pipeline_mode<synchronous>, transform_indices = @transform_5, window_bounds = array<i64: 1152, 128>}, {pipeline_mode = #tpu.pipeline_mode<synchronous>, transform_indices = @transform_6, window_bounds = array<i64: 1, 128>}, {pipeline_mode = #tpu.pipeline_mode<synchronous>, transform_indices = @transform_7, window_bounds = array<i64: 8192, 128>}, {pipeline_mode = #tpu.pipeline_mode<synchronous>, transform_indices = @transform_8, window_bounds = array<i64: 1, 128>}, {pipeline_mode = #tpu.pipeline_mode<synchronous>, transform_indices = @transform_9, window_bounds = array<i64: 128, 128>}, {pipeline_mode = #tpu.pipeline_mode<synchronous>, transform_indices = @transform_10, window_bounds = array<i64: 1, 128>}, {transform_indices = @transform_11, window_bounds = array<i64: 8, 128>}]} {
    %cst = arith.constant 0.000000e+00 : bf16
    %0 = vector.broadcast %cst : bf16 to vector<1x10x8x64xbf16>
    %cst_0 = arith.constant 0.000000e+00 : bf16
    %1 = vector.broadcast %cst_0 : bf16 to vector<8x1x8x64xbf16>
    %c0 = arith.constant 0 : index
    %c0_1 = arith.constant 0 : index
    %c0_2 = arith.constant 0 : index
    %c0_3 = arith.constant 0 : index
    %2 = vector.load %arg14[%c0, %c0_1, %c0_2, %c0_3] : memref<10x10x8x64xbf16, #tpu.memory_space<vmem>>, vector<1x10x8x64xbf16>
    tpu.vector_store %arg14[%c0, %c0_1, %c0_2, %c0_3], %0 {strides = array<i32>} : memref<10x10x8x64xbf16, #tpu.memory_space<vmem>>, vector<1x10x8x64xbf16>,
    %c9 = arith.constant 9 : index
    %c0_4 = arith.constant 0 : index
    %c0_5 = arith.constant 0 : index
    %c0_6 = arith.constant 0 : index
    %3 = vector.load %arg14[%c9, %c0_4, %c0_5, %c0_6] : memref<10x10x8x64xbf16, #tpu.memory_space<vmem>>, vector<1x10x8x64xbf16>
    tpu.vector_store %arg14[%c9, %c0_4, %c0_5, %c0_6], %0 {strides = array<i32>} : memref<10x10x8x64xbf16, #tpu.memory_space<vmem>>, vector<1x10x8x64xbf16>,
    %c1 = arith.constant 1 : index
    %c0_7 = arith.constant 0 : index
    %c0_8 = arith.constant 0 : index
    %c0_9 = arith.constant 0 : index
    %4 = vector.load %arg14[%c1, %c0_7, %c0_8, %c0_9] : memref<10x10x8x64xbf16, #tpu.memory_space<vmem>>, vector<8x1x8x64xbf16>
    tpu.vector_store %arg14[%c1, %c0_7, %c0_8, %c0_9], %1 {strides = array<i32>} : memref<10x10x8x64xbf16, #tpu.memory_space<vmem>>, vector<8x1x8x64xbf16>,
    %c1_10 = arith.constant 1 : index
    %c9_11 = arith.constant 9 : index
    %c0_12 = arith.constant 0 : index
    %c0_13 = arith.constant 0 : index
    %5 = vector.load %arg14[%c1_10, %c9_11, %c0_12, %c0_13] : memref<10x10x8x64xbf16, #tpu.memory_space<vmem>>, vector<8x1x8x64xbf16>
    tpu.vector_store %arg14[%c1_10, %c9_11, %c0_12, %c0_13], %1 {strides = array<i32>} : memref<10x10x8x64xbf16, #tpu.memory_space<vmem>>, vector<8x1x8x64xbf16>,
    %cst_14 = arith.constant 0.000000e+00 : bf16
    %6 = vector.broadcast %cst_14 : bf16 to vector<1x10x8x128xbf16>
    %cst_15 = arith.constant 0.000000e+00 : bf16
    %7 = vector.broadcast %cst_15 : bf16 to vector<8x1x8x128xbf16>
    %c0_16 = arith.constant 0 : index
    %c0_17 = arith.constant 0 : index
    %c0_18 = arith.constant 0 : index
    %c0_19 = arith.constant 0 : index
    %8 = vector.load %arg15[%c0_16, %c0_17, %c0_18, %c0_19] : memref<10x10x8x128xbf16, #tpu.memory_space<vmem>>, vector<1x10x8x128xbf16>
    tpu.vector_store %arg15[%c0_16, %c0_17, %c0_18, %c0_19], %6 {strides = array<i32>} : memref<10x10x8x128xbf16, #tpu.memory_space<vmem>>, vector<1x10x8x128xbf16>,
    %c9_20 = arith.constant 9 : index
    %c0_21 = arith.constant 0 : index
    %c0_22 = arith.constant 0 : index
    %c0_23 = arith.constant 0 : index
    %9 = vector.load %arg15[%c9_20, %c0_21, %c0_22, %c0_23] : memref<10x10x8x128xbf16, #tpu.memory_space<vmem>>, vector<1x10x8x128xbf16>
    tpu.vector_store %arg15[%c9_20, %c0_21, %c0_22, %c0_23], %6 {strides = array<i32>} : memref<10x10x8x128xbf16, #tpu.memory_space<vmem>>, vector<1x10x8x128xbf16>,
    %c1_24 = arith.constant 1 : index
    %c0_25 = arith.constant 0 : index
    %c0_26 = arith.constant 0 : index
    %c0_27 = arith.constant 0 : index
    %10 = vector.load %arg15[%c1_24, %c0_25, %c0_26, %c0_27] : memref<10x10x8x128xbf16, #tpu.memory_space<vmem>>, vector<8x1x8x128xbf16>
    tpu.vector_store %arg15[%c1_24, %c0_25, %c0_26, %c0_27], %7 {strides = array<i32>} : memref<10x10x8x128xbf16, #tpu.memory_space<vmem>>, vector<8x1x8x128xbf16>,
    %c1_28 = arith.constant 1 : index
    %c9_29 = arith.constant 9 : index
    %c0_30 = arith.constant 0 : index
    %c0_31 = arith.constant 0 : index
    %11 = vector.load %arg15[%c1_28, %c9_29, %c0_30, %c0_31] : memref<10x10x8x128xbf16, #tpu.memory_space<vmem>>, vector<8x1x8x128xbf16>
    tpu.vector_store %arg15[%c1_28, %c9_29, %c0_30, %c0_31], %7 {strides = array<i32>} : memref<10x10x8x128xbf16, #tpu.memory_space<vmem>>, vector<8x1x8x128xbf16>,
    %c0_32 = arith.constant 0 : index
    %c0_33 = arith.constant 0 : index
    %12 = vector.load %arg1[%c0_32, %c0_33] : memref<512x128xbf16, #tpu.memory_space<vmem>>, vector<512x128xbf16>
    %c0_34 = arith.constant 0 : index
    %c0_35 = arith.constant 0 : index
    %13 = vector.load %arg2[%c0_34, %c0_35] : memref<128x64xbf16, #tpu.memory_space<vmem>>, vector<128x64xbf16>
    %cst_36 = arith.constant dense<0.000000e+00> : vector<512x64xf32>
    %14 = tpu.matmul %12, %13, %cst_36 {dimension_numbers = #tpu.dot_dimension_numbers<[1], [0], [0], [1], [0, 0, 1, 1], [], []>} : vector<512x128xbf16>, vector<128x64xbf16>, vector<512x64xf32> -> vector<512x64xf32>
    %c0_37 = arith.constant 0 : index
    %c0_38 = arith.constant 0 : index
    %15 = vector.load %arg3[%c0_37, %c0_38] : memref<1x64xf32, #tpu.memory_space<vmem>>, vector<1x64xf32>
    %16 = vector.broadcast %15 : vector<1x64xf32> to vector<512x64xf32>
    %17 = arith.addf %14, %16 : vector<512x64xf32>
    %cst_39 = arith.constant 0.000000e+00 : f32
    %18 = vector.broadcast %cst_39 : f32 to vector<512x64xf32>
    %19 = arith.maximumf %17, %18 : vector<512x64xf32>
    %20 = arith.truncf %19 : vector<512x64xf32> to vector<512x64xbf16>
    %21 = vector.shape_cast %20 : vector<512x64xbf16> to vector<8x8x8x64xbf16>
    %c1_40 = arith.constant 1 : index
    %c1_41 = arith.constant 1 : index
    %c0_42 = arith.constant 0 : index
    %c0_43 = arith.constant 0 : index
    %22 = vector.load %arg14[%c1_40, %c1_41, %c0_42, %c0_43] : memref<10x10x8x64xbf16, #tpu.memory_space<vmem>>, vector<8x8x8x64xbf16>
    tpu.vector_store %arg14[%c1_40, %c1_41, %c0_42, %c0_43], %21 {strides = array<i32>} : memref<10x10x8x64xbf16, #tpu.memory_space<vmem>>, vector<8x8x8x64xbf16>,
    %c0_44 = arith.constant 0 : index
    %c0_45 = arith.constant 0 : index
    %23 = vector.load %arg5[%c0_44, %c0_45] : memref<1x128xf32, #tpu.memory_space<vmem>>, vector<1x128xf32>
    %24 = vector.shape_cast %23 : vector<1x128xf32> to vector<1x128xf32>
    %25 = vector.broadcast %24 : vector<1x128xf32> to vector<512x128xf32>
    %c0_46 = arith.constant 0 : index
    %c0_47 = arith.constant 0 : index
    %26 = vector.load %arg13[%c0_46, %c0_47] : memref<512x128xf32, #tpu.memory_space<vmem>>, vector<512x128xf32>
    tpu.vector_store %arg13[%c0_46, %c0_47], %25 {strides = array<i32>} : memref<512x128xf32, #tpu.memory_space<vmem>>, vector<512x128xf32>,
    %c0_48 = arith.constant 0 : index
    %c0_49 = arith.constant 0 : index
    %c0_50 = arith.constant 0 : index
    %c0_51 = arith.constant 0 : index
    %27 = vector.load %arg14[%c0_48, %c0_49, %c0_50, %c0_51] : memref<10x10x8x64xbf16, #tpu.memory_space<vmem>>, vector<8x8x8x64xbf16>
    %28 = vector.shape_cast %27 : vector<8x8x8x64xbf16> to vector<512x64xbf16>
    %c0_52 = arith.constant 0 : index
    %c0_53 = arith.constant 0 : index
    %29 = vector.load %arg13[%c0_52, %c0_53] : memref<512x128xf32, #tpu.memory_space<vmem>>, vector<512x128xf32>
    %c0_54 = arith.constant 0 : index
    %c0_55 = arith.constant 0 : index
    %30 = vector.load %arg4[%c0_54, %c0_55] : memref<576x128xbf16, #tpu.memory_space<vmem>>, vector<64x128xbf16>
    %cst_56 = arith.constant dense<0.000000e+00> : vector<512x128xf32>
    %31 = tpu.matmul %28, %30, %cst_56 {dimension_numbers = #tpu.dot_dimension_numbers<[1], [0], [0], [1], [0, 0, 1, 1], [], []>} : vector<512x64xbf16>, vector<64x128xbf16>, vector<512x128xf32> -> vector<512x128xf32>
    %32 = arith.addf %29, %31 : vector<512x128xf32>
    %c0_57 = arith.constant 0 : index
    %c0_58 = arith.constant 0 : index
    %33 = vector.load %arg13[%c0_57, %c0_58] : memref<512x128xf32, #tpu.memory_space<vmem>>, vector<512x128xf32>
    tpu.vector_store %arg13[%c0_57, %c0_58], %32 {strides = array<i32>} : memref<512x128xf32, #tpu.memory_space<vmem>>, vector<512x128xf32>,
    %c0_59 = arith.constant 0 : index
    %c1_60 = arith.constant 1 : index
    %c0_61 = arith.constant 0 : index
    %c0_62 = arith.constant 0 : index
    %34 = vector.load %arg14[%c0_59, %c1_60, %c0_61, %c0_62] : memref<10x10x8x64xbf16, #tpu.memory_space<vmem>>, vector<8x8x8x64xbf16>
    %35 = vector.shape_cast %34 : vector<8x8x8x64xbf16> to vector<512x64xbf16>
    %c0_63 = arith.constant 0 : index
    %c0_64 = arith.constant 0 : index
    %36 = vector.load %arg13[%c0_63, %c0_64] : memref<512x128xf32, #tpu.memory_space<vmem>>, vector<512x128xf32>
    %c64 = arith.constant 64 : index
    %c0_65 = arith.constant 0 : index
    %37 = vector.load %arg4[%c64, %c0_65] : memref<576x128xbf16, #tpu.memory_space<vmem>>, vector<64x128xbf16>
    %cst_66 = arith.constant dense<0.000000e+00> : vector<512x128xf32>
    %38 = tpu.matmul %35, %37, %cst_66 {dimension_numbers = #tpu.dot_dimension_numbers<[1], [0], [0], [1], [0, 0, 1, 1], [], []>} : vector<512x64xbf16>, vector<64x128xbf16>, vector<512x128xf32> -> vector<512x128xf32>
    %39 = arith.addf %36, %38 : vector<512x128xf32>
    %c0_67 = arith.constant 0 : index
    %c0_68 = arith.constant 0 : index
    %40 = vector.load %arg13[%c0_67, %c0_68] : memref<512x128xf32, #tpu.memory_space<vmem>>, vector<512x128xf32>
    tpu.vector_store %arg13[%c0_67, %c0_68], %39 {strides = array<i32>} : memref<512x128xf32, #tpu.memory_space<vmem>>, vector<512x128xf32>,
    %c0_69 = arith.constant 0 : index
    %c2 = arith.constant 2 : index
    %c0_70 = arith.constant 0 : index
    %c0_71 = arith.constant 0 : index
    %41 = vector.load %arg14[%c0_69, %c2, %c0_70, %c0_71] : memref<10x10x8x64xbf16, #tpu.memory_space<vmem>>, vector<8x8x8x64xbf16>
    %42 = vector.shape_cast %41 : vector<8x8x8x64xbf16> to vector<512x64xbf16>
    %c0_72 = arith.constant 0 : index
    %c0_73 = arith.constant 0 : index
    %43 = vector.load %arg13[%c0_72, %c0_73] : memref<512x128xf32, #tpu.memory_space<vmem>>, vector<512x128xf32>
    %c128 = arith.constant 128 : index
    %c0_74 = arith.constant 0 : index
    %44 = vector.load %arg4[%c128, %c0_74] : memref<576x128xbf16, #tpu.memory_space<vmem>>, vector<64x128xbf16>
    %cst_75 = arith.constant dense<0.000000e+00> : vector<512x128xf32>
    %45 = tpu.matmul %42, %44, %cst_75 {dimension_numbers = #tpu.dot_dimension_numbers<[1], [0], [0], [1], [0, 0, 1, 1], [], []>} : vector<512x64xbf16>, vector<64x128xbf16>, vector<512x128xf32> -> vector<512x128xf32>
    %46 = arith.addf %43, %45 : vector<512x128xf32>
    %c0_76 = arith.constant 0 : index
    %c0_77 = arith.constant 0 : index
    %47 = vector.load %arg13[%c0_76, %c0_77] : memref<512x128xf32, #tpu.memory_space<vmem>>, vector<512x128xf32>
    tpu.vector_store %arg13[%c0_76, %c0_77], %46 {strides = array<i32>} : memref<512x128xf32, #tpu.memory_space<vmem>>, vector<512x128xf32>,
    %c1_78 = arith.constant 1 : index
    %c0_79 = arith.constant 0 : index
    %c0_80 = arith.constant 0 : index
    %c0_81 = arith.constant 0 : index
    %48 = vector.load %arg14[%c1_78, %c0_79, %c0_80, %c0_81] : memref<10x10x8x64xbf16, #tpu.memory_space<vmem>>, vector<8x8x8x64xbf16>
    %49 = vector.shape_cast %48 : vector<8x8x8x64xbf16> to vector<512x64xbf16>
    %c0_82 = arith.constant 0 : index
    %c0_83 = arith.constant 0 : index
    %50 = vector.load %arg13[%c0_82, %c0_83] : memref<512x128xf32, #tpu.memory_space<vmem>>, vector<512x128xf32>
    %c192 = arith.constant 192 : index
    %c0_84 = arith.constant 0 : index
    %51 = vector.load %arg4[%c192, %c0_84] : memref<576x128xbf16, #tpu.memory_space<vmem>>, vector<64x128xbf16>
    %cst_85 = arith.constant dense<0.000000e+00> : vector<512x128xf32>
    %52 = tpu.matmul %49, %51, %cst_85 {dimension_numbers = #tpu.dot_dimension_numbers<[1], [0], [0], [1], [0, 0, 1, 1], [], []>} : vector<512x64xbf16>, vector<64x128xbf16>, vector<512x128xf32> -> vector<512x128xf32>
    %53 = arith.addf %50, %52 : vector<512x128xf32>
    %c0_86 = arith.constant 0 : index
    %c0_87 = arith.constant 0 : index
    %54 = vector.load %arg13[%c0_86, %c0_87] : memref<512x128xf32, #tpu.memory_space<vmem>>, vector<512x128xf32>
    tpu.vector_store %arg13[%c0_86, %c0_87], %53 {strides = array<i32>} : memref<512x128xf32, #tpu.memory_space<vmem>>, vector<512x128xf32>,
    %c1_88 = arith.constant 1 : index
    %c1_89 = arith.constant 1 : index
    %c0_90 = arith.constant 0 : index
    %c0_91 = arith.constant 0 : index
    %55 = vector.load %arg14[%c1_88, %c1_89, %c0_90, %c0_91] : memref<10x10x8x64xbf16, #tpu.memory_space<vmem>>, vector<8x8x8x64xbf16>
    %56 = vector.shape_cast %55 : vector<8x8x8x64xbf16> to vector<512x64xbf16>
    %c0_92 = arith.constant 0 : index
    %c0_93 = arith.constant 0 : index
    %57 = vector.load %arg13[%c0_92, %c0_93] : memref<512x128xf32, #tpu.memory_space<vmem>>, vector<512x128xf32>
    %c256 = arith.constant 256 : index
    %c0_94 = arith.constant 0 : index
    %58 = vector.load %arg4[%c256, %c0_94] : memref<576x128xbf16, #tpu.memory_space<vmem>>, vector<64x128xbf16>
    %cst_95 = arith.constant dense<0.000000e+00> : vector<512x128xf32>
    %59 = tpu.matmul %56, %58, %cst_95 {dimension_numbers = #tpu.dot_dimension_numbers<[1], [0], [0], [1], [0, 0, 1, 1], [], []>} : vector<512x64xbf16>, vector<64x128xbf16>, vector<512x128xf32> -> vector<512x128xf32>
    %60 = arith.addf %57, %59 : vector<512x128xf32>
    %c0_96 = arith.constant 0 : index
    %c0_97 = arith.constant 0 : index
    %61 = vector.load %arg13[%c0_96, %c0_97] : memref<512x128xf32, #tpu.memory_space<vmem>>, vector<512x128xf32>
    tpu.vector_store %arg13[%c0_96, %c0_97], %60 {strides = array<i32>} : memref<512x128xf32, #tpu.memory_space<vmem>>, vector<512x128xf32>,
    %c1_98 = arith.constant 1 : index
    %c2_99 = arith.constant 2 : index
    %c0_100 = arith.constant 0 : index
    %c0_101 = arith.constant 0 : index
    %62 = vector.load %arg14[%c1_98, %c2_99, %c0_100, %c0_101] : memref<10x10x8x64xbf16, #tpu.memory_space<vmem>>, vector<8x8x8x64xbf16>
    %63 = vector.shape_cast %62 : vector<8x8x8x64xbf16> to vector<512x64xbf16>
    %c0_102 = arith.constant 0 : index
    %c0_103 = arith.constant 0 : index
    %64 = vector.load %arg13[%c0_102, %c0_103] : memref<512x128xf32, #tpu.memory_space<vmem>>, vector<512x128xf32>
    %c320 = arith.constant 320 : index
    %c0_104 = arith.constant 0 : index
    %65 = vector.load %arg4[%c320, %c0_104] : memref<576x128xbf16, #tpu.memory_space<vmem>>, vector<64x128xbf16>
    %cst_105 = arith.constant dense<0.000000e+00> : vector<512x128xf32>
    %66 = tpu.matmul %63, %65, %cst_105 {dimension_numbers = #tpu.dot_dimension_numbers<[1], [0], [0], [1], [0, 0, 1, 1], [], []>} : vector<512x64xbf16>, vector<64x128xbf16>, vector<512x128xf32> -> vector<512x128xf32>
    %67 = arith.addf %64, %66 : vector<512x128xf32>
    %c0_106 = arith.constant 0 : index
    %c0_107 = arith.constant 0 : index
    %68 = vector.load %arg13[%c0_106, %c0_107] : memref<512x128xf32, #tpu.memory_space<vmem>>, vector<512x128xf32>
    tpu.vector_store %arg13[%c0_106, %c0_107], %67 {strides = array<i32>} : memref<512x128xf32, #tpu.memory_space<vmem>>, vector<512x128xf32>,
    %c2_108 = arith.constant 2 : index
    %c0_109 = arith.constant 0 : index
    %c0_110 = arith.constant 0 : index
    %c0_111 = arith.constant 0 : index
    %69 = vector.load %arg14[%c2_108, %c0_109, %c0_110, %c0_111] : memref<10x10x8x64xbf16, #tpu.memory_space<vmem>>, vector<8x8x8x64xbf16>
    %70 = vector.shape_cast %69 : vector<8x8x8x64xbf16> to vector<512x64xbf16>
    %c0_112 = arith.constant 0 : index
    %c0_113 = arith.constant 0 : index
    %71 = vector.load %arg13[%c0_112, %c0_113] : memref<512x128xf32, #tpu.memory_space<vmem>>, vector<512x128xf32>
    %c384 = arith.constant 384 : index
    %c0_114 = arith.constant 0 : index
    %72 = vector.load %arg4[%c384, %c0_114] : memref<576x128xbf16, #tpu.memory_space<vmem>>, vector<64x128xbf16>
    %cst_115 = arith.constant dense<0.000000e+00> : vector<512x128xf32>
    %73 = tpu.matmul %70, %72, %cst_115 {dimension_numbers = #tpu.dot_dimension_numbers<[1], [0], [0], [1], [0, 0, 1, 1], [], []>} : vector<512x64xbf16>, vector<64x128xbf16>, vector<512x128xf32> -> vector<512x128xf32>
    %74 = arith.addf %71, %73 : vector<512x128xf32>
    %c0_116 = arith.constant 0 : index
    %c0_117 = arith.constant 0 : index
    %75 = vector.load %arg13[%c0_116, %c0_117] : memref<512x128xf32, #tpu.memory_space<vmem>>, vector<512x128xf32>
    tpu.vector_store %arg13[%c0_116, %c0_117], %74 {strides = array<i32>} : memref<512x128xf32, #tpu.memory_space<vmem>>, vector<512x128xf32>,
    %c2_118 = arith.constant 2 : index
    %c1_119 = arith.constant 1 : index
    %c0_120 = arith.constant 0 : index
    %c0_121 = arith.constant 0 : index
    %76 = vector.load %arg14[%c2_118, %c1_119, %c0_120, %c0_121] : memref<10x10x8x64xbf16, #tpu.memory_space<vmem>>, vector<8x8x8x64xbf16>
    %77 = vector.shape_cast %76 : vector<8x8x8x64xbf16> to vector<512x64xbf16>
    %c0_122 = arith.constant 0 : index
    %c0_123 = arith.constant 0 : index
    %78 = vector.load %arg13[%c0_122, %c0_123] : memref<512x128xf32, #tpu.memory_space<vmem>>, vector<512x128xf32>
    %c448 = arith.constant 448 : index
    %c0_124 = arith.constant 0 : index
    %79 = vector.load %arg4[%c448, %c0_124] : memref<576x128xbf16, #tpu.memory_space<vmem>>, vector<64x128xbf16>
    %cst_125 = arith.constant dense<0.000000e+00> : vector<512x128xf32>
    %80 = tpu.matmul %77, %79, %cst_125 {dimension_numbers = #tpu.dot_dimension_numbers<[1], [0], [0], [1], [0, 0, 1, 1], [], []>} : vector<512x64xbf16>, vector<64x128xbf16>, vector<512x128xf32> -> vector<512x128xf32>
    %81 = arith.addf %78, %80 : vector<512x128xf32>
    %c0_126 = arith.constant 0 : index
    %c0_127 = arith.constant 0 : index
    %82 = vector.load %arg13[%c0_126, %c0_127] : memref<512x128xf32, #tpu.memory_space<vmem>>, vector<512x128xf32>
    tpu.vector_store %arg13[%c0_126, %c0_127], %81 {strides = array<i32>} : memref<512x128xf32, #tpu.memory_space<vmem>>, vector<512x128xf32>,
    %c2_128 = arith.constant 2 : index
    %c2_129 = arith.constant 2 : index
    %c0_130 = arith.constant 0 : index
    %c0_131 = arith.constant 0 : index
    %83 = vector.load %arg14[%c2_128, %c2_129, %c0_130, %c0_131] : memref<10x10x8x64xbf16, #tpu.memory_space<vmem>>, vector<8x8x8x64xbf16>
    %84 = vector.shape_cast %83 : vector<8x8x8x64xbf16> to vector<512x64xbf16>
    %c0_132 = arith.constant 0 : index
    %c0_133 = arith.constant 0 : index
    %85 = vector.load %arg13[%c0_132, %c0_133] : memref<512x128xf32, #tpu.memory_space<vmem>>, vector<512x128xf32>
    %c512 = arith.constant 512 : index
    %c0_134 = arith.constant 0 : index
    %86 = vector.load %arg4[%c512, %c0_134] : memref<576x128xbf16, #tpu.memory_space<vmem>>, vector<64x128xbf16>
    %cst_135 = arith.constant dense<0.000000e+00> : vector<512x128xf32>
    %87 = tpu.matmul %84, %86, %cst_135 {dimension_numbers = #tpu.dot_dimension_numbers<[1], [0], [0], [1], [0, 0, 1, 1], [], []>} : vector<512x64xbf16>, vector<64x128xbf16>, vector<512x128xf32> -> vector<512x128xf32>
    %88 = arith.addf %85, %87 : vector<512x128xf32>
    %c0_136 = arith.constant 0 : index
    %c0_137 = arith.constant 0 : index
    %89 = vector.load %arg13[%c0_136, %c0_137] : memref<512x128xf32, #tpu.memory_space<vmem>>, vector<512x128xf32>
    tpu.vector_store %arg13[%c0_136, %c0_137], %88 {strides = array<i32>} : memref<512x128xf32, #tpu.memory_space<vmem>>, vector<512x128xf32>,
    %c0_138 = arith.constant 0 : index
    %c0_139 = arith.constant 0 : index
    %90 = vector.load %arg13[%c0_138, %c0_139] : memref<512x128xf32, #tpu.memory_space<vmem>>, vector<512x128xf32>
    %cst_140 = arith.constant 0.000000e+00 : f32
    %91 = vector.broadcast %cst_140 : f32 to vector<512x128xf32>
    %92 = arith.maximumf %90, %91 : vector<512x128xf32>
    %93 = arith.truncf %92 : vector<512x128xf32> to vector<512x128xbf16>
    %94 = vector.shape_cast %93 : vector<512x128xbf16> to vector<8x8x8x128xbf16>
    %c1_141 = arith.constant 1 : index
    %c1_142 = arith.constant 1 : index
    %c0_143 = arith.constant 0 : index
    %c0_144 = arith.constant 0 : index
    %95 = vector.load %arg15[%c1_141, %c1_142, %c0_143, %c0_144] : memref<10x10x8x128xbf16, #tpu.memory_space<vmem>>, vector<8x8x8x128xbf16>
    tpu.vector_store %arg15[%c1_141, %c1_142, %c0_143, %c0_144], %94 {strides = array<i32>} : memref<10x10x8x128xbf16, #tpu.memory_space<vmem>>, vector<8x8x8x128xbf16>,
    %c0_145 = arith.constant 0 : index
    %c0_146 = arith.constant 0 : index
    %96 = vector.load %arg7[%c0_145, %c0_146] : memref<1x128xf32, #tpu.memory_space<vmem>>, vector<1x128xf32>
    %97 = vector.shape_cast %96 : vector<1x128xf32> to vector<1x128xf32>
    %98 = vector.broadcast %97 : vector<1x128xf32> to vector<512x128xf32>
    %c0_147 = arith.constant 0 : index
    %c0_148 = arith.constant 0 : index
    %99 = vector.load %arg13[%c0_147, %c0_148] : memref<512x128xf32, #tpu.memory_space<vmem>>, vector<512x128xf32>
    tpu.vector_store %arg13[%c0_147, %c0_148], %98 {strides = array<i32>} : memref<512x128xf32, #tpu.memory_space<vmem>>, vector<512x128xf32>,
    %c0_149 = arith.constant 0 : index
    %c0_150 = arith.constant 0 : index
    %c0_151 = arith.constant 0 : index
    %c0_152 = arith.constant 0 : index
    %100 = vector.load %arg15[%c0_149, %c0_150, %c0_151, %c0_152] : memref<10x10x8x128xbf16, #tpu.memory_space<vmem>>, vector<8x8x8x128xbf16>
    %101 = vector.shape_cast %100 : vector<8x8x8x128xbf16> to vector<512x128xbf16>
    %c0_153 = arith.constant 0 : index
    %c0_154 = arith.constant 0 : index
    %102 = vector.load %arg13[%c0_153, %c0_154] : memref<512x128xf32, #tpu.memory_space<vmem>>, vector<512x128xf32>
    %c0_155 = arith.constant 0 : index
    %c0_156 = arith.constant 0 : index
    %103 = vector.load %arg6[%c0_155, %c0_156] : memref<1152x128xbf16, #tpu.memory_space<vmem>>, vector<128x128xbf16>
    %cst_157 = arith.constant dense<0.000000e+00> : vector<512x128xf32>
    %104 = tpu.matmul %101, %103, %cst_157 {dimension_numbers = #tpu.dot_dimension_numbers<[1], [0], [0], [1], [0, 0, 1, 1], [], []>} : vector<512x128xbf16>, vector<128x128xbf16>, vector<512x128xf32> -> vector<512x128xf32>
    %105 = arith.addf %102, %104 : vector<512x128xf32>
    %c0_158 = arith.constant 0 : index
    %c0_159 = arith.constant 0 : index
    %106 = vector.load %arg13[%c0_158, %c0_159] : memref<512x128xf32, #tpu.memory_space<vmem>>, vector<512x128xf32>
    tpu.vector_store %arg13[%c0_158, %c0_159], %105 {strides = array<i32>} : memref<512x128xf32, #tpu.memory_space<vmem>>, vector<512x128xf32>,
    %c0_160 = arith.constant 0 : index
    %c1_161 = arith.constant 1 : index
    %c0_162 = arith.constant 0 : index
    %c0_163 = arith.constant 0 : index
    %107 = vector.load %arg15[%c0_160, %c1_161, %c0_162, %c0_163] : memref<10x10x8x128xbf16, #tpu.memory_space<vmem>>, vector<8x8x8x128xbf16>
    %108 = vector.shape_cast %107 : vector<8x8x8x128xbf16> to vector<512x128xbf16>
    %c0_164 = arith.constant 0 : index
    %c0_165 = arith.constant 0 : index
    %109 = vector.load %arg13[%c0_164, %c0_165] : memref<512x128xf32, #tpu.memory_space<vmem>>, vector<512x128xf32>
    %c128_166 = arith.constant 128 : index
    %c0_167 = arith.constant 0 : index
    %110 = vector.load %arg6[%c128_166, %c0_167] : memref<1152x128xbf16, #tpu.memory_space<vmem>>, vector<128x128xbf16>
    %cst_168 = arith.constant dense<0.000000e+00> : vector<512x128xf32>
    %111 = tpu.matmul %108, %110, %cst_168 {dimension_numbers = #tpu.dot_dimension_numbers<[1], [0], [0], [1], [0, 0, 1, 1], [], []>} : vector<512x128xbf16>, vector<128x128xbf16>, vector<512x128xf32> -> vector<512x128xf32>
    %112 = arith.addf %109, %111 : vector<512x128xf32>
    %c0_169 = arith.constant 0 : index
    %c0_170 = arith.constant 0 : index
    %113 = vector.load %arg13[%c0_169, %c0_170] : memref<512x128xf32, #tpu.memory_space<vmem>>, vector<512x128xf32>
    tpu.vector_store %arg13[%c0_169, %c0_170], %112 {strides = array<i32>} : memref<512x128xf32, #tpu.memory_space<vmem>>, vector<512x128xf32>,
    %c0_171 = arith.constant 0 : index
    %c2_172 = arith.constant 2 : index
    %c0_173 = arith.constant 0 : index
    %c0_174 = arith.constant 0 : index
    %114 = vector.load %arg15[%c0_171, %c2_172, %c0_173, %c0_174] : memref<10x10x8x128xbf16, #tpu.memory_space<vmem>>, vector<8x8x8x128xbf16>
    %115 = vector.shape_cast %114 : vector<8x8x8x128xbf16> to vector<512x128xbf16>
    %c0_175 = arith.constant 0 : index
    %c0_176 = arith.constant 0 : index
    %116 = vector.load %arg13[%c0_175, %c0_176] : memref<512x128xf32, #tpu.memory_space<vmem>>, vector<512x128xf32>
    %c256_177 = arith.constant 256 : index
    %c0_178 = arith.constant 0 : index
    %117 = vector.load %arg6[%c256_177, %c0_178] : memref<1152x128xbf16, #tpu.memory_space<vmem>>, vector<128x128xbf16>
    %cst_179 = arith.constant dense<0.000000e+00> : vector<512x128xf32>
    %118 = tpu.matmul %115, %117, %cst_179 {dimension_numbers = #tpu.dot_dimension_numbers<[1], [0], [0], [1], [0, 0, 1, 1], [], []>} : vector<512x128xbf16>, vector<128x128xbf16>, vector<512x128xf32> -> vector<512x128xf32>
    %119 = arith.addf %116, %118 : vector<512x128xf32>
    %c0_180 = arith.constant 0 : index
    %c0_181 = arith.constant 0 : index
    %120 = vector.load %arg13[%c0_180, %c0_181] : memref<512x128xf32, #tpu.memory_space<vmem>>, vector<512x128xf32>
    tpu.vector_store %arg13[%c0_180, %c0_181], %119 {strides = array<i32>} : memref<512x128xf32, #tpu.memory_space<vmem>>, vector<512x128xf32>,
    %c1_182 = arith.constant 1 : index
    %c0_183 = arith.constant 0 : index
    %c0_184 = arith.constant 0 : index
    %c0_185 = arith.constant 0 : index
    %121 = vector.load %arg15[%c1_182, %c0_183, %c0_184, %c0_185] : memref<10x10x8x128xbf16, #tpu.memory_space<vmem>>, vector<8x8x8x128xbf16>
    %122 = vector.shape_cast %121 : vector<8x8x8x128xbf16> to vector<512x128xbf16>
    %c0_186 = arith.constant 0 : index
    %c0_187 = arith.constant 0 : index
    %123 = vector.load %arg13[%c0_186, %c0_187] : memref<512x128xf32, #tpu.memory_space<vmem>>, vector<512x128xf32>
    %c384_188 = arith.constant 384 : index
    %c0_189 = arith.constant 0 : index
    %124 = vector.load %arg6[%c384_188, %c0_189] : memref<1152x128xbf16, #tpu.memory_space<vmem>>, vector<128x128xbf16>
    %cst_190 = arith.constant dense<0.000000e+00> : vector<512x128xf32>
    %125 = tpu.matmul %122, %124, %cst_190 {dimension_numbers = #tpu.dot_dimension_numbers<[1], [0], [0], [1], [0, 0, 1, 1], [], []>} : vector<512x128xbf16>, vector<128x128xbf16>, vector<512x128xf32> -> vector<512x128xf32>
    %126 = arith.addf %123, %125 : vector<512x128xf32>
    %c0_191 = arith.constant 0 : index
    %c0_192 = arith.constant 0 : index
    %127 = vector.load %arg13[%c0_191, %c0_192] : memref<512x128xf32, #tpu.memory_space<vmem>>, vector<512x128xf32>
    tpu.vector_store %arg13[%c0_191, %c0_192], %126 {strides = array<i32>} : memref<512x128xf32, #tpu.memory_space<vmem>>, vector<512x128xf32>,
    %c1_193 = arith.constant 1 : index
    %c1_194 = arith.constant 1 : index
    %c0_195 = arith.constant 0 : index
    %c0_196 = arith.constant 0 : index
    %128 = vector.load %arg15[%c1_193, %c1_194, %c0_195, %c0_196] : memref<10x10x8x128xbf16, #tpu.memory_space<vmem>>, vector<8x8x8x128xbf16>
    %129 = vector.shape_cast %128 : vector<8x8x8x128xbf16> to vector<512x128xbf16>
    %c0_197 = arith.constant 0 : index
    %c0_198 = arith.constant 0 : index
    %130 = vector.load %arg13[%c0_197, %c0_198] : memref<512x128xf32, #tpu.memory_space<vmem>>, vector<512x128xf32>
    %c512_199 = arith.constant 512 : index
    %c0_200 = arith.constant 0 : index
    %131 = vector.load %arg6[%c512_199, %c0_200] : memref<1152x128xbf16, #tpu.memory_space<vmem>>, vector<128x128xbf16>
    %cst_201 = arith.constant dense<0.000000e+00> : vector<512x128xf32>
    %132 = tpu.matmul %129, %131, %cst_201 {dimension_numbers = #tpu.dot_dimension_numbers<[1], [0], [0], [1], [0, 0, 1, 1], [], []>} : vector<512x128xbf16>, vector<128x128xbf16>, vector<512x128xf32> -> vector<512x128xf32>
    %133 = arith.addf %130, %132 : vector<512x128xf32>
    %c0_202 = arith.constant 0 : index
    %c0_203 = arith.constant 0 : index
    %134 = vector.load %arg13[%c0_202, %c0_203] : memref<512x128xf32, #tpu.memory_space<vmem>>, vector<512x128xf32>
    tpu.vector_store %arg13[%c0_202, %c0_203], %133 {strides = array<i32>} : memref<512x128xf32, #tpu.memory_space<vmem>>, vector<512x128xf32>,
    %c1_204 = arith.constant 1 : index
    %c2_205 = arith.constant 2 : index
    %c0_206 = arith.constant 0 : index
    %c0_207 = arith.constant 0 : index
    %135 = vector.load %arg15[%c1_204, %c2_205, %c0_206, %c0_207] : memref<10x10x8x128xbf16, #tpu.memory_space<vmem>>, vector<8x8x8x128xbf16>
    %136 = vector.shape_cast %135 : vector<8x8x8x128xbf16> to vector<512x128xbf16>
    %c0_208 = arith.constant 0 : index
    %c0_209 = arith.constant 0 : index
    %137 = vector.load %arg13[%c0_208, %c0_209] : memref<512x128xf32, #tpu.memory_space<vmem>>, vector<512x128xf32>
    %c640 = arith.constant 640 : index
    %c0_210 = arith.constant 0 : index
    %138 = vector.load %arg6[%c640, %c0_210] : memref<1152x128xbf16, #tpu.memory_space<vmem>>, vector<128x128xbf16>
    %cst_211 = arith.constant dense<0.000000e+00> : vector<512x128xf32>
    %139 = tpu.matmul %136, %138, %cst_211 {dimension_numbers = #tpu.dot_dimension_numbers<[1], [0], [0], [1], [0, 0, 1, 1], [], []>} : vector<512x128xbf16>, vector<128x128xbf16>, vector<512x128xf32> -> vector<512x128xf32>
    %140 = arith.addf %137, %139 : vector<512x128xf32>
    %c0_212 = arith.constant 0 : index
    %c0_213 = arith.constant 0 : index
    %141 = vector.load %arg13[%c0_212, %c0_213] : memref<512x128xf32, #tpu.memory_space<vmem>>, vector<512x128xf32>
    tpu.vector_store %arg13[%c0_212, %c0_213], %140 {strides = array<i32>} : memref<512x128xf32, #tpu.memory_space<vmem>>, vector<512x128xf32>,
    %c2_214 = arith.constant 2 : index
    %c0_215 = arith.constant 0 : index
    %c0_216 = arith.constant 0 : index
    %c0_217 = arith.constant 0 : index
    %142 = vector.load %arg15[%c2_214, %c0_215, %c0_216, %c0_217] : memref<10x10x8x128xbf16, #tpu.memory_space<vmem>>, vector<8x8x8x128xbf16>
    %143 = vector.shape_cast %142 : vector<8x8x8x128xbf16> to vector<512x128xbf16>
    %c0_218 = arith.constant 0 : index
    %c0_219 = arith.constant 0 : index
    %144 = vector.load %arg13[%c0_218, %c0_219] : memref<512x128xf32, #tpu.memory_space<vmem>>, vector<512x128xf32>
    %c768 = arith.constant 768 : index
    %c0_220 = arith.constant 0 : index
    %145 = vector.load %arg6[%c768, %c0_220] : memref<1152x128xbf16, #tpu.memory_space<vmem>>, vector<128x128xbf16>
    %cst_221 = arith.constant dense<0.000000e+00> : vector<512x128xf32>
    %146 = tpu.matmul %143, %145, %cst_221 {dimension_numbers = #tpu.dot_dimension_numbers<[1], [0], [0], [1], [0, 0, 1, 1], [], []>} : vector<512x128xbf16>, vector<128x128xbf16>, vector<512x128xf32> -> vector<512x128xf32>
    %147 = arith.addf %144, %146 : vector<512x128xf32>
    %c0_222 = arith.constant 0 : index
    %c0_223 = arith.constant 0 : index
    %148 = vector.load %arg13[%c0_222, %c0_223] : memref<512x128xf32, #tpu.memory_space<vmem>>, vector<512x128xf32>
    tpu.vector_store %arg13[%c0_222, %c0_223], %147 {strides = array<i32>} : memref<512x128xf32, #tpu.memory_space<vmem>>, vector<512x128xf32>,
    %c2_224 = arith.constant 2 : index
    %c1_225 = arith.constant 1 : index
    %c0_226 = arith.constant 0 : index
    %c0_227 = arith.constant 0 : index
    %149 = vector.load %arg15[%c2_224, %c1_225, %c0_226, %c0_227] : memref<10x10x8x128xbf16, #tpu.memory_space<vmem>>, vector<8x8x8x128xbf16>
    %150 = vector.shape_cast %149 : vector<8x8x8x128xbf16> to vector<512x128xbf16>
    %c0_228 = arith.constant 0 : index
    %c0_229 = arith.constant 0 : index
    %151 = vector.load %arg13[%c0_228, %c0_229] : memref<512x128xf32, #tpu.memory_space<vmem>>, vector<512x128xf32>
    %c896 = arith.constant 896 : index
    %c0_230 = arith.constant 0 : index
    %152 = vector.load %arg6[%c896, %c0_230] : memref<1152x128xbf16, #tpu.memory_space<vmem>>, vector<128x128xbf16>
    %cst_231 = arith.constant dense<0.000000e+00> : vector<512x128xf32>
    %153 = tpu.matmul %150, %152, %cst_231 {dimension_numbers = #tpu.dot_dimension_numbers<[1], [0], [0], [1], [0, 0, 1, 1], [], []>} : vector<512x128xbf16>, vector<128x128xbf16>, vector<512x128xf32> -> vector<512x128xf32>
    %154 = arith.addf %151, %153 : vector<512x128xf32>
    %c0_232 = arith.constant 0 : index
    %c0_233 = arith.constant 0 : index
    %155 = vector.load %arg13[%c0_232, %c0_233] : memref<512x128xf32, #tpu.memory_space<vmem>>, vector<512x128xf32>
    tpu.vector_store %arg13[%c0_232, %c0_233], %154 {strides = array<i32>} : memref<512x128xf32, #tpu.memory_space<vmem>>, vector<512x128xf32>,
    %c2_234 = arith.constant 2 : index
    %c2_235 = arith.constant 2 : index
    %c0_236 = arith.constant 0 : index
    %c0_237 = arith.constant 0 : index
    %156 = vector.load %arg15[%c2_234, %c2_235, %c0_236, %c0_237] : memref<10x10x8x128xbf16, #tpu.memory_space<vmem>>, vector<8x8x8x128xbf16>
    %157 = vector.shape_cast %156 : vector<8x8x8x128xbf16> to vector<512x128xbf16>
    %c0_238 = arith.constant 0 : index
    %c0_239 = arith.constant 0 : index
    %158 = vector.load %arg13[%c0_238, %c0_239] : memref<512x128xf32, #tpu.memory_space<vmem>>, vector<512x128xf32>
    %c1024 = arith.constant 1024 : index
    %c0_240 = arith.constant 0 : index
    %159 = vector.load %arg6[%c1024, %c0_240] : memref<1152x128xbf16, #tpu.memory_space<vmem>>, vector<128x128xbf16>
    %cst_241 = arith.constant dense<0.000000e+00> : vector<512x128xf32>
    %160 = tpu.matmul %157, %159, %cst_241 {dimension_numbers = #tpu.dot_dimension_numbers<[1], [0], [0], [1], [0, 0, 1, 1], [], []>} : vector<512x128xbf16>, vector<128x128xbf16>, vector<512x128xf32> -> vector<512x128xf32>
    %161 = arith.addf %158, %160 : vector<512x128xf32>
    %c0_242 = arith.constant 0 : index
    %c0_243 = arith.constant 0 : index
    %162 = vector.load %arg13[%c0_242, %c0_243] : memref<512x128xf32, #tpu.memory_space<vmem>>, vector<512x128xf32>
    tpu.vector_store %arg13[%c0_242, %c0_243], %161 {strides = array<i32>} : memref<512x128xf32, #tpu.memory_space<vmem>>, vector<512x128xf32>,
    %c0_244 = arith.constant 0 : index
    %c0_245 = arith.constant 0 : index
    %163 = vector.load %arg13[%c0_244, %c0_245] : memref<512x128xf32, #tpu.memory_space<vmem>>, vector<8x128xf32>
    %cst_246 = arith.constant 0.000000e+00 : f32
    %164 = vector.broadcast %cst_246 : f32 to vector<8x128xf32>
    %165 = arith.maximumf %163, %164 : vector<8x128xf32>
    %166 = arith.truncf %165 : vector<8x128xf32> to vector<8x128xbf16>
    %c0_247 = arith.constant 0 : index
    %c0_248 = arith.constant 0 : index
    %167 = vector.load %arg16[%c0_247, %c0_248] : memref<8x8192xbf16, #tpu.memory_space<vmem>>, vector<8x128xbf16>
    tpu.vector_store %arg16[%c0_247, %c0_248], %166 {strides = array<i32>} : memref<8x8192xbf16, #tpu.memory_space<vmem>>, vector<8x128xbf16>,
    %c8 = arith.constant 8 : index
    %c0_249 = arith.constant 0 : index
    %168 = vector.load %arg13[%c8, %c0_249] : memref<512x128xf32, #tpu.memory_space<vmem>>, vector<8x128xf32>
    %cst_250 = arith.constant 0.000000e+00 : f32
    %169 = vector.broadcast %cst_250 : f32 to vector<8x128xf32>
    %170 = arith.maximumf %168, %169 : vector<8x128xf32>
    %171 = arith.truncf %170 : vector<8x128xf32> to vector<8x128xbf16>
    %c0_251 = arith.constant 0 : index
    %c128_252 = arith.constant 128 : index
    %172 = vector.load %arg16[%c0_251, %c128_252] : memref<8x8192xbf16, #tpu.memory_space<vmem>>, vector<8x128xbf16>
    tpu.vector_store %arg16[%c0_251, %c128_252], %171 {strides = array<i32>} : memref<8x8192xbf16, #tpu.memory_space<vmem>>, vector<8x128xbf16>,
    %c16 = arith.constant 16 : index
    %c0_253 = arith.constant 0 : index
    %173 = vector.load %arg13[%c16, %c0_253] : memref<512x128xf32, #tpu.memory_space<vmem>>, vector<8x128xf32>
    %cst_254 = arith.constant 0.000000e+00 : f32
    %174 = vector.broadcast %cst_254 : f32 to vector<8x128xf32>
    %175 = arith.maximumf %173, %174 : vector<8x128xf32>
    %176 = arith.truncf %175 : vector<8x128xf32> to vector<8x128xbf16>
    %c0_255 = arith.constant 0 : index
    %c256_256 = arith.constant 256 : index
    %177 = vector.load %arg16[%c0_255, %c256_256] : memref<8x8192xbf16, #tpu.memory_space<vmem>>, vector<8x128xbf16>
    tpu.vector_store %arg16[%c0_255, %c256_256], %176 {strides = array<i32>} : memref<8x8192xbf16, #tpu.memory_space<vmem>>, vector<8x128xbf16>,
    %c24 = arith.constant 24 : index
    %c0_257 = arith.constant 0 : index
    %178 = vector.load %arg13[%c24, %c0_257] : memref<512x128xf32, #tpu.memory_space<vmem>>, vector<8x128xf32>
    %cst_258 = arith.constant 0.000000e+00 : f32
    %179 = vector.broadcast %cst_258 : f32 to vector<8x128xf32>
    %180 = arith.maximumf %178, %179 : vector<8x128xf32>
    %181 = arith.truncf %180 : vector<8x128xf32> to vector<8x128xbf16>
    %c0_259 = arith.constant 0 : index
    %c384_260 = arith.constant 384 : index
    %182 = vector.load %arg16[%c0_259, %c384_260] : memref<8x8192xbf16, #tpu.memory_space<vmem>>, vector<8x128xbf16>
    tpu.vector_store %arg16[%c0_259, %c384_260], %181 {strides = array<i32>} : memref<8x8192xbf16, #tpu.memory_space<vmem>>, vector<8x128xbf16>,
    %c32 = arith.constant 32 : index
    %c0_261 = arith.constant 0 : index
    %183 = vector.load %arg13[%c32, %c0_261] : memref<512x128xf32, #tpu.memory_space<vmem>>, vector<8x128xf32>
    %cst_262 = arith.constant 0.000000e+00 : f32
    %184 = vector.broadcast %cst_262 : f32 to vector<8x128xf32>
    %185 = arith.maximumf %183, %184 : vector<8x128xf32>
    %186 = arith.truncf %185 : vector<8x128xf32> to vector<8x128xbf16>
    %c0_263 = arith.constant 0 : index
    %c512_264 = arith.constant 512 : index
    %187 = vector.load %arg16[%c0_263, %c512_264] : memref<8x8192xbf16, #tpu.memory_space<vmem>>, vector<8x128xbf16>
    tpu.vector_store %arg16[%c0_263, %c512_264], %186 {strides = array<i32>} : memref<8x8192xbf16, #tpu.memory_space<vmem>>, vector<8x128xbf16>,
    %c40 = arith.constant 40 : index
    %c0_265 = arith.constant 0 : index
    %188 = vector.load %arg13[%c40, %c0_265] : memref<512x128xf32, #tpu.memory_space<vmem>>, vector<8x128xf32>
    %cst_266 = arith.constant 0.000000e+00 : f32
    %189 = vector.broadcast %cst_266 : f32 to vector<8x128xf32>
    %190 = arith.maximumf %188, %189 : vector<8x128xf32>
    %191 = arith.truncf %190 : vector<8x128xf32> to vector<8x128xbf16>
    %c0_267 = arith.constant 0 : index
    %c640_268 = arith.constant 640 : index
    %192 = vector.load %arg16[%c0_267, %c640_268] : memref<8x8192xbf16, #tpu.memory_space<vmem>>, vector<8x128xbf16>
    tpu.vector_store %arg16[%c0_267, %c640_268], %191 {strides = array<i32>} : memref<8x8192xbf16, #tpu.memory_space<vmem>>, vector<8x128xbf16>,
    %c48 = arith.constant 48 : index
    %c0_269 = arith.constant 0 : index
    %193 = vector.load %arg13[%c48, %c0_269] : memref<512x128xf32, #tpu.memory_space<vmem>>, vector<8x128xf32>
    %cst_270 = arith.constant 0.000000e+00 : f32
    %194 = vector.broadcast %cst_270 : f32 to vector<8x128xf32>
    %195 = arith.maximumf %193, %194 : vector<8x128xf32>
    %196 = arith.truncf %195 : vector<8x128xf32> to vector<8x128xbf16>
    %c0_271 = arith.constant 0 : index
    %c768_272 = arith.constant 768 : index
    %197 = vector.load %arg16[%c0_271, %c768_272] : memref<8x8192xbf16, #tpu.memory_space<vmem>>, vector<8x128xbf16>
    tpu.vector_store %arg16[%c0_271, %c768_272], %196 {strides = array<i32>} : memref<8x8192xbf16, #tpu.memory_space<vmem>>, vector<8x128xbf16>,
    %c56 = arith.constant 56 : index
    %c0_273 = arith.constant 0 : index
    %198 = vector.load %arg13[%c56, %c0_273] : memref<512x128xf32, #tpu.memory_space<vmem>>, vector<8x128xf32>
    %cst_274 = arith.constant 0.000000e+00 : f32
    %199 = vector.broadcast %cst_274 : f32 to vector<8x128xf32>
    %200 = arith.maximumf %198, %199 : vector<8x128xf32>
    %201 = arith.truncf %200 : vector<8x128xf32> to vector<8x128xbf16>
    %c0_275 = arith.constant 0 : index
    %c896_276 = arith.constant 896 : index
    %202 = vector.load %arg16[%c0_275, %c896_276] : memref<8x8192xbf16, #tpu.memory_space<vmem>>, vector<8x128xbf16>
    tpu.vector_store %arg16[%c0_275, %c896_276], %201 {strides = array<i32>} : memref<8x8192xbf16, #tpu.memory_space<vmem>>, vector<8x128xbf16>,
    %c64_277 = arith.constant 64 : index
    %c0_278 = arith.constant 0 : index
    %203 = vector.load %arg13[%c64_277, %c0_278] : memref<512x128xf32, #tpu.memory_space<vmem>>, vector<8x128xf32>
    %cst_279 = arith.constant 0.000000e+00 : f32
    %204 = vector.broadcast %cst_279 : f32 to vector<8x128xf32>
    %205 = arith.maximumf %203, %204 : vector<8x128xf32>
    %206 = arith.truncf %205 : vector<8x128xf32> to vector<8x128xbf16>
    %c0_280 = arith.constant 0 : index
    %c1024_281 = arith.constant 1024 : index
    %207 = vector.load %arg16[%c0_280, %c1024_281] : memref<8x8192xbf16, #tpu.memory_space<vmem>>, vector<8x128xbf16>
    tpu.vector_store %arg16[%c0_280, %c1024_281], %206 {strides = array<i32>} : memref<8x8192xbf16, #tpu.memory_space<vmem>>, vector<8x128xbf16>,
    %c72 = arith.constant 72 : index
    %c0_282 = arith.constant 0 : index
    %208 = vector.load %arg13[%c72, %c0_282] : memref<512x128xf32, #tpu.memory_space<vmem>>, vector<8x128xf32>
    %cst_283 = arith.constant 0.000000e+00 : f32
    %209 = vector.broadcast %cst_283 : f32 to vector<8x128xf32>
    %210 = arith.maximumf %208, %209 : vector<8x128xf32>
    %211 = arith.truncf %210 : vector<8x128xf32> to vector<8x128xbf16>
    %c0_284 = arith.constant 0 : index
    %c1152 = arith.constant 1152 : index
    %212 = vector.load %arg16[%c0_284, %c1152] : memref<8x8192xbf16, #tpu.memory_space<vmem>>, vector<8x128xbf16>
    tpu.vector_store %arg16[%c0_284, %c1152], %211 {strides = array<i32>} : memref<8x8192xbf16, #tpu.memory_space<vmem>>, vector<8x128xbf16>,
    %c80 = arith.constant 80 : index
    %c0_285 = arith.constant 0 : index
    %213 = vector.load %arg13[%c80, %c0_285] : memref<512x128xf32, #tpu.memory_space<vmem>>, vector<8x128xf32>
    %cst_286 = arith.constant 0.000000e+00 : f32
    %214 = vector.broadcast %cst_286 : f32 to vector<8x128xf32>
    %215 = arith.maximumf %213, %214 : vector<8x128xf32>
    %216 = arith.truncf %215 : vector<8x128xf32> to vector<8x128xbf16>
    %c0_287 = arith.constant 0 : index
    %c1280 = arith.constant 1280 : index
    %217 = vector.load %arg16[%c0_287, %c1280] : memref<8x8192xbf16, #tpu.memory_space<vmem>>, vector<8x128xbf16>
    tpu.vector_store %arg16[%c0_287, %c1280], %216 {strides = array<i32>} : memref<8x8192xbf16, #tpu.memory_space<vmem>>, vector<8x128xbf16>,
    %c88 = arith.constant 88 : index
    %c0_288 = arith.constant 0 : index
    %218 = vector.load %arg13[%c88, %c0_288] : memref<512x128xf32, #tpu.memory_space<vmem>>, vector<8x128xf32>
    %cst_289 = arith.constant 0.000000e+00 : f32
    %219 = vector.broadcast %cst_289 : f32 to vector<8x128xf32>
    %220 = arith.maximumf %218, %219 : vector<8x128xf32>
    %221 = arith.truncf %220 : vector<8x128xf32> to vector<8x128xbf16>
    %c0_290 = arith.constant 0 : index
    %c1408 = arith.constant 1408 : index
    %222 = vector.load %arg16[%c0_290, %c1408] : memref<8x8192xbf16, #tpu.memory_space<vmem>>, vector<8x128xbf16>
    tpu.vector_store %arg16[%c0_290, %c1408], %221 {strides = array<i32>} : memref<8x8192xbf16, #tpu.memory_space<vmem>>, vector<8x128xbf16>,
    %c96 = arith.constant 96 : index
    %c0_291 = arith.constant 0 : index
    %223 = vector.load %arg13[%c96, %c0_291] : memref<512x128xf32, #tpu.memory_space<vmem>>, vector<8x128xf32>
    %cst_292 = arith.constant 0.000000e+00 : f32
    %224 = vector.broadcast %cst_292 : f32 to vector<8x128xf32>
    %225 = arith.maximumf %223, %224 : vector<8x128xf32>
    %226 = arith.truncf %225 : vector<8x128xf32> to vector<8x128xbf16>
    %c0_293 = arith.constant 0 : index
    %c1536 = arith.constant 1536 : index
    %227 = vector.load %arg16[%c0_293, %c1536] : memref<8x8192xbf16, #tpu.memory_space<vmem>>, vector<8x128xbf16>
    tpu.vector_store %arg16[%c0_293, %c1536], %226 {strides = array<i32>} : memref<8x8192xbf16, #tpu.memory_space<vmem>>, vector<8x128xbf16>,
    %c104 = arith.constant 104 : index
    %c0_294 = arith.constant 0 : index
    %228 = vector.load %arg13[%c104, %c0_294] : memref<512x128xf32, #tpu.memory_space<vmem>>, vector<8x128xf32>
    %cst_295 = arith.constant 0.000000e+00 : f32
    %229 = vector.broadcast %cst_295 : f32 to vector<8x128xf32>
    %230 = arith.maximumf %228, %229 : vector<8x128xf32>
    %231 = arith.truncf %230 : vector<8x128xf32> to vector<8x128xbf16>
    %c0_296 = arith.constant 0 : index
    %c1664 = arith.constant 1664 : index
    %232 = vector.load %arg16[%c0_296, %c1664] : memref<8x8192xbf16, #tpu.memory_space<vmem>>, vector<8x128xbf16>
    tpu.vector_store %arg16[%c0_296, %c1664], %231 {strides = array<i32>} : memref<8x8192xbf16, #tpu.memory_space<vmem>>, vector<8x128xbf16>,
    %c112 = arith.constant 112 : index
    %c0_297 = arith.constant 0 : index
    %233 = vector.load %arg13[%c112, %c0_297] : memref<512x128xf32, #tpu.memory_space<vmem>>, vector<8x128xf32>
    %cst_298 = arith.constant 0.000000e+00 : f32
    %234 = vector.broadcast %cst_298 : f32 to vector<8x128xf32>
    %235 = arith.maximumf %233, %234 : vector<8x128xf32>
    %236 = arith.truncf %235 : vector<8x128xf32> to vector<8x128xbf16>
    %c0_299 = arith.constant 0 : index
    %c1792 = arith.constant 1792 : index
    %237 = vector.load %arg16[%c0_299, %c1792] : memref<8x8192xbf16, #tpu.memory_space<vmem>>, vector<8x128xbf16>
    tpu.vector_store %arg16[%c0_299, %c1792], %236 {strides = array<i32>} : memref<8x8192xbf16, #tpu.memory_space<vmem>>, vector<8x128xbf16>,
    %c120 = arith.constant 120 : index
    %c0_300 = arith.constant 0 : index
    %238 = vector.load %arg13[%c120, %c0_300] : memref<512x128xf32, #tpu.memory_space<vmem>>, vector<8x128xf32>
    %cst_301 = arith.constant 0.000000e+00 : f32
    %239 = vector.broadcast %cst_301 : f32 to vector<8x128xf32>
    %240 = arith.maximumf %238, %239 : vector<8x128xf32>
    %241 = arith.truncf %240 : vector<8x128xf32> to vector<8x128xbf16>
    %c0_302 = arith.constant 0 : index
    %c1920 = arith.constant 1920 : index
    %242 = vector.load %arg16[%c0_302, %c1920] : memref<8x8192xbf16, #tpu.memory_space<vmem>>, vector<8x128xbf16>
    tpu.vector_store %arg16[%c0_302, %c1920], %241 {strides = array<i32>} : memref<8x8192xbf16, #tpu.memory_space<vmem>>, vector<8x128xbf16>,
    %c128_303 = arith.constant 128 : index
    %c0_304 = arith.constant 0 : index
    %243 = vector.load %arg13[%c128_303, %c0_304] : memref<512x128xf32, #tpu.memory_space<vmem>>, vector<8x128xf32>
    %cst_305 = arith.constant 0.000000e+00 : f32
    %244 = vector.broadcast %cst_305 : f32 to vector<8x128xf32>
    %245 = arith.maximumf %243, %244 : vector<8x128xf32>
    %246 = arith.truncf %245 : vector<8x128xf32> to vector<8x128xbf16>
    %c0_306 = arith.constant 0 : index
    %c2048 = arith.constant 2048 : index
    %247 = vector.load %arg16[%c0_306, %c2048] : memref<8x8192xbf16, #tpu.memory_space<vmem>>, vector<8x128xbf16>
    tpu.vector_store %arg16[%c0_306, %c2048], %246 {strides = array<i32>} : memref<8x8192xbf16, #tpu.memory_space<vmem>>, vector<8x128xbf16>,
    %c136 = arith.constant 136 : index
    %c0_307 = arith.constant 0 : index
    %248 = vector.load %arg13[%c136, %c0_307] : memref<512x128xf32, #tpu.memory_space<vmem>>, vector<8x128xf32>
    %cst_308 = arith.constant 0.000000e+00 : f32
    %249 = vector.broadcast %cst_308 : f32 to vector<8x128xf32>
    %250 = arith.maximumf %248, %249 : vector<8x128xf32>
    %251 = arith.truncf %250 : vector<8x128xf32> to vector<8x128xbf16>
    %c0_309 = arith.constant 0 : index
    %c2176 = arith.constant 2176 : index
    %252 = vector.load %arg16[%c0_309, %c2176] : memref<8x8192xbf16, #tpu.memory_space<vmem>>, vector<8x128xbf16>
    tpu.vector_store %arg16[%c0_309, %c2176], %251 {strides = array<i32>} : memref<8x8192xbf16, #tpu.memory_space<vmem>>, vector<8x128xbf16>,
    %c144 = arith.constant 144 : index
    %c0_310 = arith.constant 0 : index
    %253 = vector.load %arg13[%c144, %c0_310] : memref<512x128xf32, #tpu.memory_space<vmem>>, vector<8x128xf32>
    %cst_311 = arith.constant 0.000000e+00 : f32
    %254 = vector.broadcast %cst_311 : f32 to vector<8x128xf32>
    %255 = arith.maximumf %253, %254 : vector<8x128xf32>
    %256 = arith.truncf %255 : vector<8x128xf32> to vector<8x128xbf16>
    %c0_312 = arith.constant 0 : index
    %c2304 = arith.constant 2304 : index
    %257 = vector.load %arg16[%c0_312, %c2304] : memref<8x8192xbf16, #tpu.memory_space<vmem>>, vector<8x128xbf16>
    tpu.vector_store %arg16[%c0_312, %c2304], %256 {strides = array<i32>} : memref<8x8192xbf16, #tpu.memory_space<vmem>>, vector<8x128xbf16>,
    %c152 = arith.constant 152 : index
    %c0_313 = arith.constant 0 : index
    %258 = vector.load %arg13[%c152, %c0_313] : memref<512x128xf32, #tpu.memory_space<vmem>>, vector<8x128xf32>
    %cst_314 = arith.constant 0.000000e+00 : f32
    %259 = vector.broadcast %cst_314 : f32 to vector<8x128xf32>
    %260 = arith.maximumf %258, %259 : vector<8x128xf32>
    %261 = arith.truncf %260 : vector<8x128xf32> to vector<8x128xbf16>
    %c0_315 = arith.constant 0 : index
    %c2432 = arith.constant 2432 : index
    %262 = vector.load %arg16[%c0_315, %c2432] : memref<8x8192xbf16, #tpu.memory_space<vmem>>, vector<8x128xbf16>
    tpu.vector_store %arg16[%c0_315, %c2432], %261 {strides = array<i32>} : memref<8x8192xbf16, #tpu.memory_space<vmem>>, vector<8x128xbf16>,
    %c160 = arith.constant 160 : index
    %c0_316 = arith.constant 0 : index
    %263 = vector.load %arg13[%c160, %c0_316] : memref<512x128xf32, #tpu.memory_space<vmem>>, vector<8x128xf32>
    %cst_317 = arith.constant 0.000000e+00 : f32
    %264 = vector.broadcast %cst_317 : f32 to vector<8x128xf32>
    %265 = arith.maximumf %263, %264 : vector<8x128xf32>
    %266 = arith.truncf %265 : vector<8x128xf32> to vector<8x128xbf16>
    %c0_318 = arith.constant 0 : index
    %c2560 = arith.constant 2560 : index
    %267 = vector.load %arg16[%c0_318, %c2560] : memref<8x8192xbf16, #tpu.memory_space<vmem>>, vector<8x128xbf16>
    tpu.vector_store %arg16[%c0_318, %c2560], %266 {strides = array<i32>} : memref<8x8192xbf16, #tpu.memory_space<vmem>>, vector<8x128xbf16>,
    %c168 = arith.constant 168 : index
    %c0_319 = arith.constant 0 : index
    %268 = vector.load %arg13[%c168, %c0_319] : memref<512x128xf32, #tpu.memory_space<vmem>>, vector<8x128xf32>
    %cst_320 = arith.constant 0.000000e+00 : f32
    %269 = vector.broadcast %cst_320 : f32 to vector<8x128xf32>
    %270 = arith.maximumf %268, %269 : vector<8x128xf32>
    %271 = arith.truncf %270 : vector<8x128xf32> to vector<8x128xbf16>
    %c0_321 = arith.constant 0 : index
    %c2688 = arith.constant 2688 : index
    %272 = vector.load %arg16[%c0_321, %c2688] : memref<8x8192xbf16, #tpu.memory_space<vmem>>, vector<8x128xbf16>
    tpu.vector_store %arg16[%c0_321, %c2688], %271 {strides = array<i32>} : memref<8x8192xbf16, #tpu.memory_space<vmem>>, vector<8x128xbf16>,
    %c176 = arith.constant 176 : index
    %c0_322 = arith.constant 0 : index
    %273 = vector.load %arg13[%c176, %c0_322] : memref<512x128xf32, #tpu.memory_space<vmem>>, vector<8x128xf32>
    %cst_323 = arith.constant 0.000000e+00 : f32
    %274 = vector.broadcast %cst_323 : f32 to vector<8x128xf32>
    %275 = arith.maximumf %273, %274 : vector<8x128xf32>
    %276 = arith.truncf %275 : vector<8x128xf32> to vector<8x128xbf16>
    %c0_324 = arith.constant 0 : index
    %c2816 = arith.constant 2816 : index
    %277 = vector.load %arg16[%c0_324, %c2816] : memref<8x8192xbf16, #tpu.memory_space<vmem>>, vector<8x128xbf16>
    tpu.vector_store %arg16[%c0_324, %c2816], %276 {strides = array<i32>} : memref<8x8192xbf16, #tpu.memory_space<vmem>>, vector<8x128xbf16>,
    %c184 = arith.constant 184 : index
    %c0_325 = arith.constant 0 : index
    %278 = vector.load %arg13[%c184, %c0_325] : memref<512x128xf32, #tpu.memory_space<vmem>>, vector<8x128xf32>
    %cst_326 = arith.constant 0.000000e+00 : f32
    %279 = vector.broadcast %cst_326 : f32 to vector<8x128xf32>
    %280 = arith.maximumf %278, %279 : vector<8x128xf32>
    %281 = arith.truncf %280 : vector<8x128xf32> to vector<8x128xbf16>
    %c0_327 = arith.constant 0 : index
    %c2944 = arith.constant 2944 : index
    %282 = vector.load %arg16[%c0_327, %c2944] : memref<8x8192xbf16, #tpu.memory_space<vmem>>, vector<8x128xbf16>
    tpu.vector_store %arg16[%c0_327, %c2944], %281 {strides = array<i32>} : memref<8x8192xbf16, #tpu.memory_space<vmem>>, vector<8x128xbf16>,
    %c192_328 = arith.constant 192 : index
    %c0_329 = arith.constant 0 : index
    %283 = vector.load %arg13[%c192_328, %c0_329] : memref<512x128xf32, #tpu.memory_space<vmem>>, vector<8x128xf32>
    %cst_330 = arith.constant 0.000000e+00 : f32
    %284 = vector.broadcast %cst_330 : f32 to vector<8x128xf32>
    %285 = arith.maximumf %283, %284 : vector<8x128xf32>
    %286 = arith.truncf %285 : vector<8x128xf32> to vector<8x128xbf16>
    %c0_331 = arith.constant 0 : index
    %c3072 = arith.constant 3072 : index
    %287 = vector.load %arg16[%c0_331, %c3072] : memref<8x8192xbf16, #tpu.memory_space<vmem>>, vector<8x128xbf16>
    tpu.vector_store %arg16[%c0_331, %c3072], %286 {strides = array<i32>} : memref<8x8192xbf16, #tpu.memory_space<vmem>>, vector<8x128xbf16>,
    %c200 = arith.constant 200 : index
    %c0_332 = arith.constant 0 : index
    %288 = vector.load %arg13[%c200, %c0_332] : memref<512x128xf32, #tpu.memory_space<vmem>>, vector<8x128xf32>
    %cst_333 = arith.constant 0.000000e+00 : f32
    %289 = vector.broadcast %cst_333 : f32 to vector<8x128xf32>
    %290 = arith.maximumf %288, %289 : vector<8x128xf32>
    %291 = arith.truncf %290 : vector<8x128xf32> to vector<8x128xbf16>
    %c0_334 = arith.constant 0 : index
    %c3200 = arith.constant 3200 : index
    %292 = vector.load %arg16[%c0_334, %c3200] : memref<8x8192xbf16, #tpu.memory_space<vmem>>, vector<8x128xbf16>
    tpu.vector_store %arg16[%c0_334, %c3200], %291 {strides = array<i32>} : memref<8x8192xbf16, #tpu.memory_space<vmem>>, vector<8x128xbf16>,
    %c208 = arith.constant 208 : index
    %c0_335 = arith.constant 0 : index
    %293 = vector.load %arg13[%c208, %c0_335] : memref<512x128xf32, #tpu.memory_space<vmem>>, vector<8x128xf32>
    %cst_336 = arith.constant 0.000000e+00 : f32
    %294 = vector.broadcast %cst_336 : f32 to vector<8x128xf32>
    %295 = arith.maximumf %293, %294 : vector<8x128xf32>
    %296 = arith.truncf %295 : vector<8x128xf32> to vector<8x128xbf16>
    %c0_337 = arith.constant 0 : index
    %c3328 = arith.constant 3328 : index
    %297 = vector.load %arg16[%c0_337, %c3328] : memref<8x8192xbf16, #tpu.memory_space<vmem>>, vector<8x128xbf16>
    tpu.vector_store %arg16[%c0_337, %c3328], %296 {strides = array<i32>} : memref<8x8192xbf16, #tpu.memory_space<vmem>>, vector<8x128xbf16>,
    %c216 = arith.constant 216 : index
    %c0_338 = arith.constant 0 : index
    %298 = vector.load %arg13[%c216, %c0_338] : memref<512x128xf32, #tpu.memory_space<vmem>>, vector<8x128xf32>
    %cst_339 = arith.constant 0.000000e+00 : f32
    %299 = vector.broadcast %cst_339 : f32 to vector<8x128xf32>
    %300 = arith.maximumf %298, %299 : vector<8x128xf32>
    %301 = arith.truncf %300 : vector<8x128xf32> to vector<8x128xbf16>
    %c0_340 = arith.constant 0 : index
    %c3456 = arith.constant 3456 : index
    %302 = vector.load %arg16[%c0_340, %c3456] : memref<8x8192xbf16, #tpu.memory_space<vmem>>, vector<8x128xbf16>
    tpu.vector_store %arg16[%c0_340, %c3456], %301 {strides = array<i32>} : memref<8x8192xbf16, #tpu.memory_space<vmem>>, vector<8x128xbf16>,
    %c224 = arith.constant 224 : index
    %c0_341 = arith.constant 0 : index
    %303 = vector.load %arg13[%c224, %c0_341] : memref<512x128xf32, #tpu.memory_space<vmem>>, vector<8x128xf32>
    %cst_342 = arith.constant 0.000000e+00 : f32
    %304 = vector.broadcast %cst_342 : f32 to vector<8x128xf32>
    %305 = arith.maximumf %303, %304 : vector<8x128xf32>
    %306 = arith.truncf %305 : vector<8x128xf32> to vector<8x128xbf16>
    %c0_343 = arith.constant 0 : index
    %c3584 = arith.constant 3584 : index
    %307 = vector.load %arg16[%c0_343, %c3584] : memref<8x8192xbf16, #tpu.memory_space<vmem>>, vector<8x128xbf16>
    tpu.vector_store %arg16[%c0_343, %c3584], %306 {strides = array<i32>} : memref<8x8192xbf16, #tpu.memory_space<vmem>>, vector<8x128xbf16>,
    %c232 = arith.constant 232 : index
    %c0_344 = arith.constant 0 : index
    %308 = vector.load %arg13[%c232, %c0_344] : memref<512x128xf32, #tpu.memory_space<vmem>>, vector<8x128xf32>
    %cst_345 = arith.constant 0.000000e+00 : f32
    %309 = vector.broadcast %cst_345 : f32 to vector<8x128xf32>
    %310 = arith.maximumf %308, %309 : vector<8x128xf32>
    %311 = arith.truncf %310 : vector<8x128xf32> to vector<8x128xbf16>
    %c0_346 = arith.constant 0 : index
    %c3712 = arith.constant 3712 : index
    %312 = vector.load %arg16[%c0_346, %c3712] : memref<8x8192xbf16, #tpu.memory_space<vmem>>, vector<8x128xbf16>
    tpu.vector_store %arg16[%c0_346, %c3712], %311 {strides = array<i32>} : memref<8x8192xbf16, #tpu.memory_space<vmem>>, vector<8x128xbf16>,
    %c240 = arith.constant 240 : index
    %c0_347 = arith.constant 0 : index
    %313 = vector.load %arg13[%c240, %c0_347] : memref<512x128xf32, #tpu.memory_space<vmem>>, vector<8x128xf32>
    %cst_348 = arith.constant 0.000000e+00 : f32
    %314 = vector.broadcast %cst_348 : f32 to vector<8x128xf32>
    %315 = arith.maximumf %313, %314 : vector<8x128xf32>
    %316 = arith.truncf %315 : vector<8x128xf32> to vector<8x128xbf16>
    %c0_349 = arith.constant 0 : index
    %c3840 = arith.constant 3840 : index
    %317 = vector.load %arg16[%c0_349, %c3840] : memref<8x8192xbf16, #tpu.memory_space<vmem>>, vector<8x128xbf16>
    tpu.vector_store %arg16[%c0_349, %c3840], %316 {strides = array<i32>} : memref<8x8192xbf16, #tpu.memory_space<vmem>>, vector<8x128xbf16>,
    %c248 = arith.constant 248 : index
    %c0_350 = arith.constant 0 : index
    %318 = vector.load %arg13[%c248, %c0_350] : memref<512x128xf32, #tpu.memory_space<vmem>>, vector<8x128xf32>
    %cst_351 = arith.constant 0.000000e+00 : f32
    %319 = vector.broadcast %cst_351 : f32 to vector<8x128xf32>
    %320 = arith.maximumf %318, %319 : vector<8x128xf32>
    %321 = arith.truncf %320 : vector<8x128xf32> to vector<8x128xbf16>
    %c0_352 = arith.constant 0 : index
    %c3968 = arith.constant 3968 : index
    %322 = vector.load %arg16[%c0_352, %c3968] : memref<8x8192xbf16, #tpu.memory_space<vmem>>, vector<8x128xbf16>
    tpu.vector_store %arg16[%c0_352, %c3968], %321 {strides = array<i32>} : memref<8x8192xbf16, #tpu.memory_space<vmem>>, vector<8x128xbf16>,
    %c256_353 = arith.constant 256 : index
    %c0_354 = arith.constant 0 : index
    %323 = vector.load %arg13[%c256_353, %c0_354] : memref<512x128xf32, #tpu.memory_space<vmem>>, vector<8x128xf32>
    %cst_355 = arith.constant 0.000000e+00 : f32
    %324 = vector.broadcast %cst_355 : f32 to vector<8x128xf32>
    %325 = arith.maximumf %323, %324 : vector<8x128xf32>
    %326 = arith.truncf %325 : vector<8x128xf32> to vector<8x128xbf16>
    %c0_356 = arith.constant 0 : index
    %c4096 = arith.constant 4096 : index
    %327 = vector.load %arg16[%c0_356, %c4096] : memref<8x8192xbf16, #tpu.memory_space<vmem>>, vector<8x128xbf16>
    tpu.vector_store %arg16[%c0_356, %c4096], %326 {strides = array<i32>} : memref<8x8192xbf16, #tpu.memory_space<vmem>>, vector<8x128xbf16>,
    %c264 = arith.constant 264 : index
    %c0_357 = arith.constant 0 : index
    %328 = vector.load %arg13[%c264, %c0_357] : memref<512x128xf32, #tpu.memory_space<vmem>>, vector<8x128xf32>
    %cst_358 = arith.constant 0.000000e+00 : f32
    %329 = vector.broadcast %cst_358 : f32 to vector<8x128xf32>
    %330 = arith.maximumf %328, %329 : vector<8x128xf32>
    %331 = arith.truncf %330 : vector<8x128xf32> to vector<8x128xbf16>
    %c0_359 = arith.constant 0 : index
    %c4224 = arith.constant 4224 : index
    %332 = vector.load %arg16[%c0_359, %c4224] : memref<8x8192xbf16, #tpu.memory_space<vmem>>, vector<8x128xbf16>
    tpu.vector_store %arg16[%c0_359, %c4224], %331 {strides = array<i32>} : memref<8x8192xbf16, #tpu.memory_space<vmem>>, vector<8x128xbf16>,
    %c272 = arith.constant 272 : index
    %c0_360 = arith.constant 0 : index
    %333 = vector.load %arg13[%c272, %c0_360] : memref<512x128xf32, #tpu.memory_space<vmem>>, vector<8x128xf32>
    %cst_361 = arith.constant 0.000000e+00 : f32
    %334 = vector.broadcast %cst_361 : f32 to vector<8x128xf32>
    %335 = arith.maximumf %333, %334 : vector<8x128xf32>
    %336 = arith.truncf %335 : vector<8x128xf32> to vector<8x128xbf16>
    %c0_362 = arith.constant 0 : index
    %c4352 = arith.constant 4352 : index
    %337 = vector.load %arg16[%c0_362, %c4352] : memref<8x8192xbf16, #tpu.memory_space<vmem>>, vector<8x128xbf16>
    tpu.vector_store %arg16[%c0_362, %c4352], %336 {strides = array<i32>} : memref<8x8192xbf16, #tpu.memory_space<vmem>>, vector<8x128xbf16>,
    %c280 = arith.constant 280 : index
    %c0_363 = arith.constant 0 : index
    %338 = vector.load %arg13[%c280, %c0_363] : memref<512x128xf32, #tpu.memory_space<vmem>>, vector<8x128xf32>
    %cst_364 = arith.constant 0.000000e+00 : f32
    %339 = vector.broadcast %cst_364 : f32 to vector<8x128xf32>
    %340 = arith.maximumf %338, %339 : vector<8x128xf32>
    %341 = arith.truncf %340 : vector<8x128xf32> to vector<8x128xbf16>
    %c0_365 = arith.constant 0 : index
    %c4480 = arith.constant 4480 : index
    %342 = vector.load %arg16[%c0_365, %c4480] : memref<8x8192xbf16, #tpu.memory_space<vmem>>, vector<8x128xbf16>
    tpu.vector_store %arg16[%c0_365, %c4480], %341 {strides = array<i32>} : memref<8x8192xbf16, #tpu.memory_space<vmem>>, vector<8x128xbf16>,
    %c288 = arith.constant 288 : index
    %c0_366 = arith.constant 0 : index
    %343 = vector.load %arg13[%c288, %c0_366] : memref<512x128xf32, #tpu.memory_space<vmem>>, vector<8x128xf32>
    %cst_367 = arith.constant 0.000000e+00 : f32
    %344 = vector.broadcast %cst_367 : f32 to vector<8x128xf32>
    %345 = arith.maximumf %343, %344 : vector<8x128xf32>
    %346 = arith.truncf %345 : vector<8x128xf32> to vector<8x128xbf16>
    %c0_368 = arith.constant 0 : index
    %c4608 = arith.constant 4608 : index
    %347 = vector.load %arg16[%c0_368, %c4608] : memref<8x8192xbf16, #tpu.memory_space<vmem>>, vector<8x128xbf16>
    tpu.vector_store %arg16[%c0_368, %c4608], %346 {strides = array<i32>} : memref<8x8192xbf16, #tpu.memory_space<vmem>>, vector<8x128xbf16>,
    %c296 = arith.constant 296 : index
    %c0_369 = arith.constant 0 : index
    %348 = vector.load %arg13[%c296, %c0_369] : memref<512x128xf32, #tpu.memory_space<vmem>>, vector<8x128xf32>
    %cst_370 = arith.constant 0.000000e+00 : f32
    %349 = vector.broadcast %cst_370 : f32 to vector<8x128xf32>
    %350 = arith.maximumf %348, %349 : vector<8x128xf32>
    %351 = arith.truncf %350 : vector<8x128xf32> to vector<8x128xbf16>
    %c0_371 = arith.constant 0 : index
    %c4736 = arith.constant 4736 : index
    %352 = vector.load %arg16[%c0_371, %c4736] : memref<8x8192xbf16, #tpu.memory_space<vmem>>, vector<8x128xbf16>
    tpu.vector_store %arg16[%c0_371, %c4736], %351 {strides = array<i32>} : memref<8x8192xbf16, #tpu.memory_space<vmem>>, vector<8x128xbf16>,
    %c304 = arith.constant 304 : index
    %c0_372 = arith.constant 0 : index
    %353 = vector.load %arg13[%c304, %c0_372] : memref<512x128xf32, #tpu.memory_space<vmem>>, vector<8x128xf32>
    %cst_373 = arith.constant 0.000000e+00 : f32
    %354 = vector.broadcast %cst_373 : f32 to vector<8x128xf32>
    %355 = arith.maximumf %353, %354 : vector<8x128xf32>
    %356 = arith.truncf %355 : vector<8x128xf32> to vector<8x128xbf16>
    %c0_374 = arith.constant 0 : index
    %c4864 = arith.constant 4864 : index
    %357 = vector.load %arg16[%c0_374, %c4864] : memref<8x8192xbf16, #tpu.memory_space<vmem>>, vector<8x128xbf16>
    tpu.vector_store %arg16[%c0_374, %c4864], %356 {strides = array<i32>} : memref<8x8192xbf16, #tpu.memory_space<vmem>>, vector<8x128xbf16>,
    %c312 = arith.constant 312 : index
    %c0_375 = arith.constant 0 : index
    %358 = vector.load %arg13[%c312, %c0_375] : memref<512x128xf32, #tpu.memory_space<vmem>>, vector<8x128xf32>
    %cst_376 = arith.constant 0.000000e+00 : f32
    %359 = vector.broadcast %cst_376 : f32 to vector<8x128xf32>
    %360 = arith.maximumf %358, %359 : vector<8x128xf32>
    %361 = arith.truncf %360 : vector<8x128xf32> to vector<8x128xbf16>
    %c0_377 = arith.constant 0 : index
    %c4992 = arith.constant 4992 : index
    %362 = vector.load %arg16[%c0_377, %c4992] : memref<8x8192xbf16, #tpu.memory_space<vmem>>, vector<8x128xbf16>
    tpu.vector_store %arg16[%c0_377, %c4992], %361 {strides = array<i32>} : memref<8x8192xbf16, #tpu.memory_space<vmem>>, vector<8x128xbf16>,
    %c320_378 = arith.constant 320 : index
    %c0_379 = arith.constant 0 : index
    %363 = vector.load %arg13[%c320_378, %c0_379] : memref<512x128xf32, #tpu.memory_space<vmem>>, vector<8x128xf32>
    %cst_380 = arith.constant 0.000000e+00 : f32
    %364 = vector.broadcast %cst_380 : f32 to vector<8x128xf32>
    %365 = arith.maximumf %363, %364 : vector<8x128xf32>
    %366 = arith.truncf %365 : vector<8x128xf32> to vector<8x128xbf16>
    %c0_381 = arith.constant 0 : index
    %c5120 = arith.constant 5120 : index
    %367 = vector.load %arg16[%c0_381, %c5120] : memref<8x8192xbf16, #tpu.memory_space<vmem>>, vector<8x128xbf16>
    tpu.vector_store %arg16[%c0_381, %c5120], %366 {strides = array<i32>} : memref<8x8192xbf16, #tpu.memory_space<vmem>>, vector<8x128xbf16>,
    %c328 = arith.constant 328 : index
    %c0_382 = arith.constant 0 : index
    %368 = vector.load %arg13[%c328, %c0_382] : memref<512x128xf32, #tpu.memory_space<vmem>>, vector<8x128xf32>
    %cst_383 = arith.constant 0.000000e+00 : f32
    %369 = vector.broadcast %cst_383 : f32 to vector<8x128xf32>
    %370 = arith.maximumf %368, %369 : vector<8x128xf32>
    %371 = arith.truncf %370 : vector<8x128xf32> to vector<8x128xbf16>
    %c0_384 = arith.constant 0 : index
    %c5248 = arith.constant 5248 : index
    %372 = vector.load %arg16[%c0_384, %c5248] : memref<8x8192xbf16, #tpu.memory_space<vmem>>, vector<8x128xbf16>
    tpu.vector_store %arg16[%c0_384, %c5248], %371 {strides = array<i32>} : memref<8x8192xbf16, #tpu.memory_space<vmem>>, vector<8x128xbf16>,
    %c336 = arith.constant 336 : index
    %c0_385 = arith.constant 0 : index
    %373 = vector.load %arg13[%c336, %c0_385] : memref<512x128xf32, #tpu.memory_space<vmem>>, vector<8x128xf32>
    %cst_386 = arith.constant 0.000000e+00 : f32
    %374 = vector.broadcast %cst_386 : f32 to vector<8x128xf32>
    %375 = arith.maximumf %373, %374 : vector<8x128xf32>
    %376 = arith.truncf %375 : vector<8x128xf32> to vector<8x128xbf16>
    %c0_387 = arith.constant 0 : index
    %c5376 = arith.constant 5376 : index
    %377 = vector.load %arg16[%c0_387, %c5376] : memref<8x8192xbf16, #tpu.memory_space<vmem>>, vector<8x128xbf16>
    tpu.vector_store %arg16[%c0_387, %c5376], %376 {strides = array<i32>} : memref<8x8192xbf16, #tpu.memory_space<vmem>>, vector<8x128xbf16>,
    %c344 = arith.constant 344 : index
    %c0_388 = arith.constant 0 : index
    %378 = vector.load %arg13[%c344, %c0_388] : memref<512x128xf32, #tpu.memory_space<vmem>>, vector<8x128xf32>
    %cst_389 = arith.constant 0.000000e+00 : f32
    %379 = vector.broadcast %cst_389 : f32 to vector<8x128xf32>
    %380 = arith.maximumf %378, %379 : vector<8x128xf32>
    %381 = arith.truncf %380 : vector<8x128xf32> to vector<8x128xbf16>
    %c0_390 = arith.constant 0 : index
    %c5504 = arith.constant 5504 : index
    %382 = vector.load %arg16[%c0_390, %c5504] : memref<8x8192xbf16, #tpu.memory_space<vmem>>, vector<8x128xbf16>
    tpu.vector_store %arg16[%c0_390, %c5504], %381 {strides = array<i32>} : memref<8x8192xbf16, #tpu.memory_space<vmem>>, vector<8x128xbf16>,
    %c352 = arith.constant 352 : index
    %c0_391 = arith.constant 0 : index
    %383 = vector.load %arg13[%c352, %c0_391] : memref<512x128xf32, #tpu.memory_space<vmem>>, vector<8x128xf32>
    %cst_392 = arith.constant 0.000000e+00 : f32
    %384 = vector.broadcast %cst_392 : f32 to vector<8x128xf32>
    %385 = arith.maximumf %383, %384 : vector<8x128xf32>
    %386 = arith.truncf %385 : vector<8x128xf32> to vector<8x128xbf16>
    %c0_393 = arith.constant 0 : index
    %c5632 = arith.constant 5632 : index
    %387 = vector.load %arg16[%c0_393, %c5632] : memref<8x8192xbf16, #tpu.memory_space<vmem>>, vector<8x128xbf16>
    tpu.vector_store %arg16[%c0_393, %c5632], %386 {strides = array<i32>} : memref<8x8192xbf16, #tpu.memory_space<vmem>>, vector<8x128xbf16>,
    %c360 = arith.constant 360 : index
    %c0_394 = arith.constant 0 : index
    %388 = vector.load %arg13[%c360, %c0_394] : memref<512x128xf32, #tpu.memory_space<vmem>>, vector<8x128xf32>
    %cst_395 = arith.constant 0.000000e+00 : f32
    %389 = vector.broadcast %cst_395 : f32 to vector<8x128xf32>
    %390 = arith.maximumf %388, %389 : vector<8x128xf32>
    %391 = arith.truncf %390 : vector<8x128xf32> to vector<8x128xbf16>
    %c0_396 = arith.constant 0 : index
    %c5760 = arith.constant 5760 : index
    %392 = vector.load %arg16[%c0_396, %c5760] : memref<8x8192xbf16, #tpu.memory_space<vmem>>, vector<8x128xbf16>
    tpu.vector_store %arg16[%c0_396, %c5760], %391 {strides = array<i32>} : memref<8x8192xbf16, #tpu.memory_space<vmem>>, vector<8x128xbf16>,
    %c368 = arith.constant 368 : index
    %c0_397 = arith.constant 0 : index
    %393 = vector.load %arg13[%c368, %c0_397] : memref<512x128xf32, #tpu.memory_space<vmem>>, vector<8x128xf32>
    %cst_398 = arith.constant 0.000000e+00 : f32
    %394 = vector.broadcast %cst_398 : f32 to vector<8x128xf32>
    %395 = arith.maximumf %393, %394 : vector<8x128xf32>
    %396 = arith.truncf %395 : vector<8x128xf32> to vector<8x128xbf16>
    %c0_399 = arith.constant 0 : index
    %c5888 = arith.constant 5888 : index
    %397 = vector.load %arg16[%c0_399, %c5888] : memref<8x8192xbf16, #tpu.memory_space<vmem>>, vector<8x128xbf16>
    tpu.vector_store %arg16[%c0_399, %c5888], %396 {strides = array<i32>} : memref<8x8192xbf16, #tpu.memory_space<vmem>>, vector<8x128xbf16>,
    %c376 = arith.constant 376 : index
    %c0_400 = arith.constant 0 : index
    %398 = vector.load %arg13[%c376, %c0_400] : memref<512x128xf32, #tpu.memory_space<vmem>>, vector<8x128xf32>
    %cst_401 = arith.constant 0.000000e+00 : f32
    %399 = vector.broadcast %cst_401 : f32 to vector<8x128xf32>
    %400 = arith.maximumf %398, %399 : vector<8x128xf32>
    %401 = arith.truncf %400 : vector<8x128xf32> to vector<8x128xbf16>
    %c0_402 = arith.constant 0 : index
    %c6016 = arith.constant 6016 : index
    %402 = vector.load %arg16[%c0_402, %c6016] : memref<8x8192xbf16, #tpu.memory_space<vmem>>, vector<8x128xbf16>
    tpu.vector_store %arg16[%c0_402, %c6016], %401 {strides = array<i32>} : memref<8x8192xbf16, #tpu.memory_space<vmem>>, vector<8x128xbf16>,
    %c384_403 = arith.constant 384 : index
    %c0_404 = arith.constant 0 : index
    %403 = vector.load %arg13[%c384_403, %c0_404] : memref<512x128xf32, #tpu.memory_space<vmem>>, vector<8x128xf32>
    %cst_405 = arith.constant 0.000000e+00 : f32
    %404 = vector.broadcast %cst_405 : f32 to vector<8x128xf32>
    %405 = arith.maximumf %403, %404 : vector<8x128xf32>
    %406 = arith.truncf %405 : vector<8x128xf32> to vector<8x128xbf16>
    %c0_406 = arith.constant 0 : index
    %c6144 = arith.constant 6144 : index
    %407 = vector.load %arg16[%c0_406, %c6144] : memref<8x8192xbf16, #tpu.memory_space<vmem>>, vector<8x128xbf16>
    tpu.vector_store %arg16[%c0_406, %c6144], %406 {strides = array<i32>} : memref<8x8192xbf16, #tpu.memory_space<vmem>>, vector<8x128xbf16>,
    %c392 = arith.constant 392 : index
    %c0_407 = arith.constant 0 : index
    %408 = vector.load %arg13[%c392, %c0_407] : memref<512x128xf32, #tpu.memory_space<vmem>>, vector<8x128xf32>
    %cst_408 = arith.constant 0.000000e+00 : f32
    %409 = vector.broadcast %cst_408 : f32 to vector<8x128xf32>
    %410 = arith.maximumf %408, %409 : vector<8x128xf32>
    %411 = arith.truncf %410 : vector<8x128xf32> to vector<8x128xbf16>
    %c0_409 = arith.constant 0 : index
    %c6272 = arith.constant 6272 : index
    %412 = vector.load %arg16[%c0_409, %c6272] : memref<8x8192xbf16, #tpu.memory_space<vmem>>, vector<8x128xbf16>
    tpu.vector_store %arg16[%c0_409, %c6272], %411 {strides = array<i32>} : memref<8x8192xbf16, #tpu.memory_space<vmem>>, vector<8x128xbf16>,
    %c400 = arith.constant 400 : index
    %c0_410 = arith.constant 0 : index
    %413 = vector.load %arg13[%c400, %c0_410] : memref<512x128xf32, #tpu.memory_space<vmem>>, vector<8x128xf32>
    %cst_411 = arith.constant 0.000000e+00 : f32
    %414 = vector.broadcast %cst_411 : f32 to vector<8x128xf32>
    %415 = arith.maximumf %413, %414 : vector<8x128xf32>
    %416 = arith.truncf %415 : vector<8x128xf32> to vector<8x128xbf16>
    %c0_412 = arith.constant 0 : index
    %c6400 = arith.constant 6400 : index
    %417 = vector.load %arg16[%c0_412, %c6400] : memref<8x8192xbf16, #tpu.memory_space<vmem>>, vector<8x128xbf16>
    tpu.vector_store %arg16[%c0_412, %c6400], %416 {strides = array<i32>} : memref<8x8192xbf16, #tpu.memory_space<vmem>>, vector<8x128xbf16>,
    %c408 = arith.constant 408 : index
    %c0_413 = arith.constant 0 : index
    %418 = vector.load %arg13[%c408, %c0_413] : memref<512x128xf32, #tpu.memory_space<vmem>>, vector<8x128xf32>
    %cst_414 = arith.constant 0.000000e+00 : f32
    %419 = vector.broadcast %cst_414 : f32 to vector<8x128xf32>
    %420 = arith.maximumf %418, %419 : vector<8x128xf32>
    %421 = arith.truncf %420 : vector<8x128xf32> to vector<8x128xbf16>
    %c0_415 = arith.constant 0 : index
    %c6528 = arith.constant 6528 : index
    %422 = vector.load %arg16[%c0_415, %c6528] : memref<8x8192xbf16, #tpu.memory_space<vmem>>, vector<8x128xbf16>
    tpu.vector_store %arg16[%c0_415, %c6528], %421 {strides = array<i32>} : memref<8x8192xbf16, #tpu.memory_space<vmem>>, vector<8x128xbf16>,
    %c416 = arith.constant 416 : index
    %c0_416 = arith.constant 0 : index
    %423 = vector.load %arg13[%c416, %c0_416] : memref<512x128xf32, #tpu.memory_space<vmem>>, vector<8x128xf32>
    %cst_417 = arith.constant 0.000000e+00 : f32
    %424 = vector.broadcast %cst_417 : f32 to vector<8x128xf32>
    %425 = arith.maximumf %423, %424 : vector<8x128xf32>
    %426 = arith.truncf %425 : vector<8x128xf32> to vector<8x128xbf16>
    %c0_418 = arith.constant 0 : index
    %c6656 = arith.constant 6656 : index
    %427 = vector.load %arg16[%c0_418, %c6656] : memref<8x8192xbf16, #tpu.memory_space<vmem>>, vector<8x128xbf16>
    tpu.vector_store %arg16[%c0_418, %c6656], %426 {strides = array<i32>} : memref<8x8192xbf16, #tpu.memory_space<vmem>>, vector<8x128xbf16>,
    %c424 = arith.constant 424 : index
    %c0_419 = arith.constant 0 : index
    %428 = vector.load %arg13[%c424, %c0_419] : memref<512x128xf32, #tpu.memory_space<vmem>>, vector<8x128xf32>
    %cst_420 = arith.constant 0.000000e+00 : f32
    %429 = vector.broadcast %cst_420 : f32 to vector<8x128xf32>
    %430 = arith.maximumf %428, %429 : vector<8x128xf32>
    %431 = arith.truncf %430 : vector<8x128xf32> to vector<8x128xbf16>
    %c0_421 = arith.constant 0 : index
    %c6784 = arith.constant 6784 : index
    %432 = vector.load %arg16[%c0_421, %c6784] : memref<8x8192xbf16, #tpu.memory_space<vmem>>, vector<8x128xbf16>
    tpu.vector_store %arg16[%c0_421, %c6784], %431 {strides = array<i32>} : memref<8x8192xbf16, #tpu.memory_space<vmem>>, vector<8x128xbf16>,
    %c432 = arith.constant 432 : index
    %c0_422 = arith.constant 0 : index
    %433 = vector.load %arg13[%c432, %c0_422] : memref<512x128xf32, #tpu.memory_space<vmem>>, vector<8x128xf32>
    %cst_423 = arith.constant 0.000000e+00 : f32
    %434 = vector.broadcast %cst_423 : f32 to vector<8x128xf32>
    %435 = arith.maximumf %433, %434 : vector<8x128xf32>
    %436 = arith.truncf %435 : vector<8x128xf32> to vector<8x128xbf16>
    %c0_424 = arith.constant 0 : index
    %c6912 = arith.constant 6912 : index
    %437 = vector.load %arg16[%c0_424, %c6912] : memref<8x8192xbf16, #tpu.memory_space<vmem>>, vector<8x128xbf16>
    tpu.vector_store %arg16[%c0_424, %c6912], %436 {strides = array<i32>} : memref<8x8192xbf16, #tpu.memory_space<vmem>>, vector<8x128xbf16>,
    %c440 = arith.constant 440 : index
    %c0_425 = arith.constant 0 : index
    %438 = vector.load %arg13[%c440, %c0_425] : memref<512x128xf32, #tpu.memory_space<vmem>>, vector<8x128xf32>
    %cst_426 = arith.constant 0.000000e+00 : f32
    %439 = vector.broadcast %cst_426 : f32 to vector<8x128xf32>
    %440 = arith.maximumf %438, %439 : vector<8x128xf32>
    %441 = arith.truncf %440 : vector<8x128xf32> to vector<8x128xbf16>
    %c0_427 = arith.constant 0 : index
    %c7040 = arith.constant 7040 : index
    %442 = vector.load %arg16[%c0_427, %c7040] : memref<8x8192xbf16, #tpu.memory_space<vmem>>, vector<8x128xbf16>
    tpu.vector_store %arg16[%c0_427, %c7040], %441 {strides = array<i32>} : memref<8x8192xbf16, #tpu.memory_space<vmem>>, vector<8x128xbf16>,
    %c448_428 = arith.constant 448 : index
    %c0_429 = arith.constant 0 : index
    %443 = vector.load %arg13[%c448_428, %c0_429] : memref<512x128xf32, #tpu.memory_space<vmem>>, vector<8x128xf32>
    %cst_430 = arith.constant 0.000000e+00 : f32
    %444 = vector.broadcast %cst_430 : f32 to vector<8x128xf32>
    %445 = arith.maximumf %443, %444 : vector<8x128xf32>
    %446 = arith.truncf %445 : vector<8x128xf32> to vector<8x128xbf16>
    %c0_431 = arith.constant 0 : index
    %c7168 = arith.constant 7168 : index
    %447 = vector.load %arg16[%c0_431, %c7168] : memref<8x8192xbf16, #tpu.memory_space<vmem>>, vector<8x128xbf16>
    tpu.vector_store %arg16[%c0_431, %c7168], %446 {strides = array<i32>} : memref<8x8192xbf16, #tpu.memory_space<vmem>>, vector<8x128xbf16>,
    %c456 = arith.constant 456 : index
    %c0_432 = arith.constant 0 : index
    %448 = vector.load %arg13[%c456, %c0_432] : memref<512x128xf32, #tpu.memory_space<vmem>>, vector<8x128xf32>
    %cst_433 = arith.constant 0.000000e+00 : f32
    %449 = vector.broadcast %cst_433 : f32 to vector<8x128xf32>
    %450 = arith.maximumf %448, %449 : vector<8x128xf32>
    %451 = arith.truncf %450 : vector<8x128xf32> to vector<8x128xbf16>
    %c0_434 = arith.constant 0 : index
    %c7296 = arith.constant 7296 : index
    %452 = vector.load %arg16[%c0_434, %c7296] : memref<8x8192xbf16, #tpu.memory_space<vmem>>, vector<8x128xbf16>
    tpu.vector_store %arg16[%c0_434, %c7296], %451 {strides = array<i32>} : memref<8x8192xbf16, #tpu.memory_space<vmem>>, vector<8x128xbf16>,
    %c464 = arith.constant 464 : index
    %c0_435 = arith.constant 0 : index
    %453 = vector.load %arg13[%c464, %c0_435] : memref<512x128xf32, #tpu.memory_space<vmem>>, vector<8x128xf32>
    %cst_436 = arith.constant 0.000000e+00 : f32
    %454 = vector.broadcast %cst_436 : f32 to vector<8x128xf32>
    %455 = arith.maximumf %453, %454 : vector<8x128xf32>
    %456 = arith.truncf %455 : vector<8x128xf32> to vector<8x128xbf16>
    %c0_437 = arith.constant 0 : index
    %c7424 = arith.constant 7424 : index
    %457 = vector.load %arg16[%c0_437, %c7424] : memref<8x8192xbf16, #tpu.memory_space<vmem>>, vector<8x128xbf16>
    tpu.vector_store %arg16[%c0_437, %c7424], %456 {strides = array<i32>} : memref<8x8192xbf16, #tpu.memory_space<vmem>>, vector<8x128xbf16>,
    %c472 = arith.constant 472 : index
    %c0_438 = arith.constant 0 : index
    %458 = vector.load %arg13[%c472, %c0_438] : memref<512x128xf32, #tpu.memory_space<vmem>>, vector<8x128xf32>
    %cst_439 = arith.constant 0.000000e+00 : f32
    %459 = vector.broadcast %cst_439 : f32 to vector<8x128xf32>
    %460 = arith.maximumf %458, %459 : vector<8x128xf32>
    %461 = arith.truncf %460 : vector<8x128xf32> to vector<8x128xbf16>
    %c0_440 = arith.constant 0 : index
    %c7552 = arith.constant 7552 : index
    %462 = vector.load %arg16[%c0_440, %c7552] : memref<8x8192xbf16, #tpu.memory_space<vmem>>, vector<8x128xbf16>
    tpu.vector_store %arg16[%c0_440, %c7552], %461 {strides = array<i32>} : memref<8x8192xbf16, #tpu.memory_space<vmem>>, vector<8x128xbf16>,
    %c480 = arith.constant 480 : index
    %c0_441 = arith.constant 0 : index
    %463 = vector.load %arg13[%c480, %c0_441] : memref<512x128xf32, #tpu.memory_space<vmem>>, vector<8x128xf32>
    %cst_442 = arith.constant 0.000000e+00 : f32
    %464 = vector.broadcast %cst_442 : f32 to vector<8x128xf32>
    %465 = arith.maximumf %463, %464 : vector<8x128xf32>
    %466 = arith.truncf %465 : vector<8x128xf32> to vector<8x128xbf16>
    %c0_443 = arith.constant 0 : index
    %c7680 = arith.constant 7680 : index
    %467 = vector.load %arg16[%c0_443, %c7680] : memref<8x8192xbf16, #tpu.memory_space<vmem>>, vector<8x128xbf16>
    tpu.vector_store %arg16[%c0_443, %c7680], %466 {strides = array<i32>} : memref<8x8192xbf16, #tpu.memory_space<vmem>>, vector<8x128xbf16>,
    %c488 = arith.constant 488 : index
    %c0_444 = arith.constant 0 : index
    %468 = vector.load %arg13[%c488, %c0_444] : memref<512x128xf32, #tpu.memory_space<vmem>>, vector<8x128xf32>
    %cst_445 = arith.constant 0.000000e+00 : f32
    %469 = vector.broadcast %cst_445 : f32 to vector<8x128xf32>
    %470 = arith.maximumf %468, %469 : vector<8x128xf32>
    %471 = arith.truncf %470 : vector<8x128xf32> to vector<8x128xbf16>
    %c0_446 = arith.constant 0 : index
    %c7808 = arith.constant 7808 : index
    %472 = vector.load %arg16[%c0_446, %c7808] : memref<8x8192xbf16, #tpu.memory_space<vmem>>, vector<8x128xbf16>
    tpu.vector_store %arg16[%c0_446, %c7808], %471 {strides = array<i32>} : memref<8x8192xbf16, #tpu.memory_space<vmem>>, vector<8x128xbf16>,
    %c496 = arith.constant 496 : index
    %c0_447 = arith.constant 0 : index
    %473 = vector.load %arg13[%c496, %c0_447] : memref<512x128xf32, #tpu.memory_space<vmem>>, vector<8x128xf32>
    %cst_448 = arith.constant 0.000000e+00 : f32
    %474 = vector.broadcast %cst_448 : f32 to vector<8x128xf32>
    %475 = arith.maximumf %473, %474 : vector<8x128xf32>
    %476 = arith.truncf %475 : vector<8x128xf32> to vector<8x128xbf16>
    %c0_449 = arith.constant 0 : index
    %c7936 = arith.constant 7936 : index
    %477 = vector.load %arg16[%c0_449, %c7936] : memref<8x8192xbf16, #tpu.memory_space<vmem>>, vector<8x128xbf16>
    tpu.vector_store %arg16[%c0_449, %c7936], %476 {strides = array<i32>} : memref<8x8192xbf16, #tpu.memory_space<vmem>>, vector<8x128xbf16>,
    %c504 = arith.constant 504 : index
    %c0_450 = arith.constant 0 : index
    %478 = vector.load %arg13[%c504, %c0_450] : memref<512x128xf32, #tpu.memory_space<vmem>>, vector<8x128xf32>
    %cst_451 = arith.constant 0.000000e+00 : f32
    %479 = vector.broadcast %cst_451 : f32 to vector<8x128xf32>
    %480 = arith.maximumf %478, %479 : vector<8x128xf32>
    %481 = arith.truncf %480 : vector<8x128xf32> to vector<8x128xbf16>
    %c0_452 = arith.constant 0 : index
    %c8064 = arith.constant 8064 : index
    %482 = vector.load %arg16[%c0_452, %c8064] : memref<8x8192xbf16, #tpu.memory_space<vmem>>, vector<8x128xbf16>
    tpu.vector_store %arg16[%c0_452, %c8064], %481 {strides = array<i32>} : memref<8x8192xbf16, #tpu.memory_space<vmem>>, vector<8x128xbf16>,
    %c0_453 = arith.constant 0 : index
    %c0_454 = arith.constant 0 : index
    %483 = vector.load %arg16[%c0_453, %c0_454] : memref<8x8192xbf16, #tpu.memory_space<vmem>>, vector<8x8192xbf16>
    %c0_455 = arith.constant 0 : index
    %c0_456 = arith.constant 0 : index
    %484 = vector.load %arg8[%c0_455, %c0_456] : memref<8192x128xbf16, #tpu.memory_space<vmem>>, vector<8192x128xbf16>
    %cst_457 = arith.constant dense<0.000000e+00> : vector<8x128xf32>
    %485 = tpu.matmul %483, %484, %cst_457 {dimension_numbers = #tpu.dot_dimension_numbers<[1], [0], [0], [1], [0, 0, 1, 1], [], []>} : vector<8x8192xbf16>, vector<8192x128xbf16>, vector<8x128xf32> -> vector<8x128xf32>
    %c0_458 = arith.constant 0 : index
    %c0_459 = arith.constant 0 : index
    %486 = vector.load %arg9[%c0_458, %c0_459] : memref<1x128xf32, #tpu.memory_space<vmem>>, vector<1x128xf32>
    %487 = vector.broadcast %486 : vector<1x128xf32> to vector<8x128xf32>
    %488 = arith.addf %485, %487 : vector<8x128xf32>
    %cst_460 = arith.constant 0.000000e+00 : f32
    %489 = vector.broadcast %cst_460 : f32 to vector<8x128xf32>
    %490 = arith.maximumf %488, %489 : vector<8x128xf32>
    %491 = arith.truncf %490 : vector<8x128xf32> to vector<8x128xbf16>
    %c0_461 = arith.constant 0 : index
    %c0_462 = arith.constant 0 : index
    %492 = vector.load %arg10[%c0_461, %c0_462] : memref<128x128xbf16, #tpu.memory_space<vmem>>, vector<128x128xbf16>
    %cst_463 = arith.constant dense<0.000000e+00> : vector<8x128xf32>
    %493 = tpu.matmul %491, %492, %cst_463 {dimension_numbers = #tpu.dot_dimension_numbers<[1], [0], [0], [1], [0, 0, 1, 1], [], []>} : vector<8x128xbf16>, vector<128x128xbf16>, vector<8x128xf32> -> vector<8x128xf32>
    %c0_464 = arith.constant 0 : index
    %c0_465 = arith.constant 0 : index
    %494 = vector.load %arg11[%c0_464, %c0_465] : memref<1x128xf32, #tpu.memory_space<vmem>>, vector<1x128xf32>
    %495 = vector.broadcast %494 : vector<1x128xf32> to vector<8x128xf32>
    %496 = arith.addf %493, %495 : vector<8x128xf32>
    %c0_466 = arith.constant 0 : index
    %c0_467 = arith.constant 0 : index
    %497 = vector.load %arg12[%c0_466, %c0_467] : memref<8x128xf32, #tpu.memory_space<vmem>>, vector<8x128xf32>
    tpu.vector_store %arg12[%c0_466, %c0_467], %496 {strides = array<i32>} : memref<8x128xf32, #tpu.memory_space<vmem>>, vector<8x128xf32>,
    return
  }
  func.func @transform_0(%arg0: i32) -> (i32, i32) {
    %c0_i32 = arith.constant 0 : i32
    %c0_i32_0 = arith.constant 0 : i32
    return %arg0, %c0_i32 : i32, i32
  }
  func.func @transform_1(%arg0: i32) -> (i32, i32) {
    %c0_i32 = arith.constant 0 : i32
    %c0_i32_0 = arith.constant 0 : i32
    %c0_i32_1 = arith.constant 0 : i32
    return %c0_i32, %c0_i32_0 : i32, i32
  }
  func.func @transform_2(%arg0: i32) -> (i32, i32) {
    %c0_i32 = arith.constant 0 : i32
    %c0_i32_0 = arith.constant 0 : i32
    %c0_i32_1 = arith.constant 0 : i32
    return %c0_i32, %c0_i32_0 : i32, i32
  }
  func.func @transform_3(%arg0: i32) -> (i32, i32) {
    %c0_i32 = arith.constant 0 : i32
    %c0_i32_0 = arith.constant 0 : i32
    %c0_i32_1 = arith.constant 0 : i32
    return %c0_i32, %c0_i32_0 : i32, i32
  }
  func.func @transform_4(%arg0: i32) -> (i32, i32) {
    %c0_i32 = arith.constant 0 : i32
    %c0_i32_0 = arith.constant 0 : i32
    %c0_i32_1 = arith.constant 0 : i32
    return %c0_i32, %c0_i32_0 : i32, i32
  }
  func.func @transform_5(%arg0: i32) -> (i32, i32) {
    %c0_i32 = arith.constant 0 : i32
    %c0_i32_0 = arith.constant 0 : i32
    %c0_i32_1 = arith.constant 0 : i32
    return %c0_i32, %c0_i32_0 : i32, i32
  }
  func.func @transform_6(%arg0: i32) -> (i32, i32) {
    %c0_i32 = arith.constant 0 : i32
    %c0_i32_0 = arith.constant 0 : i32
    %c0_i32_1 = arith.constant 0 : i32
    return %c0_i32, %c0_i32_0 : i32, i32
  }
  func.func @transform_7(%arg0: i32) -> (i32, i32) {
    %c0_i32 = arith.constant 0 : i32
    %c0_i32_0 = arith.constant 0 : i32
    %c0_i32_1 = arith.constant 0 : i32
    return %c0_i32, %c0_i32_0 : i32, i32
  }
  func.func @transform_8(%arg0: i32) -> (i32, i32) {
    %c0_i32 = arith.constant 0 : i32
    %c0_i32_0 = arith.constant 0 : i32
    %c0_i32_1 = arith.constant 0 : i32
    return %c0_i32, %c0_i32_0 : i32, i32
  }
  func.func @transform_9(%arg0: i32) -> (i32, i32) {
    %c0_i32 = arith.constant 0 : i32
    %c0_i32_0 = arith.constant 0 : i32
    %c0_i32_1 = arith.constant 0 : i32
    return %c0_i32, %c0_i32_0 : i32, i32
  }
  func.func @transform_10(%arg0: i32) -> (i32, i32) {
    %c0_i32 = arith.constant 0 : i32
    %c0_i32_0 = arith.constant 0 : i32
    %c0_i32_1 = arith.constant 0 : i32
    return %c0_i32, %c0_i32_0 : i32, i32
  }
  func.func @transform_11(%arg0: i32) -> (i32, i32) {
    %c0_i32 = arith.constant 0 : i32
    %c0_i32_0 = arith.constant 0 : i32
    return %arg0, %c0_i32 : i32, i32
  }
}

</mosaic_0001>

<bundles_post_ra>
// kernel: tpu_custom_call.1
= control target key start
LH: loop header
LB: loop body
LE: loop exit
PB: predicated region body
PF: predicated region fallthrough
CT: control target
= control target key end

     0   :  { %s32641_s0 = inlined_call_operand.hbm [shape: bf16[1024,128], index: 0, kind: input, shape index: {}]   ;;  %s32642_s1 = inlined_call_operand.vmem [shape: bf16[128,64], index: 1, kind: input, shape index: {}]   ;;  %s32643_s2 = inlined_call_operand.hbm [shape: f32[1,64], index: 2, kind: input, shape index: {}]   ;;  %s32644_s3 = inlined_call_operand.hbm [shape: bf16[576,128], index: 3, kind: input, shape index: {}]   ;;  %s32645_s4 = inlined_call_operand.hbm [shape: f32[1,128], index: 4, kind: input, shape index: {}]   ;;  %s32646_s5 = inlined_call_operand.hbm [shape: bf16[1152,128], index: 5, kind: input, shape index: {}]   ;;  %s32647_s6 = inlined_call_operand.hbm [shape: f32[1,128], index: 6, kind: input, shape index: {}]   ;;  %s32648_s7 = inlined_call_operand.hbm [shape: bf16[8192,128], index: 7, kind: input, shape index: {}]   ;;  %s32649_s8 = inlined_call_operand.hbm [shape: f32[1,128], index: 8, kind: input, shape index: {}]   ;;  %s32650_s9 = inlined_call_operand.hbm [shape: bf16[128,128], index: 9, kind: input, shape index: {}]   ;;  %s32651_s10 = inlined_call_operand.hbm [shape: f32[1,128], index: 10, kind: input, shape index: {}]   ;;  %s32652_s11 = inlined_call_operand.hbm [shape: f32[16,128], index: 11, kind: output, shape index: {}]  }
   0x1   :  { %32658 = sst [smem:[#allocation31_spill]] %s32642_s1 }
   0x2   :  { %32659 = sst [smem:[#allocation32_spill]] %s32643_s2 }
   0x3   :  { %32660 = sst [smem:[#allocation33_spill]] %s32645_s4 }
   0x4   :  { %32661 = sst [smem:[#allocation34_spill]] %s32647_s6 }
   0x5   :  { %32662 = sst [smem:[#allocation35_spill]] %s32652_s11 }
   0x6   :  { %16 = vsyncpa [#allocation7], 0 }
   0x7   :  { %18 = vsyncpa [#allocation7 + $0x1], 0 }
   0x8   :  { %19 = vsyncpa [#allocation10], 0 }
   0x9   :  { %20 = vsyncpa [#allocation13], 0 }
   0xa   :  { %21 = vsyncpa [#allocation16], 0 }
   0xb   :  { %22 = vsyncpa [#allocation19], 0 }
   0xc   :  { %23 = vsyncpa [#allocation22], 0 }
   0xd   :  { %24 = vsyncpa [#allocation8], 0 }
   0xe   :  { %26 = vsyncpa [#allocation8 + $0x1], 0  ;;  %s31281_s17 = smov 0   ;;  %s31283_s18 = smov 0  }
   0xf   :  { %s31285_s19 = smov 0   ;;  %s31287_s20 = smov 0  }
  0x10 LB: > { %s31205_s21 = smov [#allocation9]   ;;  %s31302_s23 = sadd.s32 4294967295, %s31203_s20   ;;  %s31203_s20 = sphi %s31287_s20, %s32693_s20   ;;  %s31199_s19 = sphi %s31285_s19, %s32692_s19   ;;  %s31195_s18 = sphi %s31283_s18, %s32691_s18   ;;  %s31191_s17 = sphi %s31281_s17, %s32690_s17  }
  0x11   : > { %s315_s22 = sshll.u32 %s31205_s21, 4  ;;  %p23098_p0 = scmp.ge.s32.totalorder %s31203_s20, 1  ;;  %s31307_s22 = int_to_ptr.vmem [resolvable:$true] %s315_s22 }
  0x12   : > { %p32655_p1 = scmp.eq.s32.totalorder %s31302_s23, 0  ;;  %p299_p2 = scmp.lt.s32.totalorder %s31203_s20, 3 }
  0x13   : > { %s31206_s25 = smov [#allocation12]   ;;  %s31207_s27 = smov [#allocation15]  }
  0x14   : > { %p31309_p3 = pnand %p23098_p0, %p299_p2  ;;  %s339_s26 = sshll.u32 %s31206_s25, 4  ;;  %s31316_s26 = int_to_ptr.vmem [resolvable:$true] %s339_s26 }
  0x15   : > { %s363_s28 = sshll.u32 %s31207_s27, 4  ;;  %s31208_s30 = smov [#allocation18]   ;;  %s31324_s28 = int_to_ptr.vmem [resolvable:$true] %s363_s28 }
  0x16   : > { %s32663_s24 = scalar_select %p31309_p3, 1, 0 }
  0x17   : > { %p29482_p5 = pneg %p31309_p3  ;;  %s31326_s12 = sshll.u32 %s31208_s30, 4  ;;  %s388_s12 = int_to_ptr.vmem [resolvable:$true] %s31326_s12 }
  0x18   : > { %s32665_s2 = sld [smem:[#allocation32_spill]] }
  0x19   : > { %p31320_p6 = pnand %p29482_p5, %p32655_p1 }
  0x1b   : > { %p31336_p8 = pneg %p31320_p6 }
  0x1e   : > { %s30835_s15 = scalar_lea.hbm %s32665_s2, 16 }
  0x1f   : > { %p30836_p7 = scmp.ne.s32.totalorder %s32665_s2, %s30835_s15  ;;  %p30842_p11 = scmp.lt.u32.totalorder %s30835_s15, %s32665_s2 }
  0x21   : > { %p30838_p9 = pnand %p31336_p8, %p30836_p7 }
  0x23   : > { %p30839_p10 = pneg %p30838_p9 }
  0x25   : > { %p30844_p12 = pnand %p30842_p11, %p30839_p10 }
  0x27   : > { %30847 = shalt.err (!%p30844_p12)
}
  0x28   : > { %s30848_s13 = scalar_lea.vmem %s31307_s22, 16  ;;  %s30855_s14 = scalar_lea.vmem %s31307_s22, 32 }
  0x29   : > { %p30849_p13 = scmp.ne.s32.totalorder %s31307_s22, %s30848_s13  ;;  %p30856_p5 = scmp.lt.s32.totalorder %s31307_s22, %s31307_s22 }
  0x2a   : > { %p30857_p7 = scmp.lt.s32.totalorder %s30855_s14, %s30848_s13 }
  0x2b   : > { %p30851_p0 = pnand %p30849_p13, %p31336_p8 }
  0x2c   : > { %p30858_p9 = por %p30857_p7, %p30856_p5 }
  0x2d   : > { %p30852_p2 = pneg %p30851_p0 }
  0x2f   : > { %p30859_p4 = pnand %p30858_p9, %p30852_p2 }
  0x31   : > { %30862 = shalt.err (!%p30859_p4)
}
  0x32   : > { %29485 = dma.hbm_to_vmem [thread:$0]  (!%p31320_p6), %s32665_s2, 16, %s31307_s22, [#allocation10]  }
  0x33   : > { %s32667_s4 = sld [smem:[#allocation33_spill]] }
  0x39   : > { %s30863_s30 = scalar_lea.hbm %s32667_s4, 16 }
  0x3a   : > { %p30864_p10 = scmp.ne.s32.totalorder %s32667_s4, %s30863_s30  ;;  %p30870_p4 = scmp.lt.u32.totalorder %s30863_s30, %s32667_s4 }
  0x3c   : > { %p30866_p11 = pnand %p30864_p10, %p31336_p8 }
  0x3e   : > { %p30867_p12 = pneg %p30866_p11 }
  0x40   : > { %p30872_p13 = pnand %p30870_p4, %p30867_p12 }
  0x42   : > { %30875 = shalt.err (!%p30872_p13)
}
  0x43   : > { %s30876_s22 = scalar_lea.vmem %s31316_s26, 16  ;;  %s30883_s1 = scalar_lea.vmem %s31316_s26, 32 }
  0x44   : > { %p30877_p0 = scmp.ne.s32.totalorder %s31316_s26, %s30876_s22  ;;  %p30884_p7 = scmp.lt.s32.totalorder %s31316_s26, %s31316_s26 }
  0x45   : > { %p30885_p9 = scmp.lt.s32.totalorder %s30883_s1, %s30876_s22 }
  0x46   : > { %p30879_p2 = pnand %p30877_p0, %p31336_p8 }
  0x47   : > { %p30886_p10 = por %p30885_p9, %p30884_p7 }
  0x48   : > { %p30880_p5 = pneg %p30879_p2 }
  0x4a   : > { %p30887_p11 = pnand %p30886_p10, %p30880_p5 }
  0x4c   : > { %30890 = shalt.err (!%p30887_p11)
}
  0x4d   : > { %29491 = dma.hbm_to_vmem [thread:$0]  (!%p31320_p6), %s32667_s4, 16, %s31316_s26, [#allocation13]  }
  0x4e   : > { %s32668_s6 = sld [smem:[#allocation34_spill]] }
  0x54   : > { %s30891_s27 = scalar_lea.hbm %s32668_s6, 16 }
  0x55   : > { %p30892_p12 = scmp.ne.s32.totalorder %s32668_s6, %s30891_s27  ;;  %p30898_p0 = scmp.lt.u32.totalorder %s30891_s27, %s32668_s6 }
  0x57   : > { %p30894_p4 = pnand %p30892_p12, %p31336_p8 }
  0x59   : > { %p30895_p13 = pneg %p30894_p4 }
  0x5b   : > { %p30900_p2 = pnand %p30898_p0, %p30895_p13 }
  0x5d   : > { %30903 = shalt.err (!%p30900_p2)
}
  0x5e   : > { %s30904_s26 = scalar_lea.vmem %s31324_s28, 16  ;;  %s30911_s1 = scalar_lea.vmem %s31324_s28, 32 }
  0x5f   : > { %p30905_p5 = scmp.ne.s32.totalorder %s31324_s28, %s30904_s26  ;;  %p30912_p10 = scmp.lt.s32.totalorder %s31324_s28, %s31324_s28 }
  0x60   : > { %p30913_p11 = scmp.lt.s32.totalorder %s30911_s1, %s30904_s26 }
  0x61   : > { %p30907_p7 = pnand %p30905_p5, %p31336_p8 }
  0x62   : > { %p30914_p12 = por %p30913_p11, %p30912_p10 }
  0x63   : > { %p30908_p9 = pneg %p30907_p7 }
  0x65   : > { %p30915_p4 = pnand %p30914_p12, %p30908_p9 }
  0x67   : > { %30918 = shalt.err (!%p30915_p4)
}
  0x68   : > { %29497 = dma.hbm_to_vmem [thread:$0]  (!%p31320_p6), %s32668_s6, 16, %s31324_s28, [#allocation16]  }
  0x69   : > { %s31209_s16 = smov [#allocation11]   ;;  %s30919_s13 = scalar_lea.hbm %s32649_s8, 16 }
  0x6a   : > { %s325_s21 = sshll.u32 %s31209_s16, 4  ;;  %p30920_p13 = scmp.ne.s32.totalorder %s32649_s8, %s30919_s13  ;;  %s326_s21 = int_to_ptr.vmem [resolvable:$true] %s325_s21 }
  0x6b   : > { %p30926_p5 = scmp.lt.u32.totalorder %s30919_s13, %s32649_s8 }
  0x6c   : > { %p30922_p0 = pnand %p30920_p13, %p31336_p8 }
  0x6e   : > { %p30923_p2 = pneg %p30922_p0 }
  0x70   : > { %p30928_p7 = pnand %p30926_p5, %p30923_p2 }
  0x72   : > { %30931 = shalt.err (!%p30928_p7)
}
  0x73   : > { %s30932_s28 = scalar_lea.vmem %s388_s12, 16  ;;  %s30939_s11 = scalar_lea.vmem %s388_s12, 32 }
  0x74   : > { %p30933_p9 = scmp.ne.s32.totalorder %s388_s12, %s30932_s28  ;;  %p30940_p12 = scmp.lt.s32.totalorder %s388_s12, %s388_s12 }
  0x75   : > { %p30941_p4 = scmp.lt.s32.totalorder %s30939_s11, %s30932_s28 }
  0x76   : > { %p30935_p10 = pnand %p30933_p9, %p31336_p8 }
  0x77   : > { %p30942_p1 = por %p30941_p4, %p30940_p12 }
  0x78   : > { %p30936_p11 = pneg %p30935_p10 }
  0x7a   : > { %p30943_p3 = pnand %p30942_p1, %p30936_p11 }
  0x7c   : > { %30946 = shalt.err (!%p30943_p3)
}
  0x7d   : > { %29503 = dma.hbm_to_vmem [thread:$0]  (!%p31320_p6), %s32649_s8, 16, %s388_s12, [#allocation19]  }
  0x7e   : > { %s30947_s13 = scalar_lea.hbm %s32644_s3, 4608 }
  0x7f   : > { %p30948_p13 = scmp.ne.s32.totalorder %s32644_s3, %s30947_s13  ;;  %p30954_p3 = scmp.lt.u32.totalorder %s30947_s13, %s32644_s3 }
  0x81   : > { %p30950_p0 = pnand %p30948_p13, %p31336_p8 }
  0x83   : > { %p30951_p1 = pneg %p30950_p0 }
  0x85   : > { %p30956_p2 = pnand %p30954_p3, %p30951_p1 }
  0x87   : > { %30959 = shalt.err (!%p30956_p2)
}
  0x88   : > { %s30960_s28 = scalar_lea.vmem %s326_s21, 4608  ;;  %p30968_p10 = scmp.lt.s32.totalorder %s326_s21, %s326_s21 }
  0x89   : > { %p30961_p5 = scmp.ne.s32.totalorder %s326_s21, %s30960_s28  ;;  %p30969_p11 = scmp.lt.s32.totalorder %s30960_s28, %s30960_s28 }
  0x8b   : > { %p30963_p7 = pnand %p30961_p5, %p31336_p8  ;;  %p30970_p12 = por %p30969_p11, %p30968_p10 }
  0x8d   : > { %p30964_p9 = pneg %p30963_p7 }
  0x8f   : > { %p30971_p4 = pnand %p30970_p12, %p30964_p9 }
  0x91   : > { %30974 = shalt.err (!%p30971_p4)
}
  0x92   : > { %s31210_s12 = smov 64   ;;  %s31211_s11 = smov 4  }
  0x93   : > { %29488 = dma.hbm_to_vmem [thread:$0]  (!%p31320_p6), %s32644_s3, 4608, %s326_s21, [#allocation10], %s31210_s12, %s31210_s12, %s31211_s11  }
  0x94   : > { %s31212_s27 = smov [#allocation14]   ;;  %s31213_s13 = smov [#allocation17]  }
  0x95   : > { %s349_s30 = sshll.u32 %s31212_s27, 4  ;;  %s373_s14 = sshll.u32 %s31213_s13, 4  ;;  %s350_s30 = int_to_ptr.vmem [resolvable:$true] %s349_s30  ;;  %s374_s14 = int_to_ptr.vmem [resolvable:$true] %s373_s14 }
  0x96   : > { %s30975_s1 = scalar_lea.hbm %s32646_s5, 9216 }
  0x97   : > { %p30976_p13 = scmp.ne.s32.totalorder %s32646_s5, %s30975_s1  ;;  %p30982_p3 = scmp.lt.u32.totalorder %s30975_s1, %s32646_s5 }
  0x99   : > { %p30978_p0 = pnand %p30976_p13, %p31336_p8 }
  0x9b   : > { %p30979_p1 = pneg %p30978_p0 }
  0x9d   : > { %p30984_p2 = pnand %p30982_p3, %p30979_p1 }
  0x9f   : > { %30987 = shalt.err (!%p30984_p2)
}
  0xa0   : > { %s30988_s21 = scalar_lea.vmem %s350_s30, 9216  ;;  %p30996_p10 = scmp.lt.s32.totalorder %s350_s30, %s350_s30 }
  0xa1   : > { %p30989_p5 = scmp.ne.s32.totalorder %s350_s30, %s30988_s21  ;;  %p30997_p11 = scmp.lt.s32.totalorder %s30988_s21, %s30988_s21 }
  0xa3   : > { %p30991_p7 = pnand %p30989_p5, %p31336_p8  ;;  %p30998_p12 = por %p30997_p11, %p30996_p10 }
  0xa5   : > { %p30992_p9 = pneg %p30991_p7 }
  0xa7   : > { %p30999_p4 = pnand %p30998_p12, %p30992_p9 }
  0xa9   : > { %31002 = shalt.err (!%p30999_p4)
}
  0xaa   : > { %29494 = dma.hbm_to_vmem [thread:$0]  (!%p31320_p6), %s32646_s5, 9216, %s350_s30, [#allocation13], %s31210_s12, %s31210_s12, %s31211_s11  }
  0xab   : > { %s31003_s16 = scalar_lea.hbm %s32648_s7, 65536 }
  0xac   : > { %p31004_p13 = scmp.ne.s32.totalorder %s32648_s7, %s31003_s16  ;;  %p31010_p3 = scmp.lt.u32.totalorder %s31003_s16, %s32648_s7 }
  0xae   : > { %p31006_p0 = pnand %p31004_p13, %p31336_p8 }
  0xb0   : > { %p31007_p1 = pneg %p31006_p0 }
  0xb2   : > { %p31012_p2 = pnand %p31010_p3, %p31007_p1 }
  0xb4   : > { %31015 = shalt.err (!%p31012_p2)
}
  0xb5   : > { %s31016_s1 = scalar_lea.vmem %s374_s14, 65536  ;;  %p31024_p10 = scmp.lt.s32.totalorder %s374_s14, %s374_s14 }
  0xb6   : > { %p31017_p5 = scmp.ne.s32.totalorder %s374_s14, %s31016_s1  ;;  %p31025_p11 = scmp.lt.s32.totalorder %s31016_s1, %s31016_s1 }
  0xb8   : > { %p31019_p7 = pnand %p31017_p5, %p31336_p8  ;;  %p31026_p12 = por %p31025_p11, %p31024_p10 }
  0xba   : > { %p31020_p9 = pneg %p31019_p7 }
  0xbc   : > { %p31027_p4 = pnand %p31026_p12, %p31020_p9 }
  0xbe   : > { %31030 = shalt.err (!%p31027_p4)
}
  0xbf   : > { %29500 = dma.hbm_to_vmem [thread:$0]  (!%p31320_p6), %s32648_s7, 65536, %s374_s14, [#allocation16], %s31210_s12, %s31210_s12, %s31211_s11  }
  0xc0   : > { %s31214_s21 = smov [#allocation20]   ;;  %s31215_s4 = smov [#allocation21]  }
  0xc1   : > { %s397_s2 = sshll.u32 %s31214_s21, 4  ;;  %s411_s6 = sshll.u32 %s31215_s4, 4  ;;  %s398_s2 = int_to_ptr.vmem [resolvable:$true] %s397_s2  ;;  %s412_s6 = int_to_ptr.vmem [resolvable:$true] %s411_s6 }
  0xc2   : > { %s31031_s27 = scalar_lea.hbm %s32650_s9, 1024 }
  0xc3   : > { %p31032_p13 = scmp.ne.s32.totalorder %s32650_s9, %s31031_s27  ;;  %p31038_p3 = scmp.lt.u32.totalorder %s31031_s27, %s32650_s9 }
  0xc5   : > { %p31034_p0 = pnand %p31032_p13, %p31336_p8 }
  0xc7   : > { %p31035_p1 = pneg %p31034_p0 }
  0xc9   : > { %p31040_p2 = pnand %p31038_p3, %p31035_p1 }
  0xcb   : > { %31043 = shalt.err (!%p31040_p2)
}
  0xcc   : > { %s31044_s14 = scalar_lea.vmem %s398_s2, 1024  ;;  %p31052_p10 = scmp.lt.s32.totalorder %s398_s2, %s398_s2 }
  0xcd   : > { %p31045_p5 = scmp.ne.s32.totalorder %s398_s2, %s31044_s14  ;;  %p31053_p11 = scmp.lt.s32.totalorder %s31044_s14, %s31044_s14 }
  0xcf   : > { %p31047_p7 = pnand %p31045_p5, %p31336_p8  ;;  %p31054_p12 = por %p31053_p11, %p31052_p10 }
  0xd1   : > { %p31048_p9 = pneg %p31047_p7 }
  0xd3   : > { %p31055_p4 = pnand %p31054_p12, %p31048_p9 }
  0xd5   : > { %31058 = shalt.err (!%p31055_p4)
}
  0xd6   : > { %29506 = dma.hbm_to_vmem [thread:$0]  (!%p31320_p6), %s32650_s9, 1024, %s398_s2, [#allocation19], %s31210_s12, %s31210_s12, %s31211_s11  }
  0xd7   : > { %s31059_s15 = scalar_lea.hbm %s32651_s10, 16 }
  0xd8   : > { %p31060_p13 = scmp.ne.s32.totalorder %s32651_s10, %s31059_s15  ;;  %p31066_p3 = scmp.lt.u32.totalorder %s31059_s15, %s32651_s10 }
  0xda   : > { %p31062_p0 = pnand %p31060_p13, %p31336_p8 }
  0xdc   : > { %p31063_p1 = pneg %p31062_p0 }
  0xde   : > { %p31068_p2 = pnand %p31066_p3, %p31063_p1 }
  0xe0   : > { %31071 = shalt.err (!%p31068_p2)
}
  0xe1   : > { %s31072_s26 = scalar_lea.vmem %s412_s6, 16  ;;  %s31079_s2 = scalar_lea.vmem %s412_s6, 32 }
  0xe2   : > { %p31073_p5 = scmp.ne.s32.totalorder %s412_s6, %s31072_s26  ;;  %p31080_p10 = scmp.lt.s32.totalorder %s412_s6, %s412_s6 }
  0xe3   : > { %p31081_p11 = scmp.lt.s32.totalorder %s31079_s2, %s31072_s26 }
  0xe4   : > { %p31075_p7 = pnand %p31073_p5, %p31336_p8 }
  0xe5   : > { %p31082_p12 = por %p31081_p11, %p31080_p10 }
  0xe6   : > { %p31076_p9 = pneg %p31075_p7 }
  0xe8   : > { %p31083_p4 = pnand %p31082_p12, %p31076_p9 }
  0xea   : > { %31086 = shalt.err (!%p31083_p4)
}
  0xeb   : > { %29509 = dma.hbm_to_vmem [thread:$0]  (!%p31320_p6), %s32651_s10, 16, %s412_s6, [#allocation22]  }
  0xec   : > { %s23097_s25 = sadd.s32 4294967294, %s31203_s20   ;;  %s31529_s29 = sadd.s32 1, %s31203_s20  }
  0xed   : > { %s39_s30 = sadd.s32 1, %s31199_s19  ;;  %s36_s28 = ssub.s32 %s31203_s20, %s31529_s29 }
  0xee   : > { %p46_p8 = scmp.ne.s32.totalorder %s31199_s19, %s31195_s18  ;;  %p37_p13 = scmp.eq.s32.totalorder %s36_s28, 0 }
  0xef   : > { %p47_p0 = scmp.eq.s32.totalorder %s31203_s20, 0  ;;  %p52_p1 = scmp.ne.s32.totalorder %s31195_s18, %s31191_s17 }
  0xf0   : > { %p286_p3 = scmp.eq.s32.totalorder %s31302_s23, 1  ;;  %p32669_p5 = scmp.eq.s32.totalorder %s31302_s23, 0 }
  0xf1   : > { %s31541_s21 = scalar_select %p37_p13, %s31199_s19, %s39_s30  }
  0xf2   : > { %p48_p2 = por %p47_p0, %p46_p8  ;;  %p31545_p7 = por %p32669_p5, %p52_p1 }
  0xf3   : > { %p31549_p6 = por %p286_p3, %p46_p8  ;;  %p292_p9 = scmp.eq.s32.totalorder %s23097_s25, 1 }
  0xf4   : > { %p29527_p10 = scmp.lt.s32.totalorder %s31203_s20, 2  ;;  %s422_s15 = sand.u32 1, %s31199_s19  }
  0xf5   : > { %s32671_s6 = scalar_select %p31549_p6, 1, 0 }
  0xf6   : > { %p31555_p11 = por %p292_p9, %p52_p1  ;;  %s23109_s27 = sshll.u32 %s422_s15, 8 }
  0xf7   : > { %s24857_s13 = sshll.u32 %s31203_s20, 12  ;;  %s426_s1 = scalar_lea.vmem [#allocation6], %s23109_s27 }
  0xf8   : > { %s32672_s16 = scalar_select %p31555_p11, 1, 0 }
  0xf9   : > { %s31563_s2 = scalar_lea.hbm %s32641_s0, %s24857_s13  ;;  %s433_s14 = sshll.u32 %s426_s1, 4  ;;  %s31569_s14 = int_to_ptr.vmem [resolvable:$true] %s433_s14 }
  0xfa   : > { %p31565_p12 = pnand %p29527_p10, %p48_p2  ;;  %s31571_s30 = scalar_lea.sflag [#allocation7], %s422_s15 }
  0xfb   : > { %s31087_s28 = scalar_lea.hbm %s31563_s2, 4096  ;;  %s31092_s22 = scalar_lea.hbm %s32641_s0, 8192 }
  0xfc   : > { %p31088_p4 = scmp.ne.s32.totalorder %s31563_s2, %s31087_s28  ;;  %p31089_p8 = pneg %p31565_p12 }
  0xfd   : > { %p31093_p1 = scmp.lt.u32.totalorder %s31563_s2, %s32641_s0  ;;  %p31094_p3 = scmp.lt.u32.totalorder %s31092_s22, %s31087_s28 }
  0xfe   : > { %p31090_p13 = pnand %p31089_p8, %p31088_p4  ;;  %p31096_p5 = scmp.lt.u32.totalorder %s31087_s28, %s31563_s2 }
  0xff   : > { %p31095_p2 = por %p31094_p3, %p31093_p1 }
 0x100   : > { %p31091_p0 = pneg %p31090_p13 }
 0x101   : > { %p31097_p9 = por %p31096_p5, %p31095_p2 }
 0x103   : > { %p31098_p10 = pnand %p31097_p9, %p31091_p0 }
 0x105   : > { %31101 = shalt.err (!%p31098_p10)
}
 0x106   : > { %s31102_s15 = scalar_lea.vmem %s31569_s14, 4096  ;;  %s31216_s27 = smov [#allocation6]  }
 0x107   : > { %p31103_p4 = scmp.ne.s32.totalorder %s31569_s14, %s31102_s15  ;;  %s31107_s13 = sshll.u32 %s31216_s27, 4  ;;  %s31108_s13 = int_to_ptr.vmem [resolvable:$false] %s31107_s13 }
 0x108   : > { %s31109_s26 = scalar_lea.vmem %s31108_s13, 8192  ;;  %p31110_p6 = scmp.lt.s32.totalorder %s31569_s14, %s31108_s13 }
 0x109   : > { %p31105_p13 = pnand %p31103_p4, %p31089_p8  ;;  %p31111_p1 = scmp.lt.s32.totalorder %s31109_s26, %s31102_s15 }
 0x10b   : > { %p31106_p11 = pneg %p31105_p13  ;;  %p31112_p3 = por %p31111_p1, %p31110_p6 }
 0x10d   : > { %p31113_p2 = pnand %p31112_p3, %p31106_p11 }
 0x10f   : > { %31116 = shalt.err (!%p31113_p2)
}
 0x110   : > { %29513 = dma.hbm_to_vmem [thread:$0]  (!%p31565_p12), %s31563_s2, 4096, %s31569_s14, %s31571_s30, %s31210_s12, %s31210_s12, %s31211_s11  }
 0x111   : > { %p32674_p8 = scmp.ne.s32.totalorder %s32663_s24, 0 }
 0x112   : > { %s31605_s28 = sand.u32 (!%p32674_p8), 1, %s31195_s18  }
 0x113   : > { %445 = sbr.rel (%p32674_p8) target bundleno = 4029 (0xfbd), region = 64  ;;  %s23113_s22 = sshll.u32 (!%p32674_p8), %s31605_s28, 8 }
 0x114   : > { %s448_s1 = scalar_lea.sflag (!%p32674_p8), [#allocation7], %s31605_s28  ;;  %s31609_s15 = scalar_lea.vmem (!%p32674_p8), [#allocation6], %s23113_s22 }
 0x11a   : > { %31162 = dma.done.wait (%p31545_p7), %s448_s1, 4096  }
 0x11b   : > { %31164 = vsyncadd (%p31545_p7), %s448_s1, 4294963200  ;;  %p32675_p6 = scmp.eq.s32.totalorder %s31302_s23, 0 }
 0x11d   : > { %31166 = dma.done.wait (%p32675_p6), [#allocation10], 4624   ;;  %p32676_p11 = pmov %p32675_p6 }
 0x11e   : > { %p32677_p12 = pmov %p32675_p6 }
 0x11f   : > { %31168 = vsyncadd (%p32676_p11), [#allocation10], 4294962672 }
 0x120   : > { %31170 = dma.done.wait (%p32677_p12), [#allocation13], 9232   ;;  %p32678_p0 = pmov %p32675_p6 }
 0x122   : > { %31172 = vsyncadd (%p32678_p0), [#allocation13], 4294958064  ;;  %p32679_p5 = pmov %p32678_p0 }
 0x123   : > { %p32680_p9 = pmov %p32678_p0 }
 0x124   : > { %31174 = dma.done.wait (%p32679_p5), [#allocation16], 65552  }
 0x125   : > { %31176 = vsyncadd (%p32680_p9), [#allocation16], 4294901744  ;;  %p32681_p7 = pmov %p32678_p0 }
 0x126   : > { %p32682_p10 = pmov %p32678_p0 }
 0x127   : > { %31178 = dma.done.wait (%p32681_p7), [#allocation19], 1040  }
 0x128   : > { %31180 = vsyncadd (%p32682_p10), [#allocation19], 4294966256  ;;  %p32683_p4 = pmov %p32678_p0 }
 0x129   : > { %p32684_p13 = pmov %p32678_p0 }
 0x12a   : > { %31182 = dma.done.wait (%p32683_p4), [#allocation22], 16  }
 0x12b   : > { %31184 = vsyncadd (%p32684_p13), [#allocation22], 4294967280  ;;  %s32685_s11 = sld [smem:[#allocation31_spill]]  ;;  %v29592_v4 = vld [vmem:[%s31609_s15] sm:$0xff]   ;;  %v29593_v9 = vld [vmem:[%s31609_s15 + $0x8] sm:$0xff]   ;;  %vm528_vm0 = vcmask 519168  }
 0x12c   : > { %26838 = vmatprep.mubr.bf16.mxu0 %v29592_v4  ;;  %v29594_v10 = vld [vmem:[%s31609_s15 + $0x10] sm:$0xff]   ;;  %v29595_v11 = vld [vmem:[%s31609_s15 + $0x18] sm:$0xff]   ;;  %v29620_v12 = vld [vmem:[#allocation11] sm:$0xff]   ;;  %v31217_v35 = vmov 0   ;;  %vm1999_vm1 = vcmask 523264   ;;  %vm31219_vm2 = vmmov 0  }
 0x12d   : > { %v29621_v13 = vld [vmem:[#allocation11 + $0x8] sm:$0xff]   ;;  %v29596_v14 = vld [vmem:[%s31609_s15 + $0x20] sm:$0xff]   ;;  %26902 = vmatprep.subr.bf16.mxu1 %v29620_v12  ;;  %v29622_v15 = vld [vmem:[#allocation11 + $0x10] sm:$0xff]   ;;  %529 = vst.msk [vmem:[#allocation3] sm:$0xf] %vm528_vm0, %v31217_v35  ;;  %s24854_s14 = sshll.u32 %s31302_s23, 7 }
 0x12e   : > { %26903 = vmatpush3.bf16.msra.mxu1 %v29620_v12  ;;  %v29623_v16 = vld [vmem:[#allocation11 + $0x18] sm:$0xff]   ;;  %v29597_v17 = vld [vmem:[%s31609_s15 + $0x28] sm:$0xff]   ;;  %v29598_v18 = vld [vmem:[%s31609_s15 + $0x30] sm:$0xff]   ;;  %530 = vst.msk [vmem:[#allocation3 + $0x4] sm:$0xf] %vm528_vm0, %v31217_v35  ;;  %s32686_s26 = sld [smem:[#allocation35_spill]] }
 0x12f   : > { %26904 = vmatprep.subr.bf16.mxu1 %v29621_v13  ;;  %v29599_v19 = vld [vmem:[%s31609_s15 + $0x38] sm:$0xff]   ;;  %v29600_v20 = vld [vmem:[%s31609_s15 + $0x40] sm:$0xff]   ;;  %v29601_v21 = vld [vmem:[%s31609_s15 + $0x48] sm:$0xff]   ;;  %531 = vst.msk [vmem:[#allocation3 + $0x8] sm:$0xf] %vm528_vm0, %v31217_v35  ;;  %s22928_s1 = scalar_lea.sflag [#allocation8], %s31605_s28 }
 0x130   : > { %v29602_v22 = vld [vmem:[%s31609_s15 + $0x50] sm:$0xff]   ;;  %v29603_v23 = vld [vmem:[%s31609_s15 + $0x58] sm:$0xff]   ;;  %v29604_v24 = vld [vmem:[%s31609_s15 + $0x60] sm:$0xff]   ;;  %532 = vst.msk [vmem:[#allocation3 + $0xc] sm:$0xf] %vm528_vm0, %v31217_v35  ;;  %p32687_p3 = scmp.ne.s32.totalorder %s32671_s6, 0 }
 0x131   : > { %v29584_v0 = vld [vmem:[%s32685_s11] sm:$0xff]   ;;  %v29585_v1 = vld [vmem:[%s32685_s11 + $0x8] sm:$0xff]   ;;  %v29586_v2 = vld [vmem:[%s32685_s11 + $0x10] sm:$0xff]   ;;  %533 = vst.msk [vmem:[#allocation3 + $0x10] sm:$0xf] %vm528_vm0, %v31217_v35  ;;  %s31220_s24 = smov [#allocation23]  }
 0x132   : > { %26822 = vmatprep.subr.bf16.mxu0 %v29584_v0  ;;  %v29587_v3 = vld [vmem:[%s32685_s11 + $0x18] sm:$0xff]   ;;  %v29588_v5 = vld [vmem:[%s32685_s11 + $0x20] sm:$0xff]   ;;  %v29589_v6 = vld [vmem:[%s32685_s11 + $0x28] sm:$0xff]   ;;  %26905 = vmatpush3.bf16.msra.mxu1 %v29621_v13  ;;  %534 = vst.msk [vmem:[#allocation3 + $0x14] sm:$0xf] %vm528_vm0, %v31217_v35  ;;  %s31121_s12 = sshll.u32 %s31220_s24, 4  ;;  %s31122_s12 = int_to_ptr.vmem [resolvable:$false] %s31121_s12 }
 0x133   : > { %26823 = vmatpush3.bf16.msra.mxu0 %v29584_v0  ;;  %v29590_v7 = vld [vmem:[%s32685_s11 + $0x30] sm:$0xff]   ;;  %v29591_v8 = vld [vmem:[%s32685_s11 + $0x38] sm:$0xff]   ;;  %26906 = vmatprep.subr.bf16.mxu1 %v29622_v15  ;;  %v29605_v25 = vld [vmem:[%s31609_s15 + $0x68] sm:$0xff]   ;;  %535 = vst.msk [vmem:[#allocation3 + $0x18] sm:$0xf] %vm528_vm0, %v31217_v35  ;;  %s31123_s4 = scalar_lea.vmem %s31122_s12, 256 }
 0x134   : > { %26824 = vmatprep.subr.bf16.mxu0 %v29585_v1  ;;  %v29606_v26 = vld [vmem:[%s31609_s15 + $0x70] sm:$0xff]   ;;  %v29607_v27 = vld [vmem:[%s31609_s15 + $0x78] sm:$0xff]   ;;  %v29608_v28 = vld [vmem:[%s31609_s15 + $0x80] sm:$0xff]   ;;  %536 = vst.msk [vmem:[#allocation3 + $0x1c] sm:$0xf] %vm528_vm0, %v31217_v35  ;;  %s32597_s22 = scalar_lea.hbm %s32686_s26, %s24854_s14 }
 0x135   : > { %v29609_v29 = vld [vmem:[%s31609_s15 + $0x88] sm:$0xff]   ;;  %v29610_v30 = vld [vmem:[%s31609_s15 + $0x90] sm:$0xff]   ;;  %v29611_v31 = vld [vmem:[%s31609_s15 + $0x98] sm:$0xff]   ;;  %537 = vst.msk [vmem:[#allocation3 + $0x20] sm:$0xf] %vm528_vm0, %v31217_v35 }
 0x136   : > { %26907 = vmatpush3.bf16.msra.mxu1 %v29622_v15  ;;  %v29612_v32 = vld [vmem:[%s31609_s15 + $0xa0] sm:$0xff]   ;;  %v31681_v33 = vld [vmem:[%s31609_s15 + $0xa8] sm:$0xff]   ;;  %v31684_v34 = vld [vmem:[%s31609_s15 + $0xb0] sm:$0xff]   ;;  %538 = vst.msk [vmem:[#allocation3 + $0x24] sm:$0xf] %vm528_vm0, %v31217_v35 }
 0x137   : > { %26825 = vmatpush3.bf16.msra.mxu0 %v29585_v1  ;;  %26908 = vmatprep.subr.bf16.mxu1 %v29623_v16  ;;  %540 = vst.msk [vmem:[#allocation3 + $0x168] sm:$0xf] %vm528_vm0, %v31217_v35  ;;  %541 = vst.msk [vmem:[#allocation3 + $0x16c] sm:$0xf] %vm528_vm0, %v31217_v35  ;;  %v29615_v36 = vld [vmem:[%s31609_s15 + $0xb8] sm:$0xff]   ;;  %v29616_v37 = vld [vmem:[%s31609_s15 + $0xc0] sm:$0xff]  }
 0x138   : > { %26826 = vmatprep.subr.bf16.mxu0 %v29586_v2  ;;  %542 = vst.msk [vmem:[#allocation3 + $0x170] sm:$0xf] %vm528_vm0, %v31217_v35  ;;  %543 = vst.msk [vmem:[#allocation3 + $0x174] sm:$0xf] %vm528_vm0, %v31217_v35  ;;  %v29624_v38 = vld [vmem:[#allocation3] sm:$0xff]   ;;  %v29626_v39 = vld [vmem:[#allocation3 + $0x8] sm:$0xff]  }
 0x139   : > { %544 = vst.msk [vmem:[#allocation3 + $0x178] sm:$0xf] %vm528_vm0, %v31217_v35  ;;  %545 = vst.msk [vmem:[#allocation3 + $0x17c] sm:$0xf] %vm528_vm0, %v31217_v35  ;;  %26910 = vmatprep.mubr.msk.bf16.mxu1 %vm1999_vm1, %v29624_v38  ;;  %v29617_v40 = vld [vmem:[%s31609_s15 + $0xc8] sm:$0xff]   ;;  %v29618_v41 = vld [vmem:[%s31609_s15 + $0xd0] sm:$0xff]  }
 0x13a   : > { %26909 = vmatpush3.bf16.msra.mxu1 %v29623_v16  ;;  %546 = vst.msk [vmem:[#allocation3 + $0x180] sm:$0xf] %vm528_vm0, %v31217_v35  ;;  %547 = vst.msk [vmem:[#allocation3 + $0x184] sm:$0xf] %vm528_vm0, %v31217_v35  ;;  %v29627_v42 = vld [vmem:[#allocation3 + $0x10] sm:$0xff]   ;;  %v29625_v44 = vld [vmem:[#allocation11 + $0x20] sm:$0xff]  }
 0x13b   : > { %26827 = vmatpush3.bf16.msra.mxu0 %v29586_v2  ;;  %548 = vst.msk [vmem:[#allocation3 + $0x188] sm:$0xf] %vm528_vm0, %v31217_v35  ;;  %549 = vst.msk [vmem:[#allocation3 + $0x18c] sm:$0xf] %vm528_vm0, %v31217_v35  ;;  %v29628_v43 = vld [vmem:[#allocation3 + $0x18] sm:$0xff]   ;;  %26974 = vmatprep.subr.bf16.mxu1 %v29625_v44  ;;  %v29634_v46 = vld [vmem:[#allocation11 + $0x28] sm:$0xff]  }
 0x13c   : > { %26828 = vmatprep.subr.bf16.mxu0 %v29587_v3  ;;  %551 = vst.msk [vmem:[#allocation3 + $0x28] sm:$0xf] %vm528_vm0, %v31217_v35  ;;  %552 = vst.msk [vmem:[#allocation3 + $0x50] sm:$0xf] %vm528_vm0, %v31217_v35  ;;  %v29619_v45 = vld [vmem:[%s31609_s15 + $0xd8] sm:$0xff]   ;;  %v29661_v50 = vld [vmem:[#allocation11 + $0x40] sm:$0xff]  }
 0x13d   : > { %553 = vst.msk [vmem:[#allocation3 + $0x78] sm:$0xf] %vm528_vm0, %v31217_v35  ;;  %554 = vst.msk [vmem:[#allocation3 + $0xa0] sm:$0xf] %vm528_vm0, %v31217_v35  ;;  %26911 = vmatmul.mubr.msk.bf16.vlgmr.msra.gmra.mrb[0].mxu1 %vm1999_vm1, %v29626_v39  ;;  %v29643_v47 = vld [vmem:[#allocation11 + $0x30] sm:$0xff]   ;;  %v29652_v48 = vld [vmem:[#allocation11 + $0x38] sm:$0xff]  }
 0x13e   : > { %555 = vst.msk [vmem:[#allocation3 + $0xc8] sm:$0xf] %vm528_vm0, %v31217_v35  ;;  %556 = vst.msk [vmem:[#allocation3 + $0xf0] sm:$0xf] %vm528_vm0, %v31217_v35  ;;  %26914 = vmatprep.mubr.msk.bf16.mxu1 %vm1999_vm1, %v29627_v42  ;;  %26975 = vmatpush3.bf16.msra.mxu1 %v29625_v44  ;;  %v31805_v49 = vld [vmem:[#allocation9] ss:$0 sm:$0xff] }
 0x13f   : > { %26829 = vmatpush3.bf16.msra.mxu0 %v29587_v3  ;;  %557 = vst.msk [vmem:[#allocation3 + $0x118] sm:$0xf] %vm528_vm0, %v31217_v35  ;;  %558 = vst.msk [vmem:[#allocation3 + $0x140] sm:$0xf] %vm528_vm0, %v31217_v35  ;;  %26976 = vmatprep.subr.bf16.mxu1 %v29634_v46 }
 0x140   : > { %26830 = vmatprep.subr.bf16.mxu0 %v29588_v5  ;;  %560 = vst.msk [vmem:[#allocation3 + $0x4c] sm:$0xf] %vm528_vm0, %v31217_v35  ;;  %561 = vst.msk [vmem:[#allocation3 + $0x74] sm:$0xf] %vm528_vm0, %v31217_v35 }
 0x141   : > { %562 = vst.msk [vmem:[#allocation3 + $0x9c] sm:$0xf] %vm528_vm0, %v31217_v35  ;;  %563 = vst.msk [vmem:[#allocation3 + $0xc4] sm:$0xf] %vm528_vm0, %v31217_v35 }
 0x142   : > { %564 = vst.msk [vmem:[#allocation3 + $0xec] sm:$0xf] %vm528_vm0, %v31217_v35  ;;  %565 = vst.msk [vmem:[#allocation3 + $0x114] sm:$0xf] %vm528_vm0, %v31217_v35  ;;  %26977 = vmatpush3.bf16.msra.mxu1 %v29634_v46 }
 0x143   : > { %26831 = vmatpush3.bf16.msra.mxu0 %v29588_v5  ;;  %566 = vst.msk [vmem:[#allocation3 + $0x13c] sm:$0xf] %vm528_vm0, %v31217_v35  ;;  %567 = vst.msk [vmem:[#allocation3 + $0x164] sm:$0xf] %vm528_vm0, %v31217_v35  ;;  %26978 = vmatprep.subr.bf16.mxu1 %v29643_v47 }
 0x144   : > { %26832 = vmatprep.subr.bf16.mxu0 %v29589_v6  ;;  %568 = vst [vmem:[#allocation4] sm:$0xf] %v31217_v35  ;;  %569 = vst [vmem:[#allocation4 + $0x4] sm:$0xf] %v31217_v35 }
 0x145   : > { %570 = vst [vmem:[#allocation4 + $0x8] sm:$0xf] %v31217_v35  ;;  %571 = vst [vmem:[#allocation4 + $0xc] sm:$0xf] %v31217_v35  ;;  %26915 = vmatmul.mubr.msk.bf16.gmra.mrb[4].mxu1 %vm1999_vm1, %v29628_v43 }
 0x146   : > { %572 = vst [vmem:[#allocation4 + $0x10] sm:$0xf] %v31217_v35  ;;  %573 = vst [vmem:[#allocation4 + $0x14] sm:$0xf] %v31217_v35  ;;  %26979 = vmatpush3.bf16.msra.mxu1 %v29643_v47 }
 0x147   : > { %26833 = vmatpush3.bf16.msra.mxu0 %v29589_v6  ;;  %574 = vst [vmem:[#allocation4 + $0x18] sm:$0xf] %v31217_v35  ;;  %575 = vst [vmem:[#allocation4 + $0x1c] sm:$0xf] %v31217_v35  ;;  %26980 = vmatprep.subr.bf16.mxu1 %v29652_v48 }
 0x148   : > { %26834 = vmatprep.subr.bf16.mxu0 %v29590_v7  ;;  %576 = vst [vmem:[#allocation4 + $0x20] sm:$0xf] %v31217_v35  ;;  %577 = vst [vmem:[#allocation4 + $0x24] sm:$0xf] %v31217_v35 }
 0x149   : > { %579 = vst [vmem:[#allocation4 + $0x168] sm:$0xf] %v31217_v35  ;;  %580 = vst [vmem:[#allocation4 + $0x16c] sm:$0xf] %v31217_v35 }
 0x14a   : > { %581 = vst [vmem:[#allocation4 + $0x170] sm:$0xf] %v31217_v35  ;;  %582 = vst [vmem:[#allocation4 + $0x174] sm:$0xf] %v31217_v35  ;;  %26981 = vmatpush3.bf16.msra.mxu1 %v29652_v48 }
 0x14b   : > { %26835 = vmatpush3.bf16.msra.mxu0 %v29590_v7  ;;  %583 = vst [vmem:[#allocation4 + $0x178] sm:$0xf] %v31217_v35  ;;  %584 = vst [vmem:[#allocation4 + $0x17c] sm:$0xf] %v31217_v35  ;;  %27046 = vmatprep.subr.bf16.mxu1 %v29661_v50 }
 0x14c   : > { %26836 = vmatprep.subr.bf16.mxu0 %v29591_v8  ;;  %585 = vst [vmem:[#allocation4 + $0x180] sm:$0xf] %v31217_v35  ;;  %586 = vst [vmem:[#allocation4 + $0x184] sm:$0xf] %v31217_v35 }
 0x14d   : > { %587 = vst [vmem:[#allocation4 + $0x188] sm:$0xf] %v31217_v35  ;;  %588 = vst [vmem:[#allocation4 + $0x18c] sm:$0xf] %v31217_v35 }
 0x14e   : > { %590 = vst [vmem:[#allocation4 + $0x28] sm:$0xf] %v31217_v35  ;;  %591 = vst [vmem:[#allocation4 + $0x50] sm:$0xf] %v31217_v35 }
 0x14f   : > { %26837 = vmatpush3.bf16.msra.mxu0 %v29591_v8  ;;  %592 = vst [vmem:[#allocation4 + $0x78] sm:$0xf] %v31217_v35  ;;  %593 = vst [vmem:[#allocation4 + $0xa0] sm:$0xf] %v31217_v35 }
 0x150   : > { %594 = vst [vmem:[#allocation4 + $0xc8] sm:$0xf] %v31217_v35  ;;  %595 = vst [vmem:[#allocation4 + $0xf0] sm:$0xf] %v31217_v35 }
 0x151   : > { %596 = vst [vmem:[#allocation4 + $0x118] sm:$0xf] %v31217_v35  ;;  %597 = vst [vmem:[#allocation4 + $0x140] sm:$0xf] %v31217_v35 }
 0x152   : > { %26839 = vmatmul.mubr.bf16.vlgmr.msra.gmra.mrb[0].mxu0 %v29593_v9  ;;  %599 = vst [vmem:[#allocation4 + $0x4c] sm:$0xf] %v31217_v35  ;;  %600 = vst [vmem:[#allocation4 + $0x74] sm:$0xf] %v31217_v35 }
 0x153   : > { %26842 = vmatprep.mubr.bf16.mxu0 %v29594_v10  ;;  %601 = vst [vmem:[#allocation4 + $0x9c] sm:$0xf] %v31217_v35  ;;  %602 = vst [vmem:[#allocation4 + $0xc4] sm:$0xf] %v31217_v35 }
 0x154   : > { %603 = vst [vmem:[#allocation4 + $0xec] sm:$0xf] %v31217_v35  ;;  %604 = vst [vmem:[#allocation4 + $0x114] sm:$0xf] %v31217_v35 }
 0x155   : > { %605 = vst [vmem:[#allocation4 + $0x13c] sm:$0xf] %v31217_v35  ;;  %606 = vst [vmem:[#allocation4 + $0x164] sm:$0xf] %v31217_v35 }
 0x15a   : > { %26843 = vmatmul.mubr.bf16.gmra.mrb[4].mxu0 %v29595_v11 }
 0x15b   : > { %26846 = vmatprep.mubr.bf16.mxu0 %v29596_v14 }
 0x162   : > { %26847 = vmatmul.mubr.bf16.gmra.mrb[8].mxu0 %v29597_v17 }
 0x163   : > { %26850 = vmatprep.mubr.bf16.mxu0 %v29598_v18 }
 0x16a   : > { %26851 = vmatmul.mubr.bf16.gmra.mrb[12].mxu0 %v29599_v19 }
 0x16b   : > { %26854 = vmatprep.mubr.bf16.mxu0 %v29600_v20 }
 0x172   : > { %26855 = vmatmul.mubr.bf16.gmra.mrb[16].mxu0 %v29601_v21 }
 0x173   : > { %26858 = vmatprep.mubr.bf16.mxu0 %v29602_v22 }
 0x17a   : > { %26859 = vmatmul.mubr.bf16.gmra.mrb[20].mxu0 %v29603_v23 }
 0x17b   : > { %26862 = vmatprep.mubr.bf16.mxu0 %v29604_v24 }
 0x182   : > { %26863 = vmatmul.mubr.bf16.gmra.mrb[24].mxu0 %v29605_v25 }
 0x183   : > { %26866 = vmatprep.mubr.bf16.mxu0 %v29606_v26 }
 0x18a   : > { %26867 = vmatmul.mubr.bf16.gmra.mrb[28].mxu0 %v29607_v27 }
 0x18b   : > { %26870 = vmatprep.mubr.bf16.mxu0 %v29608_v28 }
 0x192   : > { %26871 = vmatmul.mubr.bf16.gmra.mrb[32].mxu0 %v29609_v29 }
 0x193   : > { %26874 = vmatprep.mubr.bf16.mxu0 %v29610_v30 }
 0x19a   : > { %26875 = vmatmul.mubr.bf16.gmra.mrb[36].mxu0 %v29611_v31 }
 0x19b   : > { %26878 = vmatprep.mubr.bf16.mxu0 %v29612_v32 }
 0x1a2   : > { %26879 = vmatmul.mubr.bf16.gmra.mrb[40].mxu0 %v31681_v33 }
 0x1a3   : > { %26882 = vmatprep.mubr.bf16.mxu0 %v31684_v34 }
 0x1aa   : > { %26883 = vmatmul.mubr.bf16.gmra.mrb[44].mxu0 %v29615_v36 }
 0x1ab   : > { %26886 = vmatprep.mubr.bf16.mxu0 %v29616_v37 }
 0x1b2   : > { %26887 = vmatmul.mubr.bf16.gmra.mrb[48].mxu0 %v29617_v40 }
 0x1b3   : > { %26890 = vmatprep.mubr.bf16.mxu0 %v29618_v41 }
 0x1ba   : > { %26891 = vmatmul.mubr.bf16.gmra.mrb[52].mxu0 %v29619_v45 }
 0x225   : > { %v26840_v51 = vpop.f32.mrb[0].mxu0 }
 0x226   : > { %v977_v52 = vadd.f32 %v26840_v51, %v31805_v49  ;;  %v968_v53 = vpop.f32.mrb[1].mxu0 }
 0x227   : > { %v969_v54 = vadd.f32 %v31805_v49, %v968_v53  ;;  %v26841_v55 = vpop.f32.mrb[2].mxu0 }
 0x228   : > { %v1225_v56 = vmax.f32 %v977_v52, 0.0  ;;  %v980_v57 = vadd.f32 %v26841_v55, %v31805_v49  ;;  %v971_v58 = vpop.f32.mrb[3].mxu0 }
 0x229   : > { %v1223_v59 = vmax.f32 %v969_v54, 0.0  ;;  %v972_v60 = vadd.f32 %v31805_v49, %v971_v58 }
 0x22a   : > { %v24860_v61 = vpack.c.bf16 %v1225_v56, %v1225_v56  ;;  %v1226_v62 = vmax.f32 %v980_v57, 0.0 }
 0x22b   : > { %v24858_v63 = vpack.c.bf16 %v1223_v59, %v1223_v59  ;;  %v1224_v0 = vmax.f32 %v972_v60, 0.0 }
 0x22c   : > { %1546 = vst.msk [vmem:[#allocation3 + $0x34] sm:$0xf] %vm528_vm0, %v24860_v61  ;;  %v24861_v1 = vpack.c.bf16 %v1226_v62, %v1226_v62 }
 0x22d   : > { %1544 = vst.msk [vmem:[#allocation3 + $0x2c] sm:$0xf] %vm528_vm0, %v24858_v63  ;;  %v24859_v2 = vpack.c.bf16 %v1224_v0, %v1224_v0  ;;  %v26844_v3 = vpop.f32.mrb[4].mxu0 }
 0x22e   : > { %1547 = vst.msk [vmem:[#allocation3 + $0x38] sm:$0xf] %vm528_vm0, %v24861_v1  ;;  %v993_v4 = vadd.f32 %v26844_v3, %v31805_v49  ;;  %v984_v5 = vpop.f32.mrb[5].mxu0 }
 0x22f   : > { %1545 = vst.msk [vmem:[#allocation3 + $0x30] sm:$0xf] %vm528_vm0, %v24859_v2  ;;  %v985_v6 = vadd.f32 %v31805_v49, %v984_v5  ;;  %v26845_v7 = vpop.f32.mrb[6].mxu0 }
 0x230   : > { %v1229_v8 = vmax.f32 %v993_v4, 0.0  ;;  %v996_v9 = vadd.f32 %v26845_v7, %v31805_v49  ;;  %v987_v10 = vpop.f32.mrb[7].mxu0 }
 0x231   : > { %v1227_v11 = vmax.f32 %v985_v6, 0.0  ;;  %v988_v12 = vadd.f32 %v31805_v49, %v987_v10 }
 0x232   : > { %v24864_v13 = vpack.c.bf16 %v1229_v8, %v1229_v8  ;;  %v1230_v14 = vmax.f32 %v996_v9, 0.0 }
 0x233   : > { %v24862_v15 = vpack.c.bf16 %v1227_v11, %v1227_v11  ;;  %v1228_v16 = vmax.f32 %v988_v12, 0.0 }
 0x234   : > { %1550 = vst.msk [vmem:[#allocation3 + $0x44] sm:$0xf] %vm528_vm0, %v24864_v13  ;;  %v24865_v17 = vpack.c.bf16 %v1230_v14, %v1230_v14  ;;  %v29629_v18 = vld [vmem:[#allocation3 + $0x28] sm:$0xff]  }
 0x235   : > { %1548 = vst.msk [vmem:[#allocation3 + $0x3c] sm:$0xf] %vm528_vm0, %v24862_v15  ;;  %v24863_v19 = vpack.c.bf16 %v1228_v16, %v1228_v16  ;;  %v26848_v20 = vpop.f32.mrb[8].mxu0  ;;  %26918 = vmatprep.mubr.msk.bf16.mxu1 %vm1999_vm1, %v29629_v18 }
 0x236   : > { %1551 = vst.msk [vmem:[#allocation3 + $0x48] sm:$0xf] %vm528_vm0, %v24865_v17  ;;  %v1009_v21 = vadd.f32 %v26848_v20, %v31805_v49  ;;  %v1000_v22 = vpop.f32.mrb[9].mxu0  ;;  %v29630_v23 = vld [vmem:[#allocation3 + $0x30] sm:$0xff]  }
 0x237   : > { %1549 = vst.msk [vmem:[#allocation3 + $0x40] sm:$0xf] %vm528_vm0, %v24863_v19  ;;  %v1001_v24 = vadd.f32 %v31805_v49, %v1000_v22  ;;  %v26849_v25 = vpop.f32.mrb[10].mxu0  ;;  %26919 = vmatmul.mubr.msk.bf16.gmra.mrb[8].mxu1 %vm1999_vm1, %v29630_v23 }
 0x238   : > { %v1233_v26 = vmax.f32 %v1009_v21, 0.0  ;;  %v1012_v27 = vadd.f32 %v26849_v25, %v31805_v49  ;;  %v1003_v28 = vpop.f32.mrb[11].mxu0 }
 0x239   : > { %v1231_v29 = vmax.f32 %v1001_v24, 0.0  ;;  %v1004_v30 = vadd.f32 %v31805_v49, %v1003_v28 }
 0x23a   : > { %v24868_v31 = vpack.c.bf16 %v1233_v26, %v1233_v26  ;;  %v1234_v32 = vmax.f32 %v1012_v27, 0.0 }
 0x23b   : > { %v24866_v33 = vpack.c.bf16 %v1231_v29, %v1231_v29  ;;  %v1232_v34 = vmax.f32 %v1004_v30, 0.0 }
 0x23c   : > { %1554 = vst.msk [vmem:[#allocation3 + $0x5c] sm:$0xf] %vm528_vm0, %v24868_v31  ;;  %v24869_v35 = vpack.c.bf16 %v1234_v32, %v1234_v32  ;;  %v29631_v36 = vld [vmem:[#allocation3 + $0x38] sm:$0xff]  }
 0x23d   : > { %1552 = vst.msk [vmem:[#allocation3 + $0x54] sm:$0xf] %vm528_vm0, %v24866_v33  ;;  %v24867_v37 = vpack.c.bf16 %v1232_v34, %v1232_v34  ;;  %v26852_v38 = vpop.f32.mrb[12].mxu0  ;;  %26922 = vmatprep.mubr.msk.bf16.mxu1 %vm1999_vm1, %v29631_v36 }
 0x23e   : > { %1555 = vst.msk [vmem:[#allocation3 + $0x60] sm:$0xf] %vm528_vm0, %v24869_v35  ;;  %v1025_v39 = vadd.f32 %v26852_v38, %v31805_v49  ;;  %v1016_v40 = vpop.f32.mrb[13].mxu0  ;;  %v29632_v41 = vld [vmem:[#allocation3 + $0x40] sm:$0xff]  }
 0x23f   : > { %1553 = vst.msk [vmem:[#allocation3 + $0x58] sm:$0xf] %vm528_vm0, %v24867_v37  ;;  %v1017_v42 = vadd.f32 %v31805_v49, %v1016_v40  ;;  %v26853_v43 = vpop.f32.mrb[14].mxu0  ;;  %26923 = vmatmul.mubr.msk.bf16.gmra.mrb[12].mxu1 %vm1999_vm1, %v29632_v41 }
 0x240   : > { %v1237_v44 = vmax.f32 %v1025_v39, 0.0  ;;  %v1028_v45 = vadd.f32 %v26853_v43, %v31805_v49  ;;  %v1019_v46 = vpop.f32.mrb[15].mxu0 }
 0x241   : > { %v1235_v47 = vmax.f32 %v1017_v42, 0.0  ;;  %v1020_v48 = vadd.f32 %v31805_v49, %v1019_v46 }
 0x242   : > { %v24872_v50 = vpack.c.bf16 %v1237_v44, %v1237_v44  ;;  %v1238_v51 = vmax.f32 %v1028_v45, 0.0 }
 0x243   : > { %v24870_v52 = vpack.c.bf16 %v1235_v47, %v1235_v47  ;;  %v1236_v53 = vmax.f32 %v1020_v48, 0.0 }
 0x244   : > { %1558 = vst.msk [vmem:[#allocation3 + $0x6c] sm:$0xf] %vm528_vm0, %v24872_v50  ;;  %v24873_v54 = vpack.c.bf16 %v1238_v51, %v1238_v51  ;;  %v29633_v55 = vld [vmem:[#allocation3 + $0x50] sm:$0xff]  }
 0x245   : > { %1556 = vst.msk [vmem:[#allocation3 + $0x64] sm:$0xf] %vm528_vm0, %v24870_v52  ;;  %v24871_v56 = vpack.c.bf16 %v1236_v53, %v1236_v53  ;;  %v26856_v57 = vpop.f32.mrb[16].mxu0  ;;  %26926 = vmatprep.mubr.msk.bf16.mxu1 %vm1999_vm1, %v29633_v55 }
 0x246   : > { %1559 = vst.msk [vmem:[#allocation3 + $0x70] sm:$0xf] %vm528_vm0, %v24873_v54  ;;  %v1041_v58 = vadd.f32 %v26856_v57, %v31805_v49  ;;  %v1032_v59 = vpop.f32.mrb[17].mxu0  ;;  %v29635_v60 = vld [vmem:[#allocation3 + $0x58] sm:$0xff]  }
 0x247   : > { %1557 = vst.msk [vmem:[#allocation3 + $0x68] sm:$0xf] %vm528_vm0, %v24871_v56  ;;  %v1033_v61 = vadd.f32 %v31805_v49, %v1032_v59  ;;  %v26857_v62 = vpop.f32.mrb[18].mxu0  ;;  %26927 = vmatmul.mubr.msk.bf16.gmra.mrb[16].mxu1 %vm1999_vm1, %v29635_v60 }
 0x248   : > { %v1241_v63 = vmax.f32 %v1041_v58, 0.0  ;;  %v1044_v0 = vadd.f32 %v26857_v62, %v31805_v49  ;;  %v1035_v1 = vpop.f32.mrb[19].mxu0 }
 0x249   : > { %v1239_v2 = vmax.f32 %v1033_v61, 0.0  ;;  %v1036_v3 = vadd.f32 %v31805_v49, %v1035_v1 }
 0x24a   : > { %v24876_v4 = vpack.c.bf16 %v1241_v63, %v1241_v63  ;;  %v1242_v5 = vmax.f32 %v1044_v0, 0.0 }
 0x24b   : > { %v24874_v6 = vpack.c.bf16 %v1239_v2, %v1239_v2  ;;  %v1240_v7 = vmax.f32 %v1036_v3, 0.0 }
 0x24c   : > { %1562 = vst.msk [vmem:[#allocation3 + $0x84] sm:$0xf] %vm528_vm0, %v24876_v4  ;;  %v24877_v8 = vpack.c.bf16 %v1242_v5, %v1242_v5  ;;  %v29636_v9 = vld [vmem:[#allocation3 + $0x60] sm:$0xff]  }
 0x24d   : > { %1560 = vst.msk [vmem:[#allocation3 + $0x7c] sm:$0xf] %vm528_vm0, %v24874_v6  ;;  %v24875_v10 = vpack.c.bf16 %v1240_v7, %v1240_v7  ;;  %v26860_v11 = vpop.f32.mrb[20].mxu0  ;;  %26930 = vmatprep.mubr.msk.bf16.mxu1 %vm1999_vm1, %v29636_v9 }
 0x24e   : > { %1563 = vst.msk [vmem:[#allocation3 + $0x88] sm:$0xf] %vm528_vm0, %v24877_v8  ;;  %v1057_v12 = vadd.f32 %v26860_v11, %v31805_v49  ;;  %v1048_v13 = vpop.f32.mrb[21].mxu0  ;;  %v29637_v14 = vld [vmem:[#allocation3 + $0x68] sm:$0xff]  }
 0x24f   : > { %1561 = vst.msk [vmem:[#allocation3 + $0x80] sm:$0xf] %vm528_vm0, %v24875_v10  ;;  %v1049_v15 = vadd.f32 %v31805_v49, %v1048_v13  ;;  %v26861_v16 = vpop.f32.mrb[22].mxu0  ;;  %26931 = vmatmul.mubr.msk.bf16.gmra.mrb[20].mxu1 %vm1999_vm1, %v29637_v14 }
 0x250   : > { %v1245_v17 = vmax.f32 %v1057_v12, 0.0  ;;  %v1060_v18 = vadd.f32 %v26861_v16, %v31805_v49  ;;  %v1051_v19 = vpop.f32.mrb[23].mxu0 }
 0x251   : > { %v1243_v20 = vmax.f32 %v1049_v15, 0.0  ;;  %v1052_v21 = vadd.f32 %v31805_v49, %v1051_v19 }
 0x252   : > { %v24880_v22 = vpack.c.bf16 %v1245_v17, %v1245_v17  ;;  %v1246_v23 = vmax.f32 %v1060_v18, 0.0 }
 0x253   : > { %v24878_v24 = vpack.c.bf16 %v1243_v20, %v1243_v20  ;;  %v1244_v25 = vmax.f32 %v1052_v21, 0.0 }
 0x254   : > { %1566 = vst.msk [vmem:[#allocation3 + $0x94] sm:$0xf] %vm528_vm0, %v24880_v22  ;;  %v24881_v26 = vpack.c.bf16 %v1246_v23, %v1246_v23  ;;  %v29638_v27 = vld [vmem:[#allocation3 + $0x78] sm:$0xff]  }
 0x255   : > { %1564 = vst.msk [vmem:[#allocation3 + $0x8c] sm:$0xf] %vm528_vm0, %v24878_v24  ;;  %v24879_v28 = vpack.c.bf16 %v1244_v25, %v1244_v25  ;;  %v26864_v29 = vpop.f32.mrb[24].mxu0  ;;  %26934 = vmatprep.mubr.msk.bf16.mxu1 %vm1999_vm1, %v29638_v27 }
 0x256   : > { %1567 = vst.msk [vmem:[#allocation3 + $0x98] sm:$0xf] %vm528_vm0, %v24881_v26  ;;  %v1073_v30 = vadd.f32 %v26864_v29, %v31805_v49  ;;  %v1064_v31 = vpop.f32.mrb[25].mxu0  ;;  %v29639_v32 = vld [vmem:[#allocation3 + $0x80] sm:$0xff]  }
 0x257   : > { %1565 = vst.msk [vmem:[#allocation3 + $0x90] sm:$0xf] %vm528_vm0, %v24879_v28  ;;  %v1065_v33 = vadd.f32 %v31805_v49, %v1064_v31  ;;  %v26865_v34 = vpop.f32.mrb[26].mxu0  ;;  %26935 = vmatmul.mubr.msk.bf16.gmra.mrb[24].mxu1 %vm1999_vm1, %v29639_v32 }
 0x258   : > { %v1249_v35 = vmax.f32 %v1073_v30, 0.0  ;;  %v1076_v36 = vadd.f32 %v26865_v34, %v31805_v49  ;;  %v1067_v37 = vpop.f32.mrb[27].mxu0 }
 0x259   : > { %v1247_v38 = vmax.f32 %v1065_v33, 0.0  ;;  %v1068_v39 = vadd.f32 %v31805_v49, %v1067_v37 }
 0x25a   : > { %v24884_v40 = vpack.c.bf16 %v1249_v35, %v1249_v35  ;;  %v1250_v41 = vmax.f32 %v1076_v36, 0.0 }
 0x25b   : > { %v24882_v42 = vpack.c.bf16 %v1247_v38, %v1247_v38  ;;  %v1248_v43 = vmax.f32 %v1068_v39, 0.0 }
 0x25c   : > { %1570 = vst.msk [vmem:[#allocation3 + $0xac] sm:$0xf] %vm528_vm0, %v24884_v40  ;;  %v24885_v44 = vpack.c.bf16 %v1250_v41, %v1250_v41  ;;  %v29640_v45 = vld [vmem:[#allocation3 + $0x88] sm:$0xff]  }
 0x25d   : > { %1568 = vst.msk [vmem:[#allocation3 + $0xa4] sm:$0xf] %vm528_vm0, %v24882_v42  ;;  %v24883_v46 = vpack.c.bf16 %v1248_v43, %v1248_v43  ;;  %v26868_v47 = vpop.f32.mrb[28].mxu0  ;;  %26938 = vmatprep.mubr.msk.bf16.mxu1 %vm1999_vm1, %v29640_v45 }
 0x25e   : > { %1571 = vst.msk [vmem:[#allocation3 + $0xb0] sm:$0xf] %vm528_vm0, %v24885_v44  ;;  %v1089_v48 = vadd.f32 %v26868_v47, %v31805_v49  ;;  %v1080_v50 = vpop.f32.mrb[29].mxu0  ;;  %v29641_v51 = vld [vmem:[#allocation3 + $0x90] sm:$0xff]  }
 0x25f   : > { %1569 = vst.msk [vmem:[#allocation3 + $0xa8] sm:$0xf] %vm528_vm0, %v24883_v46  ;;  %v1081_v52 = vadd.f32 %v31805_v49, %v1080_v50  ;;  %v26869_v53 = vpop.f32.mrb[30].mxu0  ;;  %26939 = vmatmul.mubr.msk.bf16.gmra.mrb[28].mxu1 %vm1999_vm1, %v29641_v51 }
 0x260   : > { %v1253_v54 = vmax.f32 %v1089_v48, 0.0  ;;  %v1092_v55 = vadd.f32 %v26869_v53, %v31805_v49  ;;  %v1083_v56 = vpop.f32.mrb[31].mxu0 }
 0x261   : > { %v1251_v57 = vmax.f32 %v1081_v52, 0.0  ;;  %v1084_v58 = vadd.f32 %v31805_v49, %v1083_v56 }
 0x262   : > { %v24888_v59 = vpack.c.bf16 %v1253_v54, %v1253_v54  ;;  %v1254_v60 = vmax.f32 %v1092_v55, 0.0 }
 0x263   : > { %v24886_v61 = vpack.c.bf16 %v1251_v57, %v1251_v57  ;;  %v1252_v62 = vmax.f32 %v1084_v58, 0.0 }
 0x264   : > { %1574 = vst.msk [vmem:[#allocation3 + $0xbc] sm:$0xf] %vm528_vm0, %v24888_v59  ;;  %v24889_v63 = vpack.c.bf16 %v1254_v60, %v1254_v60  ;;  %v29642_v0 = vld [vmem:[#allocation3 + $0xa0] sm:$0xff]  }
 0x265   : > { %1572 = vst.msk [vmem:[#allocation3 + $0xb4] sm:$0xf] %vm528_vm0, %v24886_v61  ;;  %v24887_v1 = vpack.c.bf16 %v1252_v62, %v1252_v62  ;;  %v26872_v2 = vpop.f32.mrb[32].mxu0  ;;  %26942 = vmatprep.mubr.msk.bf16.mxu1 %vm1999_vm1, %v29642_v0 }
 0x266   : > { %1575 = vst.msk [vmem:[#allocation3 + $0xc0] sm:$0xf] %vm528_vm0, %v24889_v63  ;;  %v1105_v3 = vadd.f32 %v26872_v2, %v31805_v49  ;;  %v1096_v4 = vpop.f32.mrb[33].mxu0  ;;  %v29644_v5 = vld [vmem:[#allocation3 + $0xa8] sm:$0xff]  }
 0x267   : > { %1573 = vst.msk [vmem:[#allocation3 + $0xb8] sm:$0xf] %vm528_vm0, %v24887_v1  ;;  %v1097_v6 = vadd.f32 %v31805_v49, %v1096_v4  ;;  %v26873_v7 = vpop.f32.mrb[34].mxu0  ;;  %26943 = vmatmul.mubr.msk.bf16.gmra.mrb[32].mxu1 %vm1999_vm1, %v29644_v5 }
 0x268   : > { %v1257_v8 = vmax.f32 %v1105_v3, 0.0  ;;  %v1108_v9 = vadd.f32 %v26873_v7, %v31805_v49  ;;  %v1099_v10 = vpop.f32.mrb[35].mxu0 }
 0x269   : > { %v1255_v11 = vmax.f32 %v1097_v6, 0.0  ;;  %v1100_v12 = vadd.f32 %v31805_v49, %v1099_v10 }
 0x26a   : > { %v24892_v13 = vpack.c.bf16 %v1257_v8, %v1257_v8  ;;  %v1258_v14 = vmax.f32 %v1108_v9, 0.0 }
 0x26b   : > { %v24890_v15 = vpack.c.bf16 %v1255_v11, %v1255_v11  ;;  %v1256_v16 = vmax.f32 %v1100_v12, 0.0 }
 0x26c   : > { %1578 = vst.msk [vmem:[#allocation3 + $0xd4] sm:$0xf] %vm528_vm0, %v24892_v13  ;;  %v24893_v17 = vpack.c.bf16 %v1258_v14, %v1258_v14  ;;  %v29645_v18 = vld [vmem:[#allocation3 + $0xb0] sm:$0xff]  }
 0x26d   : > { %1576 = vst.msk [vmem:[#allocation3 + $0xcc] sm:$0xf] %vm528_vm0, %v24890_v15  ;;  %v24891_v19 = vpack.c.bf16 %v1256_v16, %v1256_v16  ;;  %v26876_v20 = vpop.f32.mrb[36].mxu0  ;;  %26946 = vmatprep.mubr.msk.bf16.mxu1 %vm1999_vm1, %v29645_v18 }
 0x26e   : > { %1579 = vst.msk [vmem:[#allocation3 + $0xd8] sm:$0xf] %vm528_vm0, %v24893_v17  ;;  %v1121_v21 = vadd.f32 %v26876_v20, %v31805_v49  ;;  %v1112_v22 = vpop.f32.mrb[37].mxu0  ;;  %v29646_v23 = vld [vmem:[#allocation3 + $0xb8] sm:$0xff]  }
 0x26f   : > { %1577 = vst.msk [vmem:[#allocation3 + $0xd0] sm:$0xf] %vm528_vm0, %v24891_v19  ;;  %v1113_v24 = vadd.f32 %v31805_v49, %v1112_v22  ;;  %v26877_v25 = vpop.f32.mrb[38].mxu0  ;;  %26947 = vmatmul.mubr.msk.bf16.gmra.mrb[36].mxu1 %vm1999_vm1, %v29646_v23 }
 0x270   : > { %v1261_v26 = vmax.f32 %v1121_v21, 0.0  ;;  %v1124_v27 = vadd.f32 %v26877_v25, %v31805_v49  ;;  %v1115_v28 = vpop.f32.mrb[39].mxu0 }
 0x271   : > { %v1259_v29 = vmax.f32 %v1113_v24, 0.0  ;;  %v1116_v30 = vadd.f32 %v31805_v49, %v1115_v28 }
 0x272   : > { %v24896_v31 = vpack.c.bf16 %v1261_v26, %v1261_v26  ;;  %v1262_v32 = vmax.f32 %v1124_v27, 0.0 }
 0x273   : > { %v24894_v33 = vpack.c.bf16 %v1259_v29, %v1259_v29  ;;  %v1260_v34 = vmax.f32 %v1116_v30, 0.0  ;;  %v30828_v30 = vld [vmem:[#allocation9] ss:$0 sm:$0xff] }
 0x274   : > { %1582 = vst.msk [vmem:[#allocation3 + $0xe4] sm:$0xf] %vm528_vm0, %v24896_v31  ;;  %v24897_v35 = vpack.c.bf16 %v1262_v32, %v1262_v32  ;;  %v29647_v36 = vld [vmem:[#allocation3 + $0xc8] sm:$0xff]  }
 0x275   : > { %1580 = vst.msk [vmem:[#allocation3 + $0xdc] sm:$0xf] %vm528_vm0, %v24894_v33  ;;  %v24895_v37 = vpack.c.bf16 %v1260_v34, %v1260_v34  ;;  %v26880_v38 = vpop.f32.mrb[40].mxu0  ;;  %26950 = vmatprep.mubr.msk.bf16.mxu1 %vm1999_vm1, %v29647_v36 }
 0x276   : > { %1583 = vst.msk [vmem:[#allocation3 + $0xe8] sm:$0xf] %vm528_vm0, %v24897_v35  ;;  %v1137_v39 = vadd.f32 %v26880_v38, %v31805_v49  ;;  %v1128_v40 = vpop.f32.mrb[41].mxu0  ;;  %v29648_v41 = vld [vmem:[#allocation3 + $0xd0] sm:$0xff]  }
 0x277   : > { %1581 = vst.msk [vmem:[#allocation3 + $0xe0] sm:$0xf] %vm528_vm0, %v24895_v37  ;;  %v1129_v42 = vadd.f32 %v31805_v49, %v1128_v40  ;;  %v26881_v43 = vpop.f32.mrb[42].mxu0  ;;  %26951 = vmatmul.mubr.msk.bf16.gmra.mrb[40].mxu1 %vm1999_vm1, %v29648_v41 }
 0x278   : > { %v1265_v44 = vmax.f32 %v1137_v39, 0.0  ;;  %v1140_v45 = vadd.f32 %v26881_v43, %v31805_v49  ;;  %v1131_v46 = vpop.f32.mrb[43].mxu0 }
 0x279   : > { %v1263_v47 = vmax.f32 %v1129_v42, 0.0  ;;  %v1132_v48 = vadd.f32 %v31805_v49, %v1131_v46 }
 0x27a   : > { %v24900_v50 = vpack.c.bf16 %v1265_v44, %v1265_v44  ;;  %v1266_v51 = vmax.f32 %v1140_v45, 0.0 }
 0x27b   : > { %v24898_v52 = vpack.c.bf16 %v1263_v47, %v1263_v47  ;;  %v1264_v53 = vmax.f32 %v1132_v48, 0.0 }
 0x27c   : > { %1586 = vst.msk [vmem:[#allocation3 + $0xfc] sm:$0xf] %vm528_vm0, %v24900_v50  ;;  %v24901_v54 = vpack.c.bf16 %v1266_v51, %v1266_v51  ;;  %v29649_v55 = vld [vmem:[#allocation3 + $0xd8] sm:$0xff]   ;;  %v29660_v50 = vld [vmem:[#allocation3 + $0x4] sm:$0xff]  }
 0x27d   : > { %1584 = vst.msk [vmem:[#allocation3 + $0xf4] sm:$0xf] %vm528_vm0, %v24898_v52  ;;  %v24899_v56 = vpack.c.bf16 %v1264_v53, %v1264_v53  ;;  %v26884_v57 = vpop.f32.mrb[44].mxu0  ;;  %26954 = vmatprep.mubr.msk.bf16.mxu1 %vm1999_vm1, %v29649_v55  ;;  %v29696_v52 = vld [vmem:[%s31609_s15 + $0xe0] sm:$0xff]   ;;  %v29699_v53 = vld [vmem:[%s31609_s15 + $0xe8] sm:$0xff]   ;;  %v29663_v55 = vld [vmem:[#allocation3 + $0x14] sm:$0xff]  }
 0x27e   : > { %1587 = vst.msk [vmem:[#allocation3 + $0x100] sm:$0xf] %vm528_vm0, %v24901_v54  ;;  %v1153_v58 = vadd.f32 %v26884_v57, %v31805_v49  ;;  %v1144_v59 = vpop.f32.mrb[45].mxu0  ;;  %v29650_v60 = vld [vmem:[#allocation3 + $0xe0] sm:$0xff]   ;;  %v29662_v54 = vld [vmem:[#allocation3 + $0xc] sm:$0xff]   ;;  %26894 = vmatprep.mubr.bf16.mxu0 %v29696_v52 }
 0x27f   : > { %1585 = vst.msk [vmem:[#allocation3 + $0xf8] sm:$0xf] %vm528_vm0, %v24899_v56  ;;  %v1145_v61 = vadd.f32 %v31805_v49, %v1144_v59  ;;  %v26885_v62 = vpop.f32.mrb[46].mxu0  ;;  %26955 = vmatmul.mubr.msk.bf16.gmra.mrb[44].mxu1 %vm1999_vm1, %v29650_v60  ;;  %26895 = vmatmul.mubr.bf16.gmra.mrb[56].mxu0 %v29699_v53  ;;  %v29670_v56 = vld [vmem:[#allocation11 + $0x48] sm:$0xff]   ;;  %v30829_v57 = vld [vmem:[#allocation11 + $0x40] sm:$0xff]   ;;  %v29703_v59 = vld [vmem:[%s31609_s15 + $0xf8] sm:$0xff]  }
 0x280   : > { %v1269_v63 = vmax.f32 %v1153_v58, 0.0  ;;  %v1156_v0 = vadd.f32 %v26885_v62, %v31805_v49  ;;  %v1147_v1 = vpop.f32.mrb[47].mxu0  ;;  %v29701_v58 = vld [vmem:[%s31609_s15 + $0xf0] sm:$0xff]   ;;  %v29664_v60 = vld [vmem:[#allocation3 + $0x1c] sm:$0xff]   ;;  %s23123_s15 = sshll.u32 %s31605_s28, 3 }
 0x281   : > { %v1267_v2 = vmax.f32 %v1145_v61, 0.0  ;;  %v1148_v3 = vadd.f32 %v31805_v49, %v1147_v1  ;;  %v29679_v61 = vld [vmem:[#allocation11 + $0x50] sm:$0xff]   ;;  %26898 = vmatprep.mubr.bf16.mxu0 %v29701_v58  ;;  %v29688_v62 = vld [vmem:[#allocation11 + $0x58] sm:$0xff]   ;;  %s525_s25 = scalar_lea.vmem [#allocation23], %s23123_s15 }
 0x282   : > { %v24904_v4 = vpack.c.bf16 %v1269_v63, %v1269_v63  ;;  %v1270_v5 = vmax.f32 %v1156_v0, 0.0  ;;  %v29665_v63 = vld [vmem:[#allocation3 + $0x2c] sm:$0xff]   ;;  %v31952_v0 = vld [vmem:[#allocation11 + $0x60] sm:$0xff]   ;;  %v29666_v1 = vld [vmem:[#allocation3 + $0x34] sm:$0xff]   ;;  %s22941_s30 = sshll.u32 %s525_s25, 4  ;;  %s32599_s30 = int_to_ptr.vmem [resolvable:$true] %s22941_s30 }
 0x283   : > { %v24902_v6 = vpack.c.bf16 %v1267_v2, %v1267_v2  ;;  %v1268_v7 = vmax.f32 %v1148_v3, 0.0  ;;  %v29667_v2 = vld [vmem:[#allocation3 + $0x3c] sm:$0xff]   ;;  %v29668_v3 = vld [vmem:[#allocation3 + $0x44] sm:$0xff]   ;;  %v29723_v52 = vld [vmem:[#allocation3 + $0xd0] sm:$0xff]   ;;  %s31117_s23 = scalar_lea.vmem %s32599_s30, 128  ;;  %p31124_p6 = scmp.lt.s32.totalorder %s32599_s30, %s31122_s12 }
 0x284   : > { %1590 = vst.msk [vmem:[#allocation3 + $0x10c] sm:$0xf] %vm528_vm0, %v24904_v4  ;;  %v24905_v8 = vpack.c.bf16 %v1270_v5, %v1270_v5  ;;  %v29651_v9 = vld [vmem:[#allocation3 + $0xf0] sm:$0xff]   ;;  %v29671_v5 = vld [vmem:[#allocation3 + $0x5c] sm:$0xff]   ;;  %p31118_p1 = scmp.ne.s32.totalorder %s32599_s30, %s31117_s23  ;;  %p31125_p11 = scmp.lt.s32.totalorder %s31123_s4, %s31117_s23 }
 0x285   : > { %1588 = vst.msk [vmem:[#allocation3 + $0x104] sm:$0xf] %vm528_vm0, %v24902_v6  ;;  %v24903_v10 = vpack.c.bf16 %v1268_v7, %v1268_v7  ;;  %v26888_v11 = vpop.f32.mrb[48].mxu0  ;;  %26958 = vmatprep.mubr.msk.bf16.mxu1 %vm1999_vm1, %v29651_v9  ;;  %v29669_v4 = vld [vmem:[#allocation3 + $0x54] sm:$0xff]   ;;  %v29672_v6 = vld [vmem:[#allocation3 + $0x64] sm:$0xff]   ;;  %v29673_v7 = vld [vmem:[#allocation3 + $0x6c] sm:$0xff]  }
 0x286   : > { %1591 = vst.msk [vmem:[#allocation3 + $0x110] sm:$0xf] %vm528_vm0, %v24905_v8  ;;  %v1169_v12 = vadd.f32 %v26888_v11, %v31805_v49  ;;  %v1160_v13 = vpop.f32.mrb[49].mxu0  ;;  %v29653_v14 = vld [vmem:[#allocation3 + $0xf8] sm:$0xff]   ;;  %v29675_v9 = vld [vmem:[#allocation3 + $0x84] sm:$0xff]   ;;  %p31119_p2 = pnand %p31118_p1, %p32687_p3  ;;  %p31126_p12 = por %p31125_p11, %p31124_p6 }
 0x287   : > { %1589 = vst.msk [vmem:[#allocation3 + $0x108] sm:$0xf] %vm528_vm0, %v24903_v10  ;;  %v1161_v15 = vadd.f32 %v31805_v49, %v1160_v13  ;;  %v26889_v16 = vpop.f32.mrb[50].mxu0  ;;  %26959 = vmatmul.mubr.msk.bf16.gmra.mrb[48].mxu1 %vm1999_vm1, %v29653_v14  ;;  %26899 = vmatmul.mubr.bf16.gmra.mrb[60].mxu0 %v29703_v59  ;;  %v29674_v8 = vld [vmem:[#allocation3 + $0x7c] sm:$0xff]   ;;  %v29676_v10 = vld [vmem:[#allocation3 + $0x8c] sm:$0xff]   ;;  %v29677_v11 = vld [vmem:[#allocation3 + $0x94] sm:$0xff]  }
 0x288   : > { %v1273_v17 = vmax.f32 %v1169_v12, 0.0  ;;  %v1172_v18 = vadd.f32 %v26889_v16, %v31805_v49  ;;  %v1163_v19 = vpop.f32.mrb[51].mxu0  ;;  %v29678_v12 = vld [vmem:[#allocation3 + $0xa4] sm:$0xff]   ;;  %v29680_v13 = vld [vmem:[#allocation3 + $0xac] sm:$0xff]   ;;  %v29681_v14 = vld [vmem:[#allocation3 + $0xb4] sm:$0xff]   ;;  %p31120_p8 = pneg %p31119_p2 }
 0x289   : > { %v1271_v20 = vmax.f32 %v1161_v15, 0.0  ;;  %v1164_v21 = vadd.f32 %v31805_v49, %v1163_v19  ;;  %v29682_v15 = vld [vmem:[#allocation3 + $0xbc] sm:$0xff]   ;;  %v29683_v16 = vld [vmem:[#allocation3 + $0xcc] sm:$0xff]   ;;  %v29686_v19 = vld [vmem:[#allocation3 + $0xe4] sm:$0xff]  }
 0x28a   : > { %v24908_v22 = vpack.c.bf16 %v1273_v17, %v1273_v17  ;;  %v1274_v23 = vmax.f32 %v1172_v18, 0.0  ;;  %v29684_v17 = vld [vmem:[#allocation3 + $0xd4] sm:$0xff]   ;;  %v29685_v18 = vld [vmem:[#allocation3 + $0xdc] sm:$0xff]   ;;  %p31127_p0 = pnand %p31126_p12, %p31120_p8 }
 0x28b   : > { %v24906_v24 = vpack.c.bf16 %v1271_v20, %v1271_v20  ;;  %v1272_v25 = vmax.f32 %v1164_v21, 0.0  ;;  %v29687_v20 = vld [vmem:[#allocation3 + $0xf4] sm:$0xff]   ;;  %v29689_v21 = vld [vmem:[#allocation3 + $0xfc] sm:$0xff]  }
 0x28c   : > { %1594 = vst.msk [vmem:[#allocation3 + $0x124] sm:$0xf] %vm528_vm0, %v24908_v22  ;;  %v24909_v26 = vpack.c.bf16 %v1274_v23, %v1274_v23  ;;  %v29654_v27 = vld [vmem:[#allocation3 + $0x100] sm:$0xff]   ;;  %v29724_v53 = vld [vmem:[#allocation3 + $0xd8] sm:$0xff]  }
 0x28d   : > { %1592 = vst.msk [vmem:[#allocation3 + $0x11c] sm:$0xf] %vm528_vm0, %v24906_v24  ;;  %v24907_v28 = vpack.c.bf16 %v1272_v25, %v1272_v25  ;;  %v26892_v29 = vpop.f32.mrb[52].mxu0  ;;  %26962 = vmatprep.mubr.msk.bf16.mxu1 %vm1999_vm1, %v29654_v27  ;;  %v29691_v23 = vld [vmem:[#allocation3 + $0x10c] sm:$0xff]  }
 0x28e   : > { %1595 = vst.msk [vmem:[#allocation3 + $0x128] sm:$0xf] %vm528_vm0, %v24909_v26  ;;  %v1185_v31 = vadd.f32 %v30828_v30, %v26892_v29  ;;  %v1176_v32 = vpop.f32.mrb[53].mxu0  ;;  %v29655_v49 = vld [vmem:[#allocation3 + $0x108] sm:$0xff]   ;;  %v29700_v29 = vld [vmem:[#allocation3 + $0x10] sm:$0xff]  }
 0x28f   : > { %1593 = vst.msk [vmem:[#allocation3 + $0x120] sm:$0xf] %vm528_vm0, %v24907_v28  ;;  %v1177_v33 = vadd.f32 %v30828_v30, %v1176_v32  ;;  %v26893_v34 = vpop.f32.mrb[54].mxu0  ;;  %26963 = vmatmul.mubr.msk.bf16.gmra.mrb[52].mxu1 %vm1999_vm1, %v29655_v49  ;;  %v29690_v22 = vld [vmem:[#allocation3 + $0x104] sm:$0xff]   ;;  %v29719_v32 = vld [vmem:[#allocation11 + $0x70] sm:$0xff]  }
 0x290   : > { %v1277_v35 = vmax.f32 %v1185_v31, 0.0  ;;  %v1188_v36 = vadd.f32 %v30828_v30, %v26893_v34  ;;  %v1179_v37 = vpop.f32.mrb[55].mxu0  ;;  %v29697_v27 = vld [vmem:[#allocation3 + $0x8] sm:$0xff]   ;;  %v29704_v49 = vld [vmem:[#allocation3 + $0x20] sm:$0xff]   ;;  %v29705_v34 = vld [vmem:[#allocation3 + $0x30] sm:$0xff]  }
 0x291   : > { %v1275_v38 = vmax.f32 %v1177_v33, 0.0  ;;  %v1180_v39 = vadd.f32 %v30828_v30, %v1179_v37  ;;  %v29702_v30 = vld [vmem:[#allocation3 + $0x18] sm:$0xff]   ;;  %v29710_v31 = vld [vmem:[#allocation11 + $0x68] sm:$0xff]   ;;  %v29707_v37 = vld [vmem:[#allocation3 + $0x40] sm:$0xff]  }
 0x292   : > { %v24912_v40 = vpack.c.bf16 %v1277_v35, %v1277_v35  ;;  %v1278_v41 = vmax.f32 %v1188_v36, 0.0  ;;  %v29728_v33 = vld [vmem:[#allocation11 + $0x78] sm:$0xff]   ;;  %v31987_v35 = vld [vmem:[#allocation11 + $0x80] sm:$0xff]  }
 0x293   : > { %v24910_v42 = vpack.c.bf16 %v1275_v38, %v1275_v38  ;;  %v1276_v43 = vmax.f32 %v1180_v39, 0.0  ;;  %v29706_v36 = vld [vmem:[#allocation3 + $0x38] sm:$0xff]   ;;  %v29708_v38 = vld [vmem:[#allocation3 + $0x48] sm:$0xff]  }
 0x294   : > { %1598 = vst.msk [vmem:[#allocation3 + $0x134] sm:$0xf] %vm528_vm0, %v24912_v40  ;;  %v24913_v44 = vpack.c.bf16 %v1278_v41, %v1278_v41  ;;  %v29656_v45 = vld [vmem:[#allocation3 + $0x118] sm:$0xff]   ;;  %v29711_v40 = vld [vmem:[#allocation3 + $0x60] sm:$0xff]   ;;  %v29712_v41 = vld [vmem:[#allocation3 + $0x68] sm:$0xff]  }
 0x295   : > { %1596 = vst.msk [vmem:[#allocation3 + $0x12c] sm:$0xf] %vm528_vm0, %v24910_v42  ;;  %v24911_v46 = vpack.c.bf16 %v1276_v43, %v1276_v43  ;;  %26966 = vmatprep.mubr.msk.bf16.mxu1 %vm1999_vm1, %v29656_v45  ;;  %v29693_v25 = vld [vmem:[#allocation3 + $0x124] sm:$0xff]   ;;  %v29709_v39 = vld [vmem:[#allocation3 + $0x58] sm:$0xff]   ;;  %v29713_v42 = vld [vmem:[#allocation3 + $0x70] sm:$0xff]  }
 0x296   : > { %1599 = vst.msk [vmem:[#allocation3 + $0x138] sm:$0xf] %vm528_vm0, %v24913_v44  ;;  %v29657_v47 = vld [vmem:[#allocation3 + $0x120] sm:$0xff]   ;;  %v29715_v44 = vld [vmem:[#allocation3 + $0x88] sm:$0xff]   ;;  %v29716_v45 = vld [vmem:[#allocation3 + $0x90] sm:$0xff]  }
 0x297   : > { %1597 = vst.msk [vmem:[#allocation3 + $0x130] sm:$0xf] %vm528_vm0, %v24911_v46  ;;  %26967 = vmatmul.mubr.msk.bf16.gmra.mrb[56].mxu1 %vm1999_vm1, %v29657_v47  ;;  %v29692_v24 = vld [vmem:[#allocation3 + $0x11c] sm:$0xff]   ;;  %v29718_v47 = vld [vmem:[#allocation3 + $0xa8] sm:$0xff]  }
 0x298   : > { %v29714_v43 = vld [vmem:[#allocation3 + $0x80] sm:$0xff]   ;;  %v29717_v46 = vld [vmem:[#allocation3 + $0x98] sm:$0xff]  }
 0x29c   : > { %v29658_v48 = vld [vmem:[#allocation3 + $0x128] sm:$0xff]  }
 0x29d   : > { %26970 = vmatprep.mubr.msk.bf16.mxu1 %vm1999_vm1, %v29658_v48  ;;  %v29695_v28 = vld [vmem:[#allocation3 + $0x134] sm:$0xff]  }
 0x29e   : > { %v29659_v51 = vld [vmem:[#allocation3 + $0x130] sm:$0xff]  }
 0x29f   : > { %26971 = vmatmul.mubr.msk.bf16.gmra.mrb[60].mxu1 %vm1999_vm1, %v29659_v51  ;;  %v29694_v26 = vld [vmem:[#allocation3 + $0x12c] sm:$0xff]   ;;  %v29722_v51 = vld [vmem:[#allocation3 + $0xc0] sm:$0xff]  }
 0x2a0   : > { %26982 = vmatprep.mubr.msk.bf16.mxu1 %vm1999_vm1, %v29660_v50  ;;  %v29720_v48 = vld [vmem:[#allocation3 + $0xb0] sm:$0xff]   ;;  %v29721_v50 = vld [vmem:[#allocation3 + $0xb8] sm:$0xff]  }
 0x2a7   : > { %26983 = vmatmul.mubr.msk.bf16.vlgmr.msra.gmra.mrb[0].mxu1 %vm1999_vm1, %v29662_v54  ;;  %v29725_v54 = vld [vmem:[#allocation3 + $0xe0] sm:$0xff]  }
 0x2a8   : > { %27047 = vmatpush3.bf16.msra.mxu1 %v30829_v57  ;;  %26986 = vmatprep.mubr.msk.bf16.mxu1 %vm1999_vm1, %v29663_v55 }
 0x2a9   : > { %27048 = vmatprep.subr.bf16.mxu1 %v29670_v56 }
 0x2ac   : > { %27049 = vmatpush3.bf16.msra.mxu1 %v29670_v56  ;;  %v30830_v56 = vld [vmem:[#allocation9] ss:$0 sm:$0xff] }
 0x2ad   : > { %27050 = vmatprep.subr.bf16.mxu1 %v29679_v61 }
 0x2af   : > { %26987 = vmatmul.mubr.msk.bf16.gmra.mrb[4].mxu1 %vm1999_vm1, %v29664_v60  ;;  %v29726_v60 = vld [vmem:[#allocation3 + $0xe8] sm:$0xff]  }
 0x2b0   : > { %26990 = vmatprep.mubr.msk.bf16.mxu1 %vm1999_vm1, %v29665_v63  ;;  %27051 = vmatpush3.bf16.msra.mxu1 %v29679_v61 }
 0x2b1   : > { %27052 = vmatprep.subr.bf16.mxu1 %v29688_v62 }
 0x2b4   : > { %27053 = vmatpush3.bf16.msra.mxu1 %v29688_v62  ;;  %v29727_v62 = vld [vmem:[#allocation3 + $0xf8] sm:$0xff]  }
 0x2b5   : > { %27118 = vmatprep.subr.bf16.mxu1 %v31952_v0 }
 0x2b7   : > { %26991 = vmatmul.mubr.msk.bf16.gmra.mrb[8].mxu1 %vm1999_vm1, %v29666_v1 }
 0x2b8   : > { %26994 = vmatprep.mubr.msk.bf16.mxu1 %vm1999_vm1, %v29667_v2 }
 0x2bf   : > { %26995 = vmatmul.mubr.msk.bf16.gmra.mrb[12].mxu1 %vm1999_vm1, %v29668_v3 }
 0x2c0   : > { %26998 = vmatprep.mubr.msk.bf16.mxu1 %vm1999_vm1, %v29669_v4 }
 0x2c7   : > { %26999 = vmatmul.mubr.msk.bf16.gmra.mrb[16].mxu1 %vm1999_vm1, %v29671_v5 }
 0x2c8   : > { %27002 = vmatprep.mubr.msk.bf16.mxu1 %vm1999_vm1, %v29672_v6 }
 0x2cf   : > { %27003 = vmatmul.mubr.msk.bf16.gmra.mrb[20].mxu1 %vm1999_vm1, %v29673_v7 }
 0x2d0   : > { %27006 = vmatprep.mubr.msk.bf16.mxu1 %vm1999_vm1, %v29674_v8 }
 0x2d7   : > { %27007 = vmatmul.mubr.msk.bf16.gmra.mrb[24].mxu1 %vm1999_vm1, %v29675_v9 }
 0x2d8   : > { %27010 = vmatprep.mubr.msk.bf16.mxu1 %vm1999_vm1, %v29676_v10 }
 0x2df   : > { %27011 = vmatmul.mubr.msk.bf16.gmra.mrb[28].mxu1 %vm1999_vm1, %v29677_v11 }
 0x2e0   : > { %27014 = vmatprep.mubr.msk.bf16.mxu1 %vm1999_vm1, %v29678_v12  ;;  %v29729_v12 = vld [vmem:[#allocation3 + $0x100] sm:$0xff]  }
 0x2e7   : > { %27015 = vmatmul.mubr.msk.bf16.gmra.mrb[32].mxu1 %vm1999_vm1, %v29680_v13 }
 0x2e8   : > { %27018 = vmatprep.mubr.msk.bf16.mxu1 %vm1999_vm1, %v29681_v14 }
 0x2ef   : > { %27019 = vmatmul.mubr.msk.bf16.gmra.mrb[36].mxu1 %vm1999_vm1, %v29682_v15  ;;  %v29730_v15 = vld [vmem:[#allocation3 + $0x108] sm:$0xff]  }
 0x2f0   : > { %27022 = vmatprep.mubr.msk.bf16.mxu1 %vm1999_vm1, %v29683_v16 }
 0x2f7   : > { %27023 = vmatmul.mubr.msk.bf16.gmra.mrb[40].mxu1 %vm1999_vm1, %v29684_v17 }
 0x2f8   : > { %27026 = vmatprep.mubr.msk.bf16.mxu1 %vm1999_vm1, %v29685_v18 }
 0x2ff   : > { %27027 = vmatmul.mubr.msk.bf16.gmra.mrb[44].mxu1 %vm1999_vm1, %v29686_v19 }
 0x300   : > { %27030 = vmatprep.mubr.msk.bf16.mxu1 %vm1999_vm1, %v29687_v20 }
 0x307   : > { %27031 = vmatmul.mubr.msk.bf16.gmra.mrb[48].mxu1 %vm1999_vm1, %v29689_v21 }
 0x308   : > { %27034 = vmatprep.mubr.msk.bf16.mxu1 %vm1999_vm1, %v29690_v22 }
 0x30f   : > { %27035 = vmatmul.mubr.msk.bf16.gmra.mrb[52].mxu1 %vm1999_vm1, %v29691_v23 }
 0x310   : > { %27038 = vmatprep.mubr.msk.bf16.mxu1 %vm1999_vm1, %v29692_v24  ;;  %v29731_v24 = vld [vmem:[#allocation3 + $0x110] sm:$0xff]  }
 0x317   : > { %27039 = vmatmul.mubr.msk.bf16.gmra.mrb[56].mxu1 %vm1999_vm1, %v29693_v25 }
 0x318   : > { %27042 = vmatprep.mubr.msk.bf16.mxu1 %vm1999_vm1, %v29694_v26  ;;  %v29732_v26 = vld [vmem:[#allocation3 + $0x120] sm:$0xff]  }
 0x31f   : > { %27043 = vmatmul.mubr.msk.bf16.gmra.mrb[60].mxu1 %vm1999_vm1, %v29695_v28 }
 0x320   : > { %27054 = vmatprep.mubr.msk.bf16.mxu1 %vm1999_vm1, %v29697_v27 }
 0x327   : > { %27055 = vmatmul.mubr.msk.bf16.vlgmr.msra.gmra.mrb[0].mxu1 %vm1999_vm1, %v29700_v29 }
 0x328   : > { %27119 = vmatpush3.bf16.msra.mxu1 %v31952_v0  ;;  %27058 = vmatprep.mubr.msk.bf16.mxu1 %vm1999_vm1, %v29702_v30  ;;  %v29733_v30 = vld [vmem:[#allocation3 + $0x128] sm:$0xff]  }
 0x329   : > { %27120 = vmatprep.subr.bf16.mxu1 %v29710_v31 }
 0x32c   : > { %27121 = vmatpush3.bf16.msra.mxu1 %v29710_v31  ;;  %v29734_v31 = vld [vmem:[#allocation3 + $0x130] sm:$0xff]  }
 0x32d   : > { %27122 = vmatprep.subr.bf16.mxu1 %v29719_v32 }
 0x32f   : > { %27059 = vmatmul.mubr.msk.bf16.gmra.mrb[4].mxu1 %vm1999_vm1, %v29704_v49  ;;  %v29736_v49 = vld [vmem:[#allocation3 + $0x28] sm:$0xff]  }
 0x330   : > { %27062 = vmatprep.mubr.msk.bf16.mxu1 %vm1999_vm1, %v29705_v34  ;;  %27123 = vmatpush3.bf16.msra.mxu1 %v29719_v32  ;;  %v29735_v32 = vld [vmem:[#allocation3 + $0x138] sm:$0xff]   ;;  %v29746_v34 = vld [vmem:[#allocation11 + $0x88] sm:$0xff]  }
 0x331   : > { %27124 = vmatprep.subr.bf16.mxu1 %v29728_v33 }
 0x334   : > { %27125 = vmatpush3.bf16.msra.mxu1 %v29728_v33  ;;  %v29738_v33 = vld [vmem:[#allocation3 + $0x30] sm:$0xff]  }
 0x335   : > { %27190 = vmatprep.subr.bf16.mxu1 %v31987_v35 }
 0x337   : > { %27063 = vmatmul.mubr.msk.bf16.gmra.mrb[8].mxu1 %vm1999_vm1, %v29706_v36  ;;  %v29739_v36 = vld [vmem:[#allocation3 + $0x38] sm:$0xff]  }
 0x338   : > { %27066 = vmatprep.mubr.msk.bf16.mxu1 %vm1999_vm1, %v29707_v37  ;;  %v29755_v37 = vld [vmem:[#allocation11 + $0x90] sm:$0xff]  }
 0x33f   : > { %27067 = vmatmul.mubr.msk.bf16.gmra.mrb[12].mxu1 %vm1999_vm1, %v29708_v38  ;;  %v29740_v38 = vld [vmem:[#allocation3 + $0x40] sm:$0xff]  }
 0x340   : > { %27070 = vmatprep.mubr.msk.bf16.mxu1 %vm1999_vm1, %v29709_v39  ;;  %v29764_v39 = vld [vmem:[#allocation11 + $0x98] sm:$0xff]  }
 0x347   : > { %27071 = vmatmul.mubr.msk.bf16.gmra.mrb[16].mxu1 %vm1999_vm1, %v29711_v40  ;;  %v29741_v40 = vld [vmem:[#allocation3 + $0x50] sm:$0xff]  }
 0x348   : > { %27074 = vmatprep.mubr.msk.bf16.mxu1 %vm1999_vm1, %v29712_v41  ;;  %v32031_v41 = vld [vmem:[#allocation11 + $0xa0] sm:$0xff]  }
 0x34f   : > { %27075 = vmatmul.mubr.msk.bf16.gmra.mrb[20].mxu1 %vm1999_vm1, %v29713_v42  ;;  %v29742_v42 = vld [vmem:[#allocation3 + $0x58] sm:$0xff]  }
 0x350   : > { %27078 = vmatprep.mubr.msk.bf16.mxu1 %vm1999_vm1, %v29714_v43  ;;  %v29743_v43 = vld [vmem:[#allocation3 + $0x60] sm:$0xff]  }
 0x352   : > { %v26896_v55 = vpop.f32.mrb[56].mxu0 }
 0x353   : > { %v1201_v57 = vadd.f32 %v30830_v56, %v26896_v55  ;;  %v1192_v58 = vpop.f32.mrb[57].mxu0  ;;  %v29757_v55 = vld [vmem:[#allocation3 + $0xd8] sm:$0xff]  }
 0x354   : > { %v1193_v59 = vadd.f32 %v30830_v56, %v1192_v58  ;;  %v26897_v2 = vpop.f32.mrb[58].mxu0  ;;  %v29760_v58 = vld [vmem:[#allocation3 + $0xf8] sm:$0xff]  }
 0x355   : > { %v1281_v61 = vmax.f32 %v1201_v57, 0.0  ;;  %v1204_v3 = vadd.f32 %v30830_v56, %v26897_v2  ;;  %v1195_v4 = vpop.f32.mrb[59].mxu0  ;;  %v29759_v57 = vld [vmem:[#allocation3 + $0xf0] sm:$0xff]  }
 0x356   : > { %v1279_v63 = vmax.f32 %v1193_v59, 0.0  ;;  %v1196_v5 = vadd.f32 %v30830_v56, %v1195_v4  ;;  %v29761_v59 = vld [vmem:[#allocation3 + $0x100] sm:$0xff]  }
 0x357   : > { %27079 = vmatmul.mubr.msk.bf16.gmra.mrb[24].mxu1 %vm1999_vm1, %v29715_v44  ;;  %v24916_v0 = vpack.c.bf16 %v1281_v61, %v1281_v61  ;;  %v1282_v7 = vmax.f32 %v1204_v3, 0.0  ;;  %v29745_v44 = vld [vmem:[#allocation3 + $0x78] sm:$0xff]  }
 0x358   : > { %27082 = vmatprep.mubr.msk.bf16.mxu1 %vm1999_vm1, %v29716_v45  ;;  %v24914_v1 = vpack.c.bf16 %v1279_v63, %v1279_v63  ;;  %v1280_v10 = vmax.f32 %v1196_v5, 0.0  ;;  %v29747_v45 = vld [vmem:[#allocation3 + $0x80] sm:$0xff]   ;;  %v29763_v61 = vld [vmem:[#allocation3 + $0x118] sm:$0xff]   ;;  %v29766_v63 = vld [vmem:[#allocation3 + $0x128] sm:$0xff]  }
 0x359   : > { %1602 = vst.msk [vmem:[#allocation3 + $0x14c] sm:$0xf] %vm528_vm0, %v24916_v0  ;;  %v24917_v13 = vpack.c.bf16 %v1282_v7, %v1282_v7  ;;  %v29767_v0 = vld [vmem:[#allocation3 + $0x130] sm:$0xff]  }
 0x35a   : > { %1600 = vst.msk [vmem:[#allocation3 + $0x144] sm:$0xf] %vm528_vm0, %v24914_v1  ;;  %v26900_v6 = vpop.f32.mrb[60].mxu0  ;;  %v24915_v16 = vpack.c.bf16 %v1280_v10, %v1280_v10  ;;  %v29772_v5 = vld [vmem:[#allocation3 + $0x2c] sm:$0xff]   ;;  %v29776_v10 = vld [vmem:[#allocation3 + $0x44] sm:$0xff]  }
 0x35b   : > { %v1217_v8 = vadd.f32 %v30830_v56, %v26900_v6  ;;  %v1208_v9 = vpop.f32.mrb[61].mxu0  ;;  %1603 = vst.msk [vmem:[#allocation3 + $0x150] sm:$0xf] %vm528_vm0, %v24917_v13  ;;  %v29774_v6 = vld [vmem:[#allocation3 + $0x34] sm:$0xff]   ;;  %v29782_v7 = vld [vmem:[#allocation11 + $0xa8] sm:$0xff]   ;;  %v32067_v13 = vld [vmem:[#allocation11 + $0xc0] sm:$0xff]  }
 0x35c   : > { %v1209_v11 = vadd.f32 %v30830_v56, %v1208_v9  ;;  %1601 = vst.msk [vmem:[#allocation3 + $0x148] sm:$0xf] %vm528_vm0, %v24915_v16  ;;  %v26901_v20 = vpop.f32.mrb[62].mxu0  ;;  %v29791_v9 = vld [vmem:[#allocation11 + $0xb0] sm:$0xff]  }
 0x35d   : > { %v1285_v14 = vmax.f32 %v1217_v8, 0.0  ;;  %v1220_v21 = vadd.f32 %v30830_v56, %v26901_v20  ;;  %v1211_v22 = vpop.f32.mrb[63].mxu0  ;;  %v29775_v8 = vld [vmem:[#allocation3 + $0x3c] sm:$0xff]   ;;  %v29780_v16 = vld [vmem:[#allocation3 + $0x6c] sm:$0xff]   ;;  %v29785_v20 = vld [vmem:[#allocation3 + $0x94] sm:$0xff]  }
 0x35e   : > { %v1283_v17 = vmax.f32 %v1209_v11, 0.0  ;;  %v1212_v23 = vadd.f32 %v30830_v56, %v1211_v22  ;;  %v29758_v56 = vld [vmem:[#allocation3 + $0xe0] sm:$0xff]   ;;  %v29787_v22 = vld [vmem:[#allocation3 + $0xac] sm:$0xff]  }
 0x35f   : > { %27083 = vmatmul.mubr.msk.bf16.gmra.mrb[28].mxu1 %vm1999_vm1, %v29717_v46  ;;  %v24920_v18 = vpack.c.bf16 %v1285_v14, %v1285_v14  ;;  %v1286_v25 = vmax.f32 %v1220_v21, 0.0  ;;  %v29748_v46 = vld [vmem:[#allocation3 + $0x88] sm:$0xff]   ;;  %v29800_v11 = vld [vmem:[#allocation11 + $0xb8] sm:$0xff]  }
 0x360   : > { %27086 = vmatprep.mubr.msk.bf16.mxu1 %vm1999_vm1, %v29718_v47  ;;  %v24918_v19 = vpack.c.bf16 %v1283_v17, %v1283_v17  ;;  %v1284_v27 = vmax.f32 %v1212_v23, 0.0  ;;  %v29749_v47 = vld [vmem:[#allocation3 + $0x90] sm:$0xff]   ;;  %v29778_v14 = vld [vmem:[#allocation3 + $0x5c] sm:$0xff]   ;;  %v29786_v21 = vld [vmem:[#allocation3 + $0xa4] sm:$0xff]  }
 0x361   : > { %1606 = vst.msk [vmem:[#allocation3 + $0x15c] sm:$0xf] %vm528_vm0, %v24920_v18  ;;  %v24921_v28 = vpack.c.bf16 %v1286_v25, %v1286_v25  ;;  %v29768_v1 = vld [vmem:[#allocation3 + $0x140] sm:$0xff]   ;;  %v29788_v23 = vld [vmem:[#allocation3 + $0xb4] sm:$0xff]   ;;  %v29790_v25 = vld [vmem:[#allocation3 + $0xcc] sm:$0xff]  }
 0x362   : > { %1604 = vst.msk [vmem:[#allocation3 + $0x154] sm:$0xf] %vm528_vm0, %v24918_v19  ;;  %v24919_v29 = vpack.c.bf16 %v1284_v27, %v1284_v27  ;;  %v29781_v17 = vld [vmem:[#allocation3 + $0x7c] sm:$0xff]   ;;  %v29783_v18 = vld [vmem:[#allocation3 + $0x84] sm:$0xff]   ;;  %v29784_v19 = vld [vmem:[#allocation3 + $0x8c] sm:$0xff]  }
 0x363   : > { %1607 = vst.msk [vmem:[#allocation3 + $0x160] sm:$0xf] %vm528_vm0, %v24921_v28  ;;  %v29769_v2 = vld [vmem:[#allocation3 + $0x148] sm:$0xff]   ;;  %v29793_v27 = vld [vmem:[#allocation3 + $0xdc] sm:$0xff]  }
 0x364   : > { %1605 = vst.msk [vmem:[#allocation3 + $0x158] sm:$0xf] %vm528_vm0, %v24919_v29  ;;  %v29794_v28 = vld [vmem:[#allocation3 + $0xe4] sm:$0xff]   ;;  %v29795_v29 = vld [vmem:[#allocation3 + $0xf4] sm:$0xff]  }
 0x367   : > { %27087 = vmatmul.mubr.msk.bf16.gmra.mrb[32].mxu1 %vm1999_vm1, %v29720_v48  ;;  %v29750_v48 = vld [vmem:[#allocation3 + $0xa0] sm:$0xff]  }
 0x368   : > { %27090 = vmatprep.mubr.msk.bf16.mxu1 %vm1999_vm1, %v29721_v50  ;;  %v29751_v50 = vld [vmem:[#allocation3 + $0xa8] sm:$0xff]  }
 0x369   : > { %v29770_v3 = vld [vmem:[#allocation3 + $0x150] sm:$0xff]  }
 0x36b   : > { %v29771_v4 = vld [vmem:[#allocation3 + $0x158] sm:$0xff]  }
 0x36f   : > { %27091 = vmatmul.mubr.msk.bf16.gmra.mrb[36].mxu1 %vm1999_vm1, %v29722_v51  ;;  %v29752_v51 = vld [vmem:[#allocation3 + $0xb0] sm:$0xff]  }
 0x370   : > { %27094 = vmatprep.mubr.msk.bf16.mxu1 %vm1999_vm1, %v29723_v52  ;;  %v29753_v52 = vld [vmem:[#allocation3 + $0xb8] sm:$0xff]  }
 0x377   : > { %27095 = vmatmul.mubr.msk.bf16.gmra.mrb[40].mxu1 %vm1999_vm1, %v29724_v53  ;;  %v29754_v53 = vld [vmem:[#allocation3 + $0xc8] sm:$0xff]  }
 0x378   : > { %27098 = vmatprep.mubr.msk.bf16.mxu1 %vm1999_vm1, %v29725_v54  ;;  %v29756_v54 = vld [vmem:[#allocation3 + $0xd0] sm:$0xff]  }
 0x37f   : > { %27099 = vmatmul.mubr.msk.bf16.gmra.mrb[44].mxu1 %vm1999_vm1, %v29726_v60  ;;  %v29762_v60 = vld [vmem:[#allocation3 + $0x108] sm:$0xff]  }
 0x380   : > { %27102 = vmatprep.mubr.msk.bf16.mxu1 %vm1999_vm1, %v29727_v62  ;;  %v29765_v62 = vld [vmem:[#allocation3 + $0x120] sm:$0xff]  }
 0x387   : > { %27103 = vmatmul.mubr.msk.bf16.gmra.mrb[48].mxu1 %vm1999_vm1, %v29729_v12  ;;  %v29777_v12 = vld [vmem:[#allocation3 + $0x54] sm:$0xff]  }
 0x388   : > { %27106 = vmatprep.mubr.msk.bf16.mxu1 %vm1999_vm1, %v29730_v15  ;;  %v29779_v15 = vld [vmem:[#allocation3 + $0x64] sm:$0xff]  }
 0x38f   : > { %27107 = vmatmul.mubr.msk.bf16.gmra.mrb[52].mxu1 %vm1999_vm1, %v29731_v24  ;;  %v29789_v24 = vld [vmem:[#allocation3 + $0xbc] sm:$0xff]  }
 0x390   : > { %27110 = vmatprep.mubr.msk.bf16.mxu1 %vm1999_vm1, %v29732_v26  ;;  %v29792_v26 = vld [vmem:[#allocation3 + $0xd4] sm:$0xff]  }
 0x397   : > { %27111 = vmatmul.mubr.msk.bf16.gmra.mrb[56].mxu1 %vm1999_vm1, %v29733_v30  ;;  %v29796_v30 = vld [vmem:[#allocation3 + $0xfc] sm:$0xff]  }
 0x398   : > { %27114 = vmatprep.mubr.msk.bf16.mxu1 %vm1999_vm1, %v29734_v31  ;;  %v29797_v31 = vld [vmem:[#allocation3 + $0x104] sm:$0xff]  }
 0x39f   : > { %27115 = vmatmul.mubr.msk.bf16.gmra.mrb[60].mxu1 %vm1999_vm1, %v29735_v32  ;;  %v29798_v32 = vld [vmem:[#allocation3 + $0x10c] sm:$0xff]  }
 0x3a0   : > { %27126 = vmatprep.mubr.msk.bf16.mxu1 %vm1999_vm1, %v29736_v49  ;;  %v29799_v49 = vld [vmem:[#allocation3 + $0x11c] sm:$0xff]  }
 0x3a7   : > { %27127 = vmatmul.mubr.msk.bf16.vlgmr.msra.gmra.mrb[0].mxu1 %vm1999_vm1, %v29738_v33  ;;  %v29801_v33 = vld [vmem:[#allocation3 + $0x124] sm:$0xff]  }
 0x3a8   : > { %27191 = vmatpush3.bf16.msra.mxu1 %v31987_v35  ;;  %27130 = vmatprep.mubr.msk.bf16.mxu1 %vm1999_vm1, %v29739_v36  ;;  %v29744_v35 = vld [vmem:[#allocation3 + $0x68] sm:$0xff]   ;;  %v29803_v36 = vld [vmem:[#allocation3 + $0x134] sm:$0xff]  }
 0x3a9   : > { %27192 = vmatprep.subr.bf16.mxu1 %v29746_v34 }
 0x3ac   : > { %27193 = vmatpush3.bf16.msra.mxu1 %v29746_v34  ;;  %v29802_v34 = vld [vmem:[#allocation3 + $0x12c] sm:$0xff]  }
 0x3ad   : > { %27194 = vmatprep.subr.bf16.mxu1 %v29755_v37 }
 0x3af   : > { %27131 = vmatmul.mubr.msk.bf16.gmra.mrb[4].mxu1 %vm1999_vm1, %v29740_v38  ;;  %v29805_v38 = vld [vmem:[#allocation3 + $0x14c] sm:$0xff]  }
 0x3b0   : > { %27134 = vmatprep.mubr.msk.bf16.mxu1 %vm1999_vm1, %v29741_v40  ;;  %27195 = vmatpush3.bf16.msra.mxu1 %v29755_v37  ;;  %v29804_v37 = vld [vmem:[#allocation3 + $0x144] sm:$0xff]   ;;  %v29807_v40 = vld [vmem:[#allocation3 + $0x15c] sm:$0xff]  }
 0x3b1   : > { %27196 = vmatprep.subr.bf16.mxu1 %v29764_v39 }
 0x3b4   : > { %27197 = vmatpush3.bf16.msra.mxu1 %v29764_v39  ;;  %v29806_v39 = vld [vmem:[#allocation3 + $0x154] sm:$0xff]  }
 0x3b5   : > { %27262 = vmatprep.subr.bf16.mxu1 %v32031_v41 }
 0x3b7   : > { %27135 = vmatmul.mubr.msk.bf16.gmra.mrb[8].mxu1 %vm1999_vm1, %v29742_v42  ;;  %v29810_v42 = vld [vmem:[#allocation3 + $0x38] sm:$0xff]  }
 0x3b8   : > { %27138 = vmatprep.mubr.msk.bf16.mxu1 %vm1999_vm1, %v29743_v43  ;;  %v29818_v43 = vld [vmem:[#allocation11 + $0xc8] sm:$0xff]  }
 0x3bf   : > { %27139 = vmatmul.mubr.msk.bf16.gmra.mrb[12].mxu1 %vm1999_vm1, %v29744_v35  ;;  %v29811_v35 = vld [vmem:[#allocation3 + $0x40] sm:$0xff]  }
 0x3c0   : > { %27142 = vmatprep.mubr.msk.bf16.mxu1 %vm1999_vm1, %v29745_v44  ;;  %v29827_v44 = vld [vmem:[#allocation11 + $0xd0] sm:$0xff]  }
 0x3c7   : > { %27143 = vmatmul.mubr.msk.bf16.gmra.mrb[16].mxu1 %vm1999_vm1, %v29747_v45  ;;  %v29812_v45 = vld [vmem:[#allocation3 + $0x48] sm:$0xff]  }
 0x3c8   : > { %27146 = vmatprep.mubr.msk.bf16.mxu1 %vm1999_vm1, %v29748_v46  ;;  %v29836_v46 = vld [vmem:[#allocation11 + $0xd8] sm:$0xff]  }
 0x3cf   : > { %27147 = vmatmul.mubr.msk.bf16.gmra.mrb[20].mxu1 %vm1999_vm1, %v29749_v47  ;;  %v29813_v47 = vld [vmem:[#allocation3 + $0x58] sm:$0xff]  }
 0x3d0   : > { %27150 = vmatprep.mubr.msk.bf16.mxu1 %vm1999_vm1, %v29750_v48  ;;  %v32104_v48 = vld [vmem:[#allocation11 + $0xe0] sm:$0xff]  }
 0x3d7   : > { %27151 = vmatmul.mubr.msk.bf16.gmra.mrb[24].mxu1 %vm1999_vm1, %v29751_v50  ;;  %v29814_v50 = vld [vmem:[#allocation3 + $0x60] sm:$0xff]  }
 0x3d8   : > { %27154 = vmatprep.mubr.msk.bf16.mxu1 %vm1999_vm1, %v29752_v51  ;;  %v29815_v51 = vld [vmem:[#allocation3 + $0x68] sm:$0xff]  }
 0x3df   : > { %27155 = vmatmul.mubr.msk.bf16.gmra.mrb[28].mxu1 %vm1999_vm1, %v29753_v52  ;;  %v29816_v52 = vld [vmem:[#allocation3 + $0x70] sm:$0xff]  }
 0x3e0   : > { %27158 = vmatprep.mubr.msk.bf16.mxu1 %vm1999_vm1, %v29754_v53  ;;  %v29817_v53 = vld [vmem:[#allocation3 + $0x80] sm:$0xff]  }
 0x3e7   : > { %27159 = vmatmul.mubr.msk.bf16.gmra.mrb[32].mxu1 %vm1999_vm1, %v29756_v54  ;;  %v29819_v54 = vld [vmem:[#allocation3 + $0x88] sm:$0xff]  }
 0x3e8   : > { %27162 = vmatprep.mubr.msk.bf16.mxu1 %vm1999_vm1, %v29757_v55  ;;  %v29820_v55 = vld [vmem:[#allocation3 + $0x90] sm:$0xff]  }
 0x3ef   : > { %27163 = vmatmul.mubr.msk.bf16.gmra.mrb[36].mxu1 %vm1999_vm1, %v29758_v56  ;;  %v29821_v56 = vld [vmem:[#allocation3 + $0x98] sm:$0xff]  }
 0x3f0   : > { %27166 = vmatprep.mubr.msk.bf16.mxu1 %vm1999_vm1, %v29759_v57  ;;  %v29822_v57 = vld [vmem:[#allocation3 + $0xa8] sm:$0xff]  }
 0x3f7   : > { %27167 = vmatmul.mubr.msk.bf16.gmra.mrb[40].mxu1 %vm1999_vm1, %v29760_v58  ;;  %v29823_v58 = vld [vmem:[#allocation3 + $0xb0] sm:$0xff]  }
 0x3f8   : > { %27170 = vmatprep.mubr.msk.bf16.mxu1 %vm1999_vm1, %v29761_v59  ;;  %v29824_v59 = vld [vmem:[#allocation3 + $0xb8] sm:$0xff]  }
 0x3ff   : > { %27171 = vmatmul.mubr.msk.bf16.gmra.mrb[44].mxu1 %vm1999_vm1, %v29762_v60  ;;  %v29825_v60 = vld [vmem:[#allocation3 + $0xc0] sm:$0xff]  }
 0x400   : > { %27174 = vmatprep.mubr.msk.bf16.mxu1 %vm1999_vm1, %v29763_v61  ;;  %v29826_v61 = vld [vmem:[#allocation3 + $0xd0] sm:$0xff]  }
 0x407   : > { %27175 = vmatmul.mubr.msk.bf16.gmra.mrb[48].mxu1 %vm1999_vm1, %v29765_v62  ;;  %v29828_v62 = vld [vmem:[#allocation3 + $0xd8] sm:$0xff]  }
 0x408   : > { %27178 = vmatprep.mubr.msk.bf16.mxu1 %vm1999_vm1, %v29766_v63  ;;  %v29829_v63 = vld [vmem:[#allocation3 + $0xe0] sm:$0xff]  }
 0x40f   : > { %27179 = vmatmul.mubr.msk.bf16.gmra.mrb[52].mxu1 %vm1999_vm1, %v29767_v0  ;;  %v29830_v0 = vld [vmem:[#allocation3 + $0xe8] sm:$0xff]  }
 0x410   : > { %27182 = vmatprep.mubr.msk.bf16.mxu1 %vm1999_vm1, %v29768_v1  ;;  %v29831_v1 = vld [vmem:[#allocation3 + $0xf8] sm:$0xff]  }
 0x417   : > { %27183 = vmatmul.mubr.msk.bf16.gmra.mrb[56].mxu1 %vm1999_vm1, %v29769_v2  ;;  %v29832_v2 = vld [vmem:[#allocation3 + $0x100] sm:$0xff]  }
 0x418   : > { %27186 = vmatprep.mubr.msk.bf16.mxu1 %vm1999_vm1, %v29770_v3  ;;  %v29833_v3 = vld [vmem:[#allocation3 + $0x108] sm:$0xff]  }
 0x41f   : > { %27187 = vmatmul.mubr.msk.bf16.gmra.mrb[60].mxu1 %vm1999_vm1, %v29771_v4  ;;  %v29834_v4 = vld [vmem:[#allocation3 + $0x110] sm:$0xff]  }
 0x420   : > { %27198 = vmatprep.mubr.msk.bf16.mxu1 %vm1999_vm1, %v29772_v5  ;;  %v29835_v5 = vld [vmem:[#allocation3 + $0x120] sm:$0xff]  }
 0x427   : > { %27199 = vmatmul.mubr.msk.bf16.vlgmr.msra.gmra.mrb[0].mxu1 %vm1999_vm1, %v29774_v6  ;;  %v29837_v6 = vld [vmem:[#allocation3 + $0x128] sm:$0xff]  }
 0x428   : > { %27263 = vmatpush3.bf16.msra.mxu1 %v32031_v41  ;;  %27202 = vmatprep.mubr.msk.bf16.mxu1 %vm1999_vm1, %v29775_v8  ;;  %v29808_v41 = vld [vmem:[#allocation3 + $0x30] sm:$0xff]   ;;  %v29839_v8 = vld [vmem:[#allocation3 + $0x138] sm:$0xff]  }
 0x429   : > { %27264 = vmatprep.subr.bf16.mxu1 %v29782_v7 }
 0x42c   : > { %27265 = vmatpush3.bf16.msra.mxu1 %v29782_v7  ;;  %v29838_v7 = vld [vmem:[#allocation3 + $0x130] sm:$0xff]  }
 0x42d   : > { %27266 = vmatprep.subr.bf16.mxu1 %v29791_v9 }
 0x42f   : > { %27203 = vmatmul.mubr.msk.bf16.gmra.mrb[4].mxu1 %vm1999_vm1, %v29776_v10  ;;  %v29841_v10 = vld [vmem:[#allocation3 + $0x150] sm:$0xff]  }
 0x430   : > { %27206 = vmatprep.mubr.msk.bf16.mxu1 %vm1999_vm1, %v29777_v12  ;;  %27267 = vmatpush3.bf16.msra.mxu1 %v29791_v9  ;;  %v29840_v9 = vld [vmem:[#allocation3 + $0x148] sm:$0xff]   ;;  %v29843_v12 = vld [vmem:[#allocation3 + $0x160] sm:$0xff]  }
 0x431   : > { %27268 = vmatprep.subr.bf16.mxu1 %v29800_v11 }
 0x434   : > { %27269 = vmatpush3.bf16.msra.mxu1 %v29800_v11  ;;  %v29842_v11 = vld [vmem:[#allocation3 + $0x158] sm:$0xff]  }
 0x435   : > { %27334 = vmatprep.subr.bf16.mxu1 %v32067_v13 }
 0x437   : > { %27207 = vmatmul.mubr.msk.bf16.gmra.mrb[8].mxu1 %vm1999_vm1, %v29778_v14  ;;  %v29846_v14 = vld [vmem:[#allocation3 + $0x58] sm:$0xff]  }
 0x438   : > { %27210 = vmatprep.mubr.msk.bf16.mxu1 %vm1999_vm1, %v29779_v15  ;;  %v29854_v15 = vld [vmem:[#allocation11 + $0xe8] sm:$0xff]  }
 0x43f   : > { %27211 = vmatmul.mubr.msk.bf16.gmra.mrb[12].mxu1 %vm1999_vm1, %v29780_v16  ;;  %v29847_v16 = vld [vmem:[#allocation3 + $0x60] sm:$0xff]  }
 0x440   : > { %27214 = vmatprep.mubr.msk.bf16.mxu1 %vm1999_vm1, %v29781_v17  ;;  %v29863_v17 = vld [vmem:[#allocation11 + $0xf0] sm:$0xff]  }
 0x447   : > { %27215 = vmatmul.mubr.msk.bf16.gmra.mrb[16].mxu1 %vm1999_vm1, %v29783_v18  ;;  %v29848_v18 = vld [vmem:[#allocation3 + $0x68] sm:$0xff]  }
 0x448   : > { %27218 = vmatprep.mubr.msk.bf16.mxu1 %vm1999_vm1, %v29784_v19  ;;  %v29872_v19 = vld [vmem:[#allocation11 + $0xf8] sm:$0xff]  }
 0x44f   : > { %27219 = vmatmul.mubr.msk.bf16.gmra.mrb[20].mxu1 %vm1999_vm1, %v29785_v20  ;;  %v29849_v20 = vld [vmem:[#allocation3 + $0x78] sm:$0xff]  }
 0x450   : > { %27222 = vmatprep.mubr.msk.bf16.mxu1 %vm1999_vm1, %v29786_v21  ;;  %v32140_v21 = vld [vmem:[#allocation11 + $0x100] sm:$0xff]  }
 0x457   : > { %27223 = vmatmul.mubr.msk.bf16.gmra.mrb[24].mxu1 %vm1999_vm1, %v29787_v22  ;;  %v29850_v22 = vld [vmem:[#allocation3 + $0x80] sm:$0xff]  }
 0x458   : > { %27226 = vmatprep.mubr.msk.bf16.mxu1 %vm1999_vm1, %v29788_v23  ;;  %v29851_v23 = vld [vmem:[#allocation3 + $0x88] sm:$0xff]  }
 0x45f   : > { %27227 = vmatmul.mubr.msk.bf16.gmra.mrb[28].mxu1 %vm1999_vm1, %v29789_v24  ;;  %v29852_v24 = vld [vmem:[#allocation3 + $0x90] sm:$0xff]  }
 0x460   : > { %27230 = vmatprep.mubr.msk.bf16.mxu1 %vm1999_vm1, %v29790_v25  ;;  %v29853_v25 = vld [vmem:[#allocation3 + $0xa0] sm:$0xff]  }
 0x467   : > { %27231 = vmatmul.mubr.msk.bf16.gmra.mrb[32].mxu1 %vm1999_vm1, %v29792_v26  ;;  %v29855_v26 = vld [vmem:[#allocation3 + $0xa8] sm:$0xff]  }
 0x468   : > { %27234 = vmatprep.mubr.msk.bf16.mxu1 %vm1999_vm1, %v29793_v27  ;;  %v29856_v27 = vld [vmem:[#allocation3 + $0xb0] sm:$0xff]  }
 0x46f   : > { %27235 = vmatmul.mubr.msk.bf16.gmra.mrb[36].mxu1 %vm1999_vm1, %v29794_v28  ;;  %v29857_v28 = vld [vmem:[#allocation3 + $0xb8] sm:$0xff]  }
 0x470   : > { %27238 = vmatprep.mubr.msk.bf16.mxu1 %vm1999_vm1, %v29795_v29  ;;  %v29858_v29 = vld [vmem:[#allocation3 + $0xc8] sm:$0xff]  }
 0x477   : > { %27239 = vmatmul.mubr.msk.bf16.gmra.mrb[40].mxu1 %vm1999_vm1, %v29796_v30  ;;  %v29859_v30 = vld [vmem:[#allocation3 + $0xd0] sm:$0xff]  }
 0x478   : > { %27242 = vmatprep.mubr.msk.bf16.mxu1 %vm1999_vm1, %v29797_v31  ;;  %v29860_v31 = vld [vmem:[#allocation3 + $0xd8] sm:$0xff]  }
 0x47f   : > { %27243 = vmatmul.mubr.msk.bf16.gmra.mrb[44].mxu1 %vm1999_vm1, %v29798_v32  ;;  %v29861_v32 = vld [vmem:[#allocation3 + $0xe0] sm:$0xff]  }
 0x480   : > { %27246 = vmatprep.mubr.msk.bf16.mxu1 %vm1999_vm1, %v29799_v49  ;;  %v29862_v49 = vld [vmem:[#allocation3 + $0xf0] sm:$0xff]  }
 0x487   : > { %27247 = vmatmul.mubr.msk.bf16.gmra.mrb[48].mxu1 %vm1999_vm1, %v29801_v33  ;;  %v29864_v33 = vld [vmem:[#allocation3 + $0xf8] sm:$0xff]  }
 0x488   : > { %27250 = vmatprep.mubr.msk.bf16.mxu1 %vm1999_vm1, %v29802_v34  ;;  %v29865_v34 = vld [vmem:[#allocation3 + $0x100] sm:$0xff]  }
 0x48f   : > { %27251 = vmatmul.mubr.msk.bf16.gmra.mrb[52].mxu1 %vm1999_vm1, %v29803_v36  ;;  %v29866_v36 = vld [vmem:[#allocation3 + $0x108] sm:$0xff]  }
 0x490   : > { %27254 = vmatprep.mubr.msk.bf16.mxu1 %vm1999_vm1, %v29804_v37  ;;  %v29867_v37 = vld [vmem:[#allocation3 + $0x118] sm:$0xff]  }
 0x497   : > { %27255 = vmatmul.mubr.msk.bf16.gmra.mrb[56].mxu1 %vm1999_vm1, %v29805_v38  ;;  %v29868_v38 = vld [vmem:[#allocation3 + $0x120] sm:$0xff]  }
 0x498   : > { %27258 = vmatprep.mubr.msk.bf16.mxu1 %vm1999_vm1, %v29806_v39  ;;  %v29869_v39 = vld [vmem:[#allocation3 + $0x128] sm:$0xff]  }
 0x49f   : > { %27259 = vmatmul.mubr.msk.bf16.gmra.mrb[60].mxu1 %vm1999_vm1, %v29807_v40  ;;  %v29870_v40 = vld [vmem:[#allocation3 + $0x130] sm:$0xff]  }
 0x4a0   : > { %27270 = vmatprep.mubr.msk.bf16.mxu1 %vm1999_vm1, %v29808_v41  ;;  %v29871_v41 = vld [vmem:[#allocation3 + $0x140] sm:$0xff]  }
 0x4a7   : > { %27271 = vmatmul.mubr.msk.bf16.vlgmr.msra.gmra.mrb[0].mxu1 %vm1999_vm1, %v29810_v42  ;;  %v29873_v42 = vld [vmem:[#allocation3 + $0x148] sm:$0xff]  }
 0x4a8   : > { %27335 = vmatpush3.bf16.msra.mxu1 %v32067_v13  ;;  %27274 = vmatprep.mubr.msk.bf16.mxu1 %vm1999_vm1, %v29811_v35  ;;  %v29844_v13 = vld [vmem:[#allocation3 + $0x50] sm:$0xff]   ;;  %v29876_v35 = vld [vmem:[#allocation3 + $0x168] sm:$0xff]  }
 0x4a9   : > { %27336 = vmatprep.subr.bf16.mxu1 %v29818_v43 }
 0x4ac   : > { %27337 = vmatpush3.bf16.msra.mxu1 %v29818_v43  ;;  %v29874_v43 = vld [vmem:[#allocation3 + $0x150] sm:$0xff]  }
 0x4ad   : > { %27338 = vmatprep.subr.bf16.mxu1 %v29827_v44 }
 0x4af   : > { %27275 = vmatmul.mubr.msk.bf16.gmra.mrb[4].mxu1 %vm1999_vm1, %v29812_v45  ;;  %v29877_v45 = vld [vmem:[#allocation3 + $0x170] sm:$0xff]  }
 0x4b0   : > { %27278 = vmatprep.mubr.msk.bf16.mxu1 %vm1999_vm1, %v29813_v47  ;;  %27339 = vmatpush3.bf16.msra.mxu1 %v29827_v44  ;;  %v29875_v44 = vld [vmem:[#allocation3 + $0x158] sm:$0xff]   ;;  %v29879_v47 = vld [vmem:[#allocation3 + $0x180] sm:$0xff]  }
 0x4b1   : > { %27340 = vmatprep.subr.bf16.mxu1 %v29836_v46 }
 0x4b4   : > { %27341 = vmatpush3.bf16.msra.mxu1 %v29836_v46  ;;  %v29878_v46 = vld [vmem:[#allocation3 + $0x178] sm:$0xff]  }
 0x4b5   : > { %27406 = vmatprep.subr.bf16.mxu1 %v32104_v48 }
 0x4b7   : > { %27279 = vmatmul.mubr.msk.bf16.gmra.mrb[8].mxu1 %vm1999_vm1, %v29814_v50  ;;  %v29882_v50 = vld [vmem:[#allocation3 + $0x5c] sm:$0xff]  }
 0x4b8   : > { %27282 = vmatprep.mubr.msk.bf16.mxu1 %vm1999_vm1, %v29815_v51  ;;  %v29890_v51 = vld [vmem:[#allocation11 + $0x108] sm:$0xff]  }
 0x4bf   : > { %27283 = vmatmul.mubr.msk.bf16.gmra.mrb[12].mxu1 %vm1999_vm1, %v29816_v52  ;;  %v29883_v52 = vld [vmem:[#allocation3 + $0x64] sm:$0xff]  }
 0x4c0   : > { %27286 = vmatprep.mubr.msk.bf16.mxu1 %vm1999_vm1, %v29817_v53  ;;  %v29899_v53 = vld [vmem:[#allocation11 + $0x110] sm:$0xff]  }
 0x4c7   : > { %27287 = vmatmul.mubr.msk.bf16.gmra.mrb[16].mxu1 %vm1999_vm1, %v29819_v54  ;;  %v29884_v54 = vld [vmem:[#allocation3 + $0x6c] sm:$0xff]  }
 0x4c8   : > { %27290 = vmatprep.mubr.msk.bf16.mxu1 %vm1999_vm1, %v29820_v55  ;;  %v29908_v55 = vld [vmem:[#allocation11 + $0x118] sm:$0xff]  }
 0x4cf   : > { %27291 = vmatmul.mubr.msk.bf16.gmra.mrb[20].mxu1 %vm1999_vm1, %v29821_v56  ;;  %v29885_v56 = vld [vmem:[#allocation3 + $0x7c] sm:$0xff]  }
 0x4d0   : > { %27294 = vmatprep.mubr.msk.bf16.mxu1 %vm1999_vm1, %v29822_v57  ;;  %v29886_v57 = vld [vmem:[#allocation3 + $0x84] sm:$0xff]  }
 0x4d7   : > { %27295 = vmatmul.mubr.msk.bf16.gmra.mrb[24].mxu1 %vm1999_vm1, %v29823_v58  ;;  %v29887_v58 = vld [vmem:[#allocation3 + $0x8c] sm:$0xff]  }
 0x4d8   : > { %27298 = vmatprep.mubr.msk.bf16.mxu1 %vm1999_vm1, %v29824_v59  ;;  %v29888_v59 = vld [vmem:[#allocation3 + $0x94] sm:$0xff]  }
 0x4df   : > { %27299 = vmatmul.mubr.msk.bf16.gmra.mrb[28].mxu1 %vm1999_vm1, %v29825_v60  ;;  %v29889_v60 = vld [vmem:[#allocation3 + $0xa4] sm:$0xff]  }
 0x4e0   : > { %27302 = vmatprep.mubr.msk.bf16.mxu1 %vm1999_vm1, %v29826_v61  ;;  %v29891_v61 = vld [vmem:[#allocation3 + $0xac] sm:$0xff]  }
 0x4e7   : > { %27303 = vmatmul.mubr.msk.bf16.gmra.mrb[32].mxu1 %vm1999_vm1, %v29828_v62  ;;  %v29892_v62 = vld [vmem:[#allocation3 + $0xb4] sm:$0xff]  }
 0x4e8   : > { %27306 = vmatprep.mubr.msk.bf16.mxu1 %vm1999_vm1, %v29829_v63  ;;  %v29893_v63 = vld [vmem:[#allocation3 + $0xbc] sm:$0xff]  }
 0x4ef   : > { %27307 = vmatmul.mubr.msk.bf16.gmra.mrb[36].mxu1 %vm1999_vm1, %v29830_v0  ;;  %v29894_v0 = vld [vmem:[#allocation3 + $0xcc] sm:$0xff]  }
 0x4f0   : > { %27310 = vmatprep.mubr.msk.bf16.mxu1 %vm1999_vm1, %v29831_v1  ;;  %v29895_v1 = vld [vmem:[#allocation3 + $0xd4] sm:$0xff]  }
 0x4f7   : > { %27311 = vmatmul.mubr.msk.bf16.gmra.mrb[40].mxu1 %vm1999_vm1, %v29832_v2  ;;  %v29896_v2 = vld [vmem:[#allocation3 + $0xdc] sm:$0xff]  }
 0x4f8   : > { %27314 = vmatprep.mubr.msk.bf16.mxu1 %vm1999_vm1, %v29833_v3  ;;  %v29897_v3 = vld [vmem:[#allocation3 + $0xe4] sm:$0xff]  }
 0x4ff   : > { %27315 = vmatmul.mubr.msk.bf16.gmra.mrb[44].mxu1 %vm1999_vm1, %v29834_v4  ;;  %v29898_v4 = vld [vmem:[#allocation3 + $0xf4] sm:$0xff]  }
 0x500   : > { %27318 = vmatprep.mubr.msk.bf16.mxu1 %vm1999_vm1, %v29835_v5  ;;  %v29900_v5 = vld [vmem:[#allocation3 + $0xfc] sm:$0xff]  }
 0x507   : > { %27319 = vmatmul.mubr.msk.bf16.gmra.mrb[48].mxu1 %vm1999_vm1, %v29837_v6  ;;  %v29901_v6 = vld [vmem:[#allocation3 + $0x104] sm:$0xff]  }
 0x508   : > { %27322 = vmatprep.mubr.msk.bf16.mxu1 %vm1999_vm1, %v29838_v7  ;;  %v29902_v7 = vld [vmem:[#allocation3 + $0x10c] sm:$0xff]  }
 0x50f   : > { %27323 = vmatmul.mubr.msk.bf16.gmra.mrb[52].mxu1 %vm1999_vm1, %v29839_v8  ;;  %v29903_v8 = vld [vmem:[#allocation3 + $0x11c] sm:$0xff]  }
 0x510   : > { %27326 = vmatprep.mubr.msk.bf16.mxu1 %vm1999_vm1, %v29840_v9  ;;  %v29904_v9 = vld [vmem:[#allocation3 + $0x124] sm:$0xff]  }
 0x517   : > { %27327 = vmatmul.mubr.msk.bf16.gmra.mrb[56].mxu1 %vm1999_vm1, %v29841_v10  ;;  %v29905_v10 = vld [vmem:[#allocation3 + $0x12c] sm:$0xff]  }
 0x518   : > { %27330 = vmatprep.mubr.msk.bf16.mxu1 %vm1999_vm1, %v29842_v11  ;;  %v29939_v11 = vld [vmem:[#allocation14] sm:$0xff]  }
 0x519   : > { %27550 = vmatprep.subr.bf16.mxu0 %v29939_v11 }
 0x51a   : > { %27551 = vmatpush3.bf16.msra.mxu0 %v29939_v11 }
 0x51f   : > { %27331 = vmatmul.mubr.msk.bf16.gmra.mrb[60].mxu1 %vm1999_vm1, %v29843_v12  ;;  %v29906_v12 = vld [vmem:[#allocation3 + $0x134] sm:$0xff]  }
 0x520   : > { %27342 = vmatprep.mubr.msk.bf16.mxu1 %vm1999_vm1, %v29844_v13  ;;  %v29907_v13 = vld [vmem:[#allocation3 + $0x144] sm:$0xff]  }
 0x527   : > { %27343 = vmatmul.mubr.msk.bf16.vlgmr.msra.gmra.mrb[0].mxu1 %vm1999_vm1, %v29846_v14  ;;  %v29909_v14 = vld [vmem:[#allocation3 + $0x14c] sm:$0xff]  }
 0x528   : > { %27407 = vmatpush3.bf16.msra.mxu1 %v32104_v48  ;;  %27346 = vmatprep.mubr.msk.bf16.mxu1 %vm1999_vm1, %v29847_v16  ;;  %v29880_v48 = vld [vmem:[#allocation3 + $0x54] sm:$0xff]   ;;  %v29944_v16 = vld [vmem:[#allocation14 + $0x8] sm:$0xff]  }
 0x529   : > { %27408 = vmatprep.subr.bf16.mxu1 %v29854_v15  ;;  %27552 = vmatprep.subr.bf16.mxu0 %v29944_v16 }
 0x52a   : > { %27553 = vmatpush3.bf16.msra.mxu0 %v29944_v16 }
 0x52c   : > { %27409 = vmatpush3.bf16.msra.mxu1 %v29854_v15  ;;  %v29910_v15 = vld [vmem:[#allocation3 + $0x154] sm:$0xff]  }
 0x52d   : > { %27410 = vmatprep.subr.bf16.mxu1 %v29863_v17 }
 0x52f   : > { %27347 = vmatmul.mubr.msk.bf16.gmra.mrb[4].mxu1 %vm1999_vm1, %v29848_v18  ;;  %v29911_v18 = vld [vmem:[#allocation3 + $0x15c] sm:$0xff]  }
 0x530   : > { %27350 = vmatprep.mubr.msk.bf16.mxu1 %vm1999_vm1, %v29849_v20  ;;  %27411 = vmatpush3.bf16.msra.mxu1 %v29863_v17  ;;  %v29912_v17 = vld [vmem:[#allocation3 + $0x16c] sm:$0xff]   ;;  %v29914_v20 = vld [vmem:[#allocation3 + $0x17c] sm:$0xff]  }
 0x531   : > { %27412 = vmatprep.subr.bf16.mxu1 %v29872_v19 }
 0x534   : > { %27413 = vmatpush3.bf16.msra.mxu1 %v29872_v19  ;;  %v29913_v19 = vld [vmem:[#allocation3 + $0x174] sm:$0xff]  }
 0x535   : > { %27478 = vmatprep.subr.bf16.mxu1 %v32140_v21 }
 0x537   : > { %27351 = vmatmul.mubr.msk.bf16.gmra.mrb[8].mxu1 %vm1999_vm1, %v29850_v22  ;;  %v29915_v22 = vld [vmem:[#allocation3 + $0x184] sm:$0xff]  }
 0x538   : > { %27354 = vmatprep.mubr.msk.bf16.mxu1 %vm1999_vm1, %v29851_v23  ;;  %v29916_v23 = vld [vmem:[#allocation3 + $0x58] sm:$0xff]  }
 0x53f   : > { %27355 = vmatmul.mubr.msk.bf16.gmra.mrb[12].mxu1 %vm1999_vm1, %v29852_v24  ;;  %v29951_v24 = vld [vmem:[#allocation14 + $0x18] sm:$0xff]  }
 0x540   : > { %27358 = vmatprep.mubr.msk.bf16.mxu1 %vm1999_vm1, %v29853_v25  ;;  %v29952_v25 = vld [vmem:[#allocation14 + $0x20] sm:$0xff]  }
 0x547   : > { %27359 = vmatmul.mubr.msk.bf16.gmra.mrb[16].mxu1 %vm1999_vm1, %v29855_v26  ;;  %v29953_v26 = vld [vmem:[#allocation14 + $0x28] sm:$0xff]  }
 0x548   : > { %27362 = vmatprep.mubr.msk.bf16.mxu1 %vm1999_vm1, %v29856_v27  ;;  %v29917_v27 = vld [vmem:[#allocation3 + $0x60] sm:$0xff]  }
 0x54f   : > { %27363 = vmatmul.mubr.msk.bf16.gmra.mrb[20].mxu1 %vm1999_vm1, %v29857_v28  ;;  %v29918_v28 = vld [vmem:[#allocation3 + $0x68] sm:$0xff]  }
 0x550   : > { %27366 = vmatprep.mubr.msk.bf16.mxu1 %vm1999_vm1, %v29858_v29  ;;  %v29954_v29 = vld [vmem:[#allocation14 + $0x30] sm:$0xff]  }
 0x557   : > { %27367 = vmatmul.mubr.msk.bf16.gmra.mrb[24].mxu1 %vm1999_vm1, %v29859_v30  ;;  %v29955_v30 = vld [vmem:[#allocation14 + $0x38] sm:$0xff]  }
 0x558   : > { %27370 = vmatprep.mubr.msk.bf16.mxu1 %vm1999_vm1, %v29860_v31  ;;  %v29919_v31 = vld [vmem:[#allocation3 + $0x70] sm:$0xff]  }
 0x55f   : > { %27371 = vmatmul.mubr.msk.bf16.gmra.mrb[28].mxu1 %vm1999_vm1, %v29861_v32  ;;  %v29920_v32 = vld [vmem:[#allocation3 + $0x80] sm:$0xff]  }
 0x560   : > { %27374 = vmatprep.mubr.msk.bf16.mxu1 %vm1999_vm1, %v29862_v49  ;;  %v29921_v49 = vld [vmem:[#allocation3 + $0x88] sm:$0xff]  }
 0x567   : > { %27375 = vmatmul.mubr.msk.bf16.gmra.mrb[32].mxu1 %vm1999_vm1, %v29864_v33  ;;  %v29922_v33 = vld [vmem:[#allocation3 + $0x90] sm:$0xff]  }
 0x568   : > { %27378 = vmatprep.mubr.msk.bf16.mxu1 %vm1999_vm1, %v29865_v34  ;;  %v29923_v34 = vld [vmem:[#allocation3 + $0x98] sm:$0xff]  }
 0x56f   : > { %27379 = vmatmul.mubr.msk.bf16.gmra.mrb[36].mxu1 %vm1999_vm1, %v29866_v36  ;;  %v29924_v36 = vld [vmem:[#allocation3 + $0xa8] sm:$0xff]  }
 0x570   : > { %27382 = vmatprep.mubr.msk.bf16.mxu1 %vm1999_vm1, %v29867_v37  ;;  %v29925_v37 = vld [vmem:[#allocation3 + $0xb0] sm:$0xff]  }
 0x577   : > { %27383 = vmatmul.mubr.msk.bf16.gmra.mrb[40].mxu1 %vm1999_vm1, %v29868_v38  ;;  %v29926_v38 = vld [vmem:[#allocation3 + $0xb8] sm:$0xff]  }
 0x578   : > { %27386 = vmatprep.mubr.msk.bf16.mxu1 %vm1999_vm1, %v29869_v39  ;;  %v29927_v39 = vld [vmem:[#allocation3 + $0xc0] sm:$0xff]  }
 0x57f   : > { %27387 = vmatmul.mubr.msk.bf16.gmra.mrb[44].mxu1 %vm1999_vm1, %v29870_v40  ;;  %v29928_v40 = vld [vmem:[#allocation3 + $0xd0] sm:$0xff]  }
 0x580   : > { %27390 = vmatprep.mubr.msk.bf16.mxu1 %vm1999_vm1, %v29871_v41  ;;  %v29929_v41 = vld [vmem:[#allocation3 + $0xd8] sm:$0xff]  }
 0x587   : > { %27391 = vmatmul.mubr.msk.bf16.gmra.mrb[48].mxu1 %vm1999_vm1, %v29873_v42  ;;  %v29930_v42 = vld [vmem:[#allocation3 + $0xe0] sm:$0xff]  }
 0x588   : > { %27394 = vmatprep.mubr.msk.bf16.mxu1 %vm1999_vm1, %v29874_v43  ;;  %v29931_v43 = vld [vmem:[#allocation3 + $0xe8] sm:$0xff]  }
 0x58f   : > { %27395 = vmatmul.mubr.msk.bf16.gmra.mrb[52].mxu1 %vm1999_vm1, %v29875_v44  ;;  %v29933_v44 = vld [vmem:[#allocation3 + $0x100] sm:$0xff]  }
 0x590   : > { %27398 = vmatprep.mubr.msk.bf16.mxu1 %vm1999_vm1, %v29876_v35  ;;  %v29932_v35 = vld [vmem:[#allocation3 + $0xf8] sm:$0xff]  }
 0x597   : > { %27399 = vmatmul.mubr.msk.bf16.gmra.mrb[56].mxu1 %vm1999_vm1, %v29877_v45  ;;  %v29934_v45 = vld [vmem:[#allocation3 + $0x108] sm:$0xff]  }
 0x598   : > { %27402 = vmatprep.mubr.msk.bf16.mxu1 %vm1999_vm1, %v29878_v46  ;;  %v29935_v46 = vld [vmem:[#allocation3 + $0x110] sm:$0xff]  }
 0x59f   : > { %27403 = vmatmul.mubr.msk.bf16.gmra.mrb[60].mxu1 %vm1999_vm1, %v29879_v47  ;;  %v29936_v47 = vld [vmem:[#allocation3 + $0x120] sm:$0xff]  }
 0x5a0   : > { %27414 = vmatprep.mubr.msk.bf16.mxu1 %vm1999_vm1, %v29880_v48  ;;  %v29937_v48 = vld [vmem:[#allocation3 + $0x128] sm:$0xff]  }
 0x5a7   : > { %27415 = vmatmul.mubr.msk.bf16.vlgmr.msra.gmra.mrb[0].mxu1 %vm1999_vm1, %v29882_v50  ;;  %v29938_v50 = vld [vmem:[#allocation3 + $0x130] sm:$0xff]  }
 0x5a8   : > { %27479 = vmatpush3.bf16.msra.mxu1 %v32140_v21  ;;  %27418 = vmatprep.mubr.msk.bf16.mxu1 %vm1999_vm1, %v29883_v52  ;;  %v29948_v21 = vld [vmem:[#allocation14 + $0x10] sm:$0xff]   ;;  %v29941_v52 = vld [vmem:[#allocation3 + $0x148] sm:$0xff]  }
 0x5a9   : > { %27480 = vmatprep.subr.bf16.mxu1 %v29890_v51  ;;  %27554 = vmatprep.subr.bf16.mxu0 %v29948_v21 }
 0x5aa   : > { %27555 = vmatpush3.bf16.msra.mxu0 %v29948_v21 }
 0x5ab   : > { %27556 = vmatprep.subr.bf16.mxu0 %v29951_v24 }
 0x5ac   : > { %27481 = vmatpush3.bf16.msra.mxu1 %v29890_v51  ;;  %v29940_v51 = vld [vmem:[#allocation3 + $0x138] sm:$0xff]  }
 0x5ad   : > { %27482 = vmatprep.subr.bf16.mxu1 %v29899_v53 }
 0x5ae   : > { %27557 = vmatpush3.bf16.msra.mxu0 %v29951_v24 }
 0x5af   : > { %27419 = vmatmul.mubr.msk.bf16.gmra.mrb[4].mxu1 %vm1999_vm1, %v29884_v54  ;;  %27558 = vmatprep.subr.bf16.mxu0 %v29952_v25  ;;  %v29957_v54 = vld [vmem:[#allocation14 + $0x40] sm:$0xff]  }
 0x5b0   : > { %27422 = vmatprep.mubr.msk.bf16.mxu1 %vm1999_vm1, %v29885_v56  ;;  %27483 = vmatpush3.bf16.msra.mxu1 %v29899_v53  ;;  %v29956_v53 = vld [vmem:[#allocation4] sm:$0xff]  }
 0x5b1   : > { %27484 = vmatprep.subr.bf16.mxu1 %v29908_v55  ;;  %v29942_v56 = vld [vmem:[#allocation3 + $0x150] sm:$0xff]   ;;  %27566 = vmatprep.mubr.bf16.mxu0 %v29956_v53 }
 0x5b2   : > { %27559 = vmatpush3.bf16.msra.mxu0 %v29952_v25 }
 0x5b3   : > { %27560 = vmatprep.subr.bf16.mxu0 %v29953_v26 }
 0x5b4   : > { %27485 = vmatpush3.bf16.msra.mxu1 %v29908_v55  ;;  %v29958_v55 = vld [vmem:[#allocation4 + $0x8] sm:$0xff]  }
 0x5b6   : > { %27561 = vmatpush3.bf16.msra.mxu0 %v29953_v26 }
 0x5b7   : > { %27423 = vmatmul.mubr.msk.bf16.gmra.mrb[8].mxu1 %vm1999_vm1, %v29886_v57  ;;  %27562 = vmatprep.subr.bf16.mxu0 %v29954_v29  ;;  %v29943_v57 = vld [vmem:[#allocation3 + $0x158] sm:$0xff]  }
 0x5b8   : > { %27426 = vmatprep.mubr.msk.bf16.mxu1 %vm1999_vm1, %v29887_v58  ;;  %v29946_v58 = vld [vmem:[#allocation3 + $0x170] sm:$0xff]  }
 0x5ba   : > { %27563 = vmatpush3.bf16.msra.mxu0 %v29954_v29 }
 0x5bb   : > { %27564 = vmatprep.subr.bf16.mxu0 %v29955_v30 }
 0x5be   : > { %27565 = vmatpush3.bf16.msra.mxu0 %v29955_v30 }
 0x5bf   : > { %27427 = vmatmul.mubr.msk.bf16.gmra.mrb[12].mxu1 %vm1999_vm1, %v29888_v59  ;;  %27630 = vmatprep.subr.bf16.mxu0 %v29957_v54  ;;  %v29959_v59 = vld [vmem:[#allocation4 + $0x10] sm:$0xff]  }
 0x5c0   : > { %27430 = vmatprep.mubr.msk.bf16.mxu1 %vm1999_vm1, %v29889_v60  ;;  %v29960_v60 = vld [vmem:[#allocation4 + $0x18] sm:$0xff]  }
 0x5c1   : > { %27567 = vmatmul.mubr.bf16.vlgmr.msra.gmra.mrb[64].mxu0 %v29958_v55 }
 0x5c2   : > { %27631 = vmatpush3.bf16.msra.mxu0 %v29957_v54  ;;  %27570 = vmatprep.mubr.bf16.mxu0 %v29959_v59 }
 0x5c7   : > { %27431 = vmatmul.mubr.msk.bf16.gmra.mrb[16].mxu1 %vm1999_vm1, %v29891_v61  ;;  %v29945_v61 = vld [vmem:[#allocation3 + $0x160] sm:$0xff]  }
 0x5c8   : > { %27434 = vmatprep.mubr.msk.bf16.mxu1 %vm1999_vm1, %v29892_v62  ;;  %v29947_v62 = vld [vmem:[#allocation3 + $0x178] sm:$0xff]  }
 0x5c9   : > { %27571 = vmatmul.mubr.bf16.gmra.mrb[68].mxu0 %v29960_v60 }
 0x5cf   : > { %27435 = vmatmul.mubr.msk.bf16.gmra.mrb[20].mxu1 %vm1999_vm1, %v29893_v63  ;;  %v29949_v63 = vld [vmem:[#allocation3 + $0x180] sm:$0xff]  }
 0x5d0   : > { %27438 = vmatprep.mubr.msk.bf16.mxu1 %vm1999_vm1, %v29894_v0  ;;  %v29962_v0 = vld [vmem:[#allocation14 + $0x48] sm:$0xff]  }
 0x5d1   : > { %27632 = vmatprep.subr.bf16.mxu0 %v29962_v0 }
 0x5d2   : > { %27633 = vmatpush3.bf16.msra.mxu0 %v29962_v0 }
 0x5d7   : > { %27439 = vmatmul.mubr.msk.bf16.gmra.mrb[24].mxu1 %vm1999_vm1, %v29895_v1  ;;  %v29950_v1 = vld [vmem:[#allocation3 + $0x188] sm:$0xff]  }
 0x5d8   : > { %27442 = vmatprep.mubr.msk.bf16.mxu1 %vm1999_vm1, %v29896_v2  ;;  %v29967_v2 = vld [vmem:[#allocation14 + $0x50] sm:$0xff]  }
 0x5d9   : > { %27634 = vmatprep.subr.bf16.mxu0 %v29967_v2 }
 0x5da   : > { %27635 = vmatpush3.bf16.msra.mxu0 %v29967_v2 }
 0x5df   : > { %27443 = vmatmul.mubr.msk.bf16.gmra.mrb[28].mxu1 %vm1999_vm1, %v29897_v3  ;;  %v29972_v3 = vld [vmem:[#allocation14 + $0x58] sm:$0xff]  }
 0x5e0   : > { %27446 = vmatprep.mubr.msk.bf16.mxu1 %vm1999_vm1, %v29898_v4  ;;  %27636 = vmatprep.subr.bf16.mxu0 %v29972_v3  ;;  %v29977_v4 = vld [vmem:[#allocation14 + $0x60] sm:$0xff]  }
 0x5e1   : > { %27637 = vmatpush3.bf16.msra.mxu0 %v29972_v3 }
 0x5e2   : > { %27638 = vmatprep.subr.bf16.mxu0 %v29977_v4 }
 0x5e5   : > { %27639 = vmatpush3.bf16.msra.mxu0 %v29977_v4 }
 0x5e7   : > { %27447 = vmatmul.mubr.msk.bf16.gmra.mrb[32].mxu1 %vm1999_vm1, %v29900_v5  ;;  %v29982_v5 = vld [vmem:[#allocation14 + $0x68] sm:$0xff]  }
 0x5e8   : > { %27450 = vmatprep.mubr.msk.bf16.mxu1 %vm1999_vm1, %v29901_v6  ;;  %27640 = vmatprep.subr.bf16.mxu0 %v29982_v5  ;;  %v29987_v6 = vld [vmem:[#allocation14 + $0x70] sm:$0xff]  }
 0x5e9   : > { %27641 = vmatpush3.bf16.msra.mxu0 %v29982_v5 }
 0x5ea   : > { %27642 = vmatprep.subr.bf16.mxu0 %v29987_v6 }
 0x5ed   : > { %27643 = vmatpush3.bf16.msra.mxu0 %v29987_v6 }
 0x5ef   : > { %27451 = vmatmul.mubr.msk.bf16.gmra.mrb[36].mxu1 %vm1999_vm1, %v29902_v7  ;;  %v29992_v7 = vld [vmem:[#allocation14 + $0x78] sm:$0xff]  }
 0x5f0   : > { %27454 = vmatprep.mubr.msk.bf16.mxu1 %vm1999_vm1, %v29903_v8  ;;  %27644 = vmatprep.subr.bf16.mxu0 %v29992_v7  ;;  %v32235_v8 = vld [vmem:[#allocation12] ss:$0 sm:$0xff] }
 0x5f1   : > { %27645 = vmatpush3.bf16.msra.mxu0 %v29992_v7 }
 0x5f7   : > { %27455 = vmatmul.mubr.msk.bf16.gmra.mrb[40].mxu1 %vm1999_vm1, %v29904_v9 }
 0x5f8   : > { %27458 = vmatprep.mubr.msk.bf16.mxu1 %vm1999_vm1, %v29905_v10 }
 0x5ff   : > { %27459 = vmatmul.mubr.msk.bf16.gmra.mrb[44].mxu1 %vm1999_vm1, %v29906_v12 }
 0x600   : > { %27462 = vmatprep.mubr.msk.bf16.mxu1 %vm1999_vm1, %v29907_v13 }
 0x607   : > { %27463 = vmatmul.mubr.msk.bf16.gmra.mrb[48].mxu1 %vm1999_vm1, %v29909_v14  ;;  %v29997_v14 = vld [vmem:[#allocation14 + $0x80] sm:$0xff]  }
 0x608   : > { %27466 = vmatprep.mubr.msk.bf16.mxu1 %vm1999_vm1, %v29910_v15  ;;  %27710 = vmatprep.subr.bf16.mxu0 %v29997_v14 }
 0x60f   : > { %27467 = vmatmul.mubr.msk.bf16.gmra.mrb[52].mxu1 %vm1999_vm1, %v29911_v18 }
 0x610   : > { %27470 = vmatprep.mubr.msk.bf16.mxu1 %vm1999_vm1, %v29912_v17 }
 0x617   : > { %27471 = vmatmul.mubr.msk.bf16.gmra.mrb[56].mxu1 %vm1999_vm1, %v29913_v19 }
 0x618   : > { %27474 = vmatprep.mubr.msk.bf16.mxu1 %vm1999_vm1, %v29914_v20 }
 0x61f   : > { %27475 = vmatmul.mubr.msk.bf16.gmra.mrb[60].mxu1 %vm1999_vm1, %v29915_v22 }
 0x620   : > { %27486 = vmatprep.mubr.msk.bf16.mxu1 %vm1999_vm1, %v29916_v23 }
 0x627   : > { %27487 = vmatmul.mubr.msk.bf16.vlgmr.msra.gmra.mrb[0].mxu1 %vm1999_vm1, %v29917_v27 }
 0x628   : > { %27490 = vmatprep.mubr.msk.bf16.mxu1 %vm1999_vm1, %v29918_v28 }
 0x62f   : > { %27491 = vmatmul.mubr.msk.bf16.gmra.mrb[4].mxu1 %vm1999_vm1, %v29919_v31 }
 0x630   : > { %27494 = vmatprep.mubr.msk.bf16.mxu1 %vm1999_vm1, %v29920_v32 }
 0x637   : > { %27495 = vmatmul.mubr.msk.bf16.gmra.mrb[8].mxu1 %vm1999_vm1, %v29921_v49 }
 0x638   : > { %27498 = vmatprep.mubr.msk.bf16.mxu1 %vm1999_vm1, %v29922_v33 }
 0x63f   : > { %27499 = vmatmul.mubr.msk.bf16.gmra.mrb[12].mxu1 %vm1999_vm1, %v29923_v34 }
 0x640   : > { %27502 = vmatprep.mubr.msk.bf16.mxu1 %vm1999_vm1, %v29924_v36 }
 0x647   : > { %27503 = vmatmul.mubr.msk.bf16.gmra.mrb[16].mxu1 %vm1999_vm1, %v29925_v37 }
 0x648   : > { %27506 = vmatprep.mubr.msk.bf16.mxu1 %vm1999_vm1, %v29926_v38 }
 0x64f   : > { %27507 = vmatmul.mubr.msk.bf16.gmra.mrb[20].mxu1 %vm1999_vm1, %v29927_v39 }
 0x650   : > { %27510 = vmatprep.mubr.msk.bf16.mxu1 %vm1999_vm1, %v29928_v40 }
 0x657   : > { %27511 = vmatmul.mubr.msk.bf16.gmra.mrb[24].mxu1 %vm1999_vm1, %v29929_v41 }
 0x658   : > { %27514 = vmatprep.mubr.msk.bf16.mxu1 %vm1999_vm1, %v29930_v42 }
 0x65f   : > { %27515 = vmatmul.mubr.msk.bf16.gmra.mrb[28].mxu1 %vm1999_vm1, %v29931_v43 }
 0x660   : > { %27518 = vmatprep.mubr.msk.bf16.mxu1 %vm1999_vm1, %v29932_v35 }
 0x667   : > { %27519 = vmatmul.mubr.msk.bf16.gmra.mrb[32].mxu1 %vm1999_vm1, %v29933_v44 }
 0x668   : > { %27522 = vmatprep.mubr.msk.bf16.mxu1 %vm1999_vm1, %v29934_v45 }
 0x66f   : > { %27523 = vmatmul.mubr.msk.bf16.gmra.mrb[36].mxu1 %vm1999_vm1, %v29935_v46 }
 0x670   : > { %27526 = vmatprep.mubr.msk.bf16.mxu1 %vm1999_vm1, %v29936_v47 }
 0x677   : > { %27527 = vmatmul.mubr.msk.bf16.gmra.mrb[40].mxu1 %vm1999_vm1, %v29937_v48 }
 0x678   : > { %27530 = vmatprep.mubr.msk.bf16.mxu1 %vm1999_vm1, %v29938_v50 }
 0x67f   : > { %27531 = vmatmul.mubr.msk.bf16.gmra.mrb[44].mxu1 %vm1999_vm1, %v29940_v51 }
 0x680   : > { %27534 = vmatprep.mubr.msk.bf16.mxu1 %vm1999_vm1, %v29941_v52 }
 0x687   : > { %27535 = vmatmul.mubr.msk.bf16.gmra.mrb[48].mxu1 %vm1999_vm1, %v29942_v56 }
 0x688   : > { %27538 = vmatprep.mubr.msk.bf16.mxu1 %vm1999_vm1, %v29943_v57 }
 0x68f   : > { %27539 = vmatmul.mubr.msk.bf16.gmra.mrb[52].mxu1 %vm1999_vm1, %v29945_v61 }
 0x690   : > { %27542 = vmatprep.mubr.msk.bf16.mxu1 %vm1999_vm1, %v29946_v58 }
 0x697   : > { %27543 = vmatmul.mubr.msk.bf16.gmra.mrb[56].mxu1 %vm1999_vm1, %v29947_v62 }
 0x698   : > { %27546 = vmatprep.mubr.msk.bf16.mxu1 %vm1999_vm1, %v29949_v63 }
 0x69f   : > { %27547 = vmatmul.mubr.msk.bf16.gmra.mrb[60].mxu1 %vm1999_vm1, %v29950_v1 }
 0x6fa   : > { %v27488_v9 = vpop.f32.mrb[0].mxu1 }
 0x6fb   : > { %v8800_v10 = vpop.f32.mrb[1].mxu1  ;;  %v28290_v11 = vadd.f32 %v27488_v9, %v32235_v8 }
 0x6fc   : > { %v28291_v12 = vadd.f32 %v32235_v8, %v8800_v10  ;;  %v27489_v13 = vpop.f32.mrb[2].mxu1 }
 0x6fd   : > { %v8803_v15 = vpop.f32.mrb[3].mxu1  ;;  %v9249_v18 = vmax.f32 %v28290_v11, 0.0  ;;  %v28292_v21 = vadd.f32 %v27489_v13, %v32235_v8 }
 0x6fe   : > { %v9247_v16 = vmax.f32 %v28291_v12, 0.0  ;;  %v28293_v17 = vadd.f32 %v32235_v8, %v8803_v15 }
 0x6ff   : > { %v9250_v30 = vmax.f32 %v28292_v21, 0.0 }
 0x700   : > { %v24922_v19 = vpack.c.bf16 %v9247_v16, %v9247_v16  ;;  %v9248_v20 = vmax.f32 %v28293_v17, 0.0 }
 0x702   : > { %9568 = vst [vmem:[#allocation4 + $0x2c] sm:$0xf] %v24922_v19  ;;  %v24989_v22 = vpack.c.bf16 %v9249_v18, %v9248_v20  ;;  %v27492_v23 = vpop.f32.mrb[4].mxu1 }
 0x703   : > { %v8816_v24 = vpop.f32.mrb[5].mxu1  ;;  %v28294_v25 = vadd.f32 %v27492_v23, %v32235_v8 }
 0x704   : > { %25266 = vst [vmem:[#allocation4 + $0x30] sm:$0xff] %v24989_v22   ;;  %v28295_v26 = vadd.f32 %v32235_v8, %v8816_v24  ;;  %v27493_v27 = vpop.f32.mrb[6].mxu1 }
 0x705   : > { %v28296_v28 = vadd.f32 %v27493_v27, %v32235_v8  ;;  %v8819_v29 = vpop.f32.mrb[7].mxu1  ;;  %v9253_v33 = vmax.f32 %v28294_v25, 0.0 }
 0x706   : > { %v9251_v31 = vmax.f32 %v28295_v26, 0.0  ;;  %v28297_v32 = vadd.f32 %v32235_v8, %v8819_v29 }
 0x707   : > { %v9254_v49 = vmax.f32 %v28296_v28, 0.0 }
 0x708   : > { %v24994_v34 = vpack.c.bf16 %v9251_v31, %v9250_v30  ;;  %v9252_v36 = vmax.f32 %v28297_v32, 0.0 }
 0x709   : > { %v24929_v37 = vpack.c.bf16 %v9254_v49, %v9254_v49  ;;  %v29961_v38 = vld [vmem:[#allocation4 + $0x28] sm:$0xff]  }
 0x70a   : > { %25267 = vst [vmem:[#allocation4 + $0x38] sm:$0xff] %v24994_v34   ;;  %v24999_v39 = vpack.c.bf16 %v9253_v33, %v9252_v36  ;;  %v27496_v40 = vpop.f32.mrb[8].mxu1  ;;  %27574 = vmatprep.mubr.bf16.mxu0 %v29961_v38 }
 0x70b   : > { %9575 = vst [vmem:[#allocation4 + $0x48] sm:$0xf] %v24929_v37  ;;  %v8832_v41 = vpop.f32.mrb[9].mxu1  ;;  %v29963_v42 = vld [vmem:[#allocation4 + $0x30] sm:$0xff]   ;;  %v28298_v43 = vadd.f32 %v27496_v40, %v32235_v8 }
 0x70c   : > { %25268 = vst [vmem:[#allocation4 + $0x40] sm:$0xff] %v24999_v39   ;;  %v28299_v35 = vadd.f32 %v32235_v8, %v8832_v41  ;;  %v27497_v44 = vpop.f32.mrb[10].mxu1  ;;  %27575 = vmatmul.mubr.bf16.gmra.mrb[72].mxu0 %v29963_v42 }
 0x70d   : > { %v8835_v45 = vpop.f32.mrb[11].mxu1  ;;  %v9257_v48 = vmax.f32 %v28298_v43, 0.0  ;;  %v28300_v53 = vadd.f32 %v27497_v44, %v32235_v8 }
 0x70e   : > { %v9255_v46 = vmax.f32 %v28299_v35, 0.0  ;;  %v28301_v47 = vadd.f32 %v32235_v8, %v8835_v45 }
 0x70f   : > { %v9258_v63 = vmax.f32 %v28300_v53, 0.0 }
 0x710   : > { %v24930_v50 = vpack.c.bf16 %v9255_v46, %v9255_v46  ;;  %v9256_v51 = vmax.f32 %v28301_v47, 0.0 }
 0x711   : > { %v29964_v52 = vld [vmem:[#allocation4 + $0x38] sm:$0xff]  }
 0x712   : > { %9576 = vst [vmem:[#allocation4 + $0x54] sm:$0xf] %v24930_v50  ;;  %v25004_v54 = vpack.c.bf16 %v9257_v48, %v9256_v51  ;;  %v27500_v55 = vpop.f32.mrb[12].mxu1  ;;  %27578 = vmatprep.mubr.bf16.mxu0 %v29964_v52 }
 0x713   : > { %v8848_v56 = vpop.f32.mrb[13].mxu1  ;;  %v29965_v57 = vld [vmem:[#allocation4 + $0x40] sm:$0xff]   ;;  %v28302_v58 = vadd.f32 %v27500_v55, %v32235_v8 }
 0x714   : > { %25269 = vst [vmem:[#allocation4 + $0x58] sm:$0xff] %v25004_v54   ;;  %v28303_v59 = vadd.f32 %v32235_v8, %v8848_v56  ;;  %v27501_v60 = vpop.f32.mrb[14].mxu1  ;;  %27579 = vmatmul.mubr.bf16.gmra.mrb[76].mxu0 %v29965_v57 }
 0x715   : > { %v28304_v61 = vadd.f32 %v27501_v60, %v32235_v8  ;;  %v8851_v62 = vpop.f32.mrb[15].mxu1  ;;  %v9261_v3 = vmax.f32 %v28302_v58, 0.0 }
 0x716   : > { %v9259_v0 = vmax.f32 %v28303_v59, 0.0  ;;  %v28305_v1 = vadd.f32 %v32235_v8, %v8851_v62 }
 0x717   : > { %v9262_v2 = vmax.f32 %v28304_v61, 0.0 }
 0x718   : > { %v25009_v4 = vpack.c.bf16 %v9259_v0, %v9258_v63  ;;  %v9260_v5 = vmax.f32 %v28305_v1, 0.0 }
 0x719   : > { %v24937_v6 = vpack.c.bf16 %v9262_v2, %v9262_v2  ;;  %v29966_v7 = vld [vmem:[#allocation4 + $0x50] sm:$0xff]  }
 0x71a   : > { %25270 = vst [vmem:[#allocation4 + $0x60] sm:$0xff] %v25009_v4   ;;  %v25014_v9 = vpack.c.bf16 %v9261_v3, %v9260_v5  ;;  %v27504_v10 = vpop.f32.mrb[16].mxu1  ;;  %27582 = vmatprep.mubr.bf16.mxu0 %v29966_v7 }
 0x71b   : > { %9583 = vst [vmem:[#allocation4 + $0x70] sm:$0xf] %v24937_v6  ;;  %v8864_v11 = vpop.f32.mrb[17].mxu1  ;;  %v29968_v12 = vld [vmem:[#allocation4 + $0x58] sm:$0xff]   ;;  %v28306_v13 = vadd.f32 %v27504_v10, %v32235_v8 }
 0x71c   : > { %25271 = vst [vmem:[#allocation4 + $0x68] sm:$0xff] %v25014_v9   ;;  %v28307_v14 = vadd.f32 %v32235_v8, %v8864_v11  ;;  %v27505_v15 = vpop.f32.mrb[18].mxu1  ;;  %27583 = vmatmul.mubr.bf16.gmra.mrb[80].mxu0 %v29968_v12 }
 0x71d   : > { %v8867_v16 = vpop.f32.mrb[19].mxu1  ;;  %v9265_v19 = vmax.f32 %v28306_v13, 0.0  ;;  %v28308_v23 = vadd.f32 %v27505_v15, %v32235_v8 }
 0x71e   : > { %v9263_v17 = vmax.f32 %v28307_v14, 0.0  ;;  %v28309_v18 = vadd.f32 %v32235_v8, %v8867_v16 }
 0x71f   : > { %v9266_v49 = vmax.f32 %v28308_v23, 0.0 }
 0x720   : > { %v24938_v20 = vpack.c.bf16 %v9263_v17, %v9263_v17  ;;  %v9264_v21 = vmax.f32 %v28309_v18, 0.0 }
 0x721   : > { %v29969_v22 = vld [vmem:[#allocation4 + $0x60] sm:$0xff]  }
 0x722   : > { %9584 = vst [vmem:[#allocation4 + $0x7c] sm:$0xf] %v24938_v20  ;;  %v25019_v24 = vpack.c.bf16 %v9265_v19, %v9264_v21  ;;  %v27508_v25 = vpop.f32.mrb[20].mxu1  ;;  %27586 = vmatprep.mubr.bf16.mxu0 %v29969_v22 }
 0x723   : > { %v8880_v26 = vpop.f32.mrb[21].mxu1  ;;  %v29970_v27 = vld [vmem:[#allocation4 + $0x68] sm:$0xff]   ;;  %v28310_v28 = vadd.f32 %v27508_v25, %v32235_v8 }
 0x724   : > { %25272 = vst [vmem:[#allocation4 + $0x80] sm:$0xff] %v25019_v24   ;;  %v28311_v29 = vadd.f32 %v32235_v8, %v8880_v26  ;;  %v27509_v30 = vpop.f32.mrb[22].mxu1  ;;  %27587 = vmatmul.mubr.bf16.gmra.mrb[84].mxu0 %v29970_v27 }
 0x725   : > { %v28312_v31 = vadd.f32 %v27509_v30, %v32235_v8  ;;  %v8883_v32 = vpop.f32.mrb[23].mxu1  ;;  %v9269_v37 = vmax.f32 %v28310_v28, 0.0 }
 0x726   : > { %v9267_v33 = vmax.f32 %v28311_v29, 0.0  ;;  %v28313_v34 = vadd.f32 %v32235_v8, %v8883_v32 }
 0x727   : > { %v9270_v36 = vmax.f32 %v28312_v31, 0.0 }
 0x728   : > { %v25024_v38 = vpack.c.bf16 %v9267_v33, %v9266_v49  ;;  %v9268_v39 = vmax.f32 %v28313_v34, 0.0 }
 0x729   : > { %v24945_v40 = vpack.c.bf16 %v9270_v36, %v9270_v36  ;;  %v29971_v41 = vld [vmem:[#allocation4 + $0x78] sm:$0xff]  }
 0x72a   : > { %25273 = vst [vmem:[#allocation4 + $0x88] sm:$0xff] %v25024_v38   ;;  %v25029_v42 = vpack.c.bf16 %v9269_v37, %v9268_v39  ;;  %v27512_v43 = vpop.f32.mrb[24].mxu1  ;;  %27590 = vmatprep.mubr.bf16.mxu0 %v29971_v41 }
 0x72b   : > { %9591 = vst [vmem:[#allocation4 + $0x98] sm:$0xf] %v24945_v40  ;;  %v8896_v35 = vpop.f32.mrb[25].mxu1  ;;  %v29973_v44 = vld [vmem:[#allocation4 + $0x80] sm:$0xff]   ;;  %v28314_v45 = vadd.f32 %v27512_v43, %v32235_v8 }
 0x72c   : > { %25274 = vst [vmem:[#allocation4 + $0x90] sm:$0xff] %v25029_v42   ;;  %v28315_v46 = vadd.f32 %v32235_v8, %v8896_v35  ;;  %v27513_v47 = vpop.f32.mrb[26].mxu1  ;;  %27591 = vmatmul.mubr.bf16.gmra.mrb[88].mxu0 %v29973_v44 }
 0x72d   : > { %v8899_v48 = vpop.f32.mrb[27].mxu1  ;;  %v9273_v52 = vmax.f32 %v28314_v45, 0.0  ;;  %v28316_v56 = vadd.f32 %v27513_v47, %v32235_v8 }
 0x72e   : > { %v9271_v50 = vmax.f32 %v28315_v46, 0.0  ;;  %v28317_v51 = vadd.f32 %v32235_v8, %v8899_v48 }
 0x72f   : > { %v9274_v2 = vmax.f32 %v28316_v56, 0.0 }
 0x730   : > { %v24946_v53 = vpack.c.bf16 %v9271_v50, %v9271_v50  ;;  %v9272_v54 = vmax.f32 %v28317_v51, 0.0 }
 0x731   : > { %v29974_v55 = vld [vmem:[#allocation4 + $0x88] sm:$0xff]  }
 0x732   : > { %9592 = vst [vmem:[#allocation4 + $0xa4] sm:$0xf] %v24946_v53  ;;  %v25034_v57 = vpack.c.bf16 %v9273_v52, %v9272_v54  ;;  %v27516_v58 = vpop.f32.mrb[28].mxu1  ;;  %27594 = vmatprep.mubr.bf16.mxu0 %v29974_v55 }
 0x733   : > { %v8912_v59 = vpop.f32.mrb[29].mxu1  ;;  %v29975_v60 = vld [vmem:[#allocation4 + $0x90] sm:$0xff]   ;;  %v28318_v61 = vadd.f32 %v27516_v58, %v32235_v8 }
 0x734   : > { %25275 = vst [vmem:[#allocation4 + $0xa8] sm:$0xff] %v25034_v57   ;;  %v28319_v62 = vadd.f32 %v32235_v8, %v8912_v59  ;;  %v27517_v63 = vpop.f32.mrb[30].mxu1  ;;  %27595 = vmatmul.mubr.bf16.gmra.mrb[92].mxu0 %v29975_v60 }
 0x735   : > { %v28320_v0 = vadd.f32 %v27517_v63, %v32235_v8  ;;  %v8915_v1 = vpop.f32.mrb[31].mxu1  ;;  %v9277_v6 = vmax.f32 %v28318_v61, 0.0 }
 0x736   : > { %v9275_v3 = vmax.f32 %v28319_v62, 0.0  ;;  %v28321_v4 = vadd.f32 %v32235_v8, %v8915_v1 }
 0x737   : > { %v9278_v5 = vmax.f32 %v28320_v0, 0.0 }
 0x738   : > { %v25039_v7 = vpack.c.bf16 %v9275_v3, %v9274_v2  ;;  %v9276_v9 = vmax.f32 %v28321_v4, 0.0 }
 0x739   : > { %v24953_v10 = vpack.c.bf16 %v9278_v5, %v9278_v5  ;;  %v29976_v11 = vld [vmem:[#allocation4 + $0xa0] sm:$0xff]  }
 0x73a   : > { %25276 = vst [vmem:[#allocation4 + $0xb0] sm:$0xff] %v25039_v7   ;;  %v25044_v12 = vpack.c.bf16 %v9277_v6, %v9276_v9  ;;  %v27520_v13 = vpop.f32.mrb[32].mxu1  ;;  %27598 = vmatprep.mubr.bf16.mxu0 %v29976_v11 }
 0x73b   : > { %9599 = vst [vmem:[#allocation4 + $0xc0] sm:$0xf] %v24953_v10  ;;  %v8928_v14 = vpop.f32.mrb[33].mxu1  ;;  %v29978_v15 = vld [vmem:[#allocation4 + $0xa8] sm:$0xff]   ;;  %v28322_v16 = vadd.f32 %v27520_v13, %v32235_v8 }
 0x73c   : > { %25277 = vst [vmem:[#allocation4 + $0xb8] sm:$0xff] %v25044_v12   ;;  %v28323_v17 = vadd.f32 %v32235_v8, %v8928_v14  ;;  %v27521_v18 = vpop.f32.mrb[34].mxu1  ;;  %27599 = vmatmul.mubr.bf16.gmra.mrb[96].mxu0 %v29978_v15 }
 0x73d   : > { %v8931_v19 = vpop.f32.mrb[35].mxu1  ;;  %v9281_v22 = vmax.f32 %v28322_v16, 0.0  ;;  %v28324_v26 = vadd.f32 %v27521_v18, %v32235_v8 }
 0x73e   : > { %v9279_v20 = vmax.f32 %v28323_v17, 0.0  ;;  %v28325_v21 = vadd.f32 %v32235_v8, %v8931_v19 }
 0x73f   : > { %v9282_v36 = vmax.f32 %v28324_v26, 0.0 }
 0x740   : > { %v24954_v23 = vpack.c.bf16 %v9279_v20, %v9279_v20  ;;  %v9280_v24 = vmax.f32 %v28325_v21, 0.0 }
 0x741   : > { %v29979_v25 = vld [vmem:[#allocation4 + $0xb0] sm:$0xff]  }
 0x742   : > { %9600 = vst [vmem:[#allocation4 + $0xcc] sm:$0xf] %v24954_v23  ;;  %v25049_v27 = vpack.c.bf16 %v9281_v22, %v9280_v24  ;;  %v27524_v28 = vpop.f32.mrb[36].mxu1  ;;  %27602 = vmatprep.mubr.bf16.mxu0 %v29979_v25 }
 0x743   : > { %v8944_v29 = vpop.f32.mrb[37].mxu1  ;;  %v29980_v30 = vld [vmem:[#allocation4 + $0xb8] sm:$0xff]   ;;  %v28326_v31 = vadd.f32 %v27524_v28, %v32235_v8 }
 0x744   : > { %25278 = vst [vmem:[#allocation4 + $0xd0] sm:$0xff] %v25049_v27   ;;  %v28327_v32 = vadd.f32 %v32235_v8, %v8944_v29  ;;  %v27525_v49 = vpop.f32.mrb[38].mxu1  ;;  %27603 = vmatmul.mubr.bf16.gmra.mrb[100].mxu0 %v29980_v30 }
 0x745   : > { %v28328_v33 = vadd.f32 %v27525_v49, %v32235_v8  ;;  %v8947_v34 = vpop.f32.mrb[39].mxu1  ;;  %v9285_v40 = vmax.f32 %v28326_v31, 0.0 }
 0x746   : > { %v9283_v37 = vmax.f32 %v28327_v32, 0.0  ;;  %v28329_v38 = vadd.f32 %v32235_v8, %v8947_v34 }
 0x747   : > { %v9286_v39 = vmax.f32 %v28328_v33, 0.0 }
 0x748   : > { %v25054_v41 = vpack.c.bf16 %v9283_v37, %v9282_v36  ;;  %v9284_v42 = vmax.f32 %v28329_v38, 0.0 }
 0x749   : > { %v24961_v43 = vpack.c.bf16 %v9286_v39, %v9286_v39  ;;  %v29981_v35 = vld [vmem:[#allocation4 + $0xc8] sm:$0xff]  }
 0x74a   : > { %25279 = vst [vmem:[#allocation4 + $0xd8] sm:$0xff] %v25054_v41   ;;  %v25059_v44 = vpack.c.bf16 %v9285_v40, %v9284_v42  ;;  %v27528_v45 = vpop.f32.mrb[40].mxu1  ;;  %27606 = vmatprep.mubr.bf16.mxu0 %v29981_v35 }
 0x74b   : > { %9607 = vst [vmem:[#allocation4 + $0xe8] sm:$0xf] %v24961_v43  ;;  %v8960_v46 = vpop.f32.mrb[41].mxu1  ;;  %v29983_v47 = vld [vmem:[#allocation4 + $0xd0] sm:$0xff]   ;;  %v28330_v48 = vadd.f32 %v27528_v45, %v32235_v8 }
 0x74c   : > { %25280 = vst [vmem:[#allocation4 + $0xe0] sm:$0xff] %v25059_v44   ;;  %v28331_v50 = vadd.f32 %v32235_v8, %v8960_v46  ;;  %v27529_v51 = vpop.f32.mrb[42].mxu1  ;;  %27607 = vmatmul.mubr.bf16.gmra.mrb[104].mxu0 %v29983_v47 }
 0x74d   : > { %v8963_v52 = vpop.f32.mrb[43].mxu1  ;;  %v9289_v55 = vmax.f32 %v28330_v48, 0.0  ;;  %v28332_v59 = vadd.f32 %v27529_v51, %v32235_v8 }
 0x74e   : > { %v9287_v53 = vmax.f32 %v28331_v50, 0.0  ;;  %v28333_v54 = vadd.f32 %v32235_v8, %v8963_v52 }
 0x74f   : > { %v9290_v5 = vmax.f32 %v28332_v59, 0.0 }
 0x750   : > { %v24962_v56 = vpack.c.bf16 %v9287_v53, %v9287_v53  ;;  %v9288_v57 = vmax.f32 %v28333_v54, 0.0 }
 0x751   : > { %v29984_v58 = vld [vmem:[#allocation4 + $0xd8] sm:$0xff]  }
 0x752   : > { %9608 = vst [vmem:[#allocation4 + $0xf4] sm:$0xf] %v24962_v56  ;;  %v25064_v60 = vpack.c.bf16 %v9289_v55, %v9288_v57  ;;  %v27532_v61 = vpop.f32.mrb[44].mxu1  ;;  %27610 = vmatprep.mubr.bf16.mxu0 %v29984_v58 }
 0x753   : > { %v8976_v62 = vpop.f32.mrb[45].mxu1  ;;  %v29985_v63 = vld [vmem:[#allocation4 + $0xe0] sm:$0xff]   ;;  %v28334_v0 = vadd.f32 %v27532_v61, %v32235_v8 }
 0x754   : > { %25281 = vst [vmem:[#allocation4 + $0xf8] sm:$0xff] %v25064_v60   ;;  %v28335_v1 = vadd.f32 %v32235_v8, %v8976_v62  ;;  %v27533_v2 = vpop.f32.mrb[46].mxu1  ;;  %27611 = vmatmul.mubr.bf16.gmra.mrb[108].mxu0 %v29985_v63 }
 0x755   : > { %v28336_v3 = vadd.f32 %v27533_v2, %v32235_v8  ;;  %v8979_v4 = vpop.f32.mrb[47].mxu1  ;;  %v9293_v10 = vmax.f32 %v28334_v0, 0.0 }
 0x756   : > { %v9291_v6 = vmax.f32 %v28335_v1, 0.0  ;;  %v28337_v7 = vadd.f32 %v32235_v8, %v8979_v4  ;;  %v29996_v1 = vld [vmem:[#allocation4 + $0x4] sm:$0xff]   ;;  %v30831_v4 = vld [vmem:[#allocation12] ss:$0 sm:$0xff] }
 0x757   : > { %v9294_v9 = vmax.f32 %v28336_v3, 0.0 }
 0x758   : > { %v25069_v11 = vpack.c.bf16 %v9291_v6, %v9290_v5  ;;  %v9292_v12 = vmax.f32 %v28337_v7, 0.0 }
 0x759   : > { %v24969_v13 = vpack.c.bf16 %v9294_v9, %v9294_v9  ;;  %v29986_v14 = vld [vmem:[#allocation4 + $0xf0] sm:$0xff]  }
 0x75a   : > { %25282 = vst [vmem:[#allocation4 + $0x100] sm:$0xff] %v25069_v11   ;;  %v25074_v15 = vpack.c.bf16 %v9293_v10, %v9292_v12  ;;  %v27536_v16 = vpop.f32.mrb[48].mxu1  ;;  %27614 = vmatprep.mubr.bf16.mxu0 %v29986_v14 }
 0x75b   : > { %9615 = vst [vmem:[#allocation4 + $0x110] sm:$0xf] %v24969_v13  ;;  %v8992_v17 = vpop.f32.mrb[49].mxu1  ;;  %v29988_v18 = vld [vmem:[#allocation4 + $0xf8] sm:$0xff]   ;;  %v28338_v19 = vadd.f32 %v27536_v16, %v32235_v8 }
 0x75c   : > { %25283 = vst [vmem:[#allocation4 + $0x108] sm:$0xff] %v25074_v15   ;;  %v28339_v20 = vadd.f32 %v32235_v8, %v8992_v17  ;;  %v27537_v21 = vpop.f32.mrb[50].mxu1  ;;  %27615 = vmatmul.mubr.bf16.gmra.mrb[112].mxu0 %v29988_v18 }
 0x75d   : > { %v8995_v22 = vpop.f32.mrb[51].mxu1  ;;  %v9297_v25 = vmax.f32 %v28338_v19, 0.0  ;;  %v28340_v29 = vadd.f32 %v27537_v21, %v32235_v8  ;;  %v29999_v19 = vld [vmem:[#allocation4 + $0x14] sm:$0xff]   ;;  %v30002_v21 = vld [vmem:[#allocation14 + $0x88] sm:$0xff]  }
 0x75e   : > { %v9295_v23 = vmax.f32 %v28339_v20, 0.0  ;;  %v28341_v24 = vadd.f32 %v32235_v8, %v8995_v22  ;;  %v30832_v22 = vld [vmem:[#allocation14 + $0x80] sm:$0xff]  }
 0x75f   : > { %v9298_v39 = vmax.f32 %v28340_v29, 0.0  ;;  %v30022_v29 = vld [vmem:[#allocation14 + $0xa8] sm:$0xff]  }
 0x760   : > { %v24970_v26 = vpack.c.bf16 %v9295_v23, %v9295_v23  ;;  %v9296_v27 = vmax.f32 %v28341_v24, 0.0  ;;  %v30007_v23 = vld [vmem:[#allocation14 + $0x90] sm:$0xff]   ;;  %v30000_v24 = vld [vmem:[#allocation4 + $0x1c] sm:$0xff]  }
 0x761   : > { %v29989_v28 = vld [vmem:[#allocation4 + $0x100] sm:$0xff]  }
 0x762   : > { %9616 = vst [vmem:[#allocation4 + $0x11c] sm:$0xf] %v24970_v26  ;;  %v25079_v30 = vpack.c.bf16 %v9297_v25, %v9296_v27  ;;  %v27540_v31 = vpop.f32.mrb[52].mxu1  ;;  %27618 = vmatprep.mubr.bf16.mxu0 %v29989_v28  ;;  %v30012_v25 = vld [vmem:[#allocation14 + $0x98] sm:$0xff]   ;;  %v30017_v27 = vld [vmem:[#allocation14 + $0xa0] sm:$0xff]  }
 0x763   : > { %v9008_v32 = vpop.f32.mrb[53].mxu1  ;;  %v29990_v49 = vld [vmem:[#allocation4 + $0x108] sm:$0xff]   ;;  %v28342_v33 = vadd.f32 %v27540_v31, %v32235_v8  ;;  %v30003_v28 = vld [vmem:[#allocation4 + $0x34] sm:$0xff]  }
 0x764   : > { %25284 = vst [vmem:[#allocation4 + $0x120] sm:$0xff] %v25079_v30   ;;  %v28343_v34 = vadd.f32 %v32235_v8, %v9008_v32  ;;  %v27541_v36 = vpop.f32.mrb[54].mxu1  ;;  %27619 = vmatmul.mubr.bf16.gmra.mrb[116].mxu0 %v29990_v49  ;;  %v30001_v26 = vld [vmem:[#allocation4 + $0x2c] sm:$0xff]   ;;  %v30004_v30 = vld [vmem:[#allocation4 + $0x3c] sm:$0xff]   ;;  %v30027_v31 = vld [vmem:[#allocation14 + $0xb0] sm:$0xff]  }
 0x765   : > { %v28344_v37 = vadd.f32 %v27541_v36, %v32235_v8  ;;  %v9011_v38 = vpop.f32.mrb[55].mxu1  ;;  %v9301_v43 = vmax.f32 %v28342_v33, 0.0  ;;  %v30005_v32 = vld [vmem:[#allocation4 + $0x44] sm:$0xff]   ;;  %v30032_v49 = vld [vmem:[#allocation14 + $0xb8] sm:$0xff]   ;;  %v30006_v33 = vld [vmem:[#allocation4 + $0x54] sm:$0xff]  }
 0x766   : > { %v9299_v40 = vmax.f32 %v28343_v34, 0.0  ;;  %v28345_v41 = vadd.f32 %v32235_v8, %v9011_v38  ;;  %v30037_v34 = vld [vmem:[#allocation14 + $0xc0] sm:$0xff]   ;;  %v30008_v36 = vld [vmem:[#allocation4 + $0x5c] sm:$0xff]   ;;  %v30010_v38 = vld [vmem:[#allocation4 + $0x6c] sm:$0xff]  }
 0x767   : > { %v9302_v42 = vmax.f32 %v28344_v37, 0.0  ;;  %v30009_v37 = vld [vmem:[#allocation4 + $0x64] sm:$0xff]  }
 0x768   : > { %v25084_v35 = vpack.c.bf16 %v9299_v40, %v9298_v39  ;;  %v9300_v44 = vmax.f32 %v28345_v41, 0.0  ;;  %v30011_v39 = vld [vmem:[#allocation4 + $0x7c] sm:$0xff]   ;;  %v30013_v40 = vld [vmem:[#allocation4 + $0x84] sm:$0xff]   ;;  %v30014_v41 = vld [vmem:[#allocation4 + $0x8c] sm:$0xff]  }
 0x769   : > { %v24977_v45 = vpack.c.bf16 %v9302_v42, %v9302_v42  ;;  %v29991_v46 = vld [vmem:[#allocation4 + $0x118] sm:$0xff]  }
 0x76a   : > { %25285 = vst [vmem:[#allocation4 + $0x128] sm:$0xff] %v25084_v35   ;;  %v25089_v47 = vpack.c.bf16 %v9301_v43, %v9300_v44  ;;  %v27544_v48 = vpop.f32.mrb[56].mxu1  ;;  %27622 = vmatprep.mubr.bf16.mxu0 %v29991_v46  ;;  %v30015_v42 = vld [vmem:[#allocation4 + $0x94] sm:$0xff]   ;;  %v30016_v43 = vld [vmem:[#allocation4 + $0xa4] sm:$0xff]   ;;  %v30018_v35 = vld [vmem:[#allocation4 + $0xac] sm:$0xff]  }
 0x76b   : > { %9623 = vst [vmem:[#allocation4 + $0x138] sm:$0xf] %v24977_v45  ;;  %v9024_v50 = vpop.f32.mrb[57].mxu1  ;;  %v29993_v51 = vld [vmem:[#allocation4 + $0x120] sm:$0xff]   ;;  %v28346_v52 = vadd.f32 %v27544_v48, %v32235_v8  ;;  %v30019_v44 = vld [vmem:[#allocation4 + $0xb4] sm:$0xff]   ;;  %v30021_v46 = vld [vmem:[#allocation4 + $0xcc] sm:$0xff]  }
 0x76c   : > { %25286 = vst [vmem:[#allocation4 + $0x130] sm:$0xff] %v25089_v47   ;;  %v28347_v53 = vadd.f32 %v32235_v8, %v9024_v50  ;;  %v27545_v54 = vpop.f32.mrb[58].mxu1  ;;  %27623 = vmatmul.mubr.bf16.gmra.mrb[120].mxu0 %v29993_v51  ;;  %v30020_v45 = vld [vmem:[#allocation4 + $0xbc] sm:$0xff]   ;;  %v30023_v47 = vld [vmem:[#allocation4 + $0xd4] sm:$0xff]   ;;  %v30025_v50 = vld [vmem:[#allocation4 + $0xe4] sm:$0xff]  }
 0x76d   : > { %v9027_v55 = vpop.f32.mrb[59].mxu1  ;;  %v9305_v58 = vmax.f32 %v28346_v52, 0.0  ;;  %v28348_v62 = vadd.f32 %v27545_v54, %v32235_v8  ;;  %v30024_v48 = vld [vmem:[#allocation4 + $0xdc] sm:$0xff]   ;;  %v30026_v51 = vld [vmem:[#allocation4 + $0xf4] sm:$0xff]   ;;  %v30030_v54 = vld [vmem:[#allocation4 + $0x10c] sm:$0xff]  }
 0x76e   : > { %v9303_v56 = vmax.f32 %v28347_v53, 0.0  ;;  %v28349_v57 = vadd.f32 %v32235_v8, %v9027_v55  ;;  %v29998_v8 = vld [vmem:[#allocation4 + $0xc] sm:$0xff]   ;;  %v30028_v52 = vld [vmem:[#allocation4 + $0xfc] sm:$0xff]   ;;  %v30029_v53 = vld [vmem:[#allocation4 + $0x104] sm:$0xff]  }
 0x76f   : > { %v9306_v11 = vmax.f32 %v28348_v62, 0.0  ;;  %v30031_v55 = vld [vmem:[#allocation4 + $0x11c] sm:$0xff]  }
 0x770   : > { %v24978_v59 = vpack.c.bf16 %v9303_v56, %v9303_v56  ;;  %v9304_v60 = vmax.f32 %v28349_v57, 0.0  ;;  %v30042_v62 = vld [vmem:[#allocation14 + $0xc8] sm:$0xff]  }
 0x771   : > { %v29994_v61 = vld [vmem:[#allocation4 + $0x128] sm:$0xff]  }
 0x772   : > { %9624 = vst [vmem:[#allocation4 + $0x144] sm:$0xf] %v24978_v59  ;;  %v25094_v63 = vpack.c.bf16 %v9305_v58, %v9304_v60  ;;  %v27548_v0 = vpop.f32.mrb[60].mxu1  ;;  %27626 = vmatprep.mubr.bf16.mxu0 %v29994_v61  ;;  %v30033_v56 = vld [vmem:[#allocation4 + $0x124] sm:$0xff]   ;;  %v30038_v60 = vld [vmem:[#allocation4 + $0x10] sm:$0xff]   ;;  %v30039_v61 = vld [vmem:[#allocation4 + $0x18] sm:$0xff]  }
 0x773   : > { %v9040_v2 = vpop.f32.mrb[61].mxu1  ;;  %v29995_v3 = vld [vmem:[#allocation4 + $0x130] sm:$0xff]   ;;  %v28350_v5 = vadd.f32 %v30831_v4, %v27548_v0  ;;  %v30036_v58 = vld [vmem:[#allocation4 + $0x8] sm:$0xff]   ;;  %v30040_v0 = vld [vmem:[#allocation4 + $0x20] sm:$0xff]  }
 0x774   : > { %25287 = vst [vmem:[#allocation4 + $0x148] sm:$0xff] %v25094_v63   ;;  %v28351_v6 = vadd.f32 %v30831_v4, %v9040_v2  ;;  %v27549_v7 = vpop.f32.mrb[62].mxu1  ;;  %27627 = vmatmul.mubr.bf16.gmra.mrb[124].mxu0 %v29995_v3  ;;  %v30034_v57 = vld [vmem:[#allocation4 + $0x12c] sm:$0xff]   ;;  %v30035_v59 = vld [vmem:[#allocation4 + $0x134] sm:$0xff]   ;;  %v30047_v63 = vld [vmem:[#allocation14 + $0xd0] sm:$0xff]  }
 0x775   : > { %v28352_v9 = vadd.f32 %v30831_v4, %v27549_v7  ;;  %v9043_v10 = vpop.f32.mrb[63].mxu1  ;;  %27646 = vmatprep.mubr.bf16.mxu0 %v29996_v1  ;;  %v9309_v15 = vmax.f32 %v28350_v5, 0.0  ;;  %v30052_v1 = vld [vmem:[#allocation14 + $0xd8] sm:$0xff]   ;;  %v30057_v3 = vld [vmem:[#allocation14 + $0xe0] sm:$0xff]   ;;  %v30062_v5 = vld [vmem:[#allocation14 + $0xe8] sm:$0xff]  }
 0x776   : > { %v9307_v12 = vmax.f32 %v28351_v6, 0.0  ;;  %v28353_v13 = vadd.f32 %v30831_v4, %v9043_v10  ;;  %v30041_v2 = vld [vmem:[#allocation4 + $0x30] sm:$0xff]   ;;  %v30043_v4 = vld [vmem:[#allocation4 + $0x38] sm:$0xff]   ;;  %v30044_v6 = vld [vmem:[#allocation4 + $0x40] sm:$0xff]  }
 0x777   : > { %v9310_v14 = vmax.f32 %v28352_v9, 0.0  ;;  %v30067_v7 = vld [vmem:[#allocation14 + $0xf0] sm:$0xff]   ;;  %v30072_v10 = vld [vmem:[#allocation14 + $0xf8] sm:$0xff]  }
 0x778   : > { %v25099_v16 = vpack.c.bf16 %v9307_v12, %v9306_v11  ;;  %v9308_v17 = vmax.f32 %v28353_v13, 0.0  ;;  %v30045_v9 = vld [vmem:[#allocation4 + $0x48] sm:$0xff]   ;;  %v30046_v11 = vld [vmem:[#allocation4 + $0x58] sm:$0xff]   ;;  %v30048_v13 = vld [vmem:[#allocation4 + $0x60] sm:$0xff]  }
 0x779   : > { %v24985_v18 = vpack.c.bf16 %v9310_v14, %v9310_v14  ;;  %v30077_v12 = vld [vmem:[#allocation14 + $0x100] sm:$0xff]   ;;  %v30049_v14 = vld [vmem:[#allocation4 + $0x68] sm:$0xff]  }
 0x77a   : > { %25288 = vst [vmem:[#allocation4 + $0x150] sm:$0xff] %v25099_v16   ;;  %v25104_v20 = vpack.c.bf16 %v9309_v15, %v9308_v17  ;;  %v30051_v15 = vld [vmem:[#allocation4 + $0x80] sm:$0xff]   ;;  %v30053_v16 = vld [vmem:[#allocation4 + $0x88] sm:$0xff]   ;;  %v30054_v17 = vld [vmem:[#allocation4 + $0x90] sm:$0xff]  }
 0x77b   : > { %9631 = vst [vmem:[#allocation4 + $0x160] sm:$0xf] %v24985_v18  ;;  %v30055_v18 = vld [vmem:[#allocation4 + $0x98] sm:$0xff]  }
 0x77c   : > { %25289 = vst [vmem:[#allocation4 + $0x158] sm:$0xff] %v25104_v20   ;;  %27647 = vmatmul.mubr.bf16.vlgmr.msra.gmra.mrb[64].mxu0 %v29998_v8  ;;  %v30050_v8 = vld [vmem:[#allocation4 + $0x70] sm:$0xff]  }
 0x77d   : > { %27711 = vmatpush3.bf16.msra.mxu0 %v30832_v22  ;;  %27650 = vmatprep.mubr.bf16.mxu0 %v29999_v19  ;;  %v30056_v19 = vld [vmem:[#allocation4 + $0xa8] sm:$0xff]   ;;  %v30058_v20 = vld [vmem:[#allocation4 + $0xb0] sm:$0xff]   ;;  %v30060_v22 = vld [vmem:[#allocation4 + $0xc0] sm:$0xff]  }
 0x77e   : > { %27712 = vmatprep.subr.bf16.mxu0 %v30002_v21 }
 0x781   : > { %27713 = vmatpush3.bf16.msra.mxu0 %v30002_v21  ;;  %v30059_v21 = vld [vmem:[#allocation4 + $0xb8] sm:$0xff]  }
 0x782   : > { %27714 = vmatprep.subr.bf16.mxu0 %v30007_v23 }
 0x784   : > { %27651 = vmatmul.mubr.bf16.gmra.mrb[68].mxu0 %v30000_v24  ;;  %v30063_v24 = vld [vmem:[#allocation4 + $0xd8] sm:$0xff]  }
 0x785   : > { %27654 = vmatprep.mubr.bf16.mxu0 %v30001_v26  ;;  %27715 = vmatpush3.bf16.msra.mxu0 %v30007_v23  ;;  %v30061_v23 = vld [vmem:[#allocation4 + $0xd0] sm:$0xff]   ;;  %v30065_v26 = vld [vmem:[#allocation4 + $0xe8] sm:$0xff]  }
 0x786   : > { %27716 = vmatprep.subr.bf16.mxu0 %v30012_v25 }
 0x789   : > { %27717 = vmatpush3.bf16.msra.mxu0 %v30012_v25  ;;  %v30064_v25 = vld [vmem:[#allocation4 + $0xe0] sm:$0xff]  }
 0x78a   : > { %27718 = vmatprep.subr.bf16.mxu0 %v30017_v27 }
 0x78c   : > { %27655 = vmatmul.mubr.bf16.gmra.mrb[72].mxu0 %v30003_v28  ;;  %v30068_v28 = vld [vmem:[#allocation4 + $0x100] sm:$0xff]  }
 0x78d   : > { %27658 = vmatprep.mubr.bf16.mxu0 %v30004_v30  ;;  %27719 = vmatpush3.bf16.msra.mxu0 %v30017_v27  ;;  %v30066_v27 = vld [vmem:[#allocation4 + $0xf8] sm:$0xff]   ;;  %v30070_v30 = vld [vmem:[#allocation4 + $0x110] sm:$0xff]  }
 0x78e   : > { %27720 = vmatprep.subr.bf16.mxu0 %v30022_v29 }
 0x791   : > { %27721 = vmatpush3.bf16.msra.mxu0 %v30022_v29  ;;  %v30069_v29 = vld [vmem:[#allocation4 + $0x108] sm:$0xff]  }
 0x792   : > { %27722 = vmatprep.subr.bf16.mxu0 %v30027_v31 }
 0x794   : > { %27659 = vmatmul.mubr.bf16.gmra.mrb[76].mxu0 %v30005_v32  ;;  %v30073_v32 = vld [vmem:[#allocation4 + $0x128] sm:$0xff]  }
 0x795   : > { %27662 = vmatprep.mubr.bf16.mxu0 %v30006_v33  ;;  %27723 = vmatpush3.bf16.msra.mxu0 %v30027_v31  ;;  %v30071_v31 = vld [vmem:[#allocation4 + $0x120] sm:$0xff]   ;;  %v30075_v33 = vld [vmem:[#allocation4 + $0x138] sm:$0xff]  }
 0x796   : > { %27724 = vmatprep.subr.bf16.mxu0 %v30032_v49 }
 0x799   : > { %27725 = vmatpush3.bf16.msra.mxu0 %v30032_v49  ;;  %v30074_v49 = vld [vmem:[#allocation4 + $0x130] sm:$0xff]  }
 0x79a   : > { %27790 = vmatprep.subr.bf16.mxu0 %v30037_v34 }
 0x79c   : > { %27663 = vmatmul.mubr.bf16.gmra.mrb[80].mxu0 %v30008_v36  ;;  %v30078_v36 = vld [vmem:[#allocation4 + $0x30] sm:$0xff]  }
 0x79d   : > { %27666 = vmatprep.mubr.bf16.mxu0 %v30009_v37  ;;  %v30082_v37 = vld [vmem:[#allocation14 + $0x108] sm:$0xff]  }
 0x7a4   : > { %27667 = vmatmul.mubr.bf16.gmra.mrb[84].mxu0 %v30010_v38  ;;  %v30079_v38 = vld [vmem:[#allocation4 + $0x38] sm:$0xff]  }
 0x7a5   : > { %27670 = vmatprep.mubr.bf16.mxu0 %v30011_v39  ;;  %v30087_v39 = vld [vmem:[#allocation14 + $0x110] sm:$0xff]  }
 0x7ac   : > { %27671 = vmatmul.mubr.bf16.gmra.mrb[88].mxu0 %v30013_v40  ;;  %v30080_v40 = vld [vmem:[#allocation4 + $0x40] sm:$0xff]  }
 0x7ad   : > { %27674 = vmatprep.mubr.bf16.mxu0 %v30014_v41  ;;  %v30092_v41 = vld [vmem:[#allocation14 + $0x118] sm:$0xff]  }
 0x7b4   : > { %27675 = vmatmul.mubr.bf16.gmra.mrb[92].mxu0 %v30015_v42  ;;  %v30081_v42 = vld [vmem:[#allocation4 + $0x50] sm:$0xff]  }
 0x7b5   : > { %27678 = vmatprep.mubr.bf16.mxu0 %v30016_v43  ;;  %v30097_v43 = vld [vmem:[#allocation14 + $0x120] sm:$0xff]  }
 0x7bc   : > { %27679 = vmatmul.mubr.bf16.gmra.mrb[96].mxu0 %v30018_v35  ;;  %v30083_v35 = vld [vmem:[#allocation4 + $0x58] sm:$0xff]  }
 0x7bd   : > { %27682 = vmatprep.mubr.bf16.mxu0 %v30019_v44  ;;  %v30102_v44 = vld [vmem:[#allocation14 + $0x128] sm:$0xff]  }
 0x7c4   : > { %27683 = vmatmul.mubr.bf16.gmra.mrb[100].mxu0 %v30020_v45  ;;  %v30084_v45 = vld [vmem:[#allocation4 + $0x60] sm:$0xff]  }
 0x7c5   : > { %27686 = vmatprep.mubr.bf16.mxu0 %v30021_v46  ;;  %v30107_v46 = vld [vmem:[#allocation14 + $0x130] sm:$0xff]  }
 0x7cc   : > { %27687 = vmatmul.mubr.bf16.gmra.mrb[104].mxu0 %v30023_v47  ;;  %v30085_v47 = vld [vmem:[#allocation4 + $0x68] sm:$0xff]  }
 0x7cd   : > { %27690 = vmatprep.mubr.bf16.mxu0 %v30024_v48  ;;  %v30112_v48 = vld [vmem:[#allocation14 + $0x138] sm:$0xff]  }
 0x7d4   : > { %27691 = vmatmul.mubr.bf16.gmra.mrb[108].mxu0 %v30025_v50  ;;  %v30086_v50 = vld [vmem:[#allocation4 + $0x78] sm:$0xff]  }
 0x7d5   : > { %27694 = vmatprep.mubr.bf16.mxu0 %v30026_v51  ;;  %v30117_v51 = vld [vmem:[#allocation14 + $0x140] sm:$0xff]  }
 0x7dc   : > { %27695 = vmatmul.mubr.bf16.gmra.mrb[112].mxu0 %v30028_v52  ;;  %v30088_v52 = vld [vmem:[#allocation4 + $0x80] sm:$0xff]  }
 0x7dd   : > { %27698 = vmatprep.mubr.bf16.mxu0 %v30029_v53  ;;  %v30089_v53 = vld [vmem:[#allocation4 + $0x88] sm:$0xff]  }
 0x7e4   : > { %27699 = vmatmul.mubr.bf16.gmra.mrb[116].mxu0 %v30030_v54  ;;  %v30090_v54 = vld [vmem:[#allocation4 + $0x90] sm:$0xff]  }
 0x7e5   : > { %27702 = vmatprep.mubr.bf16.mxu0 %v30031_v55  ;;  %v30091_v55 = vld [vmem:[#allocation4 + $0xa0] sm:$0xff]  }
 0x7ec   : > { %27703 = vmatmul.mubr.bf16.gmra.mrb[120].mxu0 %v30033_v56  ;;  %v30093_v56 = vld [vmem:[#allocation4 + $0xa8] sm:$0xff]  }
 0x7ed   : > { %27706 = vmatprep.mubr.bf16.mxu0 %v30034_v57  ;;  %v30094_v57 = vld [vmem:[#allocation4 + $0xb0] sm:$0xff]  }
 0x7f4   : > { %27707 = vmatmul.mubr.bf16.gmra.mrb[124].mxu0 %v30035_v59  ;;  %v30096_v59 = vld [vmem:[#allocation4 + $0xc8] sm:$0xff]  }
 0x7f5   : > { %27726 = vmatprep.mubr.bf16.mxu0 %v30036_v58  ;;  %v30095_v58 = vld [vmem:[#allocation4 + $0xb8] sm:$0xff]  }
 0x7fc   : > { %27727 = vmatmul.mubr.bf16.vlgmr.msra.gmra.mrb[64].mxu0 %v30038_v60  ;;  %v30098_v60 = vld [vmem:[#allocation4 + $0xd0] sm:$0xff]  }
 0x7fd   : > { %27791 = vmatpush3.bf16.msra.mxu0 %v30037_v34  ;;  %27730 = vmatprep.mubr.bf16.mxu0 %v30039_v61  ;;  %v30076_v34 = vld [vmem:[#allocation4 + $0x28] sm:$0xff]   ;;  %v30099_v61 = vld [vmem:[#allocation4 + $0xd8] sm:$0xff]  }
 0x7fe   : > { %27792 = vmatprep.subr.bf16.mxu0 %v30042_v62 }
 0x801   : > { %27793 = vmatpush3.bf16.msra.mxu0 %v30042_v62  ;;  %v30100_v62 = vld [vmem:[#allocation4 + $0xe0] sm:$0xff]  }
 0x802   : > { %27794 = vmatprep.subr.bf16.mxu0 %v30047_v63 }
 0x804   : > { %27731 = vmatmul.mubr.bf16.gmra.mrb[68].mxu0 %v30040_v0  ;;  %v30103_v0 = vld [vmem:[#allocation4 + $0xf8] sm:$0xff]  }
 0x805   : > { %27734 = vmatprep.mubr.bf16.mxu0 %v30041_v2  ;;  %27795 = vmatpush3.bf16.msra.mxu0 %v30047_v63  ;;  %v30101_v63 = vld [vmem:[#allocation4 + $0xf0] sm:$0xff]   ;;  %v30105_v2 = vld [vmem:[#allocation4 + $0x108] sm:$0xff]  }
 0x806   : > { %27796 = vmatprep.subr.bf16.mxu0 %v30052_v1 }
 0x809   : > { %27797 = vmatpush3.bf16.msra.mxu0 %v30052_v1  ;;  %v30104_v1 = vld [vmem:[#allocation4 + $0x100] sm:$0xff]  }
 0x80a   : > { %27798 = vmatprep.subr.bf16.mxu0 %v30057_v3 }
 0x80c   : > { %27735 = vmatmul.mubr.bf16.gmra.mrb[72].mxu0 %v30043_v4  ;;  %v30108_v4 = vld [vmem:[#allocation4 + $0x120] sm:$0xff]  }
 0x80d   : > { %27738 = vmatprep.mubr.bf16.mxu0 %v30044_v6  ;;  %27799 = vmatpush3.bf16.msra.mxu0 %v30057_v3  ;;  %v30106_v3 = vld [vmem:[#allocation4 + $0x118] sm:$0xff]   ;;  %v30110_v6 = vld [vmem:[#allocation4 + $0x130] sm:$0xff]  }
 0x80e   : > { %27800 = vmatprep.subr.bf16.mxu0 %v30062_v5 }
 0x811   : > { %27801 = vmatpush3.bf16.msra.mxu0 %v30062_v5  ;;  %v30109_v5 = vld [vmem:[#allocation4 + $0x128] sm:$0xff]  }
 0x812   : > { %27802 = vmatprep.subr.bf16.mxu0 %v30067_v7 }
 0x814   : > { %27739 = vmatmul.mubr.bf16.gmra.mrb[76].mxu0 %v30045_v9  ;;  %v30113_v9 = vld [vmem:[#allocation4 + $0x148] sm:$0xff]  }
 0x815   : > { %27742 = vmatprep.mubr.bf16.mxu0 %v30046_v11  ;;  %27803 = vmatpush3.bf16.msra.mxu0 %v30067_v7  ;;  %v30111_v7 = vld [vmem:[#allocation4 + $0x140] sm:$0xff]   ;;  %v30115_v11 = vld [vmem:[#allocation4 + $0x158] sm:$0xff]  }
 0x816   : > { %27804 = vmatprep.subr.bf16.mxu0 %v30072_v10 }
 0x819   : > { %27805 = vmatpush3.bf16.msra.mxu0 %v30072_v10  ;;  %v30114_v10 = vld [vmem:[#allocation4 + $0x150] sm:$0xff]  }
 0x81a   : > { %27870 = vmatprep.subr.bf16.mxu0 %v30077_v12 }
 0x81c   : > { %27743 = vmatmul.mubr.bf16.gmra.mrb[80].mxu0 %v30048_v13  ;;  %v30118_v13 = vld [vmem:[#allocation4 + $0x34] sm:$0xff]  }
 0x81d   : > { %27746 = vmatprep.mubr.bf16.mxu0 %v30049_v14  ;;  %v30122_v14 = vld [vmem:[#allocation14 + $0x148] sm:$0xff]  }
 0x824   : > { %27747 = vmatmul.mubr.bf16.gmra.mrb[84].mxu0 %v30050_v8  ;;  %v30119_v8 = vld [vmem:[#allocation4 + $0x3c] sm:$0xff]  }
 0x825   : > { %27750 = vmatprep.mubr.bf16.mxu0 %v30051_v15  ;;  %v30127_v15 = vld [vmem:[#allocation14 + $0x150] sm:$0xff]  }
 0x82c   : > { %27751 = vmatmul.mubr.bf16.gmra.mrb[88].mxu0 %v30053_v16  ;;  %v30120_v16 = vld [vmem:[#allocation4 + $0x44] sm:$0xff]  }
 0x82d   : > { %27754 = vmatprep.mubr.bf16.mxu0 %v30054_v17  ;;  %v30132_v17 = vld [vmem:[#allocation14 + $0x158] sm:$0xff]  }
 0x834   : > { %27755 = vmatmul.mubr.bf16.gmra.mrb[92].mxu0 %v30055_v18  ;;  %v30121_v18 = vld [vmem:[#allocation4 + $0x54] sm:$0xff]  }
 0x835   : > { %27758 = vmatprep.mubr.bf16.mxu0 %v30056_v19  ;;  %v30137_v19 = vld [vmem:[#allocation14 + $0x160] sm:$0xff]  }
 0x83c   : > { %27759 = vmatmul.mubr.bf16.gmra.mrb[96].mxu0 %v30058_v20  ;;  %v30123_v20 = vld [vmem:[#allocation4 + $0x5c] sm:$0xff]  }
 0x83d   : > { %27762 = vmatprep.mubr.bf16.mxu0 %v30059_v21  ;;  %v30142_v21 = vld [vmem:[#allocation14 + $0x168] sm:$0xff]  }
 0x844   : > { %27763 = vmatmul.mubr.bf16.gmra.mrb[100].mxu0 %v30060_v22  ;;  %v30124_v22 = vld [vmem:[#allocation4 + $0x64] sm:$0xff]  }
 0x845   : > { %27766 = vmatprep.mubr.bf16.mxu0 %v30061_v23  ;;  %v30147_v23 = vld [vmem:[#allocation14 + $0x170] sm:$0xff]  }
 0x84c   : > { %27767 = vmatmul.mubr.bf16.gmra.mrb[104].mxu0 %v30063_v24  ;;  %v30125_v24 = vld [vmem:[#allocation4 + $0x6c] sm:$0xff]  }
 0x84d   : > { %27770 = vmatprep.mubr.bf16.mxu0 %v30064_v25  ;;  %v30152_v25 = vld [vmem:[#allocation14 + $0x178] sm:$0xff]  }
 0x854   : > { %27771 = vmatmul.mubr.bf16.gmra.mrb[108].mxu0 %v30065_v26  ;;  %v30126_v26 = vld [vmem:[#allocation4 + $0x7c] sm:$0xff]  }
 0x855   : > { %27774 = vmatprep.mubr.bf16.mxu0 %v30066_v27  ;;  %v30157_v27 = vld [vmem:[#allocation14 + $0x180] sm:$0xff]  }
 0x85c   : > { %27775 = vmatmul.mubr.bf16.gmra.mrb[112].mxu0 %v30068_v28  ;;  %v30128_v28 = vld [vmem:[#allocation4 + $0x84] sm:$0xff]  }
 0x85d   : > { %27778 = vmatprep.mubr.bf16.mxu0 %v30069_v29  ;;  %v30129_v29 = vld [vmem:[#allocation4 + $0x8c] sm:$0xff]  }
 0x864   : > { %27779 = vmatmul.mubr.bf16.gmra.mrb[116].mxu0 %v30070_v30  ;;  %v30130_v30 = vld [vmem:[#allocation4 + $0x94] sm:$0xff]  }
 0x865   : > { %27782 = vmatprep.mubr.bf16.mxu0 %v30071_v31  ;;  %v30131_v31 = vld [vmem:[#allocation4 + $0xa4] sm:$0xff]  }
 0x86c   : > { %27783 = vmatmul.mubr.bf16.gmra.mrb[120].mxu0 %v30073_v32  ;;  %v30133_v32 = vld [vmem:[#allocation4 + $0xac] sm:$0xff]  }
 0x86d   : > { %27786 = vmatprep.mubr.bf16.mxu0 %v30074_v49  ;;  %v30134_v49 = vld [vmem:[#allocation4 + $0xb4] sm:$0xff]  }
 0x874   : > { %27787 = vmatmul.mubr.bf16.gmra.mrb[124].mxu0 %v30075_v33  ;;  %v30135_v33 = vld [vmem:[#allocation4 + $0xbc] sm:$0xff]  }
 0x875   : > { %27806 = vmatprep.mubr.bf16.mxu0 %v30076_v34  ;;  %v30136_v34 = vld [vmem:[#allocation4 + $0xcc] sm:$0xff]  }
 0x87c   : > { %27807 = vmatmul.mubr.bf16.vlgmr.msra.gmra.mrb[64].mxu0 %v30078_v36  ;;  %v30138_v36 = vld [vmem:[#allocation4 + $0xd4] sm:$0xff]  }
 0x87d   : > { %27871 = vmatpush3.bf16.msra.mxu0 %v30077_v12  ;;  %27810 = vmatprep.mubr.bf16.mxu0 %v30079_v38  ;;  %v30116_v12 = vld [vmem:[#allocation4 + $0x2c] sm:$0xff]   ;;  %v30140_v38 = vld [vmem:[#allocation4 + $0xe4] sm:$0xff]  }
 0x87e   : > { %27872 = vmatprep.subr.bf16.mxu0 %v30082_v37 }
 0x881   : > { %27873 = vmatpush3.bf16.msra.mxu0 %v30082_v37  ;;  %v30139_v37 = vld [vmem:[#allocation4 + $0xdc] sm:$0xff]  }
 0x882   : > { %27874 = vmatprep.subr.bf16.mxu0 %v30087_v39 }
 0x884   : > { %27811 = vmatmul.mubr.bf16.gmra.mrb[68].mxu0 %v30080_v40  ;;  %v30143_v40 = vld [vmem:[#allocation4 + $0xfc] sm:$0xff]  }
 0x885   : > { %27814 = vmatprep.mubr.bf16.mxu0 %v30081_v42  ;;  %27875 = vmatpush3.bf16.msra.mxu0 %v30087_v39  ;;  %v30141_v39 = vld [vmem:[#allocation4 + $0xf4] sm:$0xff]   ;;  %v30145_v42 = vld [vmem:[#allocation4 + $0x10c] sm:$0xff]  }
 0x886   : > { %27876 = vmatprep.subr.bf16.mxu0 %v30092_v41 }
 0x889   : > { %27877 = vmatpush3.bf16.msra.mxu0 %v30092_v41  ;;  %v30144_v41 = vld [vmem:[#allocation4 + $0x104] sm:$0xff]  }
 0x88a   : > { %27878 = vmatprep.subr.bf16.mxu0 %v30097_v43 }
 0x88c   : > { %27815 = vmatmul.mubr.bf16.gmra.mrb[72].mxu0 %v30083_v35  ;;  %v30148_v35 = vld [vmem:[#allocation4 + $0x124] sm:$0xff]  }
 0x88d   : > { %27818 = vmatprep.mubr.bf16.mxu0 %v30084_v45  ;;  %27879 = vmatpush3.bf16.msra.mxu0 %v30097_v43  ;;  %v30146_v43 = vld [vmem:[#allocation4 + $0x11c] sm:$0xff]   ;;  %v30150_v45 = vld [vmem:[#allocation4 + $0x134] sm:$0xff]  }
 0x88e   : > { %27880 = vmatprep.subr.bf16.mxu0 %v30102_v44 }
 0x891   : > { %27881 = vmatpush3.bf16.msra.mxu0 %v30102_v44  ;;  %v30149_v44 = vld [vmem:[#allocation4 + $0x12c] sm:$0xff]  }
 0x892   : > { %27882 = vmatprep.subr.bf16.mxu0 %v30107_v46 }
 0x894   : > { %27819 = vmatmul.mubr.bf16.gmra.mrb[76].mxu0 %v30085_v47  ;;  %v30153_v47 = vld [vmem:[#allocation4 + $0x14c] sm:$0xff]  }
 0x895   : > { %27822 = vmatprep.mubr.bf16.mxu0 %v30086_v50  ;;  %27883 = vmatpush3.bf16.msra.mxu0 %v30107_v46  ;;  %v30151_v46 = vld [vmem:[#allocation4 + $0x144] sm:$0xff]   ;;  %v30155_v50 = vld [vmem:[#allocation4 + $0x15c] sm:$0xff]  }
 0x896   : > { %27884 = vmatprep.subr.bf16.mxu0 %v30112_v48 }
 0x899   : > { %27885 = vmatpush3.bf16.msra.mxu0 %v30112_v48  ;;  %v30154_v48 = vld [vmem:[#allocation4 + $0x154] sm:$0xff]  }
 0x89a   : > { %27950 = vmatprep.subr.bf16.mxu0 %v30117_v51 }
 0x89c   : > { %27823 = vmatmul.mubr.bf16.gmra.mrb[80].mxu0 %v30088_v52  ;;  %v30158_v52 = vld [vmem:[#allocation4 + $0x38] sm:$0xff]  }
 0x89d   : > { %27826 = vmatprep.mubr.bf16.mxu0 %v30089_v53  ;;  %v30162_v53 = vld [vmem:[#allocation14 + $0x188] sm:$0xff]  }
 0x8a4   : > { %27827 = vmatmul.mubr.bf16.gmra.mrb[84].mxu0 %v30090_v54  ;;  %v30159_v54 = vld [vmem:[#allocation4 + $0x40] sm:$0xff]  }
 0x8a5   : > { %27830 = vmatprep.mubr.bf16.mxu0 %v30091_v55  ;;  %v30167_v55 = vld [vmem:[#allocation14 + $0x190] sm:$0xff]  }
 0x8ac   : > { %27831 = vmatmul.mubr.bf16.gmra.mrb[88].mxu0 %v30093_v56  ;;  %v30160_v56 = vld [vmem:[#allocation4 + $0x48] sm:$0xff]  }
 0x8ad   : > { %27834 = vmatprep.mubr.bf16.mxu0 %v30094_v57  ;;  %v30172_v57 = vld [vmem:[#allocation14 + $0x198] sm:$0xff]  }
 0x8b4   : > { %27835 = vmatmul.mubr.bf16.gmra.mrb[92].mxu0 %v30095_v58  ;;  %v30161_v58 = vld [vmem:[#allocation4 + $0x58] sm:$0xff]  }
 0x8b5   : > { %27838 = vmatprep.mubr.bf16.mxu0 %v30096_v59  ;;  %v30177_v59 = vld [vmem:[#allocation14 + $0x1a0] sm:$0xff]  }
 0x8bc   : > { %27839 = vmatmul.mubr.bf16.gmra.mrb[96].mxu0 %v30098_v60  ;;  %v30163_v60 = vld [vmem:[#allocation4 + $0x60] sm:$0xff]  }
 0x8bd   : > { %27842 = vmatprep.mubr.bf16.mxu0 %v30099_v61  ;;  %v30182_v61 = vld [vmem:[#allocation14 + $0x1a8] sm:$0xff]  }
 0x8c4   : > { %27843 = vmatmul.mubr.bf16.gmra.mrb[100].mxu0 %v30100_v62  ;;  %v30164_v62 = vld [vmem:[#allocation4 + $0x68] sm:$0xff]  }
 0x8c5   : > { %27846 = vmatprep.mubr.bf16.mxu0 %v30101_v63  ;;  %v30187_v63 = vld [vmem:[#allocation14 + $0x1b0] sm:$0xff]  }
 0x8cc   : > { %27847 = vmatmul.mubr.bf16.gmra.mrb[104].mxu0 %v30103_v0  ;;  %v30165_v0 = vld [vmem:[#allocation4 + $0x70] sm:$0xff]  }
 0x8cd   : > { %27850 = vmatprep.mubr.bf16.mxu0 %v30104_v1  ;;  %v30192_v1 = vld [vmem:[#allocation14 + $0x1b8] sm:$0xff]  }
 0x8d4   : > { %27851 = vmatmul.mubr.bf16.gmra.mrb[108].mxu0 %v30105_v2  ;;  %v30166_v2 = vld [vmem:[#allocation4 + $0x80] sm:$0xff]  }
 0x8d5   : > { %27854 = vmatprep.mubr.bf16.mxu0 %v30106_v3  ;;  %v30197_v3 = vld [vmem:[#allocation14 + $0x1c0] sm:$0xff]  }
 0x8dc   : > { %27855 = vmatmul.mubr.bf16.gmra.mrb[112].mxu0 %v30108_v4  ;;  %v30168_v4 = vld [vmem:[#allocation4 + $0x88] sm:$0xff]  }
 0x8dd   : > { %27858 = vmatprep.mubr.bf16.mxu0 %v30109_v5  ;;  %v30169_v5 = vld [vmem:[#allocation4 + $0x90] sm:$0xff]  }
 0x8e4   : > { %27859 = vmatmul.mubr.bf16.gmra.mrb[116].mxu0 %v30110_v6  ;;  %v30170_v6 = vld [vmem:[#allocation4 + $0x98] sm:$0xff]  }
 0x8e5   : > { %27862 = vmatprep.mubr.bf16.mxu0 %v30111_v7  ;;  %v30171_v7 = vld [vmem:[#allocation4 + $0xa8] sm:$0xff]  }
 0x8ec   : > { %27863 = vmatmul.mubr.bf16.gmra.mrb[120].mxu0 %v30113_v9  ;;  %v30173_v9 = vld [vmem:[#allocation4 + $0xb0] sm:$0xff]  }
 0x8ed   : > { %27866 = vmatprep.mubr.bf16.mxu0 %v30114_v10  ;;  %v30174_v10 = vld [vmem:[#allocation4 + $0xb8] sm:$0xff]  }
 0x8f4   : > { %27867 = vmatmul.mubr.bf16.gmra.mrb[124].mxu0 %v30115_v11  ;;  %v30175_v11 = vld [vmem:[#allocation4 + $0xc0] sm:$0xff]  }
 0x8f5   : > { %27886 = vmatprep.mubr.bf16.mxu0 %v30116_v12  ;;  %v30176_v12 = vld [vmem:[#allocation4 + $0xd0] sm:$0xff]  }
 0x8fc   : > { %27887 = vmatmul.mubr.bf16.vlgmr.msra.gmra.mrb[64].mxu0 %v30118_v13  ;;  %v30178_v13 = vld [vmem:[#allocation4 + $0xd8] sm:$0xff]  }
 0x8fd   : > { %27951 = vmatpush3.bf16.msra.mxu0 %v30117_v51  ;;  %27890 = vmatprep.mubr.bf16.mxu0 %v30119_v8  ;;  %v30156_v51 = vld [vmem:[#allocation4 + $0x30] sm:$0xff]   ;;  %v30180_v8 = vld [vmem:[#allocation4 + $0xe8] sm:$0xff]  }
 0x8fe   : > { %27952 = vmatprep.subr.bf16.mxu0 %v30122_v14 }
 0x901   : > { %27953 = vmatpush3.bf16.msra.mxu0 %v30122_v14  ;;  %v30179_v14 = vld [vmem:[#allocation4 + $0xe0] sm:$0xff]  }
 0x902   : > { %27954 = vmatprep.subr.bf16.mxu0 %v30127_v15 }
 0x904   : > { %27891 = vmatmul.mubr.bf16.gmra.mrb[68].mxu0 %v30120_v16  ;;  %v30183_v16 = vld [vmem:[#allocation4 + $0x100] sm:$0xff]  }
 0x905   : > { %27894 = vmatprep.mubr.bf16.mxu0 %v30121_v18  ;;  %27955 = vmatpush3.bf16.msra.mxu0 %v30127_v15  ;;  %v30181_v15 = vld [vmem:[#allocation4 + $0xf8] sm:$0xff]   ;;  %v30185_v18 = vld [vmem:[#allocation4 + $0x110] sm:$0xff]  }
 0x906   : > { %27956 = vmatprep.subr.bf16.mxu0 %v30132_v17 }
 0x909   : > { %27957 = vmatpush3.bf16.msra.mxu0 %v30132_v17  ;;  %v30184_v17 = vld [vmem:[#allocation4 + $0x108] sm:$0xff]  }
 0x90a   : > { %27958 = vmatprep.subr.bf16.mxu0 %v30137_v19 }
 0x90c   : > { %27895 = vmatmul.mubr.bf16.gmra.mrb[72].mxu0 %v30123_v20  ;;  %v30188_v20 = vld [vmem:[#allocation4 + $0x128] sm:$0xff]  }
 0x90d   : > { %27898 = vmatprep.mubr.bf16.mxu0 %v30124_v22  ;;  %27959 = vmatpush3.bf16.msra.mxu0 %v30137_v19  ;;  %v30186_v19 = vld [vmem:[#allocation4 + $0x120] sm:$0xff]   ;;  %v30190_v22 = vld [vmem:[#allocation4 + $0x138] sm:$0xff]  }
 0x90e   : > { %27960 = vmatprep.subr.bf16.mxu0 %v30142_v21 }
 0x911   : > { %27961 = vmatpush3.bf16.msra.mxu0 %v30142_v21  ;;  %v30189_v21 = vld [vmem:[#allocation4 + $0x130] sm:$0xff]  }
 0x912   : > { %27962 = vmatprep.subr.bf16.mxu0 %v30147_v23 }
 0x914   : > { %27899 = vmatmul.mubr.bf16.gmra.mrb[76].mxu0 %v30125_v24  ;;  %v30193_v24 = vld [vmem:[#allocation4 + $0x150] sm:$0xff]  }
 0x915   : > { %27902 = vmatprep.mubr.bf16.mxu0 %v30126_v26  ;;  %27963 = vmatpush3.bf16.msra.mxu0 %v30147_v23  ;;  %v30191_v23 = vld [vmem:[#allocation4 + $0x148] sm:$0xff]   ;;  %v30195_v26 = vld [vmem:[#allocation4 + $0x160] sm:$0xff]  }
 0x916   : > { %27964 = vmatprep.subr.bf16.mxu0 %v30152_v25 }
 0x919   : > { %27965 = vmatpush3.bf16.msra.mxu0 %v30152_v25  ;;  %v30194_v25 = vld [vmem:[#allocation4 + $0x158] sm:$0xff]  }
 0x91a   : > { %28030 = vmatprep.subr.bf16.mxu0 %v30157_v27 }
 0x91c   : > { %27903 = vmatmul.mubr.bf16.gmra.mrb[80].mxu0 %v30128_v28  ;;  %v30198_v28 = vld [vmem:[#allocation4 + $0x58] sm:$0xff]  }
 0x91d   : > { %27906 = vmatprep.mubr.bf16.mxu0 %v30129_v29  ;;  %v30202_v29 = vld [vmem:[#allocation14 + $0x1c8] sm:$0xff]  }
 0x924   : > { %27907 = vmatmul.mubr.bf16.gmra.mrb[84].mxu0 %v30130_v30  ;;  %v30199_v30 = vld [vmem:[#allocation4 + $0x60] sm:$0xff]  }
 0x925   : > { %27910 = vmatprep.mubr.bf16.mxu0 %v30131_v31  ;;  %v30207_v31 = vld [vmem:[#allocation14 + $0x1d0] sm:$0xff]  }
 0x92c   : > { %27911 = vmatmul.mubr.bf16.gmra.mrb[88].mxu0 %v30133_v32  ;;  %v30200_v32 = vld [vmem:[#allocation4 + $0x68] sm:$0xff]  }
 0x92d   : > { %27914 = vmatprep.mubr.bf16.mxu0 %v30134_v49  ;;  %v30212_v49 = vld [vmem:[#allocation14 + $0x1d8] sm:$0xff]  }
 0x934   : > { %27915 = vmatmul.mubr.bf16.gmra.mrb[92].mxu0 %v30135_v33  ;;  %v30201_v33 = vld [vmem:[#allocation4 + $0x78] sm:$0xff]  }
 0x935   : > { %27918 = vmatprep.mubr.bf16.mxu0 %v30136_v34  ;;  %v30217_v34 = vld [vmem:[#allocation14 + $0x1e0] sm:$0xff]  }
 0x93c   : > { %27919 = vmatmul.mubr.bf16.gmra.mrb[96].mxu0 %v30138_v36  ;;  %v30203_v36 = vld [vmem:[#allocation4 + $0x80] sm:$0xff]  }
 0x93d   : > { %27922 = vmatprep.mubr.bf16.mxu0 %v30139_v37  ;;  %v30222_v37 = vld [vmem:[#allocation14 + $0x1e8] sm:$0xff]  }
 0x944   : > { %27923 = vmatmul.mubr.bf16.gmra.mrb[100].mxu0 %v30140_v38  ;;  %v30204_v38 = vld [vmem:[#allocation4 + $0x88] sm:$0xff]  }
 0x945   : > { %27926 = vmatprep.mubr.bf16.mxu0 %v30141_v39  ;;  %v30227_v39 = vld [vmem:[#allocation14 + $0x1f0] sm:$0xff]  }
 0x94c   : > { %27927 = vmatmul.mubr.bf16.gmra.mrb[104].mxu0 %v30143_v40  ;;  %v30205_v40 = vld [vmem:[#allocation4 + $0x90] sm:$0xff]  }
 0x94d   : > { %27930 = vmatprep.mubr.bf16.mxu0 %v30144_v41  ;;  %v30232_v41 = vld [vmem:[#allocation14 + $0x1f8] sm:$0xff]  }
 0x954   : > { %27931 = vmatmul.mubr.bf16.gmra.mrb[108].mxu0 %v30145_v42  ;;  %v30206_v42 = vld [vmem:[#allocation4 + $0xa0] sm:$0xff]  }
 0x955   : > { %27934 = vmatprep.mubr.bf16.mxu0 %v30146_v43  ;;  %v30237_v43 = vld [vmem:[#allocation14 + $0x200] sm:$0xff]  }
 0x95c   : > { %27935 = vmatmul.mubr.bf16.gmra.mrb[112].mxu0 %v30148_v35  ;;  %v30208_v35 = vld [vmem:[#allocation4 + $0xa8] sm:$0xff]  }
 0x95d   : > { %27938 = vmatprep.mubr.bf16.mxu0 %v30149_v44  ;;  %v30209_v44 = vld [vmem:[#allocation4 + $0xb0] sm:$0xff]  }
 0x964   : > { %27939 = vmatmul.mubr.bf16.gmra.mrb[116].mxu0 %v30150_v45  ;;  %v30210_v45 = vld [vmem:[#allocation4 + $0xb8] sm:$0xff]  }
 0x965   : > { %27942 = vmatprep.mubr.bf16.mxu0 %v30151_v46  ;;  %v30211_v46 = vld [vmem:[#allocation4 + $0xc8] sm:$0xff]  }
 0x96c   : > { %27943 = vmatmul.mubr.bf16.gmra.mrb[120].mxu0 %v30153_v47  ;;  %v30213_v47 = vld [vmem:[#allocation4 + $0xd0] sm:$0xff]  }
 0x96d   : > { %27946 = vmatprep.mubr.bf16.mxu0 %v30154_v48  ;;  %v30214_v48 = vld [vmem:[#allocation4 + $0xd8] sm:$0xff]  }
 0x974   : > { %27947 = vmatmul.mubr.bf16.gmra.mrb[124].mxu0 %v30155_v50  ;;  %v30215_v50 = vld [vmem:[#allocation4 + $0xe0] sm:$0xff]  }
 0x975   : > { %27966 = vmatprep.mubr.bf16.mxu0 %v30156_v51  ;;  %v30216_v51 = vld [vmem:[#allocation4 + $0xf0] sm:$0xff]  }
 0x97c   : > { %27967 = vmatmul.mubr.bf16.vlgmr.msra.gmra.mrb[64].mxu0 %v30158_v52  ;;  %v30218_v52 = vld [vmem:[#allocation4 + $0xf8] sm:$0xff]  }
 0x97d   : > { %28031 = vmatpush3.bf16.msra.mxu0 %v30157_v27  ;;  %27970 = vmatprep.mubr.bf16.mxu0 %v30159_v54  ;;  %v30196_v27 = vld [vmem:[#allocation4 + $0x50] sm:$0xff]   ;;  %v30220_v54 = vld [vmem:[#allocation4 + $0x108] sm:$0xff]  }
 0x97e   : > { %28032 = vmatprep.subr.bf16.mxu0 %v30162_v53 }
 0x981   : > { %28033 = vmatpush3.bf16.msra.mxu0 %v30162_v53  ;;  %v30219_v53 = vld [vmem:[#allocation4 + $0x100] sm:$0xff]  }
 0x982   : > { %28034 = vmatprep.subr.bf16.mxu0 %v30167_v55 }
 0x984   : > { %27971 = vmatmul.mubr.bf16.gmra.mrb[68].mxu0 %v30160_v56  ;;  %v30223_v56 = vld [vmem:[#allocation4 + $0x120] sm:$0xff]  }
 0x985   : > { %27974 = vmatprep.mubr.bf16.mxu0 %v30161_v58  ;;  %28035 = vmatpush3.bf16.msra.mxu0 %v30167_v55  ;;  %v30221_v55 = vld [vmem:[#allocation4 + $0x118] sm:$0xff]   ;;  %v30225_v58 = vld [vmem:[#allocation4 + $0x130] sm:$0xff]  }
 0x986   : > { %28036 = vmatprep.subr.bf16.mxu0 %v30172_v57 }
 0x989   : > { %28037 = vmatpush3.bf16.msra.mxu0 %v30172_v57  ;;  %v30224_v57 = vld [vmem:[#allocation4 + $0x128] sm:$0xff]  }
 0x98a   : > { %28038 = vmatprep.subr.bf16.mxu0 %v30177_v59 }
 0x98c   : > { %27975 = vmatmul.mubr.bf16.gmra.mrb[72].mxu0 %v30163_v60  ;;  %v30228_v60 = vld [vmem:[#allocation4 + $0x148] sm:$0xff]  }
 0x98d   : > { %27978 = vmatprep.mubr.bf16.mxu0 %v30164_v62  ;;  %28039 = vmatpush3.bf16.msra.mxu0 %v30177_v59  ;;  %v30226_v59 = vld [vmem:[#allocation4 + $0x140] sm:$0xff]   ;;  %v30231_v62 = vld [vmem:[#allocation4 + $0x168] sm:$0xff]  }
 0x98e   : > { %28040 = vmatprep.subr.bf16.mxu0 %v30182_v61 }
 0x991   : > { %28041 = vmatpush3.bf16.msra.mxu0 %v30182_v61  ;;  %v30229_v61 = vld [vmem:[#allocation4 + $0x150] sm:$0xff]  }
 0x992   : > { %28042 = vmatprep.subr.bf16.mxu0 %v30187_v63 }
 0x994   : > { %27979 = vmatmul.mubr.bf16.gmra.mrb[76].mxu0 %v30165_v0  ;;  %v30233_v0 = vld [vmem:[#allocation4 + $0x170] sm:$0xff]  }
 0x995   : > { %27982 = vmatprep.mubr.bf16.mxu0 %v30166_v2  ;;  %28043 = vmatpush3.bf16.msra.mxu0 %v30187_v63  ;;  %v30230_v63 = vld [vmem:[#allocation4 + $0x158] sm:$0xff]   ;;  %v30235_v2 = vld [vmem:[#allocation4 + $0x180] sm:$0xff]  }
 0x996   : > { %28044 = vmatprep.subr.bf16.mxu0 %v30192_v1 }
 0x999   : > { %28045 = vmatpush3.bf16.msra.mxu0 %v30192_v1  ;;  %v30234_v1 = vld [vmem:[#allocation4 + $0x178] sm:$0xff]  }
 0x99a   : > { %28110 = vmatprep.subr.bf16.mxu0 %v30197_v3 }
 0x99c   : > { %27983 = vmatmul.mubr.bf16.gmra.mrb[80].mxu0 %v30168_v4  ;;  %v30238_v4 = vld [vmem:[#allocation4 + $0x5c] sm:$0xff]  }
 0x99d   : > { %27986 = vmatprep.mubr.bf16.mxu0 %v30169_v5  ;;  %v30242_v5 = vld [vmem:[#allocation14 + $0x208] sm:$0xff]  }
 0x9a4   : > { %27987 = vmatmul.mubr.bf16.gmra.mrb[84].mxu0 %v30170_v6  ;;  %v30239_v6 = vld [vmem:[#allocation4 + $0x64] sm:$0xff]  }
 0x9a5   : > { %27990 = vmatprep.mubr.bf16.mxu0 %v30171_v7  ;;  %v30247_v7 = vld [vmem:[#allocation14 + $0x210] sm:$0xff]  }
 0x9ac   : > { %27991 = vmatmul.mubr.bf16.gmra.mrb[88].mxu0 %v30173_v9  ;;  %v30240_v9 = vld [vmem:[#allocation4 + $0x6c] sm:$0xff]  }
 0x9ad   : > { %27994 = vmatprep.mubr.bf16.mxu0 %v30174_v10  ;;  %v30252_v10 = vld [vmem:[#allocation14 + $0x218] sm:$0xff]  }
 0x9b4   : > { %27995 = vmatmul.mubr.bf16.gmra.mrb[92].mxu0 %v30175_v11  ;;  %v30241_v11 = vld [vmem:[#allocation4 + $0x7c] sm:$0xff]  }
 0x9b5   : > { %27998 = vmatprep.mubr.bf16.mxu0 %v30176_v12  ;;  %v30257_v12 = vld [vmem:[#allocation14 + $0x220] sm:$0xff]  }
 0x9bc   : > { %27999 = vmatmul.mubr.bf16.gmra.mrb[96].mxu0 %v30178_v13  ;;  %v30243_v13 = vld [vmem:[#allocation4 + $0x84] sm:$0xff]  }
 0x9bd   : > { %28002 = vmatprep.mubr.bf16.mxu0 %v30179_v14  ;;  %v30262_v14 = vld [vmem:[#allocation14 + $0x228] sm:$0xff]  }
 0x9c4   : > { %28003 = vmatmul.mubr.bf16.gmra.mrb[100].mxu0 %v30180_v8  ;;  %v30244_v8 = vld [vmem:[#allocation4 + $0x8c] sm:$0xff]  }
 0x9c5   : > { %28006 = vmatprep.mubr.bf16.mxu0 %v30181_v15  ;;  %v30267_v15 = vld [vmem:[#allocation14 + $0x230] sm:$0xff]  }
 0x9cc   : > { %28007 = vmatmul.mubr.bf16.gmra.mrb[104].mxu0 %v30183_v16  ;;  %v30245_v16 = vld [vmem:[#allocation4 + $0x94] sm:$0xff]  }
 0x9cd   : > { %28010 = vmatprep.mubr.bf16.mxu0 %v30184_v17  ;;  %v30272_v17 = vld [vmem:[#allocation14 + $0x238] sm:$0xff]  }
 0x9d4   : > { %28011 = vmatmul.mubr.bf16.gmra.mrb[108].mxu0 %v30185_v18  ;;  %v30246_v18 = vld [vmem:[#allocation4 + $0xa4] sm:$0xff]  }
 0x9d5   : > { %28014 = vmatprep.mubr.bf16.mxu0 %v30186_v19  ;;  %v30248_v19 = vld [vmem:[#allocation4 + $0xac] sm:$0xff]  }
 0x9dc   : > { %28015 = vmatmul.mubr.bf16.gmra.mrb[112].mxu0 %v30188_v20  ;;  %v30249_v20 = vld [vmem:[#allocation4 + $0xb4] sm:$0xff]  }
 0x9dd   : > { %28018 = vmatprep.mubr.bf16.mxu0 %v30189_v21  ;;  %v30250_v21 = vld [vmem:[#allocation4 + $0xbc] sm:$0xff]  }
 0x9e4   : > { %28019 = vmatmul.mubr.bf16.gmra.mrb[116].mxu0 %v30190_v22  ;;  %v30251_v22 = vld [vmem:[#allocation4 + $0xcc] sm:$0xff]  }
 0x9e5   : > { %28022 = vmatprep.mubr.bf16.mxu0 %v30191_v23  ;;  %v30253_v23 = vld [vmem:[#allocation4 + $0xd4] sm:$0xff]  }
 0x9ec   : > { %28023 = vmatmul.mubr.bf16.gmra.mrb[120].mxu0 %v30193_v24  ;;  %v30254_v24 = vld [vmem:[#allocation4 + $0xdc] sm:$0xff]  }
 0x9ed   : > { %28026 = vmatprep.mubr.bf16.mxu0 %v30194_v25  ;;  %v30255_v25 = vld [vmem:[#allocation4 + $0xe4] sm:$0xff]  }
 0x9f4   : > { %28027 = vmatmul.mubr.bf16.gmra.mrb[124].mxu0 %v30195_v26  ;;  %v30256_v26 = vld [vmem:[#allocation4 + $0xf4] sm:$0xff]  }
 0x9f5   : > { %28046 = vmatprep.mubr.bf16.mxu0 %v30196_v27  ;;  %v30258_v27 = vld [vmem:[#allocation4 + $0xfc] sm:$0xff]  }
 0x9fc   : > { %28047 = vmatmul.mubr.bf16.vlgmr.msra.gmra.mrb[64].mxu0 %v30198_v28  ;;  %v30259_v28 = vld [vmem:[#allocation4 + $0x104] sm:$0xff]  }
 0x9fd   : > { %28111 = vmatpush3.bf16.msra.mxu0 %v30197_v3  ;;  %28050 = vmatprep.mubr.bf16.mxu0 %v30199_v30  ;;  %v30236_v3 = vld [vmem:[#allocation4 + $0x54] sm:$0xff]   ;;  %v30261_v30 = vld [vmem:[#allocation4 + $0x11c] sm:$0xff]  }
 0x9fe   : > { %28112 = vmatprep.subr.bf16.mxu0 %v30202_v29 }
 0xa01   : > { %28113 = vmatpush3.bf16.msra.mxu0 %v30202_v29  ;;  %v30260_v29 = vld [vmem:[#allocation4 + $0x10c] sm:$0xff]  }
 0xa02   : > { %28114 = vmatprep.subr.bf16.mxu0 %v30207_v31 }
 0xa04   : > { %28051 = vmatmul.mubr.bf16.gmra.mrb[68].mxu0 %v30200_v32  ;;  %v30264_v32 = vld [vmem:[#allocation4 + $0x12c] sm:$0xff]  }
 0xa05   : > { %28054 = vmatprep.mubr.bf16.mxu0 %v30201_v33  ;;  %28115 = vmatpush3.bf16.msra.mxu0 %v30207_v31  ;;  %v30263_v31 = vld [vmem:[#allocation4 + $0x124] sm:$0xff]  }
 0xa06   : > { %28116 = vmatprep.subr.bf16.mxu0 %v30212_v49  ;;  %v30266_v33 = vld [vmem:[#allocation4 + $0x144] sm:$0xff]  }
 0xa09   : > { %28117 = vmatpush3.bf16.msra.mxu0 %v30212_v49  ;;  %v30265_v49 = vld [vmem:[#allocation4 + $0x134] sm:$0xff]  }
 0xa0a   : > { %28118 = vmatprep.subr.bf16.mxu0 %v30217_v34 }
 0xa0c   : > { %28055 = vmatmul.mubr.bf16.gmra.mrb[72].mxu0 %v30203_v36  ;;  %v30302_v36 = vld [vmem:[#allocation17] sm:$0xff]  }
 0xa0d   : > { %28058 = vmatprep.mubr.bf16.mxu0 %v30204_v38  ;;  %28119 = vmatpush3.bf16.msra.mxu0 %v30217_v34  ;;  %v30301_v34 = vld [vmem:[#allocation17 + $0x40] sm:$0xff]  }
 0xa0e   : > { %28120 = vmatprep.subr.bf16.mxu0 %v30222_v37  ;;  %26109 = vmatprep.subr.bf16.mxu1 %v30301_v34  ;;  %v30269_v38 = vld [vmem:[#allocation4 + $0x154] sm:$0xff]   ;;  %v30305_v34 = vld [vmem:[#allocation4 + $0x160] sm:$0xff]  }
 0xa0f   : > { %26110 = vmatpush3.bf16.msra.mxu1 %v30302_v36  ;;  %v30340_v36 = vld [vmem:[#allocation17 + $0x2f0] sm:$0xff]  }
 0xa11   : > { %28121 = vmatpush3.bf16.msra.mxu0 %v30222_v37  ;;  %v30268_v37 = vld [vmem:[#allocation4 + $0x14c] sm:$0xff]  }
 0xa12   : > { %28122 = vmatprep.subr.bf16.mxu0 %v30227_v39 }
 0xa14   : > { %28059 = vmatmul.mubr.bf16.gmra.mrb[76].mxu0 %v30205_v40  ;;  %v30270_v40 = vld [vmem:[#allocation4 + $0x15c] sm:$0xff]  }
 0xa15   : > { %28062 = vmatprep.mubr.bf16.mxu0 %v30206_v42  ;;  %28123 = vmatpush3.bf16.msra.mxu0 %v30227_v39  ;;  %v30271_v39 = vld [vmem:[#allocation4 + $0x16c] sm:$0xff]   ;;  %v30307_v42 = vld [vmem:[#allocation17 + $0x8] sm:$0xff]  }
 0xa16   : > { %28124 = vmatprep.subr.bf16.mxu0 %v30232_v41 }
 0xa19   : > { %28125 = vmatpush3.bf16.msra.mxu0 %v30232_v41  ;;  %v30306_v41 = vld [vmem:[#allocation17 + $0x48] sm:$0xff]  }
 0xa1a   : > { %28190 = vmatprep.subr.bf16.mxu0 %v30237_v43  ;;  %26111 = vmatprep.subr.bf16.mxu1 %v30306_v41  ;;  %v30346_v41 = vld [vmem:[#allocation17 + $0x2b8] sm:$0xff]  }
 0xa1b   : > { %26112 = vmatpush3.bf16.msra.mxu1 %v30307_v42  ;;  %v30348_v42 = vld [vmem:[#allocation17 + $0x3c0] sm:$0xff]  }
 0xa1c   : > { %28063 = vmatmul.mubr.bf16.gmra.mrb[80].mxu0 %v30208_v35  ;;  %v30274_v35 = vld [vmem:[#allocation4 + $0x17c] sm:$0xff]  }
 0xa1d   : > { %28066 = vmatprep.mubr.bf16.mxu0 %v30209_v44  ;;  %v30275_v44 = vld [vmem:[#allocation4 + $0x184] sm:$0xff]  }
 0xa24   : > { %28067 = vmatmul.mubr.bf16.gmra.mrb[84].mxu0 %v30210_v45  ;;  %v30276_v45 = vld [vmem:[#allocation4 + $0x58] sm:$0xff]  }
 0xa25   : > { %28070 = vmatprep.mubr.bf16.mxu0 %v30211_v46  ;;  %v30312_v46 = vld [vmem:[#allocation17 + $0x50] sm:$0xff]  }
 0xa26   : > { %26113 = vmatprep.subr.bf16.mxu1 %v30312_v46 }
 0xa2c   : > { %28071 = vmatmul.mubr.bf16.gmra.mrb[88].mxu0 %v30213_v47  ;;  %v30313_v47 = vld [vmem:[#allocation17 + $0x10] sm:$0xff]  }
 0xa2d   : > { %28074 = vmatprep.mubr.bf16.mxu0 %v30214_v48  ;;  %v30314_v48 = vld [vmem:[#allocation17 + $0x58] sm:$0xff]   ;;  %26114 = vmatpush3.bf16.msra.mxu1 %v30313_v47 }
 0xa2e   : > { %26115 = vmatprep.subr.bf16.mxu1 %v30314_v48 }
 0xa34   : > { %28075 = vmatmul.mubr.bf16.gmra.mrb[92].mxu0 %v30215_v50  ;;  %v30315_v50 = vld [vmem:[#allocation17 + $0x18] sm:$0xff]  }
 0xa35   : > { %28078 = vmatprep.mubr.bf16.mxu0 %v30216_v51  ;;  %v30322_v51 = vld [vmem:[#allocation17 + $0x2c0] sm:$0xff]   ;;  %26116 = vmatpush3.bf16.msra.mxu1 %v30315_v50 }
 0xa3c   : > { %28079 = vmatmul.mubr.bf16.gmra.mrb[96].mxu0 %v30218_v52  ;;  %v30316_v52 = vld [vmem:[#allocation17 + $0x60] sm:$0xff]  }
 0xa3d   : > { %28082 = vmatprep.mubr.bf16.mxu0 %v30219_v53  ;;  %v30324_v53 = vld [vmem:[#allocation17 + $0x280] sm:$0xff]   ;;  %26117 = vmatprep.subr.bf16.mxu1 %v30316_v52 }
 0xa44   : > { %28083 = vmatmul.mubr.bf16.gmra.mrb[100].mxu0 %v30220_v54  ;;  %v30277_v54 = vld [vmem:[#allocation4 + $0x60] sm:$0xff]  }
 0xa45   : > { %28086 = vmatprep.mubr.bf16.mxu0 %v30221_v55  ;;  %v30326_v55 = vld [vmem:[#allocation17 + $0x2c8] sm:$0xff]  }
 0xa4c   : > { %28087 = vmatmul.mubr.bf16.gmra.mrb[104].mxu0 %v30223_v56  ;;  %v30278_v56 = vld [vmem:[#allocation4 + $0x68] sm:$0xff]  }
 0xa4d   : > { %28090 = vmatprep.mubr.bf16.mxu0 %v30224_v57  ;;  %v30317_v57 = vld [vmem:[#allocation17 + $0x20] sm:$0xff]  }
 0xa4e   : > { %26118 = vmatpush3.bf16.msra.mxu1 %v30317_v57  ;;  %v30335_v57 = vld [vmem:[#allocation17 + $0x80] sm:$0xff]  }
 0xa54   : > { %28091 = vmatmul.mubr.bf16.gmra.mrb[108].mxu0 %v30225_v58  ;;  %v30318_v58 = vld [vmem:[#allocation17 + $0x68] sm:$0xff]  }
 0xa55   : > { %28094 = vmatprep.mubr.bf16.mxu0 %v30226_v59  ;;  %v30327_v59 = vld [vmem:[#allocation17 + $0x288] sm:$0xff]   ;;  %26119 = vmatprep.subr.bf16.mxu1 %v30318_v58 }
 0xa5c   : > { %28095 = vmatmul.mubr.bf16.gmra.mrb[112].mxu0 %v30228_v60  ;;  %v30319_v60 = vld [vmem:[#allocation17 + $0x28] sm:$0xff]  }
 0xa5d   : > { %28098 = vmatprep.mubr.bf16.mxu0 %v30229_v61  ;;  %v30320_v61 = vld [vmem:[#allocation17 + $0x70] sm:$0xff]   ;;  %26120 = vmatpush3.bf16.msra.mxu1 %v30319_v60  ;;  %v30337_v60 = vld [vmem:[#allocation17 + $0xc8] sm:$0xff]  }
 0xa5e   : > { %26121 = vmatprep.subr.bf16.mxu1 %v30320_v61 }
 0xa64   : > { %28099 = vmatmul.mubr.bf16.gmra.mrb[116].mxu0 %v30230_v63  ;;  %v30280_v63 = vld [vmem:[#allocation4 + $0x80] sm:$0xff]  }
 0xa65   : > { %28102 = vmatprep.mubr.bf16.mxu0 %v30231_v62  ;;  %v30279_v62 = vld [vmem:[#allocation4 + $0x70] sm:$0xff]  }
 0xa6c   : > { %28103 = vmatmul.mubr.bf16.gmra.mrb[120].mxu0 %v30233_v0  ;;  %v30321_v0 = vld [vmem:[#allocation17 + $0x30] sm:$0xff]  }
 0xa6d   : > { %28106 = vmatprep.mubr.bf16.mxu0 %v30234_v1  ;;  %v30323_v1 = vld [vmem:[#allocation17 + $0x78] sm:$0xff]   ;;  %26122 = vmatpush3.bf16.msra.mxu1 %v30321_v0  ;;  %v30339_v0 = vld [vmem:[#allocation17 + $0x88] sm:$0xff]  }
 0xa6e   : > { %26123 = vmatprep.subr.bf16.mxu1 %v30323_v1  ;;  %v30341_v1 = vld [vmem:[#allocation17 + $0xd0] sm:$0xff]  }
 0xa74   : > { %28107 = vmatmul.mubr.bf16.gmra.mrb[124].mxu0 %v30235_v2  ;;  %v30325_v2 = vld [vmem:[#allocation17 + $0x38] sm:$0xff]  }
 0xa75   : > { %28126 = vmatprep.mubr.bf16.mxu0 %v30236_v3  ;;  %v30281_v3 = vld [vmem:[#allocation4 + $0x88] sm:$0xff]   ;;  %26124 = vmatpush3.bf16.msra.mxu1 %v30325_v2 }
 0xa7c   : > { %28127 = vmatmul.mubr.bf16.vlgmr.msra.gmra.mrb[64].mxu0 %v30238_v4  ;;  %v30282_v4 = vld [vmem:[#allocation4 + $0x90] sm:$0xff]  }
 0xa7d   : > { %28191 = vmatpush3.bf16.msra.mxu0 %v30237_v43  ;;  %28130 = vmatprep.mubr.bf16.mxu0 %v30239_v6  ;;  %v30273_v43 = vld [vmem:[#allocation4 + $0x174] sm:$0xff]   ;;  %v30284_v6 = vld [vmem:[#allocation4 + $0xa8] sm:$0xff]  }
 0xa7e   : > { %28192 = vmatprep.subr.bf16.mxu0 %v30242_v5 }
 0xa81   : > { %28193 = vmatpush3.bf16.msra.mxu0 %v30242_v5  ;;  %v30283_v5 = vld [vmem:[#allocation4 + $0x98] sm:$0xff]  }
 0xa82   : > { %28194 = vmatprep.subr.bf16.mxu0 %v30247_v7 }
 0xa84   : > { %28131 = vmatmul.mubr.bf16.gmra.mrb[68].mxu0 %v30240_v9  ;;  %v30286_v9 = vld [vmem:[#allocation4 + $0xb8] sm:$0xff]  }
 0xa85   : > { %28134 = vmatprep.mubr.bf16.mxu0 %v30241_v11  ;;  %28195 = vmatpush3.bf16.msra.mxu0 %v30247_v7  ;;  %v30285_v7 = vld [vmem:[#allocation4 + $0xb0] sm:$0xff]  }
 0xa86   : > { %28196 = vmatprep.subr.bf16.mxu0 %v30252_v10  ;;  %v30288_v11 = vld [vmem:[#allocation4 + $0xd0] sm:$0xff]  }
 0xa89   : > { %28197 = vmatpush3.bf16.msra.mxu0 %v30252_v10  ;;  %v30287_v10 = vld [vmem:[#allocation4 + $0xc0] sm:$0xff]  }
 0xa8a   : > { %28198 = vmatprep.subr.bf16.mxu0 %v30257_v12 }
 0xa8c   : > { %28135 = vmatmul.mubr.bf16.gmra.mrb[72].mxu0 %v30243_v13  ;;  %v30290_v13 = vld [vmem:[#allocation4 + $0xe0] sm:$0xff]  }
 0xa8d   : > { %28138 = vmatprep.mubr.bf16.mxu0 %v30244_v8  ;;  %28199 = vmatpush3.bf16.msra.mxu0 %v30257_v12  ;;  %v30289_v12 = vld [vmem:[#allocation4 + $0xd8] sm:$0xff]  }
 0xa8e   : > { %28200 = vmatprep.subr.bf16.mxu0 %v30262_v14  ;;  %v30292_v8 = vld [vmem:[#allocation4 + $0xf8] sm:$0xff]  }
 0xa91   : > { %28201 = vmatpush3.bf16.msra.mxu0 %v30262_v14  ;;  %v30291_v14 = vld [vmem:[#allocation4 + $0xe8] sm:$0xff]  }
 0xa92   : > { %28202 = vmatprep.subr.bf16.mxu0 %v30267_v15 }
 0xa94   : > { %28139 = vmatmul.mubr.bf16.gmra.mrb[76].mxu0 %v30245_v16  ;;  %v30294_v16 = vld [vmem:[#allocation4 + $0x108] sm:$0xff]  }
 0xa95   : > { %28142 = vmatprep.mubr.bf16.mxu0 %v30246_v18  ;;  %28203 = vmatpush3.bf16.msra.mxu0 %v30267_v15  ;;  %v30293_v15 = vld [vmem:[#allocation4 + $0x100] sm:$0xff]  }
 0xa96   : > { %28204 = vmatprep.subr.bf16.mxu0 %v30272_v17  ;;  %v30296_v18 = vld [vmem:[#allocation4 + $0x120] sm:$0xff]  }
 0xa99   : > { %28205 = vmatpush3.bf16.msra.mxu0 %v30272_v17  ;;  %v30295_v17 = vld [vmem:[#allocation4 + $0x110] sm:$0xff]  }
 0xa9a   : > { %26219 = vmatprep.subr.bf16.mxu0 %v30322_v51 }
 0xa9c   : > { %28143 = vmatmul.mubr.bf16.gmra.mrb[80].mxu0 %v30248_v19  ;;  %v30297_v19 = vld [vmem:[#allocation4 + $0x128] sm:$0xff]  }
 0xa9d   : > { %28146 = vmatprep.mubr.bf16.mxu0 %v30249_v20  ;;  %v30298_v20 = vld [vmem:[#allocation4 + $0x130] sm:$0xff]  }
 0xaa4   : > { %28147 = vmatmul.mubr.bf16.gmra.mrb[84].mxu0 %v30250_v21  ;;  %v30299_v21 = vld [vmem:[#allocation4 + $0x138] sm:$0xff]  }
 0xaa5   : > { %28150 = vmatprep.mubr.bf16.mxu0 %v30251_v22  ;;  %v30300_v22 = vld [vmem:[#allocation4 + $0x148] sm:$0xff]  }
 0xaac   : > { %28151 = vmatmul.mubr.bf16.gmra.mrb[88].mxu0 %v30253_v23  ;;  %v30328_v23 = vld [vmem:[#allocation17 + $0x2d0] sm:$0xff]  }
 0xaad   : > { %28154 = vmatprep.mubr.bf16.mxu0 %v30254_v24  ;;  %v30329_v24 = vld [vmem:[#allocation17 + $0x290] sm:$0xff]  }
 0xab4   : > { %28155 = vmatmul.mubr.bf16.gmra.mrb[92].mxu0 %v30255_v25  ;;  %v30330_v25 = vld [vmem:[#allocation17 + $0x2d8] sm:$0xff]  }
 0xab5   : > { %28158 = vmatprep.mubr.bf16.mxu0 %v30256_v26  ;;  %v30331_v26 = vld [vmem:[#allocation17 + $0x298] sm:$0xff]  }
 0xabc   : > { %28159 = vmatmul.mubr.bf16.gmra.mrb[96].mxu0 %v30258_v27  ;;  %v30303_v27 = vld [vmem:[#allocation4 + $0x150] sm:$0xff]  }
 0xabd   : > { %28162 = vmatprep.mubr.bf16.mxu0 %v30259_v28  ;;  %v30304_v28 = vld [vmem:[#allocation4 + $0x158] sm:$0xff]  }
 0xac4   : > { %28163 = vmatmul.mubr.bf16.gmra.mrb[100].mxu0 %v30260_v29  ;;  %v30332_v29 = vld [vmem:[#allocation17 + $0x2e0] sm:$0xff]  }
 0xac5   : > { %28166 = vmatprep.mubr.bf16.mxu0 %v30261_v30  ;;  %v30333_v30 = vld [vmem:[#allocation17 + $0xc0] sm:$0xff]  }
 0xac6   : > { %26131 = vmatprep.subr.bf16.mxu1 %v30333_v30 }
 0xacc   : > { %28167 = vmatmul.mubr.bf16.gmra.mrb[104].mxu0 %v30263_v31  ;;  %v30334_v31 = vld [vmem:[#allocation17 + $0x2a0] sm:$0xff]  }
 0xacd   : > { %28170 = vmatprep.mubr.bf16.mxu0 %v30264_v32  ;;  %v30336_v32 = vld [vmem:[#allocation17 + $0x2e8] sm:$0xff]  }
 0xad4   : > { %28171 = vmatmul.mubr.bf16.gmra.mrb[108].mxu0 %v30265_v49  ;;  %v30308_v49 = vld [vmem:[#allocation4 + $0x170] sm:$0xff]  }
 0xad5   : > { %28174 = vmatprep.mubr.bf16.mxu0 %v30266_v33  ;;  %v30338_v33 = vld [vmem:[#allocation17 + $0x2a8] sm:$0xff]  }
 0xadc   : > { %28175 = vmatmul.mubr.bf16.gmra.mrb[112].mxu0 %v30268_v37  ;;  %v30342_v37 = vld [vmem:[#allocation17 + $0x2b0] sm:$0xff]  }
 0xadd   : > { %28178 = vmatprep.mubr.bf16.mxu0 %v30269_v38  ;;  %v30344_v38 = vld [vmem:[#allocation17 + $0x2f8] sm:$0xff]  }
 0xae4   : > { %28179 = vmatmul.mubr.bf16.gmra.mrb[116].mxu0 %v30270_v40  ;;  %v30310_v40 = vld [vmem:[#allocation4 + $0x180] sm:$0xff]  }
 0xae5   : > { %28182 = vmatprep.mubr.bf16.mxu0 %v30271_v39  ;;  %v30309_v39 = vld [vmem:[#allocation4 + $0x178] sm:$0xff]  }
 0xaec   : > { %28183 = vmatmul.mubr.bf16.gmra.mrb[120].mxu0 %v30273_v43  ;;  %v30311_v43 = vld [vmem:[#allocation4 + $0x188] sm:$0xff]  }
 0xaed   : > { %28186 = vmatprep.mubr.bf16.mxu0 %v30274_v35  ;;  %v32297_v35 = vld [vmem:[#allocation15] ss:$0 sm:$0xff] }
 0xaf4   : > { %28187 = vmatmul.mubr.bf16.gmra.mrb[124].mxu0 %v30275_v44 }
 0xaf5   : > { %28206 = vmatprep.mubr.bf16.mxu0 %v30276_v45 }
 0xafc   : > { %28207 = vmatmul.mubr.bf16.vlgmr.msra.gmra.mrb[64].mxu0 %v30277_v54 }
 0xafd   : > { %28210 = vmatprep.mubr.bf16.mxu0 %v30278_v56  ;;  %26220 = vmatpush3.bf16.msra.mxu0 %v30324_v53 }
 0xafe   : > { %26221 = vmatprep.subr.bf16.mxu0 %v30326_v55 }
 0xb01   : > { %26222 = vmatpush3.bf16.msra.mxu0 %v30327_v59 }
 0xb02   : > { %26223 = vmatprep.subr.bf16.mxu0 %v30328_v23 }
 0xb04   : > { %28211 = vmatmul.mubr.bf16.gmra.mrb[68].mxu0 %v30279_v62 }
 0xb05   : > { %28214 = vmatprep.mubr.bf16.mxu0 %v30280_v63  ;;  %26224 = vmatpush3.bf16.msra.mxu0 %v30329_v24 }
 0xb06   : > { %26225 = vmatprep.subr.bf16.mxu0 %v30330_v25  ;;  %v30354_v25 = vld [vmem:[#allocation17 + $0x388] sm:$0xff]  }
 0xb09   : > { %26226 = vmatpush3.bf16.msra.mxu0 %v30331_v26  ;;  %v30355_v26 = vld [vmem:[#allocation17 + $0xa8] sm:$0xff]  }
 0xb0a   : > { %26227 = vmatprep.subr.bf16.mxu0 %v30332_v29  ;;  %v30357_v29 = vld [vmem:[#allocation17 + $0xf0] sm:$0xff]  }
 0xb0c   : > { %28215 = vmatmul.mubr.bf16.gmra.mrb[72].mxu0 %v30281_v3  ;;  %v30343_v3 = vld [vmem:[#allocation17 + $0x90] sm:$0xff]  }
 0xb0d   : > { %28218 = vmatprep.mubr.bf16.mxu0 %v30282_v4  ;;  %26228 = vmatpush3.bf16.msra.mxu0 %v30334_v31  ;;  %v30358_v31 = vld [vmem:[#allocation17 + $0x390] sm:$0xff]  }
 0xb0e   : > { %26229 = vmatprep.subr.bf16.mxu0 %v30336_v32 }
 0xb11   : > { %26230 = vmatpush3.bf16.msra.mxu0 %v30338_v33  ;;  %v30360_v33 = vld [vmem:[#allocation17 + $0x3d8] sm:$0xff]  }
 0xb12   : > { %26231 = vmatprep.subr.bf16.mxu0 %v30340_v36 }
 0xb14   : > { %28219 = vmatmul.mubr.bf16.gmra.mrb[76].mxu0 %v30283_v5 }
 0xb15   : > { %28222 = vmatprep.mubr.bf16.mxu0 %v30284_v6  ;;  %26232 = vmatpush3.bf16.msra.mxu0 %v30342_v37  ;;  %v30345_v6 = vld [vmem:[#allocation17 + $0xd8] sm:$0xff]  }
 0xb16   : > { %26233 = vmatprep.subr.bf16.mxu0 %v30344_v38  ;;  %v30361_v37 = vld [vmem:[#allocation17 + $0xf8] sm:$0xff]  }
 0xb19   : > { %26234 = vmatpush3.bf16.msra.mxu0 %v30346_v41  ;;  %v30362_v41 = vld [vmem:[#allocation17 + $0x398] sm:$0xff]  }
 0xb1a   : > { %26263 = vmatprep.subr.bf16.mxu0 %v30348_v42  ;;  %v30363_v42 = vld [vmem:[#allocation17 + $0xb8] sm:$0xff]  }
 0xb1c   : > { %28223 = vmatmul.mubr.bf16.gmra.mrb[80].mxu0 %v30285_v7 }
 0xb1d   : > { %28226 = vmatprep.mubr.bf16.mxu0 %v30286_v9 }
 0xb24   : > { %28227 = vmatmul.mubr.bf16.gmra.mrb[84].mxu0 %v30287_v10 }
 0xb25   : > { %28230 = vmatprep.mubr.bf16.mxu0 %v30288_v11 }
 0xb2c   : > { %28231 = vmatmul.mubr.bf16.gmra.mrb[88].mxu0 %v30289_v12  ;;  %v30347_v12 = vld [vmem:[#allocation17 + $0x98] sm:$0xff]  }
 0xb2d   : > { %28234 = vmatprep.mubr.bf16.mxu0 %v30290_v13 }
 0xb34   : > { %28235 = vmatmul.mubr.bf16.gmra.mrb[92].mxu0 %v30291_v14  ;;  %v30349_v14 = vld [vmem:[#allocation17 + $0xe0] sm:$0xff]  }
 0xb35   : > { %28238 = vmatprep.mubr.bf16.mxu0 %v30292_v8 }
 0xb3c   : > { %28239 = vmatmul.mubr.bf16.gmra.mrb[96].mxu0 %v30293_v15  ;;  %v30350_v15 = vld [vmem:[#allocation17 + $0x380] sm:$0xff]  }
 0xb3d   : > { %28242 = vmatprep.mubr.bf16.mxu0 %v30294_v16 }
 0xb44   : > { %28243 = vmatmul.mubr.bf16.gmra.mrb[100].mxu0 %v30295_v17 }
 0xb45   : > { %28246 = vmatprep.mubr.bf16.mxu0 %v30296_v18  ;;  %v30351_v18 = vld [vmem:[#allocation17 + $0xa0] sm:$0xff]  }
 0xb4c   : > { %28247 = vmatmul.mubr.bf16.gmra.mrb[104].mxu0 %v30297_v19  ;;  %v30352_v19 = vld [vmem:[#allocation17 + $0x3c8] sm:$0xff]  }
 0xb4d   : > { %28250 = vmatprep.mubr.bf16.mxu0 %v30298_v20 }
 0xb54   : > { %28251 = vmatmul.mubr.bf16.gmra.mrb[108].mxu0 %v30299_v21  ;;  %v30353_v21 = vld [vmem:[#allocation17 + $0xe8] sm:$0xff]  }
 0xb55   : > { %28254 = vmatprep.mubr.bf16.mxu0 %v30300_v22 }
 0xb5c   : > { %28255 = vmatmul.mubr.bf16.gmra.mrb[112].mxu0 %v30303_v27  ;;  %v30356_v27 = vld [vmem:[#allocation17 + $0x3d0] sm:$0xff]  }
 0xb5d   : > { %28258 = vmatprep.mubr.bf16.mxu0 %v30304_v28 }
 0xb64   : > { %28259 = vmatmul.mubr.bf16.gmra.mrb[116].mxu0 %v30305_v34 }
 0xb65   : > { %28262 = vmatprep.mubr.bf16.mxu0 %v30308_v49  ;;  %v30359_v49 = vld [vmem:[#allocation17 + $0xb0] sm:$0xff]  }
 0xb6c   : > { %28263 = vmatmul.mubr.bf16.gmra.mrb[120].mxu0 %v30309_v39 }
 0xb6d   : > { %28266 = vmatprep.mubr.bf16.mxu0 %v30310_v40 }
 0xb74   : > { %28267 = vmatmul.mubr.bf16.gmra.mrb[124].mxu0 %v30311_v43  ;;  %v30364_v43 = vld [vmem:[#allocation17 + $0x3e0] sm:$0xff]  }
 0xbcf   : > { %v32299_v44 = vpop.f32.mrb[64].mxu0 }
 0xbd0   : > { %v16535_v45 = vpop.f32.mrb[65].mxu0  ;;  %v28354_v34 = vadd.f32 %v32299_v44, %v32297_v35 }
 0xbd1   : > { %v28355_v46 = vadd.f32 %v32297_v35, %v16535_v45  ;;  %v28209_v47 = vpop.f32.mrb[66].mxu0 }
 0xbd2   : > { %v28356_v48 = vadd.f32 %v28209_v47, %v32297_v35  ;;  %v16538_v50 = vpop.f32.mrb[67].mxu0  ;;  %v16927_v45 = vmax.f32 %v28354_v34, 0.0  ;;  %v30366_v47 = vld [vmem:[#allocation17 + $0x3a0] sm:$0xff]   ;;  %v30389_v34 = vld [vmem:[#allocation17 + $0x170] sm:$0xff]  }
 0xbd3   : > { %v28357_v51 = vadd.f32 %v32297_v35, %v16538_v50  ;;  %v16919_v52 = vmax.f32 %v28355_v46, 0.0  ;;  %v30365_v46 = vld [vmem:[#allocation17 + $0x140] sm:$0xff]  }
 0xbd4   : > { %v16931_v53 = vmax.f32 %v28356_v48, 0.0  ;;  %v30367_v50 = vld [vmem:[#allocation17 + $0x100] sm:$0xff]  }
 0xbd5   : > { %v16923_v54 = vmax.f32 %v28357_v51, 0.0  ;;  %v25321_v58 = vpack.c.bf16 %v16919_v52, %v16919_v52  ;;  %v25323_v51 = vpack.c.bf16 %v16927_v45, %v16927_v45  ;;  %v30393_v45 = vld [vmem:[#allocation17 + $0x178] sm:$0xff]  }
 0xbd6   : > { %v25324_v61 = vpack.c.bf16 %v16931_v53, %v16931_v53  ;;  %v30368_v53 = vld [vmem:[#allocation17 + $0x3e8] sm:$0xff]  }
 0xbd7   : > { %v25322_v55 = vpack.c.bf16 %v16923_v54, %v16923_v54  ;;  %v32304_v56 = vpop.f32.mrb[68].mxu0  ;;  %v30369_v54 = vld [vmem:[#allocation17 + $0x148] sm:$0xff]  }
 0xbd8   : > { %v32306_v59 = vpop.f32.mrb[69].mxu0 }
 0xbd9   : > { %v32308_v62 = vpop.f32.mrb[70].mxu0  ;;  %21565 = vmatprep.mubr.bf16.mxu1 %v25322_v55 }
 0xbda   : > { %v16554_v63 = vpop.f32.mrb[71].mxu0  ;;  %21566 = vmatmul.mubr.bf16.vlgmr.msra.gmra.mrb[64].mxu1 %v25321_v58 }
 0xbdb   : > { %26132 = vmatpush3.bf16.msra.mxu1 %v30335_v57  ;;  %21605 = vmatprep.mubr.bf16.mxu1 %v25324_v61  ;;  %v28361_v38 = vadd.f32 %v32297_v35, %v16554_v63  ;;  %v30371_v61 = vld [vmem:[#allocation17 + $0x108] sm:$0xff]   ;;  %v30372_v63 = vld [vmem:[#allocation17 + $0x3f0] sm:$0xff]  }
 0xbdc   : > { %26133 = vmatprep.subr.bf16.mxu1 %v30337_v60  ;;  %v30370_v60 = vld [vmem:[#allocation17 + $0x3a8] sm:$0xff]  }
 0xbdd   : > { %v16939_v44 = vmax.f32 %v28361_v38, 0.0 }
 0xbdf   : > { %26134 = vmatpush3.bf16.msra.mxu1 %v30339_v0  ;;  %v28216_v2 = vpop.f32.mrb[72].mxu0  ;;  %v25326_v55 = vpack.c.bf16 %v16939_v44, %v16939_v44  ;;  %v30373_v0 = vld [vmem:[#allocation17 + $0x150] sm:$0xff]  }
 0xbe0   : > { %v28362_v4 = vadd.f32 %v28216_v2, %v32297_v35  ;;  %v32311_v5 = vpop.f32.mrb[73].mxu0  ;;  %26135 = vmatprep.subr.bf16.mxu1 %v30341_v1  ;;  %v30374_v1 = vld [vmem:[#allocation17 + $0x3b0] sm:$0xff]  }
 0xbe1   : > { %v28217_v7 = vpop.f32.mrb[74].mxu0 }
 0xbe2   : > { %v28364_v9 = vadd.f32 %v28217_v7, %v32297_v35  ;;  %v32314_v10 = vpop.f32.mrb[75].mxu0  ;;  %v16959_v11 = vmax.f32 %v28362_v4, 0.0  ;;  %v30375_v4 = vld [vmem:[#allocation17 + $0x110] sm:$0xff]  }
 0xbe3   : > { %26136 = vmatpush3.bf16.msra.mxu1 %v30343_v3 }
 0xbe4   : > { %v16963_v13 = vmax.f32 %v28364_v9, 0.0  ;;  %26137 = vmatprep.subr.bf16.mxu1 %v30345_v6  ;;  %v25331_v16 = vpack.c.bf16 %v16959_v11, %v16959_v11  ;;  %v30376_v6 = vld [vmem:[#allocation17 + $0x3f8] sm:$0xff]  }
 0xbe5   : > { %v30377_v11 = vld [vmem:[#allocation17 + $0x158] sm:$0xff]  }
 0xbe6   : > { %v25332_v8 = vpack.c.bf16 %v16963_v13, %v16963_v13 }
 0xbe7   : > { %26138 = vmatpush3.bf16.msra.mxu1 %v30347_v12  ;;  %v32316_v17 = vpop.f32.mrb[76].mxu0 }
 0xbe8   : > { %v32318_v20 = vpop.f32.mrb[77].mxu0  ;;  %21765 = vmatprep.mubr.bf16.mxu0 %v25332_v8  ;;  %26139 = vmatprep.subr.bf16.mxu1 %v30349_v14  ;;  %v28366_v2 = vadd.f32 %v32316_v17, %v32297_v35  ;;  %v30378_v14 = vld [vmem:[#allocation17 + $0x3b8] sm:$0xff]  }
 0xbe9   : > { %v28221_v22 = vpop.f32.mrb[78].mxu0  ;;  %21766 = vmatmul.mubr.bf16.vlgmr.msra.gmra.mrb[128].mxu0 %v25331_v16  ;;  %v30380_v16 = vld [vmem:[#allocation17 + $0x4c0] sm:$0xff]  }
 0xbea   : > { %v28368_v23 = vadd.f32 %v28221_v22, %v32297_v35  ;;  %26264 = vmatpush3.bf16.msra.mxu0 %v30350_v15  ;;  %v32321_v24 = vpop.f32.mrb[79].mxu0  ;;  %v16975_v8 = vmax.f32 %v28366_v2, 0.0  ;;  %v30379_v15 = vld [vmem:[#allocation17 + $0x118] sm:$0xff]   ;;  %v30401_v2 = vld [vmem:[#allocation17 + $0x1c8] sm:$0xff]  }
 0xbeb   : > { %26140 = vmatpush3.bf16.msra.mxu1 %v30351_v18  ;;  %26265 = vmatprep.subr.bf16.mxu0 %v30352_v19  ;;  %v30381_v18 = vld [vmem:[#allocation17 + $0x160] sm:$0xff]  }
 0xbec   : > { %v16979_v28 = vmax.f32 %v28368_v23, 0.0  ;;  %26141 = vmatprep.subr.bf16.mxu1 %v30353_v21  ;;  %v30382_v19 = vld [vmem:[#allocation17 + $0x480] sm:$0xff]   ;;  %v25335_v21 = vpack.c.bf16 %v16975_v8, %v16975_v8  ;;  %v30404_v8 = vld [vmem:[#allocation17 + $0x4f0] sm:$0xff]  }
 0xbed   : > { %v30383_v23 = vld [vmem:[#allocation17 + $0x120] sm:$0xff]  }
 0xbee   : > { %v25336_v30 = vpack.c.bf16 %v16979_v28, %v16979_v28  ;;  %26266 = vmatpush3.bf16.msra.mxu0 %v30354_v25  ;;  %v30384_v25 = vld [vmem:[#allocation17 + $0x4c8] sm:$0xff]  }
 0xbef   : > { %26142 = vmatpush3.bf16.msra.mxu1 %v30355_v26  ;;  %v32323_v32 = vpop.f32.mrb[80].mxu0  ;;  %26267 = vmatprep.subr.bf16.mxu0 %v30356_v27  ;;  %v30385_v28 = vld [vmem:[#allocation17 + $0x168] sm:$0xff]  }
 0xbf0   : > { %v32327_v36 = vpop.f32.mrb[81].mxu0  ;;  %21845 = vmatprep.mubr.bf16.mxu0 %v25336_v30  ;;  %26143 = vmatprep.subr.bf16.mxu1 %v30357_v29 }
 0xbf1   : > { %v28225_v39 = vpop.f32.mrb[82].mxu0 }
 0xbf2   : > { %26268 = vmatpush3.bf16.msra.mxu0 %v30358_v31  ;;  %v32330_v40 = vpop.f32.mrb[83].mxu0  ;;  %v28372_v7 = vadd.f32 %v28225_v39, %v32297_v35  ;;  %v30386_v31 = vld [vmem:[#allocation17 + $0x488] sm:$0xff]   ;;  %v30391_v39 = vld [vmem:[#allocation17 + $0x130] sm:$0xff]  }
 0xbf3   : > { %26144 = vmatpush3.bf16.msra.mxu1 %v30359_v49  ;;  %26269 = vmatprep.subr.bf16.mxu0 %v30360_v33  ;;  %v30387_v49 = vld [vmem:[#allocation17 + $0x128] sm:$0xff]   ;;  %v30388_v33 = vld [vmem:[#allocation17 + $0x4d0] sm:$0xff]  }
 0xbf4   : > { %26145 = vmatprep.subr.bf16.mxu1 %v30361_v37  ;;  %v16995_v17 = vmax.f32 %v28372_v7, 0.0  ;;  %v30390_v37 = vld [vmem:[#allocation17 + $0x490] sm:$0xff]  }
 0xbf6   : > { %26270 = vmatpush3.bf16.msra.mxu0 %v30362_v41  ;;  %v25340_v26 = vpack.c.bf16 %v16995_v17, %v16995_v17  ;;  %v30392_v41 = vld [vmem:[#allocation17 + $0x4d8] sm:$0xff]   ;;  %v28370_v17 = vadd.f32 %v32323_v32, %v32297_v35 }
 0xbf7   : > { %26146 = vmatpush3.bf16.msra.mxu1 %v30363_v42  ;;  %v32332_v48 = vpop.f32.mrb[84].mxu0  ;;  %26271 = vmatprep.subr.bf16.mxu0 %v30364_v43  ;;  %v28359_v42 = vadd.f32 %v32297_v35, %v32306_v59  ;;  %v30397_v59 = vld [vmem:[#allocation17 + $0x1c0] sm:$0xff]  }
 0xbf8   : > { %v32334_v52 = vpop.f32.mrb[85].mxu0  ;;  %26153 = vmatprep.subr.bf16.mxu1 %v30365_v46  ;;  %v28360_v46 = vadd.f32 %v32308_v62, %v32297_v35  ;;  %v30399_v62 = vld [vmem:[#allocation17 + $0x180] sm:$0xff]   ;;  %v16991_v32 = vmax.f32 %v28370_v17, 0.0 }
 0xbf9   : > { %v32336_v57 = vpop.f32.mrb[86].mxu0 }
 0xbfa   : > { %21606 = vmatmul.mubr.bf16.vlgmr.msra.gmra.mrb[68].mxu1 %v25323_v51  ;;  %26272 = vmatpush3.bf16.msra.mxu0 %v30366_v47  ;;  %v32338_v58 = vpop.f32.mrb[87].mxu0  ;;  %v30395_v51 = vld [vmem:[#allocation17 + $0x138] sm:$0xff]  }
 0xbfb   : > { %26154 = vmatpush3.bf16.msra.mxu1 %v30367_v50  ;;  %21645 = vmatprep.mubr.bf16.mxu1 %v25326_v55  ;;  %v30394_v50 = vld [vmem:[#allocation17 + $0x498] sm:$0xff]   ;;  %v16947_v55 = vmax.f32 %v28360_v46, 0.0  ;;  %v30416_v46 = vld [vmem:[#allocation17 + $0x5c8] sm:$0xff]  }
 0xbfc   : > { %26273 = vmatprep.subr.bf16.mxu0 %v30368_v53  ;;  %26155 = vmatprep.subr.bf16.mxu1 %v30369_v54  ;;  %v30396_v53 = vld [vmem:[#allocation17 + $0x4e0] sm:$0xff]   ;;  %v16935_v54 = vmax.f32 %v28359_v42, 0.0 }
 0xbfe   : > { %26274 = vmatpush3.bf16.msra.mxu0 %v30370_v60  ;;  %v30398_v60 = vld [vmem:[#allocation17 + $0x4a0] sm:$0xff]  }
 0xbff   : > { %26156 = vmatpush3.bf16.msra.mxu1 %v30371_v61  ;;  %v32342_v3 = vpop.f32.mrb[88].mxu0  ;;  %26275 = vmatprep.subr.bf16.mxu0 %v30372_v63  ;;  %v25325_v63 = vpack.c.bf16 %v16935_v54, %v16935_v54 }
 0xc00   : > { %v32345_v9 = vpop.f32.mrb[89].mxu0  ;;  %26157 = vmatprep.subr.bf16.mxu1 %v30373_v0 }
 0xc01   : > { %v32347_v12 = vpop.f32.mrb[90].mxu0 }
 0xc02   : > { %26276 = vmatpush3.bf16.msra.mxu0 %v30374_v1  ;;  %v32349_v13 = vpop.f32.mrb[91].mxu0  ;;  %v30400_v1 = vld [vmem:[#allocation17 + $0x4e8] sm:$0xff]  }
 0xc03   : > { %26158 = vmatpush3.bf16.msra.mxu1 %v30375_v4  ;;  %26277 = vmatprep.subr.bf16.mxu0 %v30376_v6  ;;  %v25328_v4 = vpack.c.bf16 %v16947_v55, %v16947_v55  ;;  %v30418_v55 = vld [vmem:[#allocation17 + $0x588] sm:$0xff]  }
 0xc04   : > { %26159 = vmatprep.subr.bf16.mxu1 %v30377_v11  ;;  %v30402_v11 = vld [vmem:[#allocation17 + $0x4a8] sm:$0xff]  }
 0xc06   : > { %26278 = vmatpush3.bf16.msra.mxu0 %v30378_v14  ;;  %v30403_v14 = vld [vmem:[#allocation17 + $0x188] sm:$0xff]  }
 0xc07   : > { %26160 = vmatpush3.bf16.msra.mxu1 %v30379_v15  ;;  %v32351_v22 = vpop.f32.mrb[92].mxu0  ;;  %26307 = vmatprep.subr.bf16.mxu0 %v30380_v16  ;;  %v30405_v15 = vld [vmem:[#allocation17 + $0x1d0] sm:$0xff]  }
 0xc08   : > { %v32353_v27 = vpop.f32.mrb[93].mxu0  ;;  %26161 = vmatprep.subr.bf16.mxu1 %v30381_v18  ;;  %v30406_v16 = vld [vmem:[#allocation17 + $0x4b0] sm:$0xff]  }
 0xc09   : > { %21846 = vmatmul.mubr.bf16.vlgmr.msra.gmra.mrb[132].mxu0 %v25335_v21  ;;  %v32355_v29 = vpop.f32.mrb[94].mxu0  ;;  %v30408_v21 = vld [vmem:[#allocation17 + $0x4f8] sm:$0xff]  }
 0xc0a   : > { %26308 = vmatpush3.bf16.msra.mxu0 %v30382_v19  ;;  %21925 = vmatprep.mubr.bf16.mxu0 %v25340_v26  ;;  %v32357_v30 = vpop.f32.mrb[95].mxu0  ;;  %v30407_v19 = vld [vmem:[#allocation17 + $0x190] sm:$0xff]   ;;  %v30409_v26 = vld [vmem:[#allocation17 + $0x1d8] sm:$0xff]  }
 0xc0b   : > { %26162 = vmatpush3.bf16.msra.mxu1 %v30383_v23  ;;  %26309 = vmatprep.subr.bf16.mxu0 %v30384_v25  ;;  %v28376_v23 = vadd.f32 %v32336_v57, %v32297_v35  ;;  %v30414_v57 = vld [vmem:[#allocation17 + $0x580] sm:$0xff]  }
 0xc0c   : > { %26163 = vmatprep.subr.bf16.mxu1 %v30385_v28 }
 0xc0e   : > { %26310 = vmatpush3.bf16.msra.mxu0 %v30386_v31 }
 0xc0f   : > { %26164 = vmatpush3.bf16.msra.mxu1 %v30387_v49  ;;  %v32359_v38 = vpop.f32.mrb[96].mxu0  ;;  %26311 = vmatprep.subr.bf16.mxu0 %v30388_v33  ;;  %v30410_v49 = vld [vmem:[#allocation17 + $0x4b8] sm:$0xff]  }
 0xc10   : > { %v32363_v43 = vpop.f32.mrb[97].mxu0  ;;  %26165 = vmatprep.subr.bf16.mxu1 %v30389_v34  ;;  %v30411_v33 = vld [vmem:[#allocation17 + $0x198] sm:$0xff]   ;;  %v30412_v34 = vld [vmem:[#allocation17 + $0x5c0] sm:$0xff]  }
 0xc11   : > { %v32367_v44 = vpop.f32.mrb[98].mxu0 }
 0xc12   : > { %26312 = vmatpush3.bf16.msra.mxu0 %v30390_v37  ;;  %v32369_v47 = vpop.f32.mrb[99].mxu0  ;;  %v17011_v37 = vmax.f32 %v28376_v23, 0.0  ;;  %v30427_v23 = vld [vmem:[#allocation17 + $0x1b8] sm:$0xff]  }
 0xc13   : > { %26166 = vmatpush3.bf16.msra.mxu1 %v30391_v39  ;;  %26313 = vmatprep.subr.bf16.mxu0 %v30392_v41  ;;  %v30413_v39 = vld [vmem:[#allocation17 + $0x1e0] sm:$0xff]   ;;  %v25339_v41 = vpack.c.bf16 %v16991_v32, %v16991_v32 }
 0xc14   : > { %26167 = vmatprep.subr.bf16.mxu1 %v30393_v45  ;;  %v30415_v45 = vld [vmem:[#allocation17 + $0x1a0] sm:$0xff]  }
 0xc16   : > { %26314 = vmatpush3.bf16.msra.mxu0 %v30394_v50  ;;  %v25344_v50 = vpack.c.bf16 %v17011_v37, %v17011_v37 }
 0xc17   : > { %26168 = vmatpush3.bf16.msra.mxu1 %v30395_v51  ;;  %v32371_v61 = vpop.f32.mrb[100].mxu0  ;;  %26315 = vmatprep.subr.bf16.mxu0 %v30396_v53  ;;  %v30417_v53 = vld [vmem:[#allocation17 + $0x1e8] sm:$0xff]  }
 0xc18   : > { %v32373_v0 = vpop.f32.mrb[101].mxu0  ;;  %26175 = vmatprep.subr.bf16.mxu1 %v30397_v59 }
 0xc19   : > { %v32375_v6 = vpop.f32.mrb[102].mxu0 }
 0xc1a   : > { %21646 = vmatmul.mubr.bf16.vlgmr.msra.gmra.mrb[72].mxu1 %v25325_v63  ;;  %26316 = vmatpush3.bf16.msra.mxu0 %v30398_v60  ;;  %v32377_v7 = vpop.f32.mrb[103].mxu0  ;;  %v30419_v60 = vld [vmem:[#allocation17 + $0x1a8] sm:$0xff]   ;;  %v30421_v63 = vld [vmem:[#allocation17 + $0x1f0] sm:$0xff]  }
 0xc1b   : > { %26176 = vmatpush3.bf16.msra.mxu1 %v30399_v62  ;;  %21685 = vmatprep.mubr.bf16.mxu1 %v25328_v4  ;;  %v30420_v62 = vld [vmem:[#allocation17 + $0x5d0] sm:$0xff]  }
 0xc1c   : > { %26317 = vmatprep.subr.bf16.mxu0 %v30400_v1  ;;  %26177 = vmatprep.subr.bf16.mxu1 %v30401_v2  ;;  %v30422_v1 = vld [vmem:[#allocation17 + $0x590] sm:$0xff]  }
 0xc1d   : > { %v30423_v4 = vld [vmem:[#allocation17 + $0x1b0] sm:$0xff]  }
 0xc1e   : > { %26318 = vmatpush3.bf16.msra.mxu0 %v30402_v11  ;;  %v30424_v11 = vld [vmem:[#allocation17 + $0x5d8] sm:$0xff]  }
 0xc1f   : > { %26178 = vmatpush3.bf16.msra.mxu1 %v30403_v14  ;;  %v32381_v18 = vpop.f32.mrb[104].mxu0  ;;  %26319 = vmatprep.subr.bf16.mxu0 %v30404_v8  ;;  %v28358_v14 = vadd.f32 %v32304_v56, %v32297_v35  ;;  %v30429_v56 = vld [vmem:[#allocation17 + $0x240] sm:$0xff]  }
 0xc20   : > { %v32385_v25 = vpop.f32.mrb[105].mxu0  ;;  %26179 = vmatprep.subr.bf16.mxu1 %v30405_v15  ;;  %v30425_v15 = vld [vmem:[#allocation17 + $0x1f8] sm:$0xff]  }
 0xc21   : > { %v32387_v28 = vpop.f32.mrb[106].mxu0 }
 0xc22   : > { %26320 = vmatpush3.bf16.msra.mxu0 %v30406_v16  ;;  %v32389_v31 = vpop.f32.mrb[107].mxu0  ;;  %v28365_v16 = vadd.f32 %v32297_v35, %v32314_v10  ;;  %v30431_v10 = vld [vmem:[#allocation17 + $0x200] sm:$0xff]  }
 0xc23   : > { %26180 = vmatpush3.bf16.msra.mxu1 %v30407_v19  ;;  %26321 = vmatprep.subr.bf16.mxu0 %v30408_v21  ;;  %v30426_v21 = vld [vmem:[#allocation17 + $0x598] sm:$0xff]  }
 0xc24   : > { %26181 = vmatprep.subr.bf16.mxu1 %v30409_v26  ;;  %v30428_v26 = vld [vmem:[#allocation17 + $0x5e0] sm:$0xff]   ;;  %v16955_v32 = vmax.f32 %v28365_v16, 0.0 }
 0xc26   : > { %26322 = vmatpush3.bf16.msra.mxu0 %v30410_v49  ;;  %v16943_v49 = vmax.f32 %v28358_v14, 0.0  ;;  %v30440_v14 = vld [vmem:[#allocation17 + $0x5f8] sm:$0xff]  }
 0xc27   : > { %26182 = vmatpush3.bf16.msra.mxu1 %v30411_v33  ;;  %v32391_v42 = vpop.f32.mrb[108].mxu0  ;;  %26351 = vmatprep.subr.bf16.mxu0 %v30412_v34  ;;  %v30430_v33 = vld [vmem:[#allocation17 + $0x5a0] sm:$0xff]  }
 0xc28   : > { %v32393_v51 = vpop.f32.mrb[109].mxu0  ;;  %26183 = vmatprep.subr.bf16.mxu1 %v30413_v39  ;;  %v25327_v37 = vpack.c.bf16 %v16943_v49, %v16943_v49  ;;  %v30442_v49 = vld [vmem:[#allocation17 + $0x5b8] sm:$0xff]  }
 0xc29   : > { %21926 = vmatmul.mubr.bf16.vlgmr.msra.gmra.mrb[136].mxu0 %v25339_v41  ;;  %v32395_v54 = vpop.f32.mrb[110].mxu0  ;;  %v30433_v41 = vld [vmem:[#allocation17 + $0x248] sm:$0xff]  }
 0xc2a   : > { %26352 = vmatpush3.bf16.msra.mxu0 %v30414_v57  ;;  %22005 = vmatprep.mubr.bf16.mxu0 %v25344_v50  ;;  %v32397_v59 = vpop.f32.mrb[111].mxu0  ;;  %v30432_v57 = vld [vmem:[#allocation17 + $0x5e8] sm:$0xff]  }
 0xc2b   : > { %26184 = vmatpush3.bf16.msra.mxu1 %v30415_v45  ;;  %26353 = vmatprep.subr.bf16.mxu0 %v30416_v46  ;;  %v25330_v45 = vpack.c.bf16 %v16955_v32, %v16955_v32  ;;  %v30444_v32 = vld [vmem:[#allocation17 + $0x6c0] sm:$0xff]  }
 0xc2c   : > { %26185 = vmatprep.subr.bf16.mxu1 %v30417_v53  ;;  %v30434_v53 = vld [vmem:[#allocation17 + $0x5a8] sm:$0xff]  }
 0xc2e   : > { %26354 = vmatpush3.bf16.msra.mxu0 %v30418_v55  ;;  %v30435_v55 = vld [vmem:[#allocation17 + $0x208] sm:$0xff]  }
 0xc2f   : > { %26186 = vmatpush3.bf16.msra.mxu1 %v30419_v60  ;;  %v32399_v2 = vpop.f32.mrb[112].mxu0  ;;  %26355 = vmatprep.subr.bf16.mxu0 %v30420_v62  ;;  %v30436_v60 = vld [vmem:[#allocation17 + $0x5f0] sm:$0xff]  }
 0xc30   : > { %v32403_v8 = vpop.f32.mrb[113].mxu0  ;;  %26187 = vmatprep.subr.bf16.mxu1 %v30421_v63  ;;  %v30437_v62 = vld [vmem:[#allocation17 + $0x250] sm:$0xff]  }
 0xc31   : > { %v32407_v17 = vpop.f32.mrb[114].mxu0  ;;  %v30438_v63 = vld [vmem:[#allocation17 + $0x5b0] sm:$0xff]  }
 0xc32   : > { %26356 = vmatpush3.bf16.msra.mxu0 %v30422_v1  ;;  %v32409_v19 = vpop.f32.mrb[115].mxu0  ;;  %v28374_v1 = vadd.f32 %v32332_v48, %v32297_v35 }
 0xc33   : > { %26188 = vmatpush3.bf16.msra.mxu1 %v30423_v4  ;;  %26357 = vmatprep.subr.bf16.mxu0 %v30424_v11  ;;  %v30439_v11 = vld [vmem:[#allocation17 + $0x210] sm:$0xff]  }
 0xc34   : > { %26189 = vmatprep.subr.bf16.mxu1 %v30425_v15  ;;  %v28380_v15 = vadd.f32 %v32347_v12, %v32297_v35  ;;  %v17007_v48 = vmax.f32 %v28374_v1, 0.0  ;;  %v30446_v12 = vld [vmem:[#allocation17 + $0x680] sm:$0xff]   ;;  %v30450_v1 = vld [vmem:[#allocation17 + $0x688] sm:$0xff]  }
 0xc36   : > { %26358 = vmatpush3.bf16.msra.mxu0 %v30426_v21  ;;  %v30441_v21 = vld [vmem:[#allocation17 + $0x258] sm:$0xff]  }
 0xc37   : > { %26190 = vmatpush3.bf16.msra.mxu1 %v30427_v23  ;;  %v32411_v34 = vpop.f32.mrb[116].mxu0  ;;  %26359 = vmatprep.subr.bf16.mxu0 %v30428_v26 }
 0xc38   : > { %v32413_v39 = vpop.f32.mrb[117].mxu0  ;;  %26197 = vmatprep.subr.bf16.mxu1 %v30429_v56  ;;  %v30443_v56 = vld [vmem:[#allocation17 + $0x218] sm:$0xff]  }
 0xc39   : > { %v32415_v46 = vpop.f32.mrb[118].mxu0 }
 0xc3a   : > { %21686 = vmatmul.mubr.bf16.vlgmr.msra.gmra.mrb[76].mxu1 %v25327_v37  ;;  %26360 = vmatpush3.bf16.msra.mxu0 %v30430_v33  ;;  %v32417_v50 = vpop.f32.mrb[119].mxu0  ;;  %v17027_v33 = vmax.f32 %v28380_v15, 0.0  ;;  %v25343_v37 = vpack.c.bf16 %v17007_v48, %v17007_v48  ;;  %v30453_v15 = vld [vmem:[#allocation17 + $0x270] sm:$0xff]   ;;  %v30456_v48 = vld [vmem:[#allocation17 + $0x6d8] sm:$0xff]  }
 0xc3b   : > { %26198 = vmatpush3.bf16.msra.mxu1 %v30431_v10  ;;  %21725 = vmatprep.mubr.bf16.mxu1 %v25330_v45  ;;  %v30445_v10 = vld [vmem:[#allocation17 + $0x260] sm:$0xff]   ;;  %v30448_v45 = vld [vmem:[#allocation17 + $0x6c8] sm:$0xff]  }
 0xc3c   : > { %26361 = vmatprep.subr.bf16.mxu0 %v30432_v57  ;;  %26199 = vmatprep.subr.bf16.mxu1 %v30433_v41  ;;  %v30447_v41 = vld [vmem:[#allocation17 + $0x220] sm:$0xff]  }
 0xc3e   : > { %26362 = vmatpush3.bf16.msra.mxu0 %v30434_v53  ;;  %v25348_v53 = vpack.c.bf16 %v17027_v33, %v17027_v33  ;;  %v28369_v33 = vadd.f32 %v32297_v35, %v32321_v24 }
 0xc3f   : > { %26200 = vmatpush3.bf16.msra.mxu1 %v30435_v55  ;;  %v32421_v4 = vpop.f32.mrb[120].mxu0  ;;  %26363 = vmatprep.subr.bf16.mxu0 %v30436_v60  ;;  %v30449_v60 = vld [vmem:[#allocation17 + $0x268] sm:$0xff]  }
 0xc40   : > { %v32425_v16 = vpop.f32.mrb[121].mxu0  ;;  %26201 = vmatprep.subr.bf16.mxu1 %v30437_v62 }
 0xc41   : > { %v32427_v23 = vpop.f32.mrb[122].mxu0 }
 0xc42   : > { %26364 = vmatpush3.bf16.msra.mxu0 %v30438_v63  ;;  %v32429_v26 = vpop.f32.mrb[123].mxu0 }
 0xc43   : > { %26202 = vmatpush3.bf16.msra.mxu1 %v30439_v11  ;;  %26365 = vmatprep.subr.bf16.mxu0 %v30440_v14  ;;  %v30451_v11 = vld [vmem:[#allocation17 + $0x228] sm:$0xff]   ;;  %v30452_v14 = vld [vmem:[#allocation17 + $0x6d0] sm:$0xff]  }
 0xc44   : > { %26203 = vmatprep.subr.bf16.mxu1 %v30441_v21  ;;  %v30454_v21 = vld [vmem:[#allocation17 + $0x690] sm:$0xff]  }
 0xc46   : > { %26366 = vmatpush3.bf16.msra.mxu0 %v30442_v49  ;;  %v30455_v49 = vld [vmem:[#allocation17 + $0x230] sm:$0xff]  }
 0xc47   : > { %26204 = vmatpush3.bf16.msra.mxu1 %v30443_v56  ;;  %v32431_v57 = vpop.f32.mrb[124].mxu0  ;;  %26395 = vmatprep.subr.bf16.mxu0 %v30444_v32  ;;  %v28363_v56 = vadd.f32 %v32297_v35, %v32311_v5  ;;  %v30457_v32 = vld [vmem:[#allocation17 + $0x278] sm:$0xff]   ;;  %v30463_v5 = vld [vmem:[#allocation17 + $0x300] sm:$0xff]  }
 0xc48   : > { %v32433_v55 = vpop.f32.mrb[125].mxu0  ;;  %26205 = vmatprep.subr.bf16.mxu1 %v30445_v10  ;;  %v30458_v10 = vld [vmem:[#allocation17 + $0x698] sm:$0xff]  }
 0xc49   : > { %22006 = vmatmul.mubr.bf16.vlgmr.msra.gmra.mrb[140].mxu0 %v25343_v37  ;;  %v32435_v62 = vpop.f32.mrb[126].mxu0  ;;  %v30460_v37 = vld [vmem:[#allocation17 + $0x6e0] sm:$0xff]  }
 0xc4a   : > { %26396 = vmatpush3.bf16.msra.mxu0 %v30446_v12  ;;  %22085 = vmatprep.mubr.bf16.mxu0 %v25348_v53  ;;  %v32437_v63 = vpop.f32.mrb[127].mxu0  ;;  %v30459_v12 = vld [vmem:[#allocation17 + $0x238] sm:$0xff]   ;;  %v16971_v53 = vmax.f32 %v28369_v33, 0.0  ;;  %v30471_v33 = vld [vmem:[#allocation17 + $0x310] sm:$0xff]  }
 0xc4b   : > { %26206 = vmatpush3.bf16.msra.mxu1 %v30447_v41  ;;  %26397 = vmatprep.subr.bf16.mxu0 %v30448_v45  ;;  %v16951_v41 = vmax.f32 %v28363_v56, 0.0  ;;  %v30461_v45 = vld [vmem:[#allocation17 + $0x340] sm:$0xff]   ;;  %v30470_v56 = vld [vmem:[#allocation17 + $0x6b0] sm:$0xff]  }
 0xc4c   : > { %26207 = vmatprep.subr.bf16.mxu1 %v30449_v60  ;;  %v30462_v60 = vld [vmem:[#allocation17 + $0x6a0] sm:$0xff]   ;;  %v25334_v24 = vpack.c.bf16 %v16971_v53, %v16971_v53  ;;  %v30475_v53 = vld [vmem:[#allocation17 + $0x318] sm:$0xff]  }
 0xc4e   : > { %26398 = vmatpush3.bf16.msra.mxu0 %v30450_v1  ;;  %v25329_v1 = vpack.c.bf16 %v16951_v41, %v16951_v41  ;;  %v30474_v41 = vld [vmem:[#allocation17 + $0x6b8] sm:$0xff]  }
 0xc4f   : > { %26208 = vmatpush3.bf16.msra.mxu1 %v30451_v11  ;;  %26399 = vmatprep.subr.bf16.mxu0 %v30452_v14  ;;  %v30464_v11 = vld [vmem:[#allocation17 + $0x6e8] sm:$0xff]  }
 0xc50   : > { %26209 = vmatprep.subr.bf16.mxu1 %v30453_v15  ;;  %v30465_v14 = vld [vmem:[#allocation17 + $0x348] sm:$0xff]  }
 0xc51   : > { %v30466_v15 = vld [vmem:[#allocation17 + $0x6a8] sm:$0xff]  }
 0xc52   : > { %26400 = vmatpush3.bf16.msra.mxu0 %v30454_v21  ;;  %v30467_v21 = vld [vmem:[#allocation17 + $0x308] sm:$0xff]  }
 0xc53   : > { %26210 = vmatpush3.bf16.msra.mxu1 %v30455_v49  ;;  %26401 = vmatprep.subr.bf16.mxu0 %v30456_v48  ;;  %v30468_v49 = vld [vmem:[#allocation17 + $0x6f0] sm:$0xff]  }
 0xc54   : > { %26211 = vmatprep.subr.bf16.mxu1 %v30457_v32  ;;  %v30469_v48 = vld [vmem:[#allocation17 + $0x350] sm:$0xff]   ;;  %v28378_v32 = vadd.f32 %v32342_v3, %v32297_v35  ;;  %v30478_v3 = vld [vmem:[#allocation17 + $0x780] sm:$0xff]  }
 0xc56   : > { %26402 = vmatpush3.bf16.msra.mxu0 %v30458_v10  ;;  %v30472_v10 = vld [vmem:[#allocation17 + $0x6f8] sm:$0xff]  }
 0xc57   : > { %26212 = vmatpush3.bf16.msra.mxu1 %v30459_v12  ;;  %26403 = vmatprep.subr.bf16.mxu0 %v30460_v37  ;;  %v28384_v12 = vadd.f32 %v32355_v29, %v32297_v35  ;;  %v30473_v37 = vld [vmem:[#allocation17 + $0x358] sm:$0xff]  }
 0xc58   : > { %26241 = vmatprep.subr.bf16.mxu1 %v30461_v45  ;;  %v17023_v45 = vmax.f32 %v28378_v32, 0.0  ;;  %v30486_v32 = vld [vmem:[#allocation17 + $0x790] sm:$0xff]  }
 0xc5a   : > { %21726 = vmatmul.mubr.bf16.vlgmr.msra.gmra.mrb[80].mxu1 %v25329_v1  ;;  %26404 = vmatpush3.bf16.msra.mxu0 %v30462_v60  ;;  %v30476_v60 = vld [vmem:[#allocation17 + $0x7c0] sm:$0xff]  }
 0xc5b   : > { %26242 = vmatpush3.bf16.msra.mxu1 %v30463_v5  ;;  %21805 = vmatprep.mubr.bf16.mxu1 %v25334_v24  ;;  %v17043_v5 = vmax.f32 %v28384_v12, 0.0  ;;  %v30477_v1 = vld [vmem:[#allocation17 + $0x360] sm:$0xff]   ;;  %v30480_v24 = vld [vmem:[#allocation17 + $0x7c8] sm:$0xff]   ;;  %v28367_v12 = vadd.f32 %v32297_v35, %v32318_v20 }
 0xc5c   : > { %26405 = vmatprep.subr.bf16.mxu0 %v30464_v11  ;;  %26243 = vmatprep.subr.bf16.mxu1 %v30465_v14  ;;  %v25347_v11 = vpack.c.bf16 %v17023_v45, %v17023_v45  ;;  %v30479_v14 = vld [vmem:[#allocation17 + $0x320] sm:$0xff]   ;;  %v30490_v45 = vld [vmem:[#allocation17 + $0x798] sm:$0xff]  }
 0xc5d   : > { %v25352_v29 = vpack.c.bf16 %v17043_v5, %v17043_v5  ;;  %v16967_v5 = vmax.f32 %v28367_v12, 0.0  ;;  %v30495_v20 = vld [vmem:[#allocation17 + $0x400] sm:$0xff]   ;;  %v28388_v12 = vadd.f32 %v32367_v44, %v32297_v35  ;;  %v30513_v44 = vld [vmem:[#allocation17 + $0x468] sm:$0xff]  }
 0xc5e   : > { %26406 = vmatpush3.bf16.msra.mxu0 %v30466_v15  ;;  %v30481_v15 = vld [vmem:[#allocation17 + $0x368] sm:$0xff]  }
 0xc5f   : > { %26244 = vmatpush3.bf16.msra.mxu1 %v30467_v21  ;;  %26407 = vmatprep.subr.bf16.mxu0 %v30468_v49  ;;  %v30482_v21 = vld [vmem:[#allocation17 + $0x788] sm:$0xff]  }
 0xc60   : > { %26245 = vmatprep.subr.bf16.mxu1 %v30469_v48  ;;  %v30483_v49 = vld [vmem:[#allocation17 + $0x328] sm:$0xff]   ;;  %v30484_v48 = vld [vmem:[#allocation17 + $0x7d0] sm:$0xff]  }
 0xc62   : > { %26408 = vmatpush3.bf16.msra.mxu0 %v30470_v56  ;;  %v30485_v56 = vld [vmem:[#allocation17 + $0x370] sm:$0xff]  }
 0xc63   : > { %26246 = vmatpush3.bf16.msra.mxu1 %v30471_v33  ;;  %26409 = vmatprep.subr.bf16.mxu0 %v30472_v10  ;;  %v30487_v33 = vld [vmem:[#allocation17 + $0x330] sm:$0xff]   ;;  %v30488_v10 = vld [vmem:[#allocation17 + $0x7d8] sm:$0xff]  }
 0xc64   : > { %26247 = vmatprep.subr.bf16.mxu1 %v30473_v37  ;;  %v30489_v37 = vld [vmem:[#allocation17 + $0x378] sm:$0xff]  }
 0xc66   : > { %26410 = vmatpush3.bf16.msra.mxu0 %v30474_v41  ;;  %v28373_v41 = vadd.f32 %v32297_v35, %v32330_v40 }
 0xc67   : > { %26248 = vmatpush3.bf16.msra.mxu1 %v30475_v53  ;;  %26439 = vmatprep.subr.bf16.mxu0 %v30476_v60  ;;  %v30491_v53 = vld [vmem:[#allocation17 + $0x338] sm:$0xff]   ;;  %v30492_v60 = vld [vmem:[#allocation17 + $0x7e0] sm:$0xff]  }
 0xc68   : > { %26249 = vmatprep.subr.bf16.mxu1 %v30477_v1  ;;  %v30493_v1 = vld [vmem:[#allocation17 + $0x440] sm:$0xff]  }
 0xc69   : > { %22086 = vmatmul.mubr.bf16.vlgmr.msra.gmra.mrb[144].mxu0 %v25347_v11  ;;  %v30494_v11 = vld [vmem:[#allocation17 + $0x7a0] sm:$0xff]  }
 0xc6a   : > { %26440 = vmatpush3.bf16.msra.mxu0 %v30478_v3  ;;  %22165 = vmatprep.mubr.bf16.mxu0 %v25352_v29  ;;  %v16987_v3 = vmax.f32 %v28373_v41, 0.0  ;;  %v30497_v29 = vld [vmem:[#allocation17 + $0x448] sm:$0xff]   ;;  %v30506_v41 = vld [vmem:[#allocation17 + $0x7b8] sm:$0xff]  }
 0xc6b   : > { %26250 = vmatpush3.bf16.msra.mxu1 %v30479_v14  ;;  %26441 = vmatprep.subr.bf16.mxu0 %v30480_v24  ;;  %v25333_v14 = vpack.c.bf16 %v16967_v5, %v16967_v5  ;;  %v30496_v24 = vld [vmem:[#allocation17 + $0x7e8] sm:$0xff]   ;;  %v17059_v5 = vmax.f32 %v28388_v12, 0.0  ;;  %v30523_v12 = vld [vmem:[#allocation17 + $0x438] sm:$0xff]  }
 0xc6c   : > { %26251 = vmatprep.subr.bf16.mxu1 %v30481_v15  ;;  %v25338_v40 = vpack.c.bf16 %v16987_v3, %v16987_v3  ;;  %v30498_v15 = vld [vmem:[#allocation17 + $0x7a8] sm:$0xff]  }
 0xc6e   : > { %26442 = vmatpush3.bf16.msra.mxu0 %v30482_v21  ;;  %v30499_v21 = vld [vmem:[#allocation17 + $0x408] sm:$0xff]  }
 0xc6f   : > { %26252 = vmatpush3.bf16.msra.mxu1 %v30483_v49  ;;  %26443 = vmatprep.subr.bf16.mxu0 %v30484_v48  ;;  %v30500_v49 = vld [vmem:[#allocation17 + $0x7f0] sm:$0xff]  }
 0xc70   : > { %26253 = vmatprep.subr.bf16.mxu1 %v30485_v56  ;;  %v30501_v48 = vld [vmem:[#allocation17 + $0x450] sm:$0xff]  }
 0xc71   : > { %v30502_v56 = vld [vmem:[#allocation17 + $0x7b0] sm:$0xff]  }
 0xc72   : > { %26444 = vmatpush3.bf16.msra.mxu0 %v30486_v32  ;;  %v28382_v32 = vadd.f32 %v32351_v22, %v32297_v35  ;;  %v30510_v22 = vld [vmem:[#allocation17 + $0x880] sm:$0xff]   ;;  %v25356_v35 = vpack.c.bf16 %v17059_v5, %v17059_v5 }
 0xc73   : > { %26254 = vmatpush3.bf16.msra.mxu1 %v30487_v33  ;;  %26445 = vmatprep.subr.bf16.mxu0 %v30488_v10  ;;  %v30503_v33 = vld [vmem:[#allocation17 + $0x410] sm:$0xff]   ;;  %v30504_v10 = vld [vmem:[#allocation17 + $0x7f8] sm:$0xff]  }
 0xc74   : > { %26255 = vmatprep.subr.bf16.mxu1 %v30489_v37  ;;  %v30505_v37 = vld [vmem:[#allocation17 + $0x458] sm:$0xff]  }
 0xc76   : > { %26446 = vmatpush3.bf16.msra.mxu0 %v30490_v45  ;;  %v17039_v45 = vmax.f32 %v28382_v32, 0.0  ;;  %v30521_v32 = vld [vmem:[#allocation17 + $0x478] sm:$0xff]  }
 0xc77   : > { %26256 = vmatpush3.bf16.msra.mxu1 %v30491_v53  ;;  %26447 = vmatprep.subr.bf16.mxu0 %v30492_v60  ;;  %v30507_v53 = vld [vmem:[#allocation17 + $0x418] sm:$0xff]   ;;  %v30508_v60 = vld [vmem:[#allocation17 + $0x8c0] sm:$0xff]  }
 0xc78   : > { %26285 = vmatprep.subr.bf16.mxu1 %v30493_v1  ;;  %v30509_v1 = vld [vmem:[#allocation17 + $0x460] sm:$0xff]   ;;  %v25351_v3 = vpack.c.bf16 %v17039_v45, %v17039_v45 }
 0xc79   : > { %v30525_v45 = vld [vmem:[#allocation17 + $0x540] sm:$0xff]  }
 0xc7a   : > { %21806 = vmatmul.mubr.bf16.vlgmr.msra.gmra.mrb[84].mxu1 %v25333_v14  ;;  %26448 = vmatpush3.bf16.msra.mxu0 %v30494_v11  ;;  %v30511_v11 = vld [vmem:[#allocation17 + $0x420] sm:$0xff]   ;;  %v30514_v14 = vld [vmem:[#allocation17 + $0x888] sm:$0xff]  }
 0xc7b   : > { %26286 = vmatpush3.bf16.msra.mxu1 %v30495_v20  ;;  %21885 = vmatprep.mubr.bf16.mxu1 %v25338_v40  ;;  %v30512_v20 = vld [vmem:[#allocation17 + $0x8c8] sm:$0xff]   ;;  %v30517_v40 = vld [vmem:[#allocation17 + $0x470] sm:$0xff]  }
 0xc7c   : > { %26449 = vmatprep.subr.bf16.mxu0 %v30496_v24  ;;  %26287 = vmatprep.subr.bf16.mxu1 %v30497_v29  ;;  %v30515_v24 = vld [vmem:[#allocation17 + $0x428] sm:$0xff]   ;;  %v30516_v29 = vld [vmem:[#allocation17 + $0x8d0] sm:$0xff]  }
 0xc7e   : > { %26450 = vmatpush3.bf16.msra.mxu0 %v30498_v15  ;;  %v30518_v15 = vld [vmem:[#allocation17 + $0x890] sm:$0xff]  }
 0xc7f   : > { %26288 = vmatpush3.bf16.msra.mxu1 %v30499_v21  ;;  %26451 = vmatprep.subr.bf16.mxu0 %v30500_v49  ;;  %v30519_v21 = vld [vmem:[#allocation17 + $0x430] sm:$0xff]   ;;  %v30520_v49 = vld [vmem:[#allocation17 + $0x8d8] sm:$0xff]  }
 0xc80   : > { %26289 = vmatprep.subr.bf16.mxu1 %v30501_v48  ;;  %v32455_v48 = vld [vmem:[#allocation15] ss:$0 sm:$0xff] }
 0xc82   : > { %26452 = vmatpush3.bf16.msra.mxu0 %v30502_v56  ;;  %v28371_v56 = vadd.f32 %v32455_v48, %v32327_v36  ;;  %v30527_v36 = vld [vmem:[#allocation17 + $0x500] sm:$0xff]  }
 0xc83   : > { %26290 = vmatpush3.bf16.msra.mxu1 %v30503_v33  ;;  %26453 = vmatprep.subr.bf16.mxu0 %v30504_v10  ;;  %v28377_v33 = vadd.f32 %v32455_v48, %v32338_v58  ;;  %v30522_v10 = vld [vmem:[#allocation17 + $0x898] sm:$0xff]  }
 0xc84   : > { %26291 = vmatprep.subr.bf16.mxu1 %v30505_v37  ;;  %v30524_v37 = vld [vmem:[#allocation17 + $0x8e0] sm:$0xff]  }
 0xc86   : > { %26454 = vmatpush3.bf16.msra.mxu0 %v30506_v41  ;;  %v16983_v41 = vmax.f32 %v28371_v56, 0.0  ;;  %v30539_v56 = vld [vmem:[#allocation17 + $0x518] sm:$0xff]  }
 0xc87   : > { %26292 = vmatpush3.bf16.msra.mxu1 %v30507_v53  ;;  %26483 = vmatprep.subr.bf16.mxu0 %v30508_v60  ;;  %v17003_v53 = vmax.f32 %v28377_v33, 0.0  ;;  %v30526_v60 = vld [vmem:[#allocation17 + $0x8a0] sm:$0xff]  }
 0xc88   : > { %26293 = vmatprep.subr.bf16.mxu1 %v30509_v1  ;;  %v25337_v5 = vpack.c.bf16 %v16983_v41, %v16983_v41  ;;  %v30528_v1 = vld [vmem:[#allocation17 + $0x8e8] sm:$0xff]  }
 0xc89   : > { %22166 = vmatmul.mubr.bf16.vlgmr.msra.gmra.mrb[148].mxu0 %v25351_v3  ;;  %v25342_v58 = vpack.c.bf16 %v17003_v53, %v17003_v53  ;;  %v30530_v3 = vld [vmem:[#allocation17 + $0x8a8] sm:$0xff]  }
 0xc8a   : > { %26484 = vmatpush3.bf16.msra.mxu0 %v30510_v22  ;;  %22245 = vmatprep.mubr.bf16.mxu0 %v25356_v35  ;;  %v30529_v22 = vld [vmem:[#allocation17 + $0x548] sm:$0xff]   ;;  %v30533_v35 = vld [vmem:[#allocation17 + $0x550] sm:$0xff]  }
 0xc8b   : > { %26294 = vmatpush3.bf16.msra.mxu1 %v30511_v11  ;;  %26485 = vmatprep.subr.bf16.mxu0 %v30512_v20  ;;  %v30531_v11 = vld [vmem:[#allocation17 + $0x508] sm:$0xff]   ;;  %v30532_v20 = vld [vmem:[#allocation17 + $0x8f0] sm:$0xff]  }
 0xc8c   : > { %26295 = vmatprep.subr.bf16.mxu1 %v30513_v44  ;;  %v30534_v44 = vld [vmem:[#allocation17 + $0x8b0] sm:$0xff]   ;;  %v30544_v41 = vld [vmem:[#allocation17 + $0x9c8] sm:$0xff]  }
 0xc8d   : > { %v30546_v53 = vld [vmem:[#allocation17 + $0x988] sm:$0xff]  }
 0xc8e   : > { %26486 = vmatpush3.bf16.msra.mxu0 %v30514_v14  ;;  %v28386_v14 = vadd.f32 %v32455_v48, %v32359_v38  ;;  %v30542_v38 = vld [vmem:[#allocation17 + $0x980] sm:$0xff]  }
 0xc8f   : > { %26296 = vmatpush3.bf16.msra.mxu1 %v30515_v24  ;;  %26487 = vmatprep.subr.bf16.mxu0 %v30516_v29  ;;  %v30535_v24 = vld [vmem:[#allocation17 + $0x510] sm:$0xff]   ;;  %v30536_v29 = vld [vmem:[#allocation17 + $0x8f8] sm:$0xff]  }
 0xc90   : > { %26297 = vmatprep.subr.bf16.mxu1 %v30517_v40  ;;  %v28392_v40 = vadd.f32 %v32455_v48, %v32375_v6 }
 0xc92   : > { %26488 = vmatpush3.bf16.msra.mxu0 %v30518_v15  ;;  %v30537_v15 = vld [vmem:[#allocation17 + $0x558] sm:$0xff]   ;;  %v17075_v33 = vmax.f32 %v28392_v40, 0.0 }
 0xc93   : > { %26298 = vmatpush3.bf16.msra.mxu1 %v30519_v21  ;;  %26489 = vmatprep.subr.bf16.mxu0 %v30520_v49  ;;  %v30538_v21 = vld [vmem:[#allocation17 + $0x8b8] sm:$0xff]   ;;  %v17055_v49 = vmax.f32 %v28386_v14, 0.0 }
 0xc94   : > { %26299 = vmatprep.subr.bf16.mxu1 %v30521_v32  ;;  %v30540_v32 = vld [vmem:[#allocation17 + $0x9c0] sm:$0xff]   ;;  %v25360_v6 = vpack.c.bf16 %v17075_v33, %v17075_v33  ;;  %v30554_v40 = vld [vmem:[#allocation17 + $0x998] sm:$0xff]  }
 0xc95   : > { %v30558_v33 = vld [vmem:[#allocation17 + $0x9a0] sm:$0xff]  }
 0xc96   : > { %26490 = vmatpush3.bf16.msra.mxu0 %v30522_v10  ;;  %v30541_v10 = vld [vmem:[#allocation17 + $0x560] sm:$0xff]  }
 0xc97   : > { %26300 = vmatpush3.bf16.msra.mxu1 %v30523_v12  ;;  %26491 = vmatprep.subr.bf16.mxu0 %v30524_v37  ;;  %v25355_v12 = vpack.c.bf16 %v17055_v49, %v17055_v49  ;;  %v30543_v37 = vld [vmem:[#allocation17 + $0x520] sm:$0xff]  }
 0xc98   : > { %26329 = vmatprep.subr.bf16.mxu1 %v30525_v45  ;;  %v30545_v45 = vld [vmem:[#allocation17 + $0x568] sm:$0xff]  }
 0xc9a   : > { %21886 = vmatmul.mubr.bf16.vlgmr.msra.gmra.mrb[88].mxu1 %v25337_v5  ;;  %26492 = vmatpush3.bf16.msra.mxu0 %v30526_v60  ;;  %v30547_v60 = vld [vmem:[#allocation17 + $0x528] sm:$0xff]   ;;  %v30549_v5 = vld [vmem:[#allocation17 + $0x570] sm:$0xff]  }
 0xc9b   : > { %26330 = vmatpush3.bf16.msra.mxu1 %v30527_v36  ;;  %21965 = vmatprep.mubr.bf16.mxu1 %v25342_v58  ;;  %v30548_v36 = vld [vmem:[#allocation17 + $0x9d0] sm:$0xff]  }
 0xc9c   : > { %26493 = vmatprep.subr.bf16.mxu0 %v30528_v1  ;;  %26331 = vmatprep.subr.bf16.mxu1 %v30529_v22  ;;  %v30550_v58 = vld [vmem:[#allocation17 + $0x990] sm:$0xff]  }
 0xc9e   : > { %26494 = vmatpush3.bf16.msra.mxu0 %v30530_v3 }
 0xc9f   : > { %26332 = vmatpush3.bf16.msra.mxu1 %v30531_v11  ;;  %26495 = vmatprep.subr.bf16.mxu0 %v30532_v20  ;;  %v30551_v20 = vld [vmem:[#allocation17 + $0x530] sm:$0xff]  }
 0xca0   : > { %26333 = vmatprep.subr.bf16.mxu1 %v30533_v35  ;;  %v30552_v35 = vld [vmem:[#allocation17 + $0x9d8] sm:$0xff]  }
 0xca2   : > { %26496 = vmatpush3.bf16.msra.mxu0 %v30534_v44  ;;  %v28375_v44 = vadd.f32 %v32455_v48, %v32334_v52  ;;  %v30559_v52 = vld [vmem:[#allocation17 + $0x600] sm:$0xff]  }
 0xca3   : > { %26334 = vmatpush3.bf16.msra.mxu1 %v30535_v24  ;;  %26497 = vmatprep.subr.bf16.mxu0 %v30536_v29  ;;  %v30553_v24 = vld [vmem:[#allocation17 + $0x578] sm:$0xff]   ;;  %v28381_v29 = vadd.f32 %v32455_v48, %v32349_v13 }
 0xca4   : > { %26335 = vmatprep.subr.bf16.mxu1 %v30537_v15  ;;  %v30555_v15 = vld [vmem:[#allocation17 + $0x538] sm:$0xff]   ;;  %v16999_v49 = vmax.f32 %v28375_v44, 0.0 }
 0xca5   : > { %v30569_v44 = vld [vmem:[#allocation17 + $0x658] sm:$0xff]  }
 0xca6   : > { %26498 = vmatpush3.bf16.msra.mxu0 %v30538_v21  ;;  %v30556_v21 = vld [vmem:[#allocation17 + $0x9e0] sm:$0xff]  }
 0xca7   : > { %26336 = vmatpush3.bf16.msra.mxu1 %v30539_v56  ;;  %26527 = vmatprep.subr.bf16.mxu0 %v30540_v32  ;;  %v30557_v56 = vld [vmem:[#allocation17 + $0x640] sm:$0xff]   ;;  %v17019_v32 = vmax.f32 %v28381_v29, 0.0  ;;  %v30571_v29 = vld [vmem:[#allocation17 + $0x618] sm:$0xff]  }
 0xca8   : > { %26337 = vmatprep.subr.bf16.mxu1 %v30541_v10  ;;  %v25341_v10 = vpack.c.bf16 %v16999_v49, %v16999_v49 }
 0xca9   : > { %22246 = vmatmul.mubr.bf16.vlgmr.msra.gmra.mrb[152].mxu0 %v25355_v12  ;;  %v30561_v12 = vld [vmem:[#allocation17 + $0x648] sm:$0xff]   ;;  %v25346_v13 = vpack.c.bf16 %v17019_v32, %v17019_v32 }
 0xcaa   : > { %26528 = vmatpush3.bf16.msra.mxu0 %v30542_v38  ;;  %22325 = vmatprep.mubr.bf16.mxu0 %v25360_v6  ;;  %v30560_v38 = vld [vmem:[#allocation17 + $0x9e8] sm:$0xff]   ;;  %v30564_v6 = vld [vmem:[#allocation17 + $0x9f0] sm:$0xff]  }
 0xcab   : > { %26338 = vmatpush3.bf16.msra.mxu1 %v30543_v37  ;;  %26529 = vmatprep.subr.bf16.mxu0 %v30544_v41  ;;  %v30562_v37 = vld [vmem:[#allocation17 + $0x9a8] sm:$0xff]  }
 0xcac   : > { %26339 = vmatprep.subr.bf16.mxu1 %v30545_v45  ;;  %v30563_v41 = vld [vmem:[#allocation17 + $0x608] sm:$0xff]  }
 0xcad   : > { %v26125_v1 = vpop.f32.mrb[64].mxu1  ;;  %v30576_v32 = vld [vmem:[#allocation17 + $0xac8] sm:$0xff]  }
 0xcae   : > { %26530 = vmatpush3.bf16.msra.mxu0 %v30546_v53  ;;  %v26126_v22 = vpop.f32.mrb[65].mxu1  ;;  %v30565_v53 = vld [vmem:[#allocation17 + $0x650] sm:$0xff]  }
 0xcaf   : > { %v32465_v3 = vadd.f32 %v26126_v22, %v26125_v1  ;;  %26340 = vmatpush3.bf16.msra.mxu1 %v30547_v60  ;;  %v26128_v11 = vpop.f32.mrb[66].mxu1  ;;  %26531 = vmatprep.subr.bf16.mxu0 %v30548_v36  ;;  %v30566_v1 = vld [vmem:[#allocation17 + $0x9b0] sm:$0xff]   ;;  %v28390_v22 = vadd.f32 %v32455_v48, %v32371_v61  ;;  %v30573_v61 = vld [vmem:[#allocation17 + $0x660] sm:$0xff]  }
 0xcb0   : > { %v26129_v14 = vpop.f32.mrb[67].mxu1  ;;  %26341 = vmatprep.subr.bf16.mxu1 %v30549_v5  ;;  %v30567_v11 = vld [vmem:[#allocation17 + $0x610] sm:$0xff]  }
 0xcb1   : > { %v30570_v14 = vld [vmem:[#allocation17 + $0x9b8] sm:$0xff]  }
 0xcb2   : > { %26532 = vmatpush3.bf16.msra.mxu0 %v30550_v58 }
 0xcb3   : > { %26342 = vmatpush3.bf16.msra.mxu1 %v30551_v20  ;;  %26533 = vmatprep.subr.bf16.mxu0 %v30552_v35  ;;  %v30568_v20 = vld [vmem:[#allocation17 + $0x9f8] sm:$0xff]   ;;  %v28396_v35 = vadd.f32 %v32455_v48, %v32387_v28 }
 0xcb4   : > { %26343 = vmatprep.subr.bf16.mxu1 %v30553_v24  ;;  %v17071_v24 = vmax.f32 %v28390_v22, 0.0  ;;  %v28379_v22 = vadd.f32 %v32455_v48, %v32345_v9  ;;  %v30590_v9 = vld [vmem:[#allocation17 + $0xaa0] sm:$0xff]  }
 0xcb6   : > { %26534 = vmatpush3.bf16.msra.mxu0 %v30554_v40  ;;  %v30572_v40 = vld [vmem:[#allocation17 + $0xac0] sm:$0xff]   ;;  %v25359_v49 = vpack.c.bf16 %v17071_v24, %v17071_v24  ;;  %v17015_v24 = vmax.f32 %v28379_v22, 0.0  ;;  %v30603_v22 = vld [vmem:[#allocation17 + $0x718] sm:$0xff]  }
 0xcb7   : > { %26344 = vmatpush3.bf16.msra.mxu1 %v30555_v15  ;;  %26535 = vmatprep.subr.bf16.mxu0 %v30556_v21  ;;  %v17091_v15 = vmax.f32 %v28396_v35, 0.0  ;;  %v30574_v21 = vld [vmem:[#allocation17 + $0xa80] sm:$0xff]  }
 0xcb8   : > { %26373 = vmatprep.subr.bf16.mxu1 %v30557_v56  ;;  %v30575_v56 = vld [vmem:[#allocation17 + $0x620] sm:$0xff]  }
 0xcb9   : > { %v25364_v28 = vpack.c.bf16 %v17091_v15, %v17091_v15  ;;  %v30591_v15 = vld [vmem:[#allocation17 + $0x700] sm:$0xff]  }
 0xcba   : > { %21966 = vmatmul.mubr.bf16.vlgmr.msra.gmra.mrb[92].mxu1 %v25341_v10  ;;  %26536 = vmatpush3.bf16.msra.mxu0 %v30558_v33  ;;  %v30577_v33 = vld [vmem:[#allocation17 + $0x668] sm:$0xff]  }
 0xcbb   : > { %26374 = vmatpush3.bf16.msra.mxu1 %v30559_v52  ;;  %22045 = vmatprep.mubr.bf16.mxu1 %v25346_v13  ;;  %v30578_v52 = vld [vmem:[#allocation17 + $0xa88] sm:$0xff]   ;;  %v30581_v13 = vld [vmem:[#allocation17 + $0x670] sm:$0xff]  }
 0xcbc   : > { %v26235_v45 = vpop.f32.mrb[128].mxu0  ;;  %26537 = vmatprep.subr.bf16.mxu0 %v30560_v38  ;;  %26375 = vmatprep.subr.bf16.mxu1 %v30561_v12  ;;  %v30579_v10 = vld [vmem:[#allocation17 + $0x628] sm:$0xff]   ;;  %v30580_v38 = vld [vmem:[#allocation17 + $0xad0] sm:$0xff]   ;;  %v24267_v12 = vld [vmem:[#allocation18] ss:$0 sm:$0xff] }
 0xcbd   : > { %v26236_v60 = vpop.f32.mrb[129].mxu0 }
 0xcbe   : > { %v32471_v36 = vadd.f32 %v26236_v60, %v26235_v45  ;;  %26538 = vmatpush3.bf16.msra.mxu0 %v30562_v37  ;;  %v26238_v5 = vpop.f32.mrb[130].mxu0  ;;  %v21568_v45 = vadd.f32 %v32465_v3, %v24267_v12  ;;  %v30587_v3 = vld [vmem:[#allocation17 + $0x638] sm:$0xff]  }
 0xcbf   : > { %26376 = vmatpush3.bf16.msra.mxu1 %v30563_v41  ;;  %v26239_v58 = vpop.f32.mrb[131].mxu0  ;;  %26539 = vmatprep.subr.bf16.mxu0 %v30564_v6  ;;  %v30582_v6 = vld [vmem:[#allocation17 + $0xa90] sm:$0xff]  }
 0xcc0   : > { %26377 = vmatprep.subr.bf16.mxu1 %v30565_v53  ;;  %v30583_v5 = vld [vmem:[#allocation17 + $0x630] sm:$0xff]  }
 0xcc2   : > { %26540 = vmatpush3.bf16.msra.mxu0 %v30566_v1  ;;  %v30584_v1 = vld [vmem:[#allocation17 + $0xad8] sm:$0xff]  }
 0xcc3   : > { %26378 = vmatpush3.bf16.msra.mxu1 %v30567_v11  ;;  %26541 = vmatprep.subr.bf16.mxu0 %v30568_v20  ;;  %v30585_v11 = vld [vmem:[#allocation17 + $0x678] sm:$0xff]   ;;  %v28385_v20 = vadd.f32 %v32455_v48, %v32357_v30  ;;  %v30592_v30 = vld [vmem:[#allocation17 + $0xae8] sm:$0xff]  }
 0xcc4   : > { %26379 = vmatprep.subr.bf16.mxu1 %v30569_v44  ;;  %v30586_v44 = vld [vmem:[#allocation17 + $0xa98] sm:$0xff]  }
 0xcc6   : > { %26542 = vmatpush3.bf16.msra.mxu0 %v30570_v14  ;;  %v30588_v14 = vld [vmem:[#allocation17 + $0xae0] sm:$0xff]  }
 0xcc7   : > { %26380 = vmatpush3.bf16.msra.mxu1 %v30571_v29  ;;  %26571 = vmatprep.subr.bf16.mxu0 %v30572_v40  ;;  %v30589_v29 = vld [vmem:[#allocation17 + $0x740] sm:$0xff]   ;;  %v17035_v40 = vmax.f32 %v28385_v20, 0.0 }
 0xcc8   : > { %26381 = vmatprep.subr.bf16.mxu1 %v30573_v61  ;;  %v25345_v61 = vpack.c.bf16 %v17015_v24, %v17015_v24  ;;  %v30606_v20 = vld [vmem:[#allocation17 + $0xb80] sm:$0xff]   ;;  %v30609_v24 = vld [vmem:[#allocation17 + $0x768] sm:$0xff]  }
 0xcc9   : > { %22326 = vmatmul.mubr.bf16.vlgmr.msra.gmra.mrb[156].mxu0 %v25359_v49  ;;  %v25350_v49 = vpack.c.bf16 %v17035_v40, %v17035_v40  ;;  %v30611_v40 = vld [vmem:[#allocation17 + $0x728] sm:$0xff]  }
 0xcca   : > { %26572 = vmatpush3.bf16.msra.mxu0 %v30574_v21  ;;  %22405 = vmatprep.mubr.bf16.mxu0 %v25364_v28  ;;  %v30593_v21 = vld [vmem:[#allocation17 + $0x748] sm:$0xff]   ;;  %v30596_v28 = vld [vmem:[#allocation17 + $0xaf0] sm:$0xff]  }
 0xccb   : > { %26382 = vmatpush3.bf16.msra.mxu1 %v30575_v56  ;;  %26573 = vmatprep.subr.bf16.mxu0 %v30576_v32  ;;  %v30594_v56 = vld [vmem:[#allocation17 + $0xaa8] sm:$0xff]  }
 0xccc   : > { %26383 = vmatprep.subr.bf16.mxu1 %v30577_v33  ;;  %v30595_v32 = vld [vmem:[#allocation17 + $0x708] sm:$0xff]  }
 0xccd   : > { %v26147_v37 = vpop.f32.mrb[68].mxu1 }
 0xcce   : > { %v26148_v41 = vpop.f32.mrb[69].mxu1  ;;  %26574 = vmatpush3.bf16.msra.mxu0 %v30578_v52  ;;  %v30597_v52 = vld [vmem:[#allocation17 + $0x750] sm:$0xff]  }
 0xccf   : > { %v26149_v53 = vadd.f32 %v26148_v41, %v26147_v37  ;;  %v26150_v60 = vpop.f32.mrb[70].mxu1  ;;  %26384 = vmatpush3.bf16.msra.mxu1 %v30579_v10  ;;  %26575 = vmatprep.subr.bf16.mxu0 %v30580_v38  ;;  %v28394_v37 = vadd.f32 %v32455_v48, %v32381_v18  ;;  %v30605_v18 = vld [vmem:[#allocation17 + $0x760] sm:$0xff]  }
 0xcd0   : > { %v26151_v58 = vpop.f32.mrb[71].mxu1  ;;  %26385 = vmatprep.subr.bf16.mxu1 %v30581_v13  ;;  %v30598_v13 = vld [vmem:[#allocation17 + $0xab0] sm:$0xff]   ;;  %v30601_v60 = vld [vmem:[#allocation17 + $0x758] sm:$0xff]  }
 0xcd1   : > { %v32482_v35 = vadd.f32 %v26149_v53, %v21568_v45  ;;  %v30600_v45 = vld [vmem:[#allocation17 + $0xaf8] sm:$0xff]   ;;  %v28400_v53 = vadd.f32 %v32455_v48, %v32395_v54  ;;  %v30604_v58 = vld [vmem:[#allocation17 + $0xbc0] sm:$0xff]  }
 0xcd2   : > { %26576 = vmatpush3.bf16.msra.mxu0 %v30582_v6  ;;  %v30599_v6 = vld [vmem:[#allocation17 + $0x710] sm:$0xff]  }
 0xcd3   : > { %26386 = vmatpush3.bf16.msra.mxu1 %v30583_v5  ;;  %26577 = vmatprep.subr.bf16.mxu0 %v30584_v1  ;;  %v30602_v5 = vld [vmem:[#allocation17 + $0xab8] sm:$0xff]   ;;  %v17087_v1 = vmax.f32 %v28394_v37, 0.0 }
 0xcd4   : > { %26387 = vmatprep.subr.bf16.mxu1 %v30585_v11  ;;  %v17107_v11 = vmax.f32 %v28400_v53, 0.0  ;;  %v30618_v37 = vld [vmem:[#allocation17 + $0xb98] sm:$0xff]   ;;  %v30621_v53 = vld [vmem:[#allocation17 + $0x840] sm:$0xff]  }
 0xcd6   : > { %26578 = vmatpush3.bf16.msra.mxu0 %v30586_v44  ;;  %v25363_v44 = vpack.c.bf16 %v17087_v1, %v17087_v1  ;;  %v25368_v54 = vpack.c.bf16 %v17107_v11, %v17107_v11  ;;  %v30627_v11 = vld [vmem:[#allocation17 + $0x808] sm:$0xff]  }
 0xcd7   : > { %26388 = vmatpush3.bf16.msra.mxu1 %v30587_v3  ;;  %26579 = vmatprep.subr.bf16.mxu0 %v30588_v14  ;;  %v30607_v3 = vld [vmem:[#allocation17 + $0x720] sm:$0xff]   ;;  %v30608_v14 = vld [vmem:[#allocation17 + $0xbc8] sm:$0xff]  }
 0xcd8   : > { %26417 = vmatprep.subr.bf16.mxu1 %v30589_v29  ;;  %v30610_v29 = vld [vmem:[#allocation17 + $0xb88] sm:$0xff]  }
 0xcda   : > { %22046 = vmatmul.mubr.bf16.vlgmr.msra.gmra.mrb[96].mxu1 %v25345_v61  ;;  %26580 = vmatpush3.bf16.msra.mxu0 %v30590_v9  ;;  %v30612_v9 = vld [vmem:[#allocation17 + $0xbd0] sm:$0xff]  }
 0xcdb   : > { %26418 = vmatpush3.bf16.msra.mxu1 %v30591_v15  ;;  %22125 = vmatprep.mubr.bf16.mxu1 %v25350_v49  ;;  %v30613_v15 = vld [vmem:[#allocation17 + $0x770] sm:$0xff]  }
 0xcdc   : > { %v26279_v33 = vpop.f32.mrb[132].mxu0  ;;  %26581 = vmatprep.subr.bf16.mxu0 %v30592_v30  ;;  %26419 = vmatprep.subr.bf16.mxu1 %v30593_v21  ;;  %v30614_v21 = vld [vmem:[#allocation17 + $0xb90] sm:$0xff]  }
 0xcdd   : > { %v26280_v10 = vpop.f32.mrb[133].mxu0 }
 0xcde   : > { %v32484_v38 = vadd.f32 %v26280_v10, %v26279_v33  ;;  %v26282_v12 = vpop.f32.mrb[134].mxu0  ;;  %26582 = vmatpush3.bf16.msra.mxu0 %v30594_v56  ;;  %v28383_v33 = vadd.f32 %v32455_v48, %v32353_v27  ;;  %v30617_v10 = vld [vmem:[#allocation17 + $0x778] sm:$0xff]   ;;  %v30622_v27 = vld [vmem:[#allocation17 + $0xba0] sm:$0xff]  }
 0xcdf   : > { %v26283_v41 = vpop.f32.mrb[135].mxu0  ;;  %26420 = vmatpush3.bf16.msra.mxu1 %v30595_v32  ;;  %26583 = vmatprep.subr.bf16.mxu0 %v30596_v28  ;;  %v30615_v32 = vld [vmem:[#allocation17 + $0x730] sm:$0xff]   ;;  %v30616_v28 = vld [vmem:[#allocation17 + $0xbd8] sm:$0xff]   ;;  %v28389_v12 = vadd.f32 %v32455_v48, %v32369_v47  ;;  %v30624_v47 = vld [vmem:[#allocation17 + $0xbe8] sm:$0xff]  }
 0xce0   : > { %26421 = vmatprep.subr.bf16.mxu1 %v30597_v52  ;;  %v30619_v41 = vld [vmem:[#allocation17 + $0x738] sm:$0xff]  }
 0xce2   : > { %26584 = vmatpush3.bf16.msra.mxu0 %v30598_v13 }
 0xce3   : > { %26422 = vmatpush3.bf16.msra.mxu1 %v30599_v6  ;;  %26585 = vmatprep.subr.bf16.mxu0 %v30600_v45  ;;  %v30620_v6 = vld [vmem:[#allocation17 + $0xbe0] sm:$0xff]   ;;  %v17031_v45 = vmax.f32 %v28383_v33, 0.0 }
 0xce4   : > { %26423 = vmatprep.subr.bf16.mxu1 %v30601_v60  ;;  %v17051_v60 = vmax.f32 %v28389_v12, 0.0  ;;  %v30638_v33 = vld [vmem:[#allocation17 + $0xc80] sm:$0xff]   ;;  %v30640_v12 = vld [vmem:[#allocation17 + $0xcc8] sm:$0xff]  }
 0xce5   : > { %v25349_v1 = vpack.c.bf16 %v17031_v45, %v17031_v45  ;;  %v30644_v45 = vld [vmem:[#allocation17 + $0xcd0] sm:$0xff]  }
 0xce6   : > { %26586 = vmatpush3.bf16.msra.mxu0 %v30602_v5  ;;  %v30623_v5 = vld [vmem:[#allocation17 + $0x800] sm:$0xff]  }
 0xce7   : > { %26424 = vmatpush3.bf16.msra.mxu1 %v30603_v22  ;;  %26615 = vmatprep.subr.bf16.mxu0 %v30604_v58  ;;  %v25354_v22 = vpack.c.bf16 %v17051_v60, %v17051_v60  ;;  %v30626_v58 = vld [vmem:[#allocation17 + $0xba8] sm:$0xff]  }
 0xce8   : > { %26425 = vmatprep.subr.bf16.mxu1 %v30605_v18  ;;  %v30628_v18 = vld [vmem:[#allocation17 + $0xbf0] sm:$0xff]  }
 0xce9   : > { %22406 = vmatmul.mubr.bf16.vlgmr.msra.gmra.mrb[160].mxu0 %v25363_v44  ;;  %v30629_v44 = vld [vmem:[#allocation17 + $0x850] sm:$0xff]  }
 0xcea   : > { %26616 = vmatpush3.bf16.msra.mxu0 %v30606_v20  ;;  %22485 = vmatprep.mubr.bf16.mxu0 %v25368_v54 }
 0xceb   : > { %26426 = vmatpush3.bf16.msra.mxu1 %v30607_v3  ;;  %26617 = vmatprep.subr.bf16.mxu0 %v30608_v14 }
 0xcec   : > { %26427 = vmatprep.subr.bf16.mxu1 %v30609_v24  ;;  %v30630_v24 = vld [vmem:[#allocation17 + $0xbb0] sm:$0xff]  }
 0xced   : > { %v26169_v61 = vpop.f32.mrb[72].mxu1 }
 0xcee   : > { %v26170_v30 = vpop.f32.mrb[73].mxu1  ;;  %26618 = vmatpush3.bf16.msra.mxu0 %v30610_v29  ;;  %v28398_v29 = vadd.f32 %v32455_v48, %v32391_v42  ;;  %v30637_v42 = vld [vmem:[#allocation17 + $0x860] sm:$0xff]  }
 0xcef   : > { %v26171_v49 = vadd.f32 %v26170_v30, %v26169_v61  ;;  %v26172_v56 = vpop.f32.mrb[74].mxu1  ;;  %26428 = vmatpush3.bf16.msra.mxu1 %v30611_v40  ;;  %26619 = vmatprep.subr.bf16.mxu0 %v30612_v9  ;;  %v30631_v9 = vld [vmem:[#allocation17 + $0x810] sm:$0xff]   ;;  %v28404_v61 = vadd.f32 %v32455_v48, %v32407_v17  ;;  %v30633_v30 = vld [vmem:[#allocation17 + $0x858] sm:$0xff]  }
 0xcf0   : > { %v26173_v52 = vpop.f32.mrb[75].mxu1  ;;  %26429 = vmatprep.subr.bf16.mxu1 %v30613_v15  ;;  %v30632_v15 = vld [vmem:[#allocation17 + $0xbf8] sm:$0xff]  }
 0xcf1   : > { %v32495_v13 = vadd.f32 %v26171_v49, %v32482_v35  ;;  %v30625_v35 = vld [vmem:[#allocation17 + $0x848] sm:$0xff]   ;;  %v17103_v49 = vmax.f32 %v28398_v29, 0.0  ;;  %v30635_v56 = vld [vmem:[#allocation17 + $0x818] sm:$0xff]  }
 0xcf2   : > { %26620 = vmatpush3.bf16.msra.mxu0 %v30614_v21  ;;  %v30634_v21 = vld [vmem:[#allocation17 + $0xbb8] sm:$0xff]  }
 0xcf3   : > { %26430 = vmatpush3.bf16.msra.mxu1 %v30615_v32  ;;  %26621 = vmatprep.subr.bf16.mxu0 %v30616_v28  ;;  %v30636_v32 = vld [vmem:[#allocation17 + $0xcc0] sm:$0xff]   ;;  %v17123_v28 = vmax.f32 %v28404_v61, 0.0  ;;  %v25367_v52 = vpack.c.bf16 %v17103_v49, %v17103_v49  ;;  %v30659_v49 = vld [vmem:[#allocation17 + $0x908] sm:$0xff]  }
 0xcf4   : > { %26431 = vmatprep.subr.bf16.mxu1 %v30617_v10  ;;  %v30639_v10 = vld [vmem:[#allocation17 + $0x820] sm:$0xff]  }
 0xcf5   : > { %v25372_v17 = vpack.c.bf16 %v17123_v28, %v17123_v28  ;;  %v30661_v28 = vld [vmem:[#allocation17 + $0x950] sm:$0xff]  }
 0xcf6   : > { %26622 = vmatpush3.bf16.msra.mxu0 %v30618_v37  ;;  %v30641_v37 = vld [vmem:[#allocation17 + $0x868] sm:$0xff]  }
 0xcf7   : > { %26432 = vmatpush3.bf16.msra.mxu1 %v30619_v41  ;;  %26623 = vmatprep.subr.bf16.mxu0 %v30620_v6  ;;  %v30642_v41 = vld [vmem:[#allocation17 + $0xc88] sm:$0xff]  }
 0xcf8   : > { %26461 = vmatprep.subr.bf16.mxu1 %v30621_v53  ;;  %v30643_v6 = vld [vmem:[#allocation17 + $0x828] sm:$0xff]   ;;  %v30645_v53 = vld [vmem:[#allocation17 + $0x870] sm:$0xff]  }
 0xcfa   : > { %22126 = vmatmul.mubr.bf16.vlgmr.msra.gmra.mrb[100].mxu1 %v25349_v1  ;;  %26624 = vmatpush3.bf16.msra.mxu0 %v30622_v27 }
 0xcfb   : > { %26462 = vmatpush3.bf16.msra.mxu1 %v30623_v5  ;;  %22205 = vmatprep.mubr.bf16.mxu1 %v25354_v22  ;;  %v30646_v5 = vld [vmem:[#allocation17 + $0xc90] sm:$0xff]   ;;  %v30648_v22 = vld [vmem:[#allocation17 + $0xcd8] sm:$0xff]  }
 0xcfc   : > { %v26323_v20 = vpop.f32.mrb[136].mxu0  ;;  %26625 = vmatprep.subr.bf16.mxu0 %v30624_v47  ;;  %26463 = vmatprep.subr.bf16.mxu1 %v30625_v35  ;;  %v30647_v35 = vld [vmem:[#allocation17 + $0x830] sm:$0xff]  }
 0xcfd   : > { %v26324_v3 = vpop.f32.mrb[137].mxu0 }
 0xcfe   : > { %v32497_v14 = vadd.f32 %v26324_v3, %v26323_v20  ;;  %v26326_v54 = vpop.f32.mrb[138].mxu0  ;;  %26626 = vmatpush3.bf16.msra.mxu0 %v30626_v58  ;;  %v28387_v58 = vadd.f32 %v32455_v48, %v32363_v43  ;;  %v28393_v20 = vadd.f32 %v32455_v48, %v32377_v7  ;;  %v30650_v3 = vld [vmem:[#allocation17 + $0xc98] sm:$0xff]   ;;  %v30654_v43 = vld [vmem:[#allocation17 + $0xca0] sm:$0xff]   ;;  %v30656_v7 = vld [vmem:[#allocation17 + $0xce8] sm:$0xff]  }
 0xcff   : > { %v26327_v40 = vpop.f32.mrb[139].mxu0  ;;  %26464 = vmatpush3.bf16.msra.mxu1 %v30627_v11  ;;  %26627 = vmatprep.subr.bf16.mxu0 %v30628_v18  ;;  %v30649_v18 = vld [vmem:[#allocation17 + $0x878] sm:$0xff]  }
 0xd00   : > { %26465 = vmatprep.subr.bf16.mxu1 %v30629_v44  ;;  %v30651_v54 = vld [vmem:[#allocation17 + $0x838] sm:$0xff]   ;;  %v17047_v29 = vmax.f32 %v28387_v58, 0.0  ;;  %v30653_v40 = vld [vmem:[#allocation17 + $0x940] sm:$0xff]   ;;  %v30672_v58 = vld [vmem:[#allocation17 + $0xdc8] sm:$0xff]  }
 0xd02   : > { %26628 = vmatpush3.bf16.msra.mxu0 %v30630_v24  ;;  %v30652_v24 = vld [vmem:[#allocation17 + $0xce0] sm:$0xff]   ;;  %v25353_v61 = vpack.c.bf16 %v17047_v29, %v17047_v29 }
 0xd03   : > { %26466 = vmatpush3.bf16.msra.mxu1 %v30631_v9  ;;  %26629 = vmatprep.subr.bf16.mxu0 %v30632_v15  ;;  %v17067_v9 = vmax.f32 %v28393_v20, 0.0  ;;  %v30655_v15 = vld [vmem:[#allocation17 + $0x900] sm:$0xff]   ;;  %v30675_v20 = vld [vmem:[#allocation17 + $0x928] sm:$0xff]  }
 0xd04   : > { %26467 = vmatprep.subr.bf16.mxu1 %v30633_v30 }
 0xd05   : > { %v25358_v30 = vpack.c.bf16 %v17067_v9, %v17067_v9 }
 0xd06   : > { %26630 = vmatpush3.bf16.msra.mxu0 %v30634_v21  ;;  %v30658_v21 = vld [vmem:[#allocation17 + $0xca8] sm:$0xff]  }
 0xd07   : > { %26468 = vmatpush3.bf16.msra.mxu1 %v30635_v56  ;;  %26659 = vmatprep.subr.bf16.mxu0 %v30636_v32  ;;  %v30660_v56 = vld [vmem:[#allocation17 + $0xcf0] sm:$0xff]  }
 0xd08   : > { %26469 = vmatprep.subr.bf16.mxu1 %v30637_v42 }
 0xd09   : > { %22486 = vmatmul.mubr.bf16.vlgmr.msra.gmra.mrb[164].mxu0 %v25367_v52 }
 0xd0a   : > { %26660 = vmatpush3.bf16.msra.mxu0 %v30638_v33  ;;  %22565 = vmatprep.mubr.bf16.mxu0 %v25372_v17 }
 0xd0b   : > { %26470 = vmatpush3.bf16.msra.mxu1 %v30639_v10  ;;  %26661 = vmatprep.subr.bf16.mxu0 %v30640_v12  ;;  %v30662_v10 = vld [vmem:[#allocation17 + $0xcb0] sm:$0xff]   ;;  %v28402_v12 = vadd.f32 %v32455_v48, %v32399_v2  ;;  %v30669_v2 = vld [vmem:[#allocation17 + $0x960] sm:$0xff]  }
 0xd0c   : > { %26471 = vmatprep.subr.bf16.mxu1 %v30641_v37  ;;  %v30663_v37 = vld [vmem:[#allocation17 + $0x910] sm:$0xff]  }
 0xd0d   : > { %v26191_v60 = vpop.f32.mrb[76].mxu1 }
 0xd0e   : > { %v26192_v27 = vpop.f32.mrb[77].mxu1  ;;  %26662 = vmatpush3.bf16.msra.mxu0 %v30642_v41  ;;  %v30664_v41 = vld [vmem:[#allocation17 + $0xcf8] sm:$0xff]  }
 0xd0f   : > { %v26193_v1 = vadd.f32 %v26192_v27, %v26191_v60  ;;  %v26194_v47 = vpop.f32.mrb[78].mxu1  ;;  %26472 = vmatpush3.bf16.msra.mxu1 %v30643_v6  ;;  %26663 = vmatprep.subr.bf16.mxu0 %v30644_v45  ;;  %v28408_v6 = vadd.f32 %v32455_v48, %v32415_v46  ;;  %v30665_v45 = vld [vmem:[#allocation17 + $0x958] sm:$0xff]   ;;  %v17119_v60 = vmax.f32 %v28402_v12, 0.0  ;;  %v30686_v12 = vld [vmem:[#allocation17 + $0xda0] sm:$0xff]  }
 0xd10   : > { %v26195_v11 = vpop.f32.mrb[79].mxu1  ;;  %26473 = vmatprep.subr.bf16.mxu1 %v30645_v53  ;;  %v30666_v53 = vld [vmem:[#allocation17 + $0xcb8] sm:$0xff]   ;;  %v30670_v47 = vld [vmem:[#allocation17 + $0xd80] sm:$0xff]  }
 0xd11   : > { %v32508_v44 = vadd.f32 %v26193_v1, %v32495_v13  ;;  %v30657_v13 = vld [vmem:[#allocation17 + $0x948] sm:$0xff]   ;;  %v30667_v27 = vld [vmem:[#allocation17 + $0x918] sm:$0xff]   ;;  %v17139_v1 = vmax.f32 %v28408_v6, 0.0 }
 0xd12   : > { %26664 = vmatpush3.bf16.msra.mxu0 %v30646_v5  ;;  %v30668_v5 = vld [vmem:[#allocation17 + $0xdc0] sm:$0xff]   ;;  %v30673_v11 = vld [vmem:[#allocation17 + $0x968] sm:$0xff]  }
 0xd13   : > { %26474 = vmatpush3.bf16.msra.mxu1 %v30647_v35  ;;  %26665 = vmatprep.subr.bf16.mxu0 %v30648_v22  ;;  %v25371_v35 = vpack.c.bf16 %v17119_v60, %v17119_v60  ;;  %v30671_v22 = vld [vmem:[#allocation17 + $0x920] sm:$0xff]   ;;  %v25376_v46 = vpack.c.bf16 %v17139_v1, %v17139_v1  ;;  %v30690_v6 = vld [vmem:[#allocation17 + $0xda8] sm:$0xff]   ;;  %v30693_v60 = vld [vmem:[#allocation17 + $0xa50] sm:$0xff]  }
 0xd14   : > { %26475 = vmatprep.subr.bf16.mxu1 %v30649_v18  ;;  %v30674_v18 = vld [vmem:[#allocation17 + $0xd88] sm:$0xff]  }
 0xd16   : > { %26666 = vmatpush3.bf16.msra.mxu0 %v30650_v3  ;;  %v30676_v3 = vld [vmem:[#allocation17 + $0xdd0] sm:$0xff]  }
 0xd17   : > { %26476 = vmatpush3.bf16.msra.mxu1 %v30651_v54  ;;  %26667 = vmatprep.subr.bf16.mxu0 %v30652_v24  ;;  %v30677_v54 = vld [vmem:[#allocation17 + $0x970] sm:$0xff]  }
 0xd18   : > { %26505 = vmatprep.subr.bf16.mxu1 %v30653_v40  ;;  %v30678_v40 = vld [vmem:[#allocation17 + $0xd90] sm:$0xff]  }
 0xd1a   : > { %22206 = vmatmul.mubr.bf16.vlgmr.msra.gmra.mrb[104].mxu1 %v25353_v61  ;;  %26668 = vmatpush3.bf16.msra.mxu0 %v30654_v43  ;;  %v30680_v61 = vld [vmem:[#allocation17 + $0xdd8] sm:$0xff]  }
 0xd1b   : > { %26506 = vmatpush3.bf16.msra.mxu1 %v30655_v15  ;;  %22285 = vmatprep.mubr.bf16.mxu1 %v25358_v30  ;;  %v30679_v15 = vld [vmem:[#allocation17 + $0x930] sm:$0xff]   ;;  %v30681_v30 = vld [vmem:[#allocation17 + $0x978] sm:$0xff]  }
 0xd1c   : > { %v26367_v32 = vpop.f32.mrb[140].mxu0  ;;  %26669 = vmatprep.subr.bf16.mxu0 %v30656_v7  ;;  %26507 = vmatprep.subr.bf16.mxu1 %v30657_v13  ;;  %v28391_v7 = vadd.f32 %v32455_v48, %v32373_v0  ;;  %v30685_v0 = vld [vmem:[#allocation17 + $0xa40] sm:$0xff]  }
 0xd1d   : > { %v26368_v42 = vpop.f32.mrb[141].mxu0 }
 0xd1e   : > { %v32510_v33 = vadd.f32 %v26368_v42, %v26367_v32  ;;  %v26370_v52 = vpop.f32.mrb[142].mxu0  ;;  %26670 = vmatpush3.bf16.msra.mxu0 %v30658_v21  ;;  %v28397_v21 = vadd.f32 %v32455_v48, %v32389_v31  ;;  %v30683_v32 = vld [vmem:[#allocation17 + $0x938] sm:$0xff]   ;;  %v30687_v31 = vld [vmem:[#allocation17 + $0xa00] sm:$0xff]  }
 0xd1f   : > { %v26371_v17 = vpop.f32.mrb[143].mxu0  ;;  %26508 = vmatpush3.bf16.msra.mxu1 %v30659_v49  ;;  %26671 = vmatprep.subr.bf16.mxu0 %v30660_v56  ;;  %v30682_v56 = vld [vmem:[#allocation17 + $0xd98] sm:$0xff]   ;;  %v17063_v52 = vmax.f32 %v28391_v7, 0.0  ;;  %v30708_v7 = vld [vmem:[#allocation17 + $0xed0] sm:$0xff]  }
 0xd20   : > { %26509 = vmatprep.subr.bf16.mxu1 %v30661_v28  ;;  %v30684_v28 = vld [vmem:[#allocation17 + $0xde0] sm:$0xff]  }
 0xd21   : > { %v25357_v17 = vpack.c.bf16 %v17063_v52, %v17063_v52  ;;  %v30712_v52 = vld [vmem:[#allocation17 + $0xed8] sm:$0xff]  }
 0xd22   : > { %26672 = vmatpush3.bf16.msra.mxu0 %v30662_v10  ;;  %v17083_v10 = vmax.f32 %v28397_v21, 0.0 }
 0xd23   : > { %26510 = vmatpush3.bf16.msra.mxu1 %v30663_v37  ;;  %26673 = vmatprep.subr.bf16.mxu0 %v30664_v41  ;;  %v30689_v37 = vld [vmem:[#allocation17 + $0xa48] sm:$0xff]  }
 0xd24   : > { %26511 = vmatprep.subr.bf16.mxu1 %v30665_v45  ;;  %v25362_v41 = vpack.c.bf16 %v17083_v10, %v17083_v10  ;;  %v30692_v45 = vld [vmem:[#allocation17 + $0xdf0] sm:$0xff]  }
 0xd26   : > { %26674 = vmatpush3.bf16.msra.mxu0 %v30666_v53 }
 0xd27   : > { %26512 = vmatpush3.bf16.msra.mxu1 %v30667_v27  ;;  %26703 = vmatprep.subr.bf16.mxu0 %v30668_v5 }
 0xd28   : > { %26513 = vmatprep.subr.bf16.mxu1 %v30669_v2  ;;  %v30694_v2 = vld [vmem:[#allocation17 + $0xdb0] sm:$0xff]  }
 0xd29   : > { %22566 = vmatmul.mubr.bf16.vlgmr.msra.gmra.mrb[168].mxu0 %v25371_v35 }
 0xd2a   : > { %26704 = vmatpush3.bf16.msra.mxu0 %v30670_v47  ;;  %22645 = vmatprep.mubr.bf16.mxu0 %v25376_v46  ;;  %v28406_v47 = vadd.f32 %v32455_v48, %v32411_v34  ;;  %v28412_v46 = vadd.f32 %v32455_v48, %v32427_v23  ;;  %v30701_v34 = vld [vmem:[#allocation17 + $0xa60] sm:$0xff]   ;;  %v30705_v48 = vld [vmem:[#allocation17 + $0xa68] sm:$0xff]  }
 0xd2b   : > { %26514 = vmatpush3.bf16.msra.mxu1 %v30671_v22  ;;  %26705 = vmatprep.subr.bf16.mxu0 %v30672_v58  ;;  %v30695_v22 = vld [vmem:[#allocation17 + $0xa10] sm:$0xff]   ;;  %v30696_v58 = vld [vmem:[#allocation17 + $0xdf8] sm:$0xff]  }
 0xd2c   : > { %26515 = vmatprep.subr.bf16.mxu1 %v30673_v11  ;;  %v30697_v11 = vld [vmem:[#allocation17 + $0xa58] sm:$0xff]  }
 0xd2d   : > { %v26213_v24 = vpop.f32.mrb[80].mxu1 }
 0xd2e   : > { %v26214_v29 = vpop.f32.mrb[81].mxu1  ;;  %26706 = vmatpush3.bf16.msra.mxu0 %v30674_v18  ;;  %v30698_v18 = vld [vmem:[#allocation17 + $0xdb8] sm:$0xff]  }
 0xd2f   : > { %v26215_v9 = vadd.f32 %v26214_v29, %v26213_v24  ;;  %v26216_v43 = vpop.f32.mrb[82].mxu1  ;;  %26516 = vmatpush3.bf16.msra.mxu1 %v30675_v20  ;;  %26707 = vmatprep.subr.bf16.mxu0 %v30676_v3  ;;  %v17135_v20 = vmax.f32 %v28406_v47, 0.0  ;;  %v30699_v3 = vld [vmem:[#allocation17 + $0xa18] sm:$0xff]   ;;  %v17155_v24 = vmax.f32 %v28412_v46, 0.0  ;;  %v30702_v29 = vld [vmem:[#allocation17 + $0xe80] sm:$0xff]   ;;  %v30722_v47 = vld [vmem:[#allocation17 + $0xea8] sm:$0xff]  }
 0xd30   : > { %v26217_v13 = vpop.f32.mrb[83].mxu1  ;;  %26517 = vmatprep.subr.bf16.mxu1 %v30677_v54  ;;  %v30700_v54 = vld [vmem:[#allocation17 + $0xec0] sm:$0xff]   ;;  %v30704_v43 = vld [vmem:[#allocation17 + $0xec8] sm:$0xff]  }
 0xd31   : > { %v21728_v49 = vadd.f32 %v26215_v9, %v32508_v44  ;;  %v30688_v44 = vld [vmem:[#allocation17 + $0xde8] sm:$0xff]   ;;  %v30703_v9 = vld [vmem:[#allocation17 + $0xa20] sm:$0xff]   ;;  %v25380_v23 = vpack.c.bf16 %v17155_v24, %v17155_v24  ;;  %v30709_v13 = vld [vmem:[#allocation17 + $0xa70] sm:$0xff]  }
 0xd32   : > { %26708 = vmatpush3.bf16.msra.mxu0 %v30678_v40  ;;  %v25375_v40 = vpack.c.bf16 %v17135_v20, %v17135_v20  ;;  %v30726_v20 = vld [vmem:[#allocation17 + $0xeb0] sm:$0xff]  }
 0xd33   : > { %26518 = vmatpush3.bf16.msra.mxu1 %v30679_v15  ;;  %26709 = vmatprep.subr.bf16.mxu0 %v30680_v61  ;;  %v32522_v42 = vadd.f32 %v32471_v36, %v21728_v49  ;;  %v30691_v36 = vld [vmem:[#allocation17 + $0xa08] sm:$0xff]   ;;  %v30710_v49 = vld [vmem:[#allocation17 + $0xe90] sm:$0xff]  }
 0xd34   : > { %26519 = vmatprep.subr.bf16.mxu1 %v30681_v30  ;;  %v30706_v15 = vld [vmem:[#allocation17 + $0xe88] sm:$0xff]   ;;  %v30727_v24 = vld [vmem:[#allocation17 + $0xb10] sm:$0xff]  }
 0xd35   : > { %v30707_v61 = vld [vmem:[#allocation17 + $0xa28] sm:$0xff]  }
 0xd36   : > { %26710 = vmatpush3.bf16.msra.mxu0 %v30682_v56 }
 0xd37   : > { %26520 = vmatpush3.bf16.msra.mxu1 %v30683_v32  ;;  %26711 = vmatprep.subr.bf16.mxu0 %v30684_v28  ;;  %v30711_v28 = vld [vmem:[#allocation17 + $0xa30] sm:$0xff]  }
 0xd38   : > { %26549 = vmatprep.subr.bf16.mxu1 %v30685_v0  ;;  %v32530_v0 = vld [vmem:[#allocation15] ss:$0 sm:$0xff] }
 0xd39   : > { %v28395_v10 = vadd.f32 %v32530_v0, %v32385_v25  ;;  %v30717_v25 = vld [vmem:[#allocation17 + $0xb40] sm:$0xff]  }
 0xd3a   : > { %22286 = vmatmul.mubr.bf16.vlgmr.msra.gmra.mrb[108].mxu1 %v25357_v17  ;;  %26712 = vmatpush3.bf16.msra.mxu0 %v30686_v12  ;;  %v28401_v17 = vadd.f32 %v32530_v0, %v32397_v59  ;;  %v30719_v59 = vld [vmem:[#allocation17 + $0xb00] sm:$0xff]  }
 0xd3b   : > { %26550 = vmatpush3.bf16.msra.mxu1 %v30687_v31  ;;  %22365 = vmatprep.mubr.bf16.mxu1 %v25362_v41  ;;  %v30713_v31 = vld [vmem:[#allocation17 + $0xa78] sm:$0xff]  }
 0xd3c   : > { %v26411_v53 = vpop.f32.mrb[144].mxu0  ;;  %26713 = vmatprep.subr.bf16.mxu0 %v30688_v44  ;;  %26551 = vmatprep.subr.bf16.mxu1 %v30689_v37  ;;  %v30714_v37 = vld [vmem:[#allocation17 + $0xe98] sm:$0xff]  }
 0xd3d   : > { %v26412_v27 = vpop.f32.mrb[145].mxu0  ;;  %v30715_v41 = vld [vmem:[#allocation17 + $0xa38] sm:$0xff]  }
 0xd3e   : > { %v32524_v5 = vadd.f32 %v26412_v27, %v26411_v53  ;;  %v26414_v1 = vpop.f32.mrb[146].mxu0  ;;  %26714 = vmatpush3.bf16.msra.mxu0 %v30690_v6  ;;  %v30716_v6 = vld [vmem:[#allocation17 + $0xee0] sm:$0xff]   ;;  %v17099_v53 = vmax.f32 %v28401_v17, 0.0 }
 0xd3f   : > { %v26415_v35 = vpop.f32.mrb[147].mxu0  ;;  %26552 = vmatpush3.bf16.msra.mxu1 %v30691_v36  ;;  %26715 = vmatprep.subr.bf16.mxu0 %v30692_v45  ;;  %v17079_v45 = vmax.f32 %v28395_v10, 0.0  ;;  %v30721_v1 = vld [vmem:[#allocation17 + $0xb48] sm:$0xff]  }
 0xd40   : > { %26553 = vmatprep.subr.bf16.mxu1 %v30693_v60  ;;  %v30718_v60 = vld [vmem:[#allocation17 + $0xea0] sm:$0xff]   ;;  %v30724_v35 = vld [vmem:[#allocation17 + $0xef0] sm:$0xff]  }
 0xd41   : > { %v25361_v27 = vpack.c.bf16 %v17079_v45, %v17079_v45  ;;  %v30745_v45 = vld [vmem:[#allocation17 + $0xb78] sm:$0xff]  }
 0xd42   : > { %26716 = vmatpush3.bf16.msra.mxu0 %v30694_v2  ;;  %v25366_v2 = vpack.c.bf16 %v17099_v53, %v17099_v53 }
 0xd43   : > { %26554 = vmatpush3.bf16.msra.mxu1 %v30695_v22  ;;  %26717 = vmatprep.subr.bf16.mxu0 %v30696_v58  ;;  %v30725_v58 = vld [vmem:[#allocation17 + $0xb50] sm:$0xff]  }
 0xd44   : > { %26555 = vmatprep.subr.bf16.mxu1 %v30697_v11 }
 0xd46   : > { %26718 = vmatpush3.bf16.msra.mxu0 %v30698_v18 }
 0xd47   : > { %26556 = vmatpush3.bf16.msra.mxu1 %v30699_v3  ;;  %26747 = vmatprep.subr.bf16.mxu0 %v30700_v54  ;;  %v28410_v3 = vadd.f32 %v32530_v0, %v32421_v4  ;;  %v30733_v4 = vld [vmem:[#allocation17 + $0xb60] sm:$0xff]  }
 0xd48   : > { %26557 = vmatprep.subr.bf16.mxu1 %v30701_v34  ;;  %v30728_v34 = vld [vmem:[#allocation17 + $0xef8] sm:$0xff]  }
 0xd49   : > { %22646 = vmatmul.mubr.bf16.vlgmr.msra.gmra.mrb[172].mxu0 %v25375_v40  ;;  %v30729_v40 = vld [vmem:[#allocation17 + $0xb58] sm:$0xff]  }
 0xd4a   : > { %26748 = vmatpush3.bf16.msra.mxu0 %v30702_v29  ;;  %22725 = vmatprep.mubr.bf16.mxu0 %v25380_v23  ;;  %v28416_v29 = vadd.f32 %v32530_v0, %v32435_v62  ;;  %v30731_v23 = vld [vmem:[#allocation17 + $0xb18] sm:$0xff]  }
 0xd4b   : > { %26558 = vmatpush3.bf16.msra.mxu1 %v30703_v9  ;;  %26749 = vmatprep.subr.bf16.mxu0 %v30704_v43  ;;  %v30730_v9 = vld [vmem:[#allocation17 + $0xeb8] sm:$0xff]   ;;  %v17151_v43 = vmax.f32 %v28410_v3, 0.0 }
 0xd4c   : > { %26559 = vmatprep.subr.bf16.mxu1 %v30705_v48  ;;  %v30732_v48 = vld [vmem:[#allocation17 + $0xfc0] sm:$0xff]  }
 0xd4d   : > { %v26257_v30 = vpop.f32.mrb[84].mxu1 }
 0xd4e   : > { %v26258_v21 = vpop.f32.mrb[85].mxu1  ;;  %26750 = vmatpush3.bf16.msra.mxu0 %v30706_v15  ;;  %v17171_v15 = vmax.f32 %v28416_v29, 0.0  ;;  %v28414_v29 = vadd.f32 %v32530_v0, %v32431_v57  ;;  %v30766_v57 = vld [vmem:[#allocation17 + $0xc68] sm:$0xff]  }
 0xd4f   : > { %v26259_v56 = vadd.f32 %v26258_v21, %v26257_v30  ;;  %v26260_v32 = vpop.f32.mrb[86].mxu1  ;;  %26560 = vmatpush3.bf16.msra.mxu1 %v30707_v61  ;;  %26751 = vmatprep.subr.bf16.mxu0 %v30708_v7  ;;  %v30734_v61 = vld [vmem:[#allocation17 + $0xf80] sm:$0xff]   ;;  %v25379_v7 = vpack.c.bf16 %v17151_v43, %v17151_v43  ;;  %v30736_v30 = vld [vmem:[#allocation17 + $0xfc8] sm:$0xff]   ;;  %v30760_v43 = vld [vmem:[#allocation17 + $0xff8] sm:$0xff]  }
 0xd50   : > { %v26261_v12 = vpop.f32.mrb[87].mxu1  ;;  %26561 = vmatprep.subr.bf16.mxu1 %v30709_v13  ;;  %v30735_v13 = vld [vmem:[#allocation17 + $0xb20] sm:$0xff]   ;;  %v25384_v62 = vpack.c.bf16 %v17171_v15, %v17171_v15  ;;  %v30737_v21 = vld [vmem:[#allocation17 + $0xb68] sm:$0xff]   ;;  %v30740_v32 = vld [vmem:[#allocation17 + $0xfd0] sm:$0xff]   ;;  %v17167_v15 = vmax.f32 %v28414_v29, 0.0 }
 0xd51   : > { %v21808_v44 = vadd.f32 %v26259_v56, %v32522_v42  ;;  %v30720_v42 = vld [vmem:[#allocation17 + $0xee8] sm:$0xff]   ;;  %v30742_v12 = vld [vmem:[#allocation17 + $0xf90] sm:$0xff]   ;;  %v30786_v29 = vld [vmem:[#allocation17 + $0xd78] sm:$0xff]  }
 0xd52   : > { %26752 = vmatpush3.bf16.msra.mxu0 %v30710_v49  ;;  %v30738_v49 = vld [vmem:[#allocation17 + $0xf88] sm:$0xff]  }
 0xd53   : > { %26562 = vmatpush3.bf16.msra.mxu1 %v30711_v28  ;;  %26753 = vmatprep.subr.bf16.mxu0 %v30712_v52  ;;  %v32538_v36 = vadd.f32 %v32484_v38, %v21808_v44  ;;  %v30723_v38 = vld [vmem:[#allocation17 + $0xb08] sm:$0xff]   ;;  %v30741_v28 = vld [vmem:[#allocation17 + $0xb70] sm:$0xff]  }
 0xd54   : > { %26563 = vmatprep.subr.bf16.mxu1 %v30713_v31  ;;  %v30739_v56 = vld [vmem:[#allocation17 + $0xb28] sm:$0xff]   ;;  %v30743_v44 = vld [vmem:[#allocation17 + $0xb30] sm:$0xff]  }
 0xd56   : > { %26754 = vmatpush3.bf16.msra.mxu0 %v30714_v37  ;;  %v30744_v37 = vld [vmem:[#allocation17 + $0xfd8] sm:$0xff]  }
 0xd57   : > { %26564 = vmatpush3.bf16.msra.mxu1 %v30715_v41  ;;  %26755 = vmatprep.subr.bf16.mxu0 %v30716_v6  ;;  %v28399_v41 = vadd.f32 %v32530_v0, %v32393_v51  ;;  %v30749_v51 = vld [vmem:[#allocation17 + $0xc40] sm:$0xff]  }
 0xd58   : > { %26593 = vmatprep.subr.bf16.mxu1 %v30717_v25  ;;  %v28405_v25 = vadd.f32 %v32530_v0, %v32409_v19  ;;  %v30751_v19 = vld [vmem:[#allocation17 + $0xc00] sm:$0xff]  }
 0xd5a   : > { %22366 = vmatmul.mubr.bf16.vlgmr.msra.gmra.mrb[112].mxu1 %v25361_v27  ;;  %26756 = vmatpush3.bf16.msra.mxu0 %v30718_v60  ;;  %v30746_v60 = vld [vmem:[#allocation17 + $0xf98] sm:$0xff]   ;;  %v30748_v27 = vld [vmem:[#allocation17 + $0xfe0] sm:$0xff]  }
 0xd5b   : > { %26594 = vmatpush3.bf16.msra.mxu1 %v30719_v59  ;;  %22445 = vmatprep.mubr.bf16.mxu1 %v25366_v2  ;;  %v30747_v59 = vld [vmem:[#allocation17 + $0xb38] sm:$0xff]   ;;  %v17115_v2 = vmax.f32 %v28405_v25, 0.0  ;;  %v30773_v25 = vld [vmem:[#allocation17 + $0xd00] sm:$0xff]  }
 0xd5c   : > { %v26455_v22 = vpop.f32.mrb[148].mxu0  ;;  %26757 = vmatprep.subr.bf16.mxu0 %v30720_v42  ;;  %26595 = vmatprep.subr.bf16.mxu1 %v30721_v1  ;;  %v17095_v1 = vmax.f32 %v28399_v41, 0.0 }
 0xd5d   : > { %v26456_v46 = vpop.f32.mrb[149].mxu0 }
 0xd5e   : > { %v32540_v11 = vadd.f32 %v26456_v46, %v26455_v22  ;;  %v26458_v18 = vpop.f32.mrb[150].mxu0  ;;  %26758 = vmatpush3.bf16.msra.mxu0 %v30722_v47  ;;  %v30750_v47 = vld [vmem:[#allocation17 + $0xfa0] sm:$0xff]   ;;  %v25370_v22 = vpack.c.bf16 %v17115_v2, %v17115_v2  ;;  %v30756_v46 = vld [vmem:[#allocation17 + $0xff0] sm:$0xff]  }
 0xd5f   : > { %v26459_v54 = vpop.f32.mrb[151].mxu0  ;;  %26596 = vmatpush3.bf16.msra.mxu1 %v30723_v38  ;;  %26759 = vmatprep.subr.bf16.mxu0 %v30724_v35  ;;  %v25365_v38 = vpack.c.bf16 %v17095_v1, %v17095_v1  ;;  %v30753_v35 = vld [vmem:[#allocation17 + $0xc48] sm:$0xff]   ;;  %v30777_v2 = vld [vmem:[#allocation17 + $0xd10] sm:$0xff]  }
 0xd60   : > { %26597 = vmatprep.subr.bf16.mxu1 %v30725_v58  ;;  %v30754_v58 = vld [vmem:[#allocation17 + $0xfa8] sm:$0xff]  }
 0xd62   : > { %26760 = vmatpush3.bf16.msra.mxu0 %v30726_v20  ;;  %v30757_v20 = vld [vmem:[#allocation17 + $0xc50] sm:$0xff]  }
 0xd63   : > { %26598 = vmatpush3.bf16.msra.mxu1 %v30727_v24  ;;  %26761 = vmatprep.subr.bf16.mxu0 %v30728_v34  ;;  %v30758_v34 = vld [vmem:[#allocation17 + $0xfb0] sm:$0xff]  }
 0xd64   : > { %26599 = vmatprep.subr.bf16.mxu1 %v30729_v40 }
 0xd66   : > { %26762 = vmatpush3.bf16.msra.mxu0 %v30730_v9  ;;  %v30759_v9 = vld [vmem:[#allocation17 + $0xc10] sm:$0xff]  }
 0xd67   : > { %26600 = vmatpush3.bf16.msra.mxu1 %v30731_v23  ;;  %26791 = vmatprep.subr.bf16.mxu0 %v30732_v48  ;;  %v30761_v23 = vld [vmem:[#allocation17 + $0xc58] sm:$0xff]  }
 0xd68   : > { %26601 = vmatprep.subr.bf16.mxu1 %v30733_v4  ;;  %v30762_v48 = vld [vmem:[#allocation17 + $0xfb8] sm:$0xff]  }
 0xd69   : > { %22726 = vmatmul.mubr.bf16.vlgmr.msra.gmra.mrb[176].mxu0 %v25379_v7  ;;  %v30763_v4 = vld [vmem:[#allocation17 + $0xc18] sm:$0xff]   ;;  %v25383_v7 = vpack.c.bf16 %v17167_v15, %v17167_v15  ;;  %v30788_v15 = vld [vmem:[#allocation17 + $0xe40] sm:$0xff]  }
 0xd6a   : > { %26792 = vmatpush3.bf16.msra.mxu0 %v30734_v61  ;;  %22805 = vmatprep.mubr.bf16.mxu0 %v25384_v62  ;;  %v30764_v61 = vld [vmem:[#allocation17 + $0xc60] sm:$0xff]   ;;  %v30768_v62 = vld [vmem:[#allocation17 + $0xc70] sm:$0xff]  }
 0xd6b   : > { %26602 = vmatpush3.bf16.msra.mxu1 %v30735_v13  ;;  %26793 = vmatprep.subr.bf16.mxu0 %v30736_v30  ;;  %v30765_v13 = vld [vmem:[#allocation17 + $0xc20] sm:$0xff]   ;;  %v30767_v30 = vld [vmem:[#allocation17 + $0xc28] sm:$0xff]  }
 0xd6c   : > { %26603 = vmatprep.subr.bf16.mxu1 %v30737_v21 }
 0xd6d   : > { %v26301_v52 = vpop.f32.mrb[88].mxu1 }
 0xd6e   : > { %v26302_v10 = vpop.f32.mrb[89].mxu1  ;;  %26794 = vmatpush3.bf16.msra.mxu0 %v30738_v49 }
 0xd6f   : > { %v26303_v31 = vadd.f32 %v26302_v10, %v26301_v52  ;;  %v26304_v17 = vpop.f32.mrb[90].mxu1  ;;  %26604 = vmatpush3.bf16.msra.mxu1 %v30739_v56  ;;  %26795 = vmatprep.subr.bf16.mxu0 %v30740_v32  ;;  %v28403_v52 = vadd.f32 %v32530_v0, %v32403_v8  ;;  %v30774_v8 = vld [vmem:[#allocation17 + $0xd48] sm:$0xff]  }
 0xd70   : > { %v26305_v6 = vpop.f32.mrb[91].mxu1  ;;  %26605 = vmatprep.subr.bf16.mxu1 %v30741_v28  ;;  %v30769_v28 = vld [vmem:[#allocation17 + $0xc30] sm:$0xff]  }
 0xd71   : > { %v21888_v53 = vadd.f32 %v26303_v31, %v32538_v36  ;;  %v30752_v36 = vld [vmem:[#allocation17 + $0xfe8] sm:$0xff]   ;;  %v28409_v31 = vadd.f32 %v32530_v0, %v32417_v50  ;;  %v17111_v41 = vmax.f32 %v28403_v52, 0.0  ;;  %v30772_v6 = vld [vmem:[#allocation17 + $0xd40] sm:$0xff]  }
 0xd72   : > { %26796 = vmatpush3.bf16.msra.mxu0 %v30742_v12  ;;  %v30770_v12 = vld [vmem:[#allocation17 + $0xc78] sm:$0xff]   ;;  %v30775_v50 = vld [vmem:[#allocation17 + $0xd08] sm:$0xff]   ;;  %v30796_v52 = vld [vmem:[#allocation17 + $0xe60] sm:$0xff]  }
 0xd73   : > { %26606 = vmatpush3.bf16.msra.mxu1 %v30743_v44  ;;  %26797 = vmatprep.subr.bf16.mxu0 %v30744_v37  ;;  %v32552_v42 = vadd.f32 %v32497_v14, %v21888_v53  ;;  %v30755_v14 = vld [vmem:[#allocation17 + $0xc08] sm:$0xff]   ;;  %v30771_v44 = vld [vmem:[#allocation17 + $0xc38] sm:$0xff]   ;;  %v25369_v53 = vpack.c.bf16 %v17111_v41, %v17111_v41 }
 0xd74   : > { %26607 = vmatprep.subr.bf16.mxu1 %v30745_v45  ;;  %v17131_v45 = vmax.f32 %v28409_v31, 0.0  ;;  %v30799_v31 = vld [vmem:[#allocation17 + $0xe28] sm:$0xff]  }
 0xd76   : > { %26798 = vmatpush3.bf16.msra.mxu0 %v30746_v60  ;;  %v25374_v60 = vpack.c.bf16 %v17131_v45, %v17131_v45  ;;  %v30801_v45 = vld [vmem:[#allocation17 + $0xe30] sm:$0xff]  }
 0xd77   : > { %26608 = vmatpush3.bf16.msra.mxu1 %v30747_v59  ;;  %26799 = vmatprep.subr.bf16.mxu0 %v30748_v27  ;;  %v30776_v27 = vld [vmem:[#allocation17 + $0xd50] sm:$0xff]  }
 0xd78   : > { %26637 = vmatprep.subr.bf16.mxu1 %v30749_v51 }
 0xd7a   : > { %22446 = vmatmul.mubr.bf16.vlgmr.msra.gmra.mrb[116].mxu1 %v25365_v38  ;;  %26800 = vmatpush3.bf16.msra.mxu0 %v30750_v47  ;;  %v30778_v47 = vld [vmem:[#allocation17 + $0xd58] sm:$0xff]   ;;  %v30780_v38 = vld [vmem:[#allocation17 + $0xd60] sm:$0xff]  }
 0xd7b   : > { %26638 = vmatpush3.bf16.msra.mxu1 %v30751_v19  ;;  %22525 = vmatprep.mubr.bf16.mxu1 %v25370_v22  ;;  %v30779_v19 = vld [vmem:[#allocation17 + $0xd18] sm:$0xff]   ;;  %v30783_v22 = vld [vmem:[#allocation17 + $0xd28] sm:$0xff]  }
 0xd7c   : > { %v26499_v18 = vpop.f32.mrb[152].mxu0  ;;  %26801 = vmatprep.subr.bf16.mxu0 %v30752_v36  ;;  %26639 = vmatprep.subr.bf16.mxu1 %v30753_v35  ;;  %v30781_v36 = vld [vmem:[#allocation17 + $0xd20] sm:$0xff]   ;;  %v30782_v35 = vld [vmem:[#allocation17 + $0xd68] sm:$0xff]  }
 0xd7d   : > { %v26500_v3 = vpop.f32.mrb[153].mxu0 }
 0xd7e   : > { %v32554_v54 = vadd.f32 %v26500_v3, %v26499_v18  ;;  %v26502_v24 = vpop.f32.mrb[154].mxu0  ;;  %26802 = vmatpush3.bf16.msra.mxu0 %v30754_v58  ;;  %v30784_v58 = vld [vmem:[#allocation17 + $0xd70] sm:$0xff]  }
 0xd7f   : > { %v26503_v40 = vpop.f32.mrb[155].mxu0  ;;  %26640 = vmatpush3.bf16.msra.mxu1 %v30755_v14  ;;  %26803 = vmatprep.subr.bf16.mxu0 %v30756_v46  ;;  %v30785_v3 = vld [vmem:[#allocation17 + $0xd30] sm:$0xff]   ;;  %v28407_v24 = vadd.f32 %v32530_v0, %v32413_v39  ;;  %v30790_v39 = vld [vmem:[#allocation17 + $0xe48] sm:$0xff]  }
 0xd80   : > { %26641 = vmatprep.subr.bf16.mxu1 %v30757_v20  ;;  %v28413_v40 = vadd.f32 %v32530_v0, %v32429_v26 }
 0xd82   : > { %26804 = vmatpush3.bf16.msra.mxu0 %v30758_v34 }
 0xd83   : > { %26642 = vmatpush3.bf16.msra.mxu1 %v30759_v9  ;;  %26805 = vmatprep.subr.bf16.mxu0 %v30760_v43  ;;  %v30787_v43 = vld [vmem:[#allocation17 + $0xd38] sm:$0xff]  }
 0xd84   : > { %26643 = vmatprep.subr.bf16.mxu1 %v30761_v23 }
 0xd86   : > { %26806 = vmatpush3.bf16.msra.mxu0 %v30762_v48  ;;  %v17127_v48 = vmax.f32 %v28407_v24, 0.0  ;;  %v30814_v24 = vld [vmem:[#allocation17 + $0xf68] sm:$0xff]  }
 0xd87   : > { %26644 = vmatpush3.bf16.msra.mxu1 %v30763_v4  ;;  %v17147_v4 = vmax.f32 %v28413_v40, 0.0 }
 0xd88   : > { %26645 = vmatprep.subr.bf16.mxu1 %v30764_v61  ;;  %v30789_v61 = vld [vmem:[#allocation17 + $0xe00] sm:$0xff]  }
 0xd89   : > { %22806 = vmatmul.mubr.bf16.vlgmr.msra.gmra.mrb[180].mxu0 %v25383_v7  ;;  %v25373_v7 = vpack.c.bf16 %v17127_v48, %v17127_v48  ;;  %v30817_v48 = vld [vmem:[#allocation17 + $0xf30] sm:$0xff]  }
 0xd8b   : > { %26646 = vmatpush3.bf16.msra.mxu1 %v30765_v13  ;;  %v25378_v13 = vpack.c.bf16 %v17147_v4, %v17147_v4 }
 0xd8c   : > { %26647 = vmatprep.subr.bf16.mxu1 %v30766_v57  ;;  %v30791_v57 = vld [vmem:[#allocation17 + $0xe08] sm:$0xff]  }
 0xd8d   : > { %v26345_v21 = vpop.f32.mrb[92].mxu1 }
 0xd8e   : > { %v26346_v49 = vpop.f32.mrb[93].mxu1 }
 0xd8f   : > { %v26347_v56 = vadd.f32 %v26346_v49, %v26345_v21  ;;  %v26348_v32 = vpop.f32.mrb[94].mxu1  ;;  %26648 = vmatpush3.bf16.msra.mxu1 %v30767_v30  ;;  %v30792_v30 = vld [vmem:[#allocation17 + $0xe50] sm:$0xff]  }
 0xd90   : > { %v26349_v10 = vpop.f32.mrb[95].mxu1  ;;  %26649 = vmatprep.subr.bf16.mxu1 %v30768_v62  ;;  %v30794_v32 = vld [vmem:[#allocation17 + $0xe58] sm:$0xff]  }
 0xd91   : > { %v21968_v17 = vadd.f32 %v26347_v56, %v32552_v42  ;;  %v30793_v56 = vld [vmem:[#allocation17 + $0xe10] sm:$0xff]   ;;  %v30797_v10 = vld [vmem:[#allocation17 + $0xe20] sm:$0xff]  }
 0xd93   : > { %26650 = vmatpush3.bf16.msra.mxu1 %v30769_v28  ;;  %v22008_v37 = vadd.f32 %v32510_v33, %v21968_v17  ;;  %v30795_v28 = vld [vmem:[#allocation17 + $0xe18] sm:$0xff]   ;;  %v30800_v17 = vld [vmem:[#allocation17 + $0xe70] sm:$0xff]  }
 0xd94   : > { %26651 = vmatprep.subr.bf16.mxu1 %v30770_v12  ;;  %v30798_v12 = vld [vmem:[#allocation17 + $0xe68] sm:$0xff]  }
 0xd97   : > { %26652 = vmatpush3.bf16.msra.mxu1 %v30771_v44 }
 0xd98   : > { %26681 = vmatprep.subr.bf16.mxu1 %v30772_v6 }
 0xd9a   : > { %22526 = vmatmul.mubr.bf16.vlgmr.msra.gmra.mrb[120].mxu1 %v25369_v53 }
 0xd9b   : > { %26682 = vmatpush3.bf16.msra.mxu1 %v30773_v25  ;;  %22605 = vmatprep.mubr.bf16.mxu1 %v25374_v60  ;;  %v28411_v25 = vadd.f32 %v32530_v0, %v32425_v16  ;;  %v28417_v60 = vadd.f32 %v32530_v0, %v32437_v63  ;;  %v30806_v16 = vld [vmem:[#allocation17 + $0xf48] sm:$0xff]  }
 0xd9c   : > { %v26543_v59 = vpop.f32.mrb[156].mxu0  ;;  %26683 = vmatprep.subr.bf16.mxu1 %v30774_v8  ;;  %v30802_v8 = vld [vmem:[#allocation17 + $0xe78] sm:$0xff]  }
 0xd9d   : > { %v26544_v42 = vpop.f32.mrb[157].mxu0 }
 0xd9e   : > { %v32564_v1 = vadd.f32 %v26544_v42, %v26543_v59  ;;  %v26546_v33 = vpop.f32.mrb[158].mxu0  ;;  %v30803_v59 = vld [vmem:[#allocation17 + $0xe38] sm:$0xff]   ;;  %v17143_v42 = vmax.f32 %v28411_v25, 0.0 }
 0xd9f   : > { %v26547_v51 = vpop.f32.mrb[159].mxu0  ;;  %26684 = vmatpush3.bf16.msra.mxu1 %v30775_v50  ;;  %v30804_v33 = vld [vmem:[#allocation17 + $0xf40] sm:$0xff]  }
 0xda0   : > { %26685 = vmatprep.subr.bf16.mxu1 %v30776_v27  ;;  %v17163_v51 = vmax.f32 %v28417_v60, 0.0  ;;  %v30820_v60 = vld [vmem:[#allocation20] sm:$0xff]  }
 0xda3   : > { %26686 = vmatpush3.bf16.msra.mxu1 %v30777_v2  ;;  %v30805_v2 = vld [vmem:[#allocation17 + $0xf00] sm:$0xff]  }
 0xda4   : > { %26687 = vmatprep.subr.bf16.mxu1 %v30778_v47  ;;  %v25377_v47 = vpack.c.bf16 %v17143_v42, %v17143_v42  ;;  %v30823_v42 = vld [vmem:[#allocation20 + $0x18] sm:$0xff]  }
 0xda7   : > { %26688 = vmatpush3.bf16.msra.mxu1 %v30779_v19  ;;  %v25382_v19 = vpack.c.bf16 %v17163_v51, %v17163_v51 }
 0xda8   : > { %26689 = vmatprep.subr.bf16.mxu1 %v30780_v38  ;;  %v30807_v38 = vld [vmem:[#allocation17 + $0xf08] sm:$0xff]  }
 0xdab   : > { %26690 = vmatpush3.bf16.msra.mxu1 %v30781_v36  ;;  %v30808_v36 = vld [vmem:[#allocation17 + $0xf50] sm:$0xff]  }
 0xdac   : > { %26691 = vmatprep.subr.bf16.mxu1 %v30782_v35 }
 0xdad   : > { %v26389_v14 = vpop.f32.mrb[96].mxu1 }
 0xdae   : > { %v26390_v46 = vpop.f32.mrb[97].mxu1 }
 0xdaf   : > { %v26391_v18 = vadd.f32 %v26390_v46, %v26389_v14  ;;  %v26392_v20 = vpop.f32.mrb[98].mxu1  ;;  %26692 = vmatpush3.bf16.msra.mxu1 %v30783_v22  ;;  %v30809_v14 = vld [vmem:[#allocation17 + $0xf10] sm:$0xff]   ;;  %v30810_v46 = vld [vmem:[#allocation17 + $0xf58] sm:$0xff]  }
 0xdb0   : > { %v26393_v34 = vpop.f32.mrb[99].mxu1  ;;  %26693 = vmatprep.subr.bf16.mxu1 %v30784_v58  ;;  %v30812_v20 = vld [vmem:[#allocation17 + $0xf60] sm:$0xff]  }
 0xdb1   : > { %v22048_v9 = vadd.f32 %v26391_v18, %v22008_v37  ;;  %v30811_v18 = vld [vmem:[#allocation17 + $0xf18] sm:$0xff]   ;;  %v30815_v34 = vld [vmem:[#allocation17 + $0xf28] sm:$0xff]  }
 0xdb3   : > { %26694 = vmatpush3.bf16.msra.mxu1 %v30785_v3  ;;  %v22088_v23 = vadd.f32 %v32524_v5, %v22048_v9  ;;  %v30813_v3 = vld [vmem:[#allocation17 + $0xf20] sm:$0xff]  }
 0xdb4   : > { %26695 = vmatprep.subr.bf16.mxu1 %v30786_v29  ;;  %v30816_v29 = vld [vmem:[#allocation17 + $0xf70] sm:$0xff]  }
 0xdb7   : > { %26696 = vmatpush3.bf16.msra.mxu1 %v30787_v43 }
 0xdb8   : > { %26725 = vmatprep.subr.bf16.mxu1 %v30788_v15  ;;  %v28415_v15 = vadd.f32 %v32530_v0, %v32433_v55 }
 0xdba   : > { %22606 = vmatmul.mubr.bf16.vlgmr.msra.gmra.mrb[124].mxu1 %v25373_v7 }
 0xdbb   : > { %26726 = vmatpush3.bf16.msra.mxu1 %v30789_v61  ;;  %22685 = vmatprep.mubr.bf16.mxu1 %v25378_v13  ;;  %v30818_v61 = vld [vmem:[#allocation17 + $0xf78] sm:$0xff]  }
 0xdbc   : > { %v26587_v26 = vpop.f32.mrb[160].mxu0  ;;  %26727 = vmatprep.subr.bf16.mxu1 %v30790_v39  ;;  %v30819_v39 = vld [vmem:[#allocation17 + $0xf38] sm:$0xff]  }
 0xdbd   : > { %v26588_v62 = vpop.f32.mrb[161].mxu0 }
 0xdbe   : > { %v32571_v21 = vadd.f32 %v26588_v62, %v26587_v26  ;;  %v26590_v5 = vpop.f32.mrb[162].mxu0 }
 0xdbf   : > { %v26591_v49 = vpop.f32.mrb[163].mxu0  ;;  %26728 = vmatpush3.bf16.msra.mxu1 %v30791_v57  ;;  %v17159_v57 = vmax.f32 %v28415_v15, 0.0 }
 0xdc0   : > { %26729 = vmatprep.subr.bf16.mxu1 %v30792_v30 }
 0xdc1   : > { %v25381_v26 = vpack.c.bf16 %v17159_v57, %v17159_v57 }
 0xdc3   : > { %26730 = vmatpush3.bf16.msra.mxu1 %v30793_v56 }
 0xdc4   : > { %26731 = vmatprep.subr.bf16.mxu1 %v30794_v32 }
 0xdc7   : > { %26732 = vmatpush3.bf16.msra.mxu1 %v30795_v28 }
 0xdc8   : > { %26733 = vmatprep.subr.bf16.mxu1 %v30796_v52 }
 0xdcb   : > { %26734 = vmatpush3.bf16.msra.mxu1 %v30797_v10 }
 0xdcc   : > { %26735 = vmatprep.subr.bf16.mxu1 %v30798_v12 }
 0xdcd   : > { %v26433_v44 = vpop.f32.mrb[100].mxu1 }
 0xdce   : > { %v26434_v37 = vpop.f32.mrb[101].mxu1 }
 0xdcf   : > { %v26435_v41 = vadd.f32 %v26434_v37, %v26433_v44  ;;  %v26436_v6 = vpop.f32.mrb[102].mxu1  ;;  %26736 = vmatpush3.bf16.msra.mxu1 %v30799_v31 }
 0xdd0   : > { %v26437_v53 = vpop.f32.mrb[103].mxu1  ;;  %26737 = vmatprep.subr.bf16.mxu1 %v30800_v17 }
 0xdd1   : > { %v22128_v50 = vadd.f32 %v26435_v41, %v22088_v23 }
 0xdd3   : > { %26738 = vmatpush3.bf16.msra.mxu1 %v30801_v45  ;;  %v22168_v27 = vadd.f32 %v32540_v11, %v22128_v50  ;;  %v31218_v50 = vmov 0.0  }
 0xdd4   : > { %26739 = vmatprep.subr.bf16.mxu1 %v30802_v8 }
 0xdd7   : > { %26740 = vmatpush3.bf16.msra.mxu1 %v30803_v59 }
 0xdd8   : > { %26769 = vmatprep.subr.bf16.mxu1 %v30804_v33 }
 0xdda   : > { %22686 = vmatmul.mubr.bf16.vlgmr.msra.gmra.mrb[128].mxu1 %v25377_v47 }
 0xddb   : > { %26770 = vmatpush3.bf16.msra.mxu1 %v30805_v2  ;;  %22765 = vmatprep.mubr.bf16.mxu1 %v25382_v19  ;;  %v30824_v19 = vld [vmem:[#allocation20 + $0x20] sm:$0xff]  }
 0xddc   : > { %v26631_v63 = vpop.f32.mrb[164].mxu0  ;;  %26771 = vmatprep.subr.bf16.mxu1 %v30806_v16 }
 0xddd   : > { %v26632_v35 = vpop.f32.mrb[165].mxu0 }
 0xdde   : > { %v32578_v22 = vadd.f32 %v26632_v35, %v26631_v63  ;;  %v26634_v11 = vpop.f32.mrb[166].mxu0 }
 0xddf   : > { %v26635_v58 = vpop.f32.mrb[167].mxu0  ;;  %26772 = vmatpush3.bf16.msra.mxu1 %v30807_v38 }
 0xde0   : > { %26773 = vmatprep.subr.bf16.mxu1 %v30808_v36 }
 0xde3   : > { %26774 = vmatpush3.bf16.msra.mxu1 %v30809_v14  ;;  %v30825_v14 = vld [vmem:[#allocation20 + $0x28] sm:$0xff]  }
 0xde4   : > { %26775 = vmatprep.subr.bf16.mxu1 %v30810_v46  ;;  %v30826_v46 = vld [vmem:[#allocation20 + $0x30] sm:$0xff]  }
 0xde7   : > { %26776 = vmatpush3.bf16.msra.mxu1 %v30811_v18 }
 0xde8   : > { %26777 = vmatprep.subr.bf16.mxu1 %v30812_v20 }
 0xdeb   : > { %26778 = vmatpush3.bf16.msra.mxu1 %v30813_v3  ;;  %v30827_v3 = vld [vmem:[#allocation20 + $0x38] sm:$0xff]  }
 0xdec   : > { %26779 = vmatprep.subr.bf16.mxu1 %v30814_v24 }
 0xded   : > { %v26477_v40 = vpop.f32.mrb[104].mxu1 }
 0xdee   : > { %v26478_v9 = vpop.f32.mrb[105].mxu1 }
 0xdef   : > { %v26479_v43 = vadd.f32 %v26478_v9, %v26477_v40  ;;  %v26480_v23 = vpop.f32.mrb[106].mxu1  ;;  %26780 = vmatpush3.bf16.msra.mxu1 %v30815_v34 }
 0xdf0   : > { %v26481_v4 = vpop.f32.mrb[107].mxu1  ;;  %26781 = vmatprep.subr.bf16.mxu1 %v30816_v29 }
 0xdf1   : > { %v22208_v7 = vadd.f32 %v26479_v43, %v22168_v27  ;;  %v30821_v27 = vld [vmem:[#allocation20 + $0x8] sm:$0xff]  }
 0xdf3   : > { %26782 = vmatpush3.bf16.msra.mxu1 %v30817_v48  ;;  %v22248_v13 = vadd.f32 %v32554_v54, %v22208_v7 }
 0xdf4   : > { %26783 = vmatprep.subr.bf16.mxu1 %v30818_v61 }
 0xdf7   : > { %26784 = vmatpush3.bf16.msra.mxu1 %v30819_v39 }
 0xdf8   : > { %28270 = vmatprep.subr.bf16.mxu1 %v31218_v50 }
 0xdfa   : > { %22766 = vmatmul.mubr.bf16.vlgmr.msra.gmra.mrb[132].mxu1 %v25381_v26 }
 0xdfb   : > { %28271 = vmatpush3.bf16.msra.mxu1 %v30820_v60  ;;  %28286 = vmatprep.mubr.msk.bf16.mxu1 %vm31219_vm2, %v31218_v50 }
 0xdfc   : > { %v26675_v30 = vpop.f32.mrb[168].mxu0  ;;  %28272 = vmatprep.subr.bf16.mxu1 %v31218_v50 }
 0xdfd   : > { %v26676_v62 = vpop.f32.mrb[169].mxu0 }
 0xdfe   : > { %v32583_v5 = vadd.f32 %v26676_v62, %v26675_v30  ;;  %v26678_v49 = vpop.f32.mrb[170].mxu0 }
 0xdff   : > { %v26679_v56 = vpop.f32.mrb[171].mxu0  ;;  %28273 = vmatpush3.bf16.msra.mxu1 %v30821_v27 }
 0xe00   : > { %28274 = vmatprep.subr.bf16.mxu1 %v31218_v50 }
 0xe0d   : > { %v26521_v55 = vpop.f32.mrb[108].mxu1 }
 0xe0e   : > { %v26522_v0 = vpop.f32.mrb[109].mxu1 }
 0xe0f   : > { %v26523_v32 = vadd.f32 %v26522_v0, %v26521_v55  ;;  %v26524_v28 = vpop.f32.mrb[110].mxu1 }
 0xe10   : > { %v26525_v52 = vpop.f32.mrb[111].mxu1 }
 0xe11   : > { %v22288_v10 = vadd.f32 %v26523_v32, %v22248_v13 }
 0xe13   : > { %v22328_v12 = vadd.f32 %v32564_v1, %v22288_v10  ;;  %v30822_v1 = vld [vmem:[#allocation20 + $0x10] sm:$0xff]  }
 0xe14   : > { %28275 = vmatpush3.bf16.msra.mxu1 %v30822_v1 }
 0xe15   : > { %28276 = vmatprep.subr.bf16.mxu1 %v31218_v50 }
 0xe18   : > { %28277 = vmatpush3.bf16.msra.mxu1 %v30823_v42 }
 0xe19   : > { %28278 = vmatprep.subr.bf16.mxu1 %v31218_v50 }
 0xe1c   : > { %v26719_v54 = vpop.f32.mrb[172].mxu0  ;;  %28279 = vmatpush3.bf16.msra.mxu1 %v30824_v19 }
 0xe1d   : > { %v26720_v31 = vpop.f32.mrb[173].mxu0  ;;  %28280 = vmatprep.subr.bf16.mxu1 %v31218_v50 }
 0xe1e   : > { %v32586_v17 = vadd.f32 %v26720_v31, %v26719_v54  ;;  %v26722_v44 = vpop.f32.mrb[174].mxu0 }
 0xe1f   : > { %v26723_v37 = vpop.f32.mrb[175].mxu0 }
 0xe20   : > { %28281 = vmatpush3.bf16.msra.mxu1 %v30825_v14 }
 0xe21   : > { %28282 = vmatprep.subr.bf16.mxu1 %v31218_v50 }
 0xe24   : > { %28283 = vmatpush3.bf16.msra.mxu1 %v30826_v46 }
 0xe25   : > { %28284 = vmatprep.subr.bf16.mxu1 %v31218_v50 }
 0xe28   : > { %28285 = vmatpush3.bf16.msra.mxu1 %v30827_v3 }
 0xe2d   : > { %v26565_v41 = vpop.f32.mrb[112].mxu1 }
 0xe2e   : > { %v26566_v6 = vpop.f32.mrb[113].mxu1 }
 0xe2f   : > { %v26567_v45 = vadd.f32 %v26566_v6, %v26565_v41  ;;  %v26568_v25 = vpop.f32.mrb[114].mxu1 }
 0xe30   : > { %v26569_v53 = vpop.f32.mrb[115].mxu1 }
 0xe31   : > { %v22368_v8 = vadd.f32 %v26567_v45, %v22328_v12 }
 0xe33   : > { %v22408_v59 = vadd.f32 %v32571_v21, %v22368_v8 }
 0xe3c   : > { %v26763_v33 = vpop.f32.mrb[176].mxu0 }
 0xe3d   : > { %v26764_v51 = vpop.f32.mrb[177].mxu0 }
 0xe3e   : > { %v26765_v2 = vadd.f32 %v26764_v51, %v26763_v33  ;;  %v26766_v47 = vpop.f32.mrb[178].mxu0 }
 0xe3f   : > { %v26767_v16 = vpop.f32.mrb[179].mxu0 }
 0xe4d   : > { %v26609_v21 = vpop.f32.mrb[116].mxu1 }
 0xe4e   : > { %v26610_v38 = vpop.f32.mrb[117].mxu1 }
 0xe4f   : > { %v26611_v63 = vadd.f32 %v26610_v38, %v26609_v21  ;;  %v26612_v36 = vpop.f32.mrb[118].mxu1 }
 0xe50   : > { %v26613_v35 = vpop.f32.mrb[119].mxu1 }
 0xe51   : > { %v22448_v11 = vadd.f32 %v26611_v63, %v22408_v59 }
 0xe53   : > { %v22488_v58 = vadd.f32 %v32578_v22, %v22448_v11 }
 0xe5c   : > { %v26807_v18 = vpop.f32.mrb[180].mxu0 }
 0xe5d   : > { %v26808_v20 = vpop.f32.mrb[181].mxu0 }
 0xe5e   : > { %v26809_v24 = vadd.f32 %v26808_v20, %v26807_v18  ;;  %v26810_v34 = vpop.f32.mrb[182].mxu0 }
 0xe5f   : > { %v26811_v29 = vpop.f32.mrb[183].mxu0 }
 0xe6d   : > { %v26653_v40 = vpop.f32.mrb[120].mxu1 }
 0xe6e   : > { %v26654_v9 = vpop.f32.mrb[121].mxu1 }
 0xe6f   : > { %v26655_v43 = vadd.f32 %v26654_v9, %v26653_v40  ;;  %v26656_v23 = vpop.f32.mrb[122].mxu1 }
 0xe70   : > { %v26657_v22 = vpop.f32.mrb[123].mxu1 }
 0xe71   : > { %v22528_v48 = vadd.f32 %v26655_v43, %v22488_v58 }
 0xe73   : > { %v22568_v15 = vadd.f32 %v32583_v5, %v22528_v48 }
 0xe8d   : > { %v26697_v4 = vpop.f32.mrb[124].mxu1 }
 0xe8e   : > { %v26698_v61 = vpop.f32.mrb[125].mxu1 }
 0xe8f   : > { %v26699_v7 = vadd.f32 %v26698_v61, %v26697_v4  ;;  %v26700_v39 = vpop.f32.mrb[126].mxu1 }
 0xe90   : > { %v26701_v13 = vpop.f32.mrb[127].mxu1 }
 0xe91   : > { %v22608_v57 = vadd.f32 %v26699_v7, %v22568_v15 }
 0xe93   : > { %v22648_v26 = vadd.f32 %v32586_v17, %v22608_v57  ;;  %v24844_v17 = vld [vmem:[#allocation21] ss:$0 sm:$0xff] }
 0xead   : > { %v26741_v30 = vpop.f32.mrb[128].mxu1 }
 0xeae   : > { %v26742_v62 = vpop.f32.mrb[129].mxu1 }
 0xeaf   : > { %v26743_v49 = vadd.f32 %v26742_v62, %v26741_v30  ;;  %v26744_v56 = vpop.f32.mrb[130].mxu1 }
 0xeb0   : > { %v26745_v55 = vpop.f32.mrb[131].mxu1 }
 0xeb1   : > { %v22688_v0 = vadd.f32 %v26743_v49, %v22648_v26 }
 0xeb3   : > { %v22728_v32 = vadd.f32 %v26765_v2, %v22688_v0 }
 0xecd   : > { %v26785_v28 = vpop.f32.mrb[132].mxu1 }
 0xece   : > { %v26786_v52 = vpop.f32.mrb[133].mxu1 }
 0xecf   : > { %v26787_v5 = vadd.f32 %v26786_v52, %v26785_v28  ;;  %v26788_v10 = vpop.f32.mrb[134].mxu1 }
 0xed0   : > { %v26789_v12 = vpop.f32.mrb[135].mxu1 }
 0xed1   : > { %v22768_v54 = vadd.f32 %v26787_v5, %v22728_v32 }
 0xed3   : > { %v22808_v31 = vadd.f32 %v26809_v24, %v22768_v54 }
 0xed5   : > { %v22813_v44 = vmax.f32 %v22808_v31, 0.0 }
 0xed7   : > { %v22814_v37 = vpack.c.bf16 %v22813_v44, %v22813_v44 }
 0xed9   : > { %28287 = vmatmul.mubr.bf16.vlgmr.msra.gmra.mrb[136].mxu1 %v22814_v37 }
 0xfac   : > { %v22920_v41 = vpop.f32.mrb[136].mxu1 }
 0xfad   : > { %v22921_v6 = vadd.f32 %v24844_v17, %v22920_v41  ;;  %v28288_v45 = vpop.f32.mrb[137].mxu1 }
 0xfae   : > { %v22923_v25 = vpop.f32.mrb[138].mxu1 }
 0xfaf   : > { %22926 = vst [vmem:[%s525_s25] sm:$0xff] %v22921_v6  ;;  %v28289_v53 = vpop.f32.mrb[139].mxu1 }
 0xfb0   : > { %31130 = shalt.err (!%p31127_p0)
}
 0xfb1   : > { %s31131_s28 = scalar_lea.hbm %s32597_s22, 128  ;;  %s31135_s14 = scalar_lea.hbm %s32686_s26, 256 }
 0xfb2   : > { %p31132_p5 = scmp.ne.s32.totalorder %s32597_s22, %s31131_s28  ;;  %p31136_p10 = scmp.lt.u32.totalorder %s32597_s22, %s32686_s26 }
 0xfb3   : > { %p31137_p4 = scmp.lt.u32.totalorder %s31135_s14, %s31131_s28  ;;  %p31139_p1 = scmp.lt.u32.totalorder %s31131_s28, %s32597_s22 }
 0xfb4   : > { %p31133_p9 = pnand %p31132_p5, %p32687_p3 }
 0xfb5   : > { %p31138_p13 = por %p31137_p4, %p31136_p10 }
 0xfb6   : > { %p31134_p7 = pneg %p31133_p9 }
 0xfb7   : > { %p31140_p2 = por %p31139_p1, %p31138_p13 }
 0xfb9   : > { %p31141_p8 = pnand %p31140_p2, %p31134_p7 }
 0xfbb   : > { %31144 = shalt.err (!%p31141_p8)
}
 0xfbc   : > { %29480 = dma.vmem_to_hbm [thread:$0]  (%p32687_p3), %s32599_s30, 128, %s32597_s22, %s22928_s1  }
 0xfbd PF: > { %s22953_s13 = sand.u32 1, %s31191_s17   ;;  %p32688_p6 = scmp.ne.s32.totalorder %s32672_s16, 0 }
 0xfbe   : > { %p32689_p11 = scmp.ge.s32.totalorder %s31203_s20, 2  ;;  %s22954_s23 = scalar_lea.sflag [#allocation8], %s22953_s13 }
 0xfc0   : > { %p29515_p12 = pnand %p32689_p11, %p32688_p6 }
 0xfc2   : > { %31186 = dma.done.wait (!%p29515_p12), %s22954_s23, 128  }
 0xfc3   : > { %31188 = vsyncadd (!%p29515_p12), %s22954_s23, 4294967168  ;;  %p29_p0 = scmp.ge.s32.totalorder %s31529_s29, 4   ;;  %s32690_s17 = smov %s31195_s18 }
 0xfc4   : > { %s32691_s18 = smov %s31199_s19  ;;  %s32692_s19 = smov %s31541_s21 }
 0xfc5   : > { %s32693_s20 = smov %s31529_s29  ;;  %31 = sbr.rel (!%p29_p0) target bundleno = 16 (0x10), region = 165 }
 0xfcc   :  { %22959 = vsyncpa [#allocation7], 1 }
 0xfcd   :  { %22961 = vsyncpa [#allocation7 + $0x1], 1 }
 0xfce   :  { %22962 = vsyncpa [#allocation10], 1 }
 0xfcf   :  { %22963 = vsyncpa [#allocation13], 1 }
 0xfd0   :  { %22964 = vsyncpa [#allocation16], 1 }
 0xfd1   :  { %22965 = vsyncpa [#allocation19], 1 }
 0xfd2   :  { %22966 = vsyncpa [#allocation22], 1 }
 0xfd3   :  { %22967 = vsyncpa [#allocation8], 1 }
 0xfd4   :  { %22969 = vsyncpa [#allocation8 + $0x1], 1 }

</bundles_post_ra>
